<compile_context>
chip_gen: v7x
topology: tpu7x:2x2x1
jax: 0.10.0
libtpu: 0.0.40
codegen_flags: <defaults>
</compile_context>

<pallas_src>
import jax
import jax.numpy as jnp
from jax.experimental import pallas as pl
from jax.experimental.pallas import tpu as pltpu

NEG_SLOPE = 0.01   # nn.LeakyReLU default
BN_EPS = 1e-5      # nn.BatchNorm2d default


# ----------------------------------------------------------------------------
# Stride-2 ConvTranspose2d (k=3, p=1, op=1), phase decomposed.
# ----------------------------------------------------------------------------
def _make_upconv_kernel(Hin, Win, Cin, Cout, TI, fuse_bn):
    Wp = Win + 1  # input zero-padded by one row/col at bottom/right

    def body(x_ref, w_ref, b_ref, ss_ref, o_ref, st_ref):
        t = pl.program_id(1)
        r0 = pl.multiple_of(t * TI, TI)
        x = x_ref[0, pl.ds(r0, TI + 1), :, :]                # (TI+1, Wp, Cin)

        if fuse_bn:
            # Previous layer's BatchNorm affine + LeakyReLU, fused on the read.
            scale = ss_ref[0:1, :].reshape(1, 1, Cin)
            shift = ss_ref[1:2, :].reshape(1, 1, Cin)
            a = x * scale + shift
            a = jnp.where(a >= 0.0, a, NEG_SLOPE * a)
            # Re-zero the padded row/col (pad was applied to the raw tensor).
            rows = jax.lax.broadcasted_iota(jnp.int32, (TI + 1, Wp, 1), 0) + r0
            cols = jax.lax.broadcasted_iota(jnp.int32, (TI + 1, Wp, 1), 1)
            a = jnp.where((rows < Hin) & (cols < Win), a, 0.0)
        else:
            a = x

        # Stack the two kw taps along the contraction dim: (TI+1, Win, 2*Cin).
        acat = jnp.concatenate([a[:, 0:Win, :], a[:, 1:Win + 1, :]], axis=-1)
        ac0 = acat[0:TI].reshape(TI * Win, 2 * Cin)
        ac1 = acat[1:TI + 1].reshape(TI * Win, 2 * Cin)

        bias2 = b_ref[...]                                   # (1, 2*Cout)
        # Even output rows use one input row tap, odd rows use two.
        even = jnp.dot(ac0, w_ref[0], preferred_element_type=jnp.float32) + bias2
        odd = (jnp.dot(ac0, w_ref[1], preferred_element_type=jnp.float32)
               + jnp.dot(ac1, w_ref[2], preferred_element_type=jnp.float32)
               + bias2)

        # Phase-packed store (column parity already interleaved on the lane dim).
        o_ref[0, :, 0, :, :] = even.reshape(TI, Win, 2 * Cout)
        o_ref[0, :, 1, :, :] = odd.reshape(TI, Win, 2 * Cout)

        # Per-tile partial BatchNorm statistics (sum, sum of squares).
        se = jnp.sum(even, axis=0, keepdims=True) + jnp.sum(odd, axis=0, keepdims=True)
        sq = (jnp.sum(even * even, axis=0, keepdims=True)
              + jnp.sum(odd * odd, axis=0, keepdims=True))
        s1 = se[:, :Cout] + se[:, Cout:]
        s2 = sq[:, :Cout] + sq[:, Cout:]
        st_ref[...] = jnp.concatenate([s1, s2], axis=0).reshape(1, 1, 2, Cout)

    if fuse_bn:
        def kernel(x_ref, w_ref, b_ref, ss_ref, o_ref, st_ref):
            body(x_ref, w_ref, b_ref, ss_ref, o_ref, st_ref)
    else:
        def kernel(x_ref, w_ref, b_ref, o_ref, st_ref):
            body(x_ref, w_ref, b_ref, None, o_ref, st_ref)
    return kernel


def upconv2x_pallas(x_pad, w_phase, bias2, in_scale_shift):
    """ConvTranspose2d(k=3, s=2, p=1, op=1) on NHWC input (phase decomposed).

    x_pad: (N, Hin+1, Win+1, Cin) raw input zero-padded 1 row/col bottom/right.
    Returns (y, stats): y (N, 2*Hin, 2*Win, Cout), stats (N, tiles, 2, Cout).
    """
    N, Hp, Wp, Cin = x_pad.shape
    Hin, Win = Hp - 1, Wp - 1
    Cout = w_phase.shape[2] // 2
    TI = 4 if Hin % 4 == 0 else 1
    nT = Hin // TI
    fuse_bn = in_scale_shift is not None

    in_specs = [
        pl.BlockSpec((1, Hp, Wp, Cin), lambda n, t: (n, 0, 0, 0)),
        pl.BlockSpec((3, 2 * Cin, 2 * Cout), lambda n, t: (0, 0, 0)),
        pl.BlockSpec((1, 2 * Cout), lambda n, t: (0, 0)),
    ]
    args = [x_pad, w_phase, bias2]
    if fuse_bn:
        in_specs.append(pl.BlockSpec((2, Cin), lambda n, t: (0, 0)))
        args.append(in_scale_shift)

    packed, stats = pl.pallas_call(
        _make_upconv_kernel(Hin, Win, Cin, Cout, TI, fuse_bn),
        out_shape=(
            jax.ShapeDtypeStruct((N, Hin, 2, Win, 2 * Cout), jnp.float32),
            jax.ShapeDtypeStruct((N, nT, 2, Cout), jnp.float32),
        ),
        grid=(N, nT),
        in_specs=in_specs,
        out_specs=(
            pl.BlockSpec((1, TI, 2, Win, 2 * Cout), lambda n, t: (n, t, 0, 0, 0)),
            pl.BlockSpec((1, 1, 2, Cout), lambda n, t: (n, t, 0, 0)),
        ),
        compiler_params=pltpu.CompilerParams(
            dimension_semantics=("parallel", "parallel")),
    )(*args)

    y = packed.reshape(N, 2 * Hin, 2 * Win, Cout)   # contiguous (free) un-pack
    return y, stats


# ----------------------------------------------------------------------------
# conv3: ConvTranspose2d(64->3, k=7, s=1, p=3) + Tanh, then 2*tanh(.)
# ----------------------------------------------------------------------------
def _make_conv3_kernel(H, W, Wp, Cin, Cout, K, pad, TI):
    def kernel(x_ref, w_ref, b_ref, ss_ref, o_ref):
        t = pl.program_id(1)
        r0 = pl.multiple_of(t * TI, TI)
        a = x_ref[0, pl.ds(r0, TI + K - 1), :, :]            # (TI+K-1, Wp, Cin)

        # Fused BatchNorm2 affine + LeakyReLU, then re-zero the padded border.
        scale = ss_ref[0:1, :].reshape(1, 1, Cin)
        shift = ss_ref[1:2, :].reshape(1, 1, Cin)
        a = a * scale + shift
        a = jnp.where(a >= 0.0, a, NEG_SLOPE * a)
        rows = jax.lax.broadcasted_iota(jnp.int32, (TI + K - 1, Wp, 1), 0) + r0
        cols = jax.lax.broadcasted_iota(jnp.int32, (TI + K - 1, Wp, 1), 1)
        valid = (rows >= pad) & (rows < pad + H) & (cols >= pad) & (cols < pad + W)
        a = jnp.where(valid, a, 0.0)

        # K row taps accumulate into one (TI*Wp, K*Cout) result; the K column
        # taps are stacked along the matmul N dim and combined by shifting the
        # (cheap, 21-lane) result instead of the input.
        m = jnp.dot(a[0:TI].reshape(TI * Wp, Cin), w_ref[0],
                    preferred_element_type=jnp.float32)
        for kh in range(1, K):
            m = m + jnp.dot(a[kh:kh + TI].reshape(TI * Wp, Cin), w_ref[kh],
                            preferred_element_type=jnp.float32)
        m = m.reshape(TI, Wp, K * Cout)

        acc = m[:, 0:W, 0:Cout]
        for kw in range(1, K):
            acc = acc + m[:, kw:kw + W, kw * Cout:(kw + 1) * Cout]
        acc = acc + b_ref[...].reshape(1, 1, Cout)

        # Sequential(..., Tanh()) followed by the module-level 2*tanh(.).
        o_ref[...] = (2.0 * jnp.tanh(jnp.tanh(acc))).reshape(1, TI, W, Cout)
    return kernel


def conv3_pallas(x_pad, w_stack, bias, scale_shift, *, H, W, pad):
    N, Hp, Wp, Cin = x_pad.shape
    K = w_stack.shape[0]
    Cout = w_stack.shape[2] // K
    TI = 8 if H % 8 == 0 else (4 if H % 4 == 0 else 1)
    nT = H // TI
    return pl.pallas_call(
        _make_conv3_kernel(H, W, Wp, Cin, Cout, K, pad, TI),
        out_shape=jax.ShapeDtypeStruct((N, H, W, Cout), jnp.float32),
        grid=(N, nT),
        in_specs=[
            pl.BlockSpec((1, Hp, Wp, Cin), lambda n, t: (n, 0, 0, 0)),
            pl.BlockSpec((K, Cin, K * Cout), lambda n, t: (0, 0, 0)),
            pl.BlockSpec((1, Cout), lambda n, t: (0, 0)),
            pl.BlockSpec((2, Cin), lambda n, t: (0, 0)),
        ],
        out_specs=pl.BlockSpec((1, TI, W, Cout), lambda n, t: (n, t, 0, 0)),
        compiler_params=pltpu.CompilerParams(
            dimension_semantics=("parallel", "parallel")),
    )(x_pad, w_stack, bias.reshape(1, Cout), scale_shift)


# ----------------------------------------------------------------------------
# Weight / BatchNorm glue (tiny, runs in plain JAX).
# ----------------------------------------------------------------------------
def _phase_weights(w):
    """(Cin, Cout, 3, 3) ConvTranspose2d weight -> (3, 2*Cin, 2*Cout) phases.

    [0]: even output rows (kernel row 1); [1]: odd rows, input row tap dh=0
    (kernel row 2); [2]: odd rows, dh=1 (kernel row 0).  Contraction rows
    [0:Cin]/[Cin:2Cin] are the dw=0/dw=1 input taps; output columns
    [0:Cout]/[Cout:2Cout] are the even/odd output-column parities.
    """
    Cin, Cout = w.shape[0], w.shape[1]
    zero = jnp.zeros((Cin, Cout), w.dtype)

    def blk(kh):
        top = jnp.concatenate([w[:, :, kh, 1], w[:, :, kh, 2]], axis=1)
        bot = jnp.concatenate([zero, w[:, :, kh, 0]], axis=1)
        return jnp.concatenate([top, bot], axis=0)

    return jnp.stack([blk(1), blk(2), blk(0)], axis=0)


def _conv7_weights(w):
    """(Cin, Cout, 7, 7) ConvTranspose2d (s=1, p=3) weight -> (7, Cin, 7*Cout)."""
    K = w.shape[2]
    wf = jnp.transpose(jnp.flip(w, axis=(2, 3)), (2, 3, 0, 1))  # (KH, KW, Cin, Cout)
    return jnp.transpose(wf, (0, 2, 1, 3)).reshape(K, w.shape[0], K * w.shape[1])


def _bn_scale_shift(stats, count, gamma, beta, eps=BN_EPS):
    s = jnp.sum(stats, axis=(0, 1))                  # (2, C): [sum, sum_sq]
    mean = s[0] / count
    var = s[1] / count - mean * mean                 # biased var (training BN)
    scale = gamma * jax.lax.rsqrt(var + eps)
    shift = beta - mean * scale
    return jnp.stack([scale, shift], axis=0)         # (2, C)


# ----------------------------------------------------------------------------
# Generator forward (matches the PyTorch module, training-mode BatchNorm).
# ----------------------------------------------------------------------------
@jax.jit
def generator_forward(x_nchw, params):
    N = x_nchw.shape[0]
    x = jnp.transpose(x_nchw, (0, 2, 3, 1)).astype(jnp.float32)   # -> NHWC

    # conv1: ConvT(192->128, k3 s2 p1 op1); its BN+LeakyReLU fused into conv2.
    xp = jnp.pad(x, ((0, 0), (0, 1), (0, 1), (0, 0)))
    y1, st1 = upconv2x_pallas(xp, _phase_weights(params["w1"]),
                              jnp.tile(params["b1"], 2).reshape(1, -1), None)
    ss1 = _bn_scale_shift(st1, N * y1.shape[1] * y1.shape[2],
                          params["g1"], params["be1"])

    # conv2: ConvT(128->64, k3 s2 p1 op1); its BN+LeakyReLU fused into conv3.
    y1p = jnp.pad(y1, ((0, 0), (0, 1), (0, 1), (0, 0)))
    y2, st2 = upconv2x_pallas(y1p, _phase_weights(params["w2"]),
                              jnp.tile(params["b2"], 2).reshape(1, -1), ss1)
    ss2 = _bn_scale_shift(st2, N * y2.shape[1] * y2.shape[2],
                          params["g2"], params["be2"])

    # conv3: ConvT(64->3, k7 s1 p3) + Tanh, then 2*tanh(.)
    H, W = y2.shape[1], y2.shape[2]
    pad = 3                                # = k - 1 - padding
    Wp = ((W + 2 * pad + 7) // 8) * 8      # lane/sublane-friendly padded width
    y2p = jnp.pad(y2, ((0, 0), (pad, pad), (pad, Wp - W - pad), (0, 0)))
    out = conv3_pallas(y2p, _conv7_weights(params["w3"]), params["b3"], ss2,
                       H=H, W=W, pad=pad)

    return jnp.transpose(out, (0, 3, 1, 2))          # tiny 3-channel -> NCHW


# ----------------------------------------------------------------------------
# Pure-JAX reference (for correctness checking) and test driver.
# ----------------------------------------------------------------------------
def _convT_ref(x, w, b, stride, padding, output_padding):
    N, H, W, C = x.shape
    K = w.shape[2]
    if stride > 1:
        xd = jnp.zeros((N, (H - 1) * stride + 1, (W - 1) * stride + 1, C), x.dtype)
        xd = xd.at[:, ::stride, ::stride, :].set(x)
    else:
        xd = x
    lo = K - 1 - padding
    hi = K - 1 - padding + output_padding
    xp = jnp.pad(xd, ((0, 0), (lo, hi), (lo, hi), (0, 0)))
    wf = jnp.transpose(jnp.flip(w, (2, 3)), (2, 3, 0, 1))
    y = jax.lax.conv_general_dilated(
        xp, wf, (1, 1), "VALID",
        dimension_numbers=("NHWC", "HWIO", "NHWC"),
        precision=jax.lax.Precision.HIGHEST)
    return y + b


def _ref_forward(x_nchw, p):
    def bn_lrelu(y, g, b):
        m = jnp.mean(y, axis=(0, 1, 2))
        v = jnp.var(y, axis=(0, 1, 2))
        z = (y - m) * jax.lax.rsqrt(v + BN_EPS) * g + b
        return jnp.where(z >= 0.0, z, NEG_SLOPE * z)

    x = jnp.transpose(x_nchw, (0, 2, 3, 1)).astype(jnp.float32)
    y = bn_lrelu(_convT_ref(x, p["w1"], p["b1"], 2, 1, 1), p["g1"], p["be1"])
    y = bn_lrelu(_convT_ref(y, p["w2"], p["b2"], 2, 1, 1), p["g2"], p["be2"])
    y = _convT_ref(y, p["w3"], p["b3"], 1, 3, 0)
    return jnp.transpose(2.0 * jnp.tanh(jnp.tanh(y)), (0, 3, 1, 2))


def init_params(key):
    ks = jax.random.split(key, 10)
    return {
        "w1": jax.random.normal(ks[0], (192, 128, 3, 3), jnp.float32) * 0.05,
        "b1": jax.random.normal(ks[1], (128,), jnp.float32) * 0.05,
        "g1": 1.0 + 0.1 * jax.random.normal(ks[2], (128,), jnp.float32),
        "be1": 0.1 * jax.random.normal(ks[3], (128,), jnp.float32),
        "w2": jax.random.normal(ks[4], (128, 64, 3, 3), jnp.float32) * 0.05,
        "b2": jax.random.normal(ks[5], (64,), jnp.float32) * 0.05,
        "g2": 1.0 + 0.1 * jax.random.normal(ks[6], (64,), jnp.float32),
        "be2": 0.1 * jax.random.normal(ks[7], (64,), jnp.float32),
        "w3": jax.random.normal(ks[8], (64, 3, 7, 7), jnp.float32) * 0.05,
        "b3": jax.random.normal(ks[9], (3,), jnp.float32) * 0.05,
    }


if __name__ == "__main__":
    kx, kp = jax.random.split(jax.random.PRNGKey(0))
    params = init_params(kp)
    x = jax.random.normal(kx, (2, 192, 16, 16), jnp.float32)

    out = jax.block_until_ready(generator_forward(x, params))

    assert out.shape == (2, 3, 64, 64), out.shape
    assert bool(jnp.all(jnp.isfinite(out)))
    assert bool(jnp.all(jnp.abs(out) <= 2.0 + 1e-5))   # range of 2*tanh(tanh(.))

    ref = _ref_forward(x, params)
    err = float(jnp.max(jnp.abs(out - ref)))
    assert err < 5e-2, f"max abs err vs reference = {err}"

    print("KERNEL_OK")
</pallas_src>

<mosaic_0001>
module attributes {stable_mosaic.version = 11 : i64} {
  func.func @kernel(%arg0: i32, %arg1: i32, %arg2: memref<1x17x17x192xf32, #tpu.memory_space<vmem>>, %arg3: memref<3x384x256xf32, #tpu.memory_space<vmem>>, %arg4: memref<1x256xf32, #tpu.memory_space<vmem>>, %arg5: memref<1x4x2x16x256xf32, #tpu.memory_space<vmem>>, %arg6: memref<1x1x2x128xf32, #tpu.memory_space<vmem>>) attributes {dimension_semantics = [#tpu.dimension_semantics<parallel>, #tpu.dimension_semantics<parallel>], iteration_bounds = array<i64: 2, 4>, scalar_prefetch = 0 : i64, scratch_operands = 0 : i64, tpu.core_type = #tpu.core_type<tc>, window_params = [{transform_indices = @transform_0, window_bounds = array<i64: 1, 17, 17, 192>}, {pipeline_mode = #tpu.pipeline_mode<synchronous>, transform_indices = @transform_1, window_bounds = array<i64: 3, 384, 256>}, {pipeline_mode = #tpu.pipeline_mode<synchronous>, transform_indices = @transform_2, window_bounds = array<i64: 1, 256>}, {transform_indices = @transform_3, window_bounds = array<i64: 1, 4, 2, 16, 256>}, {transform_indices = @transform_4, window_bounds = array<i64: 1, 1, 2, 128>}]} {
    %c4_i32 = arith.constant 4 : i32
    %0 = arith.muli %arg1, %c4_i32 : i32
    %1 = tpu.assume_multiple %0, 4 : i32
    %c0 = arith.constant 0 : index
    %2 = arith.index_cast %1 : i32 to index
    %c0_0 = arith.constant 0 : index
    %c0_1 = arith.constant 0 : index
    %3 = vector.load %arg2[%c0, %2, %c0_0, %c0_1] : memref<1x17x17x192xf32, #tpu.memory_space<vmem>>, vector<1x5x17x192xf32>
    %4 = vector.shape_cast %3 : vector<1x5x17x192xf32> to vector<5x17x192xf32>
    %5 = vector.extract_strided_slice %4 {offsets = [0, 0, 0], sizes = [5, 16, 192], strides = [1, 1, 1]} : vector<5x17x192xf32> to vector<5x16x192xf32>
    %6 = vector.extract_strided_slice %4 {offsets = [0, 1, 0], sizes = [5, 16, 192], strides = [1, 1, 1]} : vector<5x17x192xf32> to vector<5x16x192xf32>
    %7 = tpu.concatenate %5, %6 in 2 : vector<5x16x192xf32>, vector<5x16x192xf32> -> vector<5x16x384xf32>
    %8 = vector.extract_strided_slice %7 {offsets = [0, 0, 0], sizes = [4, 16, 384], strides = [1, 1, 1]} : vector<5x16x384xf32> to vector<4x16x384xf32>
    %9 = vector.shape_cast %8 : vector<4x16x384xf32> to vector<64x384xf32>
    %10 = vector.extract_strided_slice %7 {offsets = [1, 0, 0], sizes = [4, 16, 384], strides = [1, 1, 1]} : vector<5x16x384xf32> to vector<4x16x384xf32>
    %11 = vector.shape_cast %10 : vector<4x16x384xf32> to vector<64x384xf32>
    %c0_2 = arith.constant 0 : index
    %c0_3 = arith.constant 0 : index
    %12 = vector.load %arg4[%c0_2, %c0_3] : memref<1x256xf32, #tpu.memory_space<vmem>>, vector<1x256xf32>
    %c0_4 = arith.constant 0 : index
    %c0_5 = arith.constant 0 : index
    %c0_6 = arith.constant 0 : index
    %13 = vector.load %arg3[%c0_4, %c0_5, %c0_6] : memref<3x384x256xf32, #tpu.memory_space<vmem>>, vector<1x384x256xf32>
    %14 = vector.shape_cast %13 : vector<1x384x256xf32> to vector<384x256xf32>
    %cst = arith.constant dense<0.000000e+00> : vector<64x256xf32>
    %15 = tpu.matmul %9, %14, %cst {dimension_numbers = #tpu.dot_dimension_numbers<[1], [0], [0], [1], [0, 0, 1, 1], [], []>} : vector<64x384xf32>, vector<384x256xf32>, vector<64x256xf32> -> vector<64x256xf32>
    %16 = vector.broadcast %12 : vector<1x256xf32> to vector<64x256xf32>
    %17 = arith.addf %15, %16 : vector<64x256xf32>
    %c1 = arith.constant 1 : index
    %c0_7 = arith.constant 0 : index
    %c0_8 = arith.constant 0 : index
    %18 = vector.load %arg3[%c1, %c0_7, %c0_8] : memref<3x384x256xf32, #tpu.memory_space<vmem>>, vector<1x384x256xf32>
    %19 = vector.shape_cast %18 : vector<1x384x256xf32> to vector<384x256xf32>
    %cst_9 = arith.constant dense<0.000000e+00> : vector<64x256xf32>
    %20 = tpu.matmul %9, %19, %cst_9 {dimension_numbers = #tpu.dot_dimension_numbers<[1], [0], [0], [1], [0, 0, 1, 1], [], []>} : vector<64x384xf32>, vector<384x256xf32>, vector<64x256xf32> -> vector<64x256xf32>
    %c2 = arith.constant 2 : index
    %c0_10 = arith.constant 0 : index
    %c0_11 = arith.constant 0 : index
    %21 = vector.load %arg3[%c2, %c0_10, %c0_11] : memref<3x384x256xf32, #tpu.memory_space<vmem>>, vector<1x384x256xf32>
    %22 = vector.shape_cast %21 : vector<1x384x256xf32> to vector<384x256xf32>
    %cst_12 = arith.constant dense<0.000000e+00> : vector<64x256xf32>
    %23 = tpu.matmul %11, %22, %cst_12 {dimension_numbers = #tpu.dot_dimension_numbers<[1], [0], [0], [1], [0, 0, 1, 1], [], []>} : vector<64x384xf32>, vector<384x256xf32>, vector<64x256xf32> -> vector<64x256xf32>
    %24 = arith.addf %20, %23 : vector<64x256xf32>
    %25 = vector.broadcast %12 : vector<1x256xf32> to vector<64x256xf32>
    %26 = arith.addf %24, %25 : vector<64x256xf32>
    %27 = vector.shape_cast %17 : vector<64x256xf32> to vector<4x16x256xf32>
    %c0_13 = arith.constant 0 : index
    %c0_14 = arith.constant 0 : index
    %c0_15 = arith.constant 0 : index
    %c0_16 = arith.constant 0 : index
    %c0_17 = arith.constant 0 : index
    %28 = vector.load %arg5[%c0_13, %c0_14, %c0_15, %c0_16, %c0_17] : memref<1x4x2x16x256xf32, #tpu.memory_space<vmem>>, vector<1x4x1x16x256xf32>
    %29 = vector.shape_cast %28 : vector<1x4x1x16x256xf32> to vector<4x16x256xf32>
    %30 = vector.shape_cast %27 : vector<4x16x256xf32> to vector<1x4x1x16x256xf32>
    tpu.vector_store %arg5[%c0_13, %c0_14, %c0_15, %c0_16, %c0_17], %30 {strides = array<i32>} : memref<1x4x2x16x256xf32, #tpu.memory_space<vmem>>, vector<1x4x1x16x256xf32>,
    %31 = vector.shape_cast %26 : vector<64x256xf32> to vector<4x16x256xf32>
    %c0_18 = arith.constant 0 : index
    %c0_19 = arith.constant 0 : index
    %c1_20 = arith.constant 1 : index
    %c0_21 = arith.constant 0 : index
    %c0_22 = arith.constant 0 : index
    %32 = vector.load %arg5[%c0_18, %c0_19, %c1_20, %c0_21, %c0_22] : memref<1x4x2x16x256xf32, #tpu.memory_space<vmem>>, vector<1x4x1x16x256xf32>
    %33 = vector.shape_cast %32 : vector<1x4x1x16x256xf32> to vector<4x16x256xf32>
    %34 = vector.shape_cast %31 : vector<4x16x256xf32> to vector<1x4x1x16x256xf32>
    tpu.vector_store %arg5[%c0_18, %c0_19, %c1_20, %c0_21, %c0_22], %34 {strides = array<i32>} : memref<1x4x2x16x256xf32, #tpu.memory_space<vmem>>, vector<1x4x1x16x256xf32>,
    %cst_23 = arith.constant dense<0.000000e+00> : vector<256xf32>
    %35 = vector.multi_reduction <add>, %17, %cst_23 [0] : vector<64x256xf32> to vector<256xf32>
    %36 = vector.shape_cast %35 : vector<256xf32> to vector<1x256xf32>
    %cst_24 = arith.constant dense<0.000000e+00> : vector<256xf32>
    %37 = vector.multi_reduction <add>, %26, %cst_24 [0] : vector<64x256xf32> to vector<256xf32>
    %38 = vector.shape_cast %37 : vector<256xf32> to vector<1x256xf32>
    %39 = arith.addf %36, %38 : vector<1x256xf32>
    %40 = arith.mulf %17, %17 : vector<64x256xf32>
    %cst_25 = arith.constant dense<0.000000e+00> : vector<256xf32>
    %41 = vector.multi_reduction <add>, %40, %cst_25 [0] : vector<64x256xf32> to vector<256xf32>
    %42 = vector.shape_cast %41 : vector<256xf32> to vector<1x256xf32>
    %43 = arith.mulf %26, %26 : vector<64x256xf32>
    %cst_26 = arith.constant dense<0.000000e+00> : vector<256xf32>
    %44 = vector.multi_reduction <add>, %43, %cst_26 [0] : vector<64x256xf32> to vector<256xf32>
    %45 = vector.shape_cast %44 : vector<256xf32> to vector<1x256xf32>
    %46 = arith.addf %42, %45 : vector<1x256xf32>
    %47 = vector.extract_strided_slice %39 {offsets = [0, 0], sizes = [1, 128], strides = [1, 1]} : vector<1x256xf32> to vector<1x128xf32>
    %48 = vector.extract_strided_slice %39 {offsets = [0, 128], sizes = [1, 128], strides = [1, 1]} : vector<1x256xf32> to vector<1x128xf32>
    %49 = arith.addf %47, %48 : vector<1x128xf32>
    %50 = vector.extract_strided_slice %46 {offsets = [0, 0], sizes = [1, 128], strides = [1, 1]} : vector<1x256xf32> to vector<1x128xf32>
    %51 = vector.extract_strided_slice %46 {offsets = [0, 128], sizes = [1, 128], strides = [1, 1]} : vector<1x256xf32> to vector<1x128xf32>
    %52 = arith.addf %50, %51 : vector<1x128xf32>
    %53 = tpu.concatenate %49, %52 in 0 : vector<1x128xf32>, vector<1x128xf32> -> vector<2x128xf32>
    %54 = vector.shape_cast %53 : vector<2x128xf32> to vector<1x1x2x128xf32>
    %c0_27 = arith.constant 0 : index
    %c0_28 = arith.constant 0 : index
    %c0_29 = arith.constant 0 : index
    %c0_30 = arith.constant 0 : index
    %55 = vector.load %arg6[%c0_27, %c0_28, %c0_29, %c0_30] : memref<1x1x2x128xf32, #tpu.memory_space<vmem>>, vector<1x1x2x128xf32>
    tpu.vector_store %arg6[%c0_27, %c0_28, %c0_29, %c0_30], %54 {strides = array<i32>} : memref<1x1x2x128xf32, #tpu.memory_space<vmem>>, vector<1x1x2x128xf32>,
    return
  }
  func.func @transform_0(%arg0: i32, %arg1: i32) -> (i32, i32, i32, i32) {
    %c0_i32 = arith.constant 0 : i32
    %c0_i32_0 = arith.constant 0 : i32
    %c0_i32_1 = arith.constant 0 : i32
    %c0_i32_2 = arith.constant 0 : i32
    return %arg0, %c0_i32, %c0_i32_0, %c0_i32_1 : i32, i32, i32, i32
  }
  func.func @transform_1(%arg0: i32, %arg1: i32) -> (i32, i32, i32) {
    %c0_i32 = arith.constant 0 : i32
    %c0_i32_0 = arith.constant 0 : i32
    %c0_i32_1 = arith.constant 0 : i32
    %c0_i32_2 = arith.constant 0 : i32
    return %c0_i32, %c0_i32_0, %c0_i32_1 : i32, i32, i32
  }
  func.func @transform_2(%arg0: i32, %arg1: i32) -> (i32, i32) {
    %c0_i32 = arith.constant 0 : i32
    %c0_i32_0 = arith.constant 0 : i32
    %c0_i32_1 = arith.constant 0 : i32
    return %c0_i32, %c0_i32_0 : i32, i32
  }
  func.func @transform_3(%arg0: i32, %arg1: i32) -> (i32, i32, i32, i32, i32) {
    %c0_i32 = arith.constant 0 : i32
    %c0_i32_0 = arith.constant 0 : i32
    %c0_i32_1 = arith.constant 0 : i32
    %c0_i32_2 = arith.constant 0 : i32
    return %arg0, %arg1, %c0_i32, %c0_i32_0, %c0_i32_1 : i32, i32, i32, i32, i32
  }
  func.func @transform_4(%arg0: i32, %arg1: i32) -> (i32, i32, i32, i32) {
    %c0_i32 = arith.constant 0 : i32
    %c0_i32_0 = arith.constant 0 : i32
    %c0_i32_1 = arith.constant 0 : i32
    return %arg0, %arg1, %c0_i32, %c0_i32_0 : i32, i32, i32, i32
  }
}

module attributes {stable_mosaic.version = 11 : i64} {
  func.func @kernel(%arg0: i32, %arg1: i32, %arg2: memref<1x33x33x128xf32, #tpu.memory_space<vmem>>, %arg3: memref<3x256x128xf32, #tpu.memory_space<vmem>>, %arg4: memref<1x128xf32, #tpu.memory_space<vmem>>, %arg5: memref<2x128xf32, #tpu.memory_space<vmem>>, %arg6: memref<1x4x2x32x128xf32, #tpu.memory_space<vmem>>, %arg7: memref<1x1x2x64xf32, #tpu.memory_space<vmem>>) attributes {dimension_semantics = [#tpu.dimension_semantics<parallel>, #tpu.dimension_semantics<parallel>], iteration_bounds = array<i64: 2, 8>, scalar_prefetch = 0 : i64, scratch_operands = 0 : i64, tpu.core_type = #tpu.core_type<tc>, window_params = [{transform_indices = @transform_0, window_bounds = array<i64: 1, 33, 33, 128>}, {pipeline_mode = #tpu.pipeline_mode<synchronous>, transform_indices = @transform_1, window_bounds = array<i64: 3, 256, 128>}, {pipeline_mode = #tpu.pipeline_mode<synchronous>, transform_indices = @transform_2, window_bounds = array<i64: 1, 128>}, {pipeline_mode = #tpu.pipeline_mode<synchronous>, transform_indices = @transform_3, window_bounds = array<i64: 2, 128>}, {transform_indices = @transform_4, window_bounds = array<i64: 1, 4, 2, 32, 128>}, {transform_indices = @transform_5, window_bounds = array<i64: 1, 1, 2, 64>}]} {
    %c4_i32 = arith.constant 4 : i32
    %0 = arith.muli %arg1, %c4_i32 : i32
    %1 = tpu.assume_multiple %0, 4 : i32
    %c0 = arith.constant 0 : index
    %2 = arith.index_cast %1 : i32 to index
    %c0_0 = arith.constant 0 : index
    %c0_1 = arith.constant 0 : index
    %3 = vector.load %arg2[%c0, %2, %c0_0, %c0_1] : memref<1x33x33x128xf32, #tpu.memory_space<vmem>>, vector<1x5x33x128xf32>
    %4 = vector.shape_cast %3 : vector<1x5x33x128xf32> to vector<5x33x128xf32>
    %c0_2 = arith.constant 0 : index
    %c0_3 = arith.constant 0 : index
    %5 = vector.load %arg5[%c0_2, %c0_3] : memref<2x128xf32, #tpu.memory_space<vmem>>, vector<1x128xf32>
    %6 = vector.shape_cast %5 : vector<1x128xf32> to vector<1x1x128xf32>
    %c1 = arith.constant 1 : index
    %c0_4 = arith.constant 0 : index
    %7 = vector.load %arg5[%c1, %c0_4] : memref<2x128xf32, #tpu.memory_space<vmem>>, vector<1x128xf32>
    %8 = vector.shape_cast %7 : vector<1x128xf32> to vector<1x1x128xf32>
    %9 = vector.broadcast %6 : vector<1x1x128xf32> to vector<5x33x128xf32>
    %10 = arith.mulf %4, %9 : vector<5x33x128xf32>
    %11 = vector.broadcast %8 : vector<1x1x128xf32> to vector<5x33x128xf32>
    %12 = arith.addf %10, %11 : vector<5x33x128xf32>
    %cst = arith.constant 0.000000e+00 : f32
    %13 = vector.broadcast %cst : f32 to vector<5x33x128xf32>
    %14 = arith.cmpf oge, %12, %13 : vector<5x33x128xf32>
    %cst_5 = arith.constant 0.00999999977 : f32
    %15 = vector.broadcast %cst_5 : f32 to vector<5x33x128xf32>
    %16 = arith.mulf %15, %12 : vector<5x33x128xf32>
    %17 = arith.select %14, %12, %16 : vector<5x33x128xi1>, vector<5x33x128xf32>
    %18 = tpu.iota {dimensions = array<i32: 0>} : vector<5x33x1xi32>
    %19 = vector.broadcast %1 : i32 to vector<5x33x1xi32>
    %20 = arith.addi %18, %19 : vector<5x33x1xi32>
    %21 = tpu.iota {dimensions = array<i32: 1>} : vector<5x33x1xi32>
    %c32_i32 = arith.constant 32 : i32
    %22 = vector.broadcast %c32_i32 : i32 to vector<5x33x1xi32>
    %23 = arith.cmpi slt, %20, %22 : vector<5x33x1xi32>
    %c32_i32_6 = arith.constant 32 : i32
    %24 = vector.broadcast %c32_i32_6 : i32 to vector<5x33x1xi32>
    %25 = arith.cmpi slt, %21, %24 : vector<5x33x1xi32>
    %26 = arith.andi %23, %25 : vector<5x33x1xi1>
    %cst_7 = arith.constant 0.000000e+00 : f32
    %27 = vector.shape_cast %26 : vector<5x33x1xi1> to vector<5x33x1xi1>
    %28 = vector.broadcast %27 : vector<5x33x1xi1> to vector<5x33x128xi1>
    %29 = vector.broadcast %cst_7 : f32 to vector<5x33x128xf32>
    %30 = arith.select %28, %17, %29 : vector<5x33x128xi1>, vector<5x33x128xf32>
    %31 = vector.extract_strided_slice %30 {offsets = [0, 0, 0], sizes = [5, 32, 128], strides = [1, 1, 1]} : vector<5x33x128xf32> to vector<5x32x128xf32>
    %32 = vector.extract_strided_slice %30 {offsets = [0, 1, 0], sizes = [5, 32, 128], strides = [1, 1, 1]} : vector<5x33x128xf32> to vector<5x32x128xf32>
    %33 = tpu.concatenate %31, %32 in 2 : vector<5x32x128xf32>, vector<5x32x128xf32> -> vector<5x32x256xf32>
    %34 = vector.extract_strided_slice %33 {offsets = [0, 0, 0], sizes = [4, 32, 256], strides = [1, 1, 1]} : vector<5x32x256xf32> to vector<4x32x256xf32>
    %35 = vector.shape_cast %34 : vector<4x32x256xf32> to vector<128x256xf32>
    %36 = vector.extract_strided_slice %33 {offsets = [1, 0, 0], sizes = [4, 32, 256], strides = [1, 1, 1]} : vector<5x32x256xf32> to vector<4x32x256xf32>
    %37 = vector.shape_cast %36 : vector<4x32x256xf32> to vector<128x256xf32>
    %c0_8 = arith.constant 0 : index
    %c0_9 = arith.constant 0 : index
    %38 = vector.load %arg4[%c0_8, %c0_9] : memref<1x128xf32, #tpu.memory_space<vmem>>, vector<1x128xf32>
    %c0_10 = arith.constant 0 : index
    %c0_11 = arith.constant 0 : index
    %c0_12 = arith.constant 0 : index
    %39 = vector.load %arg3[%c0_10, %c0_11, %c0_12] : memref<3x256x128xf32, #tpu.memory_space<vmem>>, vector<1x256x128xf32>
    %40 = vector.shape_cast %39 : vector<1x256x128xf32> to vector<256x128xf32>
    %cst_13 = arith.constant dense<0.000000e+00> : vector<128x128xf32>
    %41 = tpu.matmul %35, %40, %cst_13 {dimension_numbers = #tpu.dot_dimension_numbers<[1], [0], [0], [1], [0, 0, 1, 1], [], []>} : vector<128x256xf32>, vector<256x128xf32>, vector<128x128xf32> -> vector<128x128xf32>
    %42 = vector.broadcast %38 : vector<1x128xf32> to vector<128x128xf32>
    %43 = arith.addf %41, %42 : vector<128x128xf32>
    %c1_14 = arith.constant 1 : index
    %c0_15 = arith.constant 0 : index
    %c0_16 = arith.constant 0 : index
    %44 = vector.load %arg3[%c1_14, %c0_15, %c0_16] : memref<3x256x128xf32, #tpu.memory_space<vmem>>, vector<1x256x128xf32>
    %45 = vector.shape_cast %44 : vector<1x256x128xf32> to vector<256x128xf32>
    %cst_17 = arith.constant dense<0.000000e+00> : vector<128x128xf32>
    %46 = tpu.matmul %35, %45, %cst_17 {dimension_numbers = #tpu.dot_dimension_numbers<[1], [0], [0], [1], [0, 0, 1, 1], [], []>} : vector<128x256xf32>, vector<256x128xf32>, vector<128x128xf32> -> vector<128x128xf32>
    %c2 = arith.constant 2 : index
    %c0_18 = arith.constant 0 : index
    %c0_19 = arith.constant 0 : index
    %47 = vector.load %arg3[%c2, %c0_18, %c0_19] : memref<3x256x128xf32, #tpu.memory_space<vmem>>, vector<1x256x128xf32>
    %48 = vector.shape_cast %47 : vector<1x256x128xf32> to vector<256x128xf32>
    %cst_20 = arith.constant dense<0.000000e+00> : vector<128x128xf32>
    %49 = tpu.matmul %37, %48, %cst_20 {dimension_numbers = #tpu.dot_dimension_numbers<[1], [0], [0], [1], [0, 0, 1, 1], [], []>} : vector<128x256xf32>, vector<256x128xf32>, vector<128x128xf32> -> vector<128x128xf32>
    %50 = arith.addf %46, %49 : vector<128x128xf32>
    %51 = vector.broadcast %38 : vector<1x128xf32> to vector<128x128xf32>
    %52 = arith.addf %50, %51 : vector<128x128xf32>
    %53 = vector.shape_cast %43 : vector<128x128xf32> to vector<4x32x128xf32>
    %c0_21 = arith.constant 0 : index
    %c0_22 = arith.constant 0 : index
    %c0_23 = arith.constant 0 : index
    %c0_24 = arith.constant 0 : index
    %c0_25 = arith.constant 0 : index
    %54 = vector.load %arg6[%c0_21, %c0_22, %c0_23, %c0_24, %c0_25] : memref<1x4x2x32x128xf32, #tpu.memory_space<vmem>>, vector<1x4x1x32x128xf32>
    %55 = vector.shape_cast %54 : vector<1x4x1x32x128xf32> to vector<4x32x128xf32>
    %56 = vector.shape_cast %53 : vector<4x32x128xf32> to vector<1x4x1x32x128xf32>
    tpu.vector_store %arg6[%c0_21, %c0_22, %c0_23, %c0_24, %c0_25], %56 {strides = array<i32>} : memref<1x4x2x32x128xf32, #tpu.memory_space<vmem>>, vector<1x4x1x32x128xf32>,
    %57 = vector.shape_cast %52 : vector<128x128xf32> to vector<4x32x128xf32>
    %c0_26 = arith.constant 0 : index
    %c0_27 = arith.constant 0 : index
    %c1_28 = arith.constant 1 : index
    %c0_29 = arith.constant 0 : index
    %c0_30 = arith.constant 0 : index
    %58 = vector.load %arg6[%c0_26, %c0_27, %c1_28, %c0_29, %c0_30] : memref<1x4x2x32x128xf32, #tpu.memory_space<vmem>>, vector<1x4x1x32x128xf32>
    %59 = vector.shape_cast %58 : vector<1x4x1x32x128xf32> to vector<4x32x128xf32>
    %60 = vector.shape_cast %57 : vector<4x32x128xf32> to vector<1x4x1x32x128xf32>
    tpu.vector_store %arg6[%c0_26, %c0_27, %c1_28, %c0_29, %c0_30], %60 {strides = array<i32>} : memref<1x4x2x32x128xf32, #tpu.memory_space<vmem>>, vector<1x4x1x32x128xf32>,
    %cst_31 = arith.constant dense<0.000000e+00> : vector<128xf32>
    %61 = vector.multi_reduction <add>, %43, %cst_31 [0] : vector<128x128xf32> to vector<128xf32>
    %62 = vector.shape_cast %61 : vector<128xf32> to vector<1x128xf32>
    %cst_32 = arith.constant dense<0.000000e+00> : vector<128xf32>
    %63 = vector.multi_reduction <add>, %52, %cst_32 [0] : vector<128x128xf32> to vector<128xf32>
    %64 = vector.shape_cast %63 : vector<128xf32> to vector<1x128xf32>
    %65 = arith.addf %62, %64 : vector<1x128xf32>
    %66 = arith.mulf %43, %43 : vector<128x128xf32>
    %cst_33 = arith.constant dense<0.000000e+00> : vector<128xf32>
    %67 = vector.multi_reduction <add>, %66, %cst_33 [0] : vector<128x128xf32> to vector<128xf32>
    %68 = vector.shape_cast %67 : vector<128xf32> to vector<1x128xf32>
    %69 = arith.mulf %52, %52 : vector<128x128xf32>
    %cst_34 = arith.constant dense<0.000000e+00> : vector<128xf32>
    %70 = vector.multi_reduction <add>, %69, %cst_34 [0] : vector<128x128xf32> to vector<128xf32>
    %71 = vector.shape_cast %70 : vector<128xf32> to vector<1x128xf32>
    %72 = arith.addf %68, %71 : vector<1x128xf32>
    %73 = vector.extract_strided_slice %65 {offsets = [0, 0], sizes = [1, 64], strides = [1, 1]} : vector<1x128xf32> to vector<1x64xf32>
    %74 = vector.extract_strided_slice %65 {offsets = [0, 64], sizes = [1, 64], strides = [1, 1]} : vector<1x128xf32> to vector<1x64xf32>
    %75 = arith.addf %73, %74 : vector<1x64xf32>
    %76 = vector.extract_strided_slice %72 {offsets = [0, 0], sizes = [1, 64], strides = [1, 1]} : vector<1x128xf32> to vector<1x64xf32>
    %77 = vector.extract_strided_slice %72 {offsets = [0, 64], sizes = [1, 64], strides = [1, 1]} : vector<1x128xf32> to vector<1x64xf32>
    %78 = arith.addf %76, %77 : vector<1x64xf32>
    %79 = tpu.concatenate %75, %78 in 0 : vector<1x64xf32>, vector<1x64xf32> -> vector<2x64xf32>
    %80 = vector.shape_cast %79 : vector<2x64xf32> to vector<1x1x2x64xf32>
    %c0_35 = arith.constant 0 : index
    %c0_36 = arith.constant 0 : index
    %c0_37 = arith.constant 0 : index
    %c0_38 = arith.constant 0 : index
    %81 = vector.load %arg7[%c0_35, %c0_36, %c0_37, %c0_38] : memref<1x1x2x64xf32, #tpu.memory_space<vmem>>, vector<1x1x2x64xf32>
    tpu.vector_store %arg7[%c0_35, %c0_36, %c0_37, %c0_38], %80 {strides = array<i32>} : memref<1x1x2x64xf32, #tpu.memory_space<vmem>>, vector<1x1x2x64xf32>,
    return
  }
  func.func @transform_0(%arg0: i32, %arg1: i32) -> (i32, i32, i32, i32) {
    %c0_i32 = arith.constant 0 : i32
    %c0_i32_0 = arith.constant 0 : i32
    %c0_i32_1 = arith.constant 0 : i32
    %c0_i32_2 = arith.constant 0 : i32
    return %arg0, %c0_i32, %c0_i32_0, %c0_i32_1 : i32, i32, i32, i32
  }
  func.func @transform_1(%arg0: i32, %arg1: i32) -> (i32, i32, i32) {
    %c0_i32 = arith.constant 0 : i32
    %c0_i32_0 = arith.constant 0 : i32
    %c0_i32_1 = arith.constant 0 : i32
    %c0_i32_2 = arith.constant 0 : i32
    return %c0_i32, %c0_i32_0, %c0_i32_1 : i32, i32, i32
  }
  func.func @transform_2(%arg0: i32, %arg1: i32) -> (i32, i32) {
    %c0_i32 = arith.constant 0 : i32
    %c0_i32_0 = arith.constant 0 : i32
    %c0_i32_1 = arith.constant 0 : i32
    return %c0_i32, %c0_i32_0 : i32, i32
  }
  func.func @transform_3(%arg0: i32, %arg1: i32) -> (i32, i32) {
    %c0_i32 = arith.constant 0 : i32
    %c0_i32_0 = arith.constant 0 : i32
    %c0_i32_1 = arith.constant 0 : i32
    return %c0_i32, %c0_i32_0 : i32, i32
  }
  func.func @transform_4(%arg0: i32, %arg1: i32) -> (i32, i32, i32, i32, i32) {
    %c0_i32 = arith.constant 0 : i32
    %c0_i32_0 = arith.constant 0 : i32
    %c0_i32_1 = arith.constant 0 : i32
    %c0_i32_2 = arith.constant 0 : i32
    return %arg0, %arg1, %c0_i32, %c0_i32_0, %c0_i32_1 : i32, i32, i32, i32, i32
  }
  func.func @transform_5(%arg0: i32, %arg1: i32) -> (i32, i32, i32, i32) {
    %c0_i32 = arith.constant 0 : i32
    %c0_i32_0 = arith.constant 0 : i32
    %c0_i32_1 = arith.constant 0 : i32
    return %arg0, %arg1, %c0_i32, %c0_i32_0 : i32, i32, i32, i32
  }
}

module attributes {stable_mosaic.version = 11 : i64} {
  func.func @kernel(%arg0: i32, %arg1: i32, %arg2: memref<1x70x72x64xf32, #tpu.memory_space<vmem>>, %arg3: memref<7x64x21xf32, #tpu.memory_space<vmem>>, %arg4: memref<1x3xf32, #tpu.memory_space<vmem>>, %arg5: memref<2x64xf32, #tpu.memory_space<vmem>>, %arg6: memref<1x8x64x3xf32, #tpu.memory_space<vmem>>) attributes {dimension_semantics = [#tpu.dimension_semantics<parallel>, #tpu.dimension_semantics<parallel>], iteration_bounds = array<i64: 2, 8>, scalar_prefetch = 0 : i64, scratch_operands = 0 : i64, tpu.core_type = #tpu.core_type<tc>, window_params = [{transform_indices = @transform_0, window_bounds = array<i64: 1, 70, 72, 64>}, {pipeline_mode = #tpu.pipeline_mode<synchronous>, transform_indices = @transform_1, window_bounds = array<i64: 7, 64, 21>}, {pipeline_mode = #tpu.pipeline_mode<synchronous>, transform_indices = @transform_2, window_bounds = array<i64: 1, 3>}, {pipeline_mode = #tpu.pipeline_mode<synchronous>, transform_indices = @transform_3, window_bounds = array<i64: 2, 64>}, {transform_indices = @transform_4, window_bounds = array<i64: 1, 8, 64, 3>}]} {
    %c8_i32 = arith.constant 8 : i32
    %0 = arith.muli %arg1, %c8_i32 : i32
    %1 = tpu.assume_multiple %0, 8 : i32
    %c0 = arith.constant 0 : index
    %2 = arith.index_cast %1 : i32 to index
    %c0_0 = arith.constant 0 : index
    %c0_1 = arith.constant 0 : index
    %3 = vector.load %arg2[%c0, %2, %c0_0, %c0_1] : memref<1x70x72x64xf32, #tpu.memory_space<vmem>>, vector<1x14x72x64xf32>
    %4 = vector.shape_cast %3 : vector<1x14x72x64xf32> to vector<14x72x64xf32>
    %c0_2 = arith.constant 0 : index
    %c0_3 = arith.constant 0 : index
    %5 = vector.load %arg5[%c0_2, %c0_3] : memref<2x64xf32, #tpu.memory_space<vmem>>, vector<1x64xf32>
    %6 = vector.shape_cast %5 : vector<1x64xf32> to vector<1x1x64xf32>
    %c1 = arith.constant 1 : index
    %c0_4 = arith.constant 0 : index
    %7 = vector.load %arg5[%c1, %c0_4] : memref<2x64xf32, #tpu.memory_space<vmem>>, vector<1x64xf32>
    %8 = vector.shape_cast %7 : vector<1x64xf32> to vector<1x1x64xf32>
    %9 = vector.broadcast %6 : vector<1x1x64xf32> to vector<14x72x64xf32>
    %10 = arith.mulf %4, %9 : vector<14x72x64xf32>
    %11 = vector.broadcast %8 : vector<1x1x64xf32> to vector<14x72x64xf32>
    %12 = arith.addf %10, %11 : vector<14x72x64xf32>
    %cst = arith.constant 0.000000e+00 : f32
    %13 = vector.broadcast %cst : f32 to vector<14x72x64xf32>
    %14 = arith.cmpf oge, %12, %13 : vector<14x72x64xf32>
    %cst_5 = arith.constant 0.00999999977 : f32
    %15 = vector.broadcast %cst_5 : f32 to vector<14x72x64xf32>
    %16 = arith.mulf %15, %12 : vector<14x72x64xf32>
    %17 = arith.select %14, %12, %16 : vector<14x72x64xi1>, vector<14x72x64xf32>
    %18 = tpu.iota {dimensions = array<i32: 0>} : vector<14x72x1xi32>
    %19 = vector.broadcast %1 : i32 to vector<14x72x1xi32>
    %20 = arith.addi %18, %19 : vector<14x72x1xi32>
    %21 = tpu.iota {dimensions = array<i32: 1>} : vector<14x72x1xi32>
    %c3_i32 = arith.constant 3 : i32
    %22 = vector.broadcast %c3_i32 : i32 to vector<14x72x1xi32>
    %23 = arith.cmpi sge, %20, %22 : vector<14x72x1xi32>
    %c67_i32 = arith.constant 67 : i32
    %24 = vector.broadcast %c67_i32 : i32 to vector<14x72x1xi32>
    %25 = arith.cmpi slt, %20, %24 : vector<14x72x1xi32>
    %26 = arith.andi %23, %25 : vector<14x72x1xi1>
    %c3_i32_6 = arith.constant 3 : i32
    %27 = vector.broadcast %c3_i32_6 : i32 to vector<14x72x1xi32>
    %28 = arith.cmpi sge, %21, %27 : vector<14x72x1xi32>
    %29 = arith.andi %26, %28 : vector<14x72x1xi1>
    %c67_i32_7 = arith.constant 67 : i32
    %30 = vector.broadcast %c67_i32_7 : i32 to vector<14x72x1xi32>
    %31 = arith.cmpi slt, %21, %30 : vector<14x72x1xi32>
    %32 = arith.andi %29, %31 : vector<14x72x1xi1>
    %cst_8 = arith.constant 0.000000e+00 : f32
    %33 = vector.shape_cast %32 : vector<14x72x1xi1> to vector<14x72x1xi1>
    %34 = vector.broadcast %33 : vector<14x72x1xi1> to vector<14x72x64xi1>
    %35 = vector.broadcast %cst_8 : f32 to vector<14x72x64xf32>
    %36 = arith.select %34, %17, %35 : vector<14x72x64xi1>, vector<14x72x64xf32>
    %37 = vector.extract_strided_slice %36 {offsets = [0, 0, 0], sizes = [8, 72, 64], strides = [1, 1, 1]} : vector<14x72x64xf32> to vector<8x72x64xf32>
    %38 = vector.shape_cast %37 : vector<8x72x64xf32> to vector<576x64xf32>
    %c0_9 = arith.constant 0 : index
    %c0_10 = arith.constant 0 : index
    %c0_11 = arith.constant 0 : index
    %39 = vector.load %arg3[%c0_9, %c0_10, %c0_11] : memref<7x64x21xf32, #tpu.memory_space<vmem>>, vector<1x64x21xf32>
    %40 = vector.shape_cast %39 : vector<1x64x21xf32> to vector<64x21xf32>
    %cst_12 = arith.constant dense<0.000000e+00> : vector<576x21xf32>
    %41 = tpu.matmul %38, %40, %cst_12 {dimension_numbers = #tpu.dot_dimension_numbers<[1], [0], [0], [1], [0, 0, 1, 1], [], []>} : vector<576x64xf32>, vector<64x21xf32>, vector<576x21xf32> -> vector<576x21xf32>
    %42 = vector.extract_strided_slice %36 {offsets = [1, 0, 0], sizes = [8, 72, 64], strides = [1, 1, 1]} : vector<14x72x64xf32> to vector<8x72x64xf32>
    %43 = vector.shape_cast %42 : vector<8x72x64xf32> to vector<576x64xf32>
    %c1_13 = arith.constant 1 : index
    %c0_14 = arith.constant 0 : index
    %c0_15 = arith.constant 0 : index
    %44 = vector.load %arg3[%c1_13, %c0_14, %c0_15] : memref<7x64x21xf32, #tpu.memory_space<vmem>>, vector<1x64x21xf32>
    %45 = vector.shape_cast %44 : vector<1x64x21xf32> to vector<64x21xf32>
    %cst_16 = arith.constant dense<0.000000e+00> : vector<576x21xf32>
    %46 = tpu.matmul %43, %45, %cst_16 {dimension_numbers = #tpu.dot_dimension_numbers<[1], [0], [0], [1], [0, 0, 1, 1], [], []>} : vector<576x64xf32>, vector<64x21xf32>, vector<576x21xf32> -> vector<576x21xf32>
    %47 = arith.addf %41, %46 : vector<576x21xf32>
    %48 = vector.extract_strided_slice %36 {offsets = [2, 0, 0], sizes = [8, 72, 64], strides = [1, 1, 1]} : vector<14x72x64xf32> to vector<8x72x64xf32>
    %49 = vector.shape_cast %48 : vector<8x72x64xf32> to vector<576x64xf32>
    %c2 = arith.constant 2 : index
    %c0_17 = arith.constant 0 : index
    %c0_18 = arith.constant 0 : index
    %50 = vector.load %arg3[%c2, %c0_17, %c0_18] : memref<7x64x21xf32, #tpu.memory_space<vmem>>, vector<1x64x21xf32>
    %51 = vector.shape_cast %50 : vector<1x64x21xf32> to vector<64x21xf32>
    %cst_19 = arith.constant dense<0.000000e+00> : vector<576x21xf32>
    %52 = tpu.matmul %49, %51, %cst_19 {dimension_numbers = #tpu.dot_dimension_numbers<[1], [0], [0], [1], [0, 0, 1, 1], [], []>} : vector<576x64xf32>, vector<64x21xf32>, vector<576x21xf32> -> vector<576x21xf32>
    %53 = arith.addf %47, %52 : vector<576x21xf32>
    %54 = vector.extract_strided_slice %36 {offsets = [3, 0, 0], sizes = [8, 72, 64], strides = [1, 1, 1]} : vector<14x72x64xf32> to vector<8x72x64xf32>
    %55 = vector.shape_cast %54 : vector<8x72x64xf32> to vector<576x64xf32>
    %c3 = arith.constant 3 : index
    %c0_20 = arith.constant 0 : index
    %c0_21 = arith.constant 0 : index
    %56 = vector.load %arg3[%c3, %c0_20, %c0_21] : memref<7x64x21xf32, #tpu.memory_space<vmem>>, vector<1x64x21xf32>
    %57 = vector.shape_cast %56 : vector<1x64x21xf32> to vector<64x21xf32>
    %cst_22 = arith.constant dense<0.000000e+00> : vector<576x21xf32>
    %58 = tpu.matmul %55, %57, %cst_22 {dimension_numbers = #tpu.dot_dimension_numbers<[1], [0], [0], [1], [0, 0, 1, 1], [], []>} : vector<576x64xf32>, vector<64x21xf32>, vector<576x21xf32> -> vector<576x21xf32>
    %59 = arith.addf %53, %58 : vector<576x21xf32>
    %60 = vector.extract_strided_slice %36 {offsets = [4, 0, 0], sizes = [8, 72, 64], strides = [1, 1, 1]} : vector<14x72x64xf32> to vector<8x72x64xf32>
    %61 = vector.shape_cast %60 : vector<8x72x64xf32> to vector<576x64xf32>
    %c4 = arith.constant 4 : index
    %c0_23 = arith.constant 0 : index
    %c0_24 = arith.constant 0 : index
    %62 = vector.load %arg3[%c4, %c0_23, %c0_24] : memref<7x64x21xf32, #tpu.memory_space<vmem>>, vector<1x64x21xf32>
    %63 = vector.shape_cast %62 : vector<1x64x21xf32> to vector<64x21xf32>
    %cst_25 = arith.constant dense<0.000000e+00> : vector<576x21xf32>
    %64 = tpu.matmul %61, %63, %cst_25 {dimension_numbers = #tpu.dot_dimension_numbers<[1], [0], [0], [1], [0, 0, 1, 1], [], []>} : vector<576x64xf32>, vector<64x21xf32>, vector<576x21xf32> -> vector<576x21xf32>
    %65 = arith.addf %59, %64 : vector<576x21xf32>
    %66 = vector.extract_strided_slice %36 {offsets = [5, 0, 0], sizes = [8, 72, 64], strides = [1, 1, 1]} : vector<14x72x64xf32> to vector<8x72x64xf32>
    %67 = vector.shape_cast %66 : vector<8x72x64xf32> to vector<576x64xf32>
    %c5 = arith.constant 5 : index
    %c0_26 = arith.constant 0 : index
    %c0_27 = arith.constant 0 : index
    %68 = vector.load %arg3[%c5, %c0_26, %c0_27] : memref<7x64x21xf32, #tpu.memory_space<vmem>>, vector<1x64x21xf32>
    %69 = vector.shape_cast %68 : vector<1x64x21xf32> to vector<64x21xf32>
    %cst_28 = arith.constant dense<0.000000e+00> : vector<576x21xf32>
    %70 = tpu.matmul %67, %69, %cst_28 {dimension_numbers = #tpu.dot_dimension_numbers<[1], [0], [0], [1], [0, 0, 1, 1], [], []>} : vector<576x64xf32>, vector<64x21xf32>, vector<576x21xf32> -> vector<576x21xf32>
    %71 = arith.addf %65, %70 : vector<576x21xf32>
    %72 = vector.extract_strided_slice %36 {offsets = [6, 0, 0], sizes = [8, 72, 64], strides = [1, 1, 1]} : vector<14x72x64xf32> to vector<8x72x64xf32>
    %73 = vector.shape_cast %72 : vector<8x72x64xf32> to vector<576x64xf32>
    %c6 = arith.constant 6 : index
    %c0_29 = arith.constant 0 : index
    %c0_30 = arith.constant 0 : index
    %74 = vector.load %arg3[%c6, %c0_29, %c0_30] : memref<7x64x21xf32, #tpu.memory_space<vmem>>, vector<1x64x21xf32>
    %75 = vector.shape_cast %74 : vector<1x64x21xf32> to vector<64x21xf32>
    %cst_31 = arith.constant dense<0.000000e+00> : vector<576x21xf32>
    %76 = tpu.matmul %73, %75, %cst_31 {dimension_numbers = #tpu.dot_dimension_numbers<[1], [0], [0], [1], [0, 0, 1, 1], [], []>} : vector<576x64xf32>, vector<64x21xf32>, vector<576x21xf32> -> vector<576x21xf32>
    %77 = arith.addf %71, %76 : vector<576x21xf32>
    %78 = vector.shape_cast %77 : vector<576x21xf32> to vector<8x72x21xf32>
    %79 = vector.extract_strided_slice %78 {offsets = [0, 0, 0], sizes = [8, 64, 3], strides = [1, 1, 1]} : vector<8x72x21xf32> to vector<8x64x3xf32>
    %80 = vector.extract_strided_slice %78 {offsets = [0, 1, 3], sizes = [8, 64, 3], strides = [1, 1, 1]} : vector<8x72x21xf32> to vector<8x64x3xf32>
    %81 = arith.addf %79, %80 : vector<8x64x3xf32>
    %82 = vector.extract_strided_slice %78 {offsets = [0, 2, 6], sizes = [8, 64, 3], strides = [1, 1, 1]} : vector<8x72x21xf32> to vector<8x64x3xf32>
    %83 = arith.addf %81, %82 : vector<8x64x3xf32>
    %84 = vector.extract_strided_slice %78 {offsets = [0, 3, 9], sizes = [8, 64, 3], strides = [1, 1, 1]} : vector<8x72x21xf32> to vector<8x64x3xf32>
    %85 = arith.addf %83, %84 : vector<8x64x3xf32>
    %86 = vector.extract_strided_slice %78 {offsets = [0, 4, 12], sizes = [8, 64, 3], strides = [1, 1, 1]} : vector<8x72x21xf32> to vector<8x64x3xf32>
    %87 = arith.addf %85, %86 : vector<8x64x3xf32>
    %88 = vector.extract_strided_slice %78 {offsets = [0, 5, 15], sizes = [8, 64, 3], strides = [1, 1, 1]} : vector<8x72x21xf32> to vector<8x64x3xf32>
    %89 = arith.addf %87, %88 : vector<8x64x3xf32>
    %90 = vector.extract_strided_slice %78 {offsets = [0, 6, 18], sizes = [8, 64, 3], strides = [1, 1, 1]} : vector<8x72x21xf32> to vector<8x64x3xf32>
    %91 = arith.addf %89, %90 : vector<8x64x3xf32>
    %c0_32 = arith.constant 0 : index
    %c0_33 = arith.constant 0 : index
    %92 = vector.load %arg4[%c0_32, %c0_33] : memref<1x3xf32, #tpu.memory_space<vmem>>, vector<1x3xf32>
    %93 = vector.shape_cast %92 : vector<1x3xf32> to vector<1x1x3xf32>
    %94 = vector.broadcast %93 : vector<1x1x3xf32> to vector<8x64x3xf32>
    %95 = arith.addf %91, %94 : vector<8x64x3xf32>
    %96 = math.tanh %95 : vector<8x64x3xf32>
    %97 = math.tanh %96 : vector<8x64x3xf32>
    %cst_34 = arith.constant 2.000000e+00 : f32
    %98 = vector.broadcast %cst_34 : f32 to vector<8x64x3xf32>
    %99 = arith.mulf %98, %97 : vector<8x64x3xf32>
    %100 = vector.shape_cast %99 : vector<8x64x3xf32> to vector<1x8x64x3xf32>
    %c0_35 = arith.constant 0 : index
    %c0_36 = arith.constant 0 : index
    %c0_37 = arith.constant 0 : index
    %c0_38 = arith.constant 0 : index
    %101 = vector.load %arg6[%c0_35, %c0_36, %c0_37, %c0_38] : memref<1x8x64x3xf32, #tpu.memory_space<vmem>>, vector<1x8x64x3xf32>
    tpu.vector_store %arg6[%c0_35, %c0_36, %c0_37, %c0_38], %100 {strides = array<i32>} : memref<1x8x64x3xf32, #tpu.memory_space<vmem>>, vector<1x8x64x3xf32>,
    return
  }
  func.func @transform_0(%arg0: i32, %arg1: i32) -> (i32, i32, i32, i32) {
    %c0_i32 = arith.constant 0 : i32
    %c0_i32_0 = arith.constant 0 : i32
    %c0_i32_1 = arith.constant 0 : i32
    %c0_i32_2 = arith.constant 0 : i32
    return %arg0, %c0_i32, %c0_i32_0, %c0_i32_1 : i32, i32, i32, i32
  }
  func.func @transform_1(%arg0: i32, %arg1: i32) -> (i32, i32, i32) {
    %c0_i32 = arith.constant 0 : i32
    %c0_i32_0 = arith.constant 0 : i32
    %c0_i32_1 = arith.constant 0 : i32
    %c0_i32_2 = arith.constant 0 : i32
    return %c0_i32, %c0_i32_0, %c0_i32_1 : i32, i32, i32
  }
  func.func @transform_2(%arg0: i32, %arg1: i32) -> (i32, i32) {
    %c0_i32 = arith.constant 0 : i32
    %c0_i32_0 = arith.constant 0 : i32
    %c0_i32_1 = arith.constant 0 : i32
    return %c0_i32, %c0_i32_0 : i32, i32
  }
  func.func @transform_3(%arg0: i32, %arg1: i32) -> (i32, i32) {
    %c0_i32 = arith.constant 0 : i32
    %c0_i32_0 = arith.constant 0 : i32
    %c0_i32_1 = arith.constant 0 : i32
    return %c0_i32, %c0_i32_0 : i32, i32
  }
  func.func @transform_4(%arg0: i32, %arg1: i32) -> (i32, i32, i32, i32) {
    %c0_i32 = arith.constant 0 : i32
    %c0_i32_0 = arith.constant 0 : i32
    %c0_i32_1 = arith.constant 0 : i32
    return %arg0, %arg1, %c0_i32, %c0_i32_0 : i32, i32, i32, i32
  }
}

</mosaic_0001>

<bundles_post_ra>
// kernel: tile.19
= control target key start
LH: loop header
LB: loop body
LE: loop exit
PB: predicated region body
PF: predicated region fallthrough
CT: control target
= control target key end

     0   :  { %vm7_vm0 = vcmask 523264   ;;  %vm13_vm1 = vcmask 1048064   ;;  %s39_s0 = inlined_call_operand.vmem [shape: f32[2,64], index: 0, kind: input, shape index: {}]   ;;  %s40_s1 = inlined_call_operand.vmem [shape: f32[1,128], index: 1, kind: output, shape index: {}]  }
   0x1   :  { %v4_v0 = vld [vmem:[%s39_s0] sm:$0x3]  ;;  %s22_s0 = smov 64  }
   0x2   :  { %5 = vst [vmem:[#allocation1] sm:$0x3] %v4_v0 }
   0x9   :  { %v10_v1 = vld [vmem:[#allocation1 + $0x1] sm:$0x1]   ;;  %v6_v2 = vld [vmem:[#allocation1] sm:$0x1]  }
   0xa   :  { %11 = vrot.lane.b32.xlu0 %v10_v1, %s22_s0  ;;  %8 = vst.msk [vmem:[#allocation0] sm:$0x1] %vm7_vm0, %v6_v2  }
  0x7c   :  { %v12_v3 = vpop.permute.xlu0 %11  }
  0x7d   :  { %14 = vst.msk [vmem:[#allocation0] sm:$0x1] %vm13_vm1, %v12_v3  }
  0x84   :  { %v18_v4 = vld [vmem:[#allocation0] sm:$0x1] }
  0x85   :  { %20 = vst [vmem:[%s40_s1] sm:$0x1] %v18_v4 }

// kernel: tile.13
= control target key start
LH: loop header
LB: loop body
LE: loop exit
PB: predicated region body
PF: predicated region fallthrough
CT: control target
= control target key end

     0   :  { %2 = vsyncpa [#allocation1], 0  ;;  %s44_s6 = smov [#allocation0]   ;;  %s70_s0 = inlined_call_operand.hbm [shape: f32[128], index: 0, kind: input, shape index: {}]   ;;  %s71_s1 = inlined_call_operand.vmem [shape: f32[2,128], index: 1, kind: output, shape index: {}]  }
   0x1   :  { %s9_s7 = sshll.u32 %s44_s6, 4  ;;  %s20_s10 = scalar_lea.hbm %s70_s0, 16  ;;  %s10_s7 = int_to_ptr.vmem [resolvable:$true] %s9_s7 }
   0x2   :  { %p21_p0 = scmp.ne.s32.totalorder %s70_s0, %s20_s10  ;;  %p24_p1 = scmp.lt.u32.totalorder %s20_s10, %s70_s0 }
   0x4   :  { %p26_p2 = pnand %p24_p1, %p21_p0 }
   0x6   :  { %29 = shalt.err (!%p26_p2)
}
   0x7   :  { %s30_s15 = scalar_lea.vmem %s10_s7, 16  ;;  %s34_s16 = scalar_lea.vmem %s10_s7, 32 }
   0x8   :  { %p31_p3 = scmp.ne.s32.totalorder %s10_s7, %s30_s15  ;;  %p35_p4 = scmp.lt.s32.totalorder %s10_s7, %s10_s7 }
   0x9   :  { %p36_p5 = scmp.lt.s32.totalorder %s34_s16, %s30_s15 }
   0xb   :  { %p37_p6 = por %p36_p5, %p35_p4 }
   0xd   :  { %p38_p7 = pnand %p37_p6, %p31_p3 }
   0xf   :  { %41 = shalt.err (!%p38_p7)
}
  0x10   :  { %12 = dma.hbm_to_vmem [thread:$0]  %s70_s0, 16, %s10_s7, [#allocation1]  }
  0x11   :  { %42 = dma.done.wait [#allocation1], 16  }
  0x12   :  { %43 = vsyncadd [#allocation1], 4294967280  ;;  %v16_v0 = vld [vmem:[#allocation0] ss:$0 sm:$0xff] }
  0x13   :  { %17 = vst [vmem:[%s71_s1] sm:$0x3] %v16_v0 }
  0x14   :  { %18 = vsyncpa [#allocation1], 1 }

// kernel: tile.18
= control target key start
LH: loop header
LB: loop body
LE: loop exit
PB: predicated region body
PF: predicated region fallthrough
CT: control target
= control target key end

     0   :  { %2 = vsyncpa [#allocation1], 0  ;;  %s44_s6 = smov [#allocation0]   ;;  %s70_s0 = inlined_call_operand.hbm [shape: f32[64], index: 0, kind: input, shape index: {}]   ;;  %s71_s1 = inlined_call_operand.vmem [shape: f32[2,64], index: 1, kind: output, shape index: {}]  }
   0x1   :  { %s9_s7 = sshll.u32 %s44_s6, 4  ;;  %s20_s10 = scalar_lea.hbm %s70_s0, 16  ;;  %s10_s7 = int_to_ptr.vmem [resolvable:$true] %s9_s7 }
   0x2   :  { %p21_p0 = scmp.ne.s32.totalorder %s70_s0, %s20_s10  ;;  %p24_p1 = scmp.lt.u32.totalorder %s20_s10, %s70_s0 }
   0x4   :  { %p26_p2 = pnand %p24_p1, %p21_p0 }
   0x6   :  { %29 = shalt.err (!%p26_p2)
}
   0x7   :  { %s30_s15 = scalar_lea.vmem %s10_s7, 16  ;;  %s34_s16 = scalar_lea.vmem %s10_s7, 32 }
   0x8   :  { %p31_p3 = scmp.ne.s32.totalorder %s10_s7, %s30_s15  ;;  %p35_p4 = scmp.lt.s32.totalorder %s10_s7, %s10_s7 }
   0x9   :  { %p36_p5 = scmp.lt.s32.totalorder %s34_s16, %s30_s15 }
   0xb   :  { %p37_p6 = por %p36_p5, %p35_p4 }
   0xd   :  { %p38_p7 = pnand %p37_p6, %p31_p3 }
   0xf   :  { %41 = shalt.err (!%p38_p7)
}
  0x10   :  { %12 = dma.hbm_to_vmem [thread:$0]  %s70_s0, 16, %s10_s7, [#allocation1]  }
  0x11   :  { %42 = dma.done.wait [#allocation1], 16  }
  0x12   :  { %43 = vsyncadd [#allocation1], 4294967280  ;;  %v16_v0 = vld [vmem:[#allocation0] ss:$0 sm:$0xff] }
  0x13   :  { %17 = vst [vmem:[%s71_s1] sm:$0x3] %v16_v0 }
  0x14   :  { %18 = vsyncpa [#allocation1], 1 }

// kernel: generator_forward.3
= control target key start
LH: loop header
LB: loop body
LE: loop exit
PB: predicated region body
PF: predicated region fallthrough
CT: control target
= control target key end

     0   :  { %s2482_s15 = smov 0   ;;  %s2484_s16 = smov 0   ;;  %s3851_s0 = inlined_call_operand.vmem [shape: f32[2,17,17,192], index: 0, kind: input, shape index: {}]   ;;  %s3852_s1 = inlined_call_operand.vmem [shape: f32[3,384,256], index: 1, kind: input, shape index: {}]   ;;  %s3853_s2 = inlined_call_operand.vmem [shape: f32[1,256], index: 2, kind: input, shape index: {}]   ;;  %s3854_s3 = inlined_call_operand.vmem [shape: f32[2,16,2,16,256], index: 3, kind: output, shape index: {0}]   ;;  %s3855_s4 = inlined_call_operand.vmem [shape: f32[2,4,2,128], index: 4, kind: output, shape index: {1}]  }
   0x1   :  { %s2486_s17 = smov 0   ;;  %s2488_s18 = smov 0  }
   0x2   :  { %s2490_s19 = smov 0  }
   0x3 LB: > { %s24_s20 = sadd.s32 1, %s2445_s17  ;;  %s27_s21 = sadd.s32 1, %s2449_s18  ;;  %s2453_s19 = sphi %s2490_s19, %s15_s19   ;;  %s2449_s18 = sphi %s2488_s18, %s3859_s18   ;;  %s2445_s17 = sphi %s2486_s17, %s3858_s17   ;;  %s2441_s16 = sphi %s2484_s16, %s3857_s16   ;;  %s2437_s15 = sphi %s2482_s15, %s3856_s15  }
   0x4   : > { %p25_p0 = scmp.ge.s32.totalorder %s24_s20, 4  ;;  %p1757_p1 = scmp.ge.s32.totalorder %s2453_s19, 1 }
   0x5   : > { %p181_p2 = scmp.lt.s32.totalorder %s2453_s19, 9 }
   0x6   : > { %s3861_s20 = smov (%p25_p0, %s24_s20), 0  ;;  %s3863_s21 = smov (!%p25_p0, %s27_s21), %s2449_s18 }
   0x7   : > { %p182_p3 = pnand %p1757_p1, %p181_p2  ;;  %p29_p4 = scmp.ge.s32.totalorder %s3863_s21, 2 }
   0x8   : > { %p220_p5 = scmp.lt.s32.totalorder (!%p182_p3), %s2441_s16, 1  ;;  %v442_v0 = vld [vmem:[%s3852_s1 + $0x8] sm:$0xff] (!%p182_p3)  ;;  %v444_v1 = vld [vmem:[%s3852_s1 + $0x18] sm:$0xff] (!%p182_p3)  ;;  %v441_v2 = vld [vmem:[%s3852_s1] sm:$0xff] (!%p182_p3)  ;;  %s1978_s14 = smul.u32 (!%p182_p3), 192, %s2437_s15  ;;  %v2455_v23 = vmov (!%p182_p3), 0.0  }
   0x9   : > { %s3865_s21 = smov (%p29_p4, %s3863_s21), 0  ;;  %185 = sbr.rel (%p182_p3) target bundleno = 512 (0x200), region = 32 }
   0xa   : > { %v1979_v3 = vpack.c.bf16 (!%p182_p3), %v444_v1, %v442_v0  ;;  %v443_v4 = vld [vmem:[%s3852_s1 + $0x10] sm:$0xff] (!%p182_p3)  ;;  %v446_v5 = vld [vmem:[%s3852_s1 + $0x28] sm:$0xff] (!%p182_p3)  ;;  %v448_v6 = vld [vmem:[%s3852_s1 + $0x38] sm:$0xff] (!%p182_p3)  ;;  %1145 = vmatprep.mubr.f32.mxu1 (!%p182_p3), %v2455_v23  ;;  %vm308_vm0 = vcmask (!%p182_p3), 1046528   ;;  %vm399_vm1 = vcmask (!%p182_p3), 523264   ;;  %s1759_s8 = sshll.u32 (!%p182_p3), %s2437_s15, 2 }
   0xb   : > { %v1981_v7 = vpack.c.bf16 (!%p182_p3), %v443_v4, %v441_v2  ;;  %v1983_v8 = vpack.c.bf16 (!%p182_p3), %v448_v6, %v446_v5  ;;  %v445_v9 = vld [vmem:[%s3852_s1 + $0x20] sm:$0xff] (!%p182_p3)  ;;  %v447_v10 = vld [vmem:[%s3852_s1 + $0x30] sm:$0xff] (!%p182_p3)  ;;  %v450_v11 = vld [vmem:[%s3852_s1 + $0x48] sm:$0xff] (!%p182_p3)  ;;  %p228_p6 = scmp.lt.s32.totalorder (!%p182_p3), %s1759_s8, 15  ;;  %p238_p7 = scmp.lt.s32.totalorder (!%p182_p3), %s2437_s15, 3  ;;  %vm1611_vm2 = vcmask (!%p182_p3), 1040384  }
   0xc   : > { %1980 = vmatprep.subr.bf16.mxu0 (!%p182_p3), %v1979_v3  ;;  %v452_v12 = vld [vmem:[%s3852_s1 + $0x58] sm:$0xff] (!%p182_p3)  ;;  %v1985_v13 = vpack.c.bf16 (!%p182_p3), %v447_v10, %v445_v9  ;;  %v449_v15 = vld [vmem:[%s3852_s1 + $0x40] sm:$0xff] (!%p182_p3)  ;;  %v451_v16 = vld [vmem:[%s3852_s1 + $0x50] sm:$0xff] (!%p182_p3) }
   0xd   : > { %1982 = vmatpush1.bf16.msra.mxu0 (!%p182_p3), %v1981_v7  ;;  %v1987_v14 = vpack.c.bf16 (!%p182_p3), %v452_v12, %v450_v11  ;;  %v454_v17 = vld [vmem:[%s3852_s1 + $0x68] sm:$0xff] (!%p182_p3)  ;;  %v456_v18 = vld [vmem:[%s3852_s1 + $0x78] sm:$0xff] (!%p182_p3)  ;;  %v453_v19 = vld [vmem:[%s3852_s1 + $0x60] sm:$0xff] (!%p182_p3)  ;;  %v1989_v27 = vpack.c.bf16 (!%p182_p3), %v451_v16, %v449_v15 }
   0xe   : > { %1984 = vmatprep.subr.bf16.mxu0 (!%p182_p3), %v1983_v8  ;;  %v455_v20 = vld [vmem:[%s3852_s1 + $0x70] sm:$0xff] (!%p182_p3)  ;;  %v458_v21 = vld [vmem:[%s3852_s1 + $0x88] sm:$0xff] (!%p182_p3)  ;;  %v460_v22 = vld [vmem:[%s3852_s1 + $0x98] sm:$0xff] (!%p182_p3)  ;;  %v1991_v34 = vpack.c.bf16 (!%p182_p3), %v456_v18, %v454_v17 }
   0xf   : > { %v1993_v44 = vpack.c.bf16 (!%p182_p3), %v455_v20, %v453_v19  ;;  %v1995_v48 = vpack.c.bf16 (!%p182_p3), %v460_v22, %v458_v21  ;;  %v457_v49 = vld [vmem:[%s3852_s1 + $0x80] sm:$0xff] (!%p182_p3)  ;;  %v459_v55 = vld [vmem:[%s3852_s1 + $0x90] sm:$0xff] (!%p182_p3)  ;;  %v462_v56 = vld [vmem:[%s3852_s1 + $0xa8] sm:$0xff] (!%p182_p3) }
  0x10   : > { %s3867_s16 = smov (!%p220_p5, %s2441_s16), 1  ;;  %v464_v59 = vld [vmem:[%s3852_s1 + $0xb8] sm:$0xff]  ;;  %v1997_v62 = vpack.c.bf16 %v459_v55, %v457_v49  ;;  %v461_v4 = vld [vmem:[%s3852_s1 + $0xa0] sm:$0xff]  ;;  %v463_v5 = vld [vmem:[%s3852_s1 + $0xb0] sm:$0xff]  ;;  %s3869_s8 = smov (!%p228_p6, %s1759_s8), 15 }
  0x11   : > { %s2347_s24 = smul.u32 816, %s3867_s16  ;;  %1986 = vmatpush1.bf16.msra.mxu0 %v1985_v13  ;;  %v1999_v3 = vpack.c.bf16 %v464_v59, %v462_v56  ;;  %v466_v7 = vld [vmem:[%s3852_s1 + $0xc8] sm:$0xff]  ;;  %v2001_v12 = vpack.c.bf16 %v463_v5, %v461_v4  ;;  %v468_v13 = vld [vmem:[%s3852_s1 + $0xd8] sm:$0xff]  ;;  %v465_v17 = vld [vmem:[%s3852_s1 + $0xc0] sm:$0xff]  ;;  %s1760_s9 = sshll.u32 %s3869_s8, 3 }
  0x12   : > { %1988 = vmatprep.subr.bf16.mxu0 %v1987_v14  ;;  %v2003_v16 = vpack.c.bf16 %v468_v13, %v466_v7  ;;  %v467_v18 = vld [vmem:[%s3852_s1 + $0xd0] sm:$0xff]  ;;  %v470_v22 = vld [vmem:[%s3852_s1 + $0xe8] sm:$0xff]  ;;  %v476_v55 = vld [vmem:[%s3852_s1 + $0x118] sm:$0xff]  ;;  %s1761_s10 = sshll.u32 %s3867_s16, 7  ;;  %s3871_s15 = smov (!%p238_p7, %s2437_s15), 3 }
  0x13   : > { %s224_s5 = scalar_lea.vmem %s3851_s0, %s2347_s24  ;;  %v471_v49 = vld [vmem:[%s3852_s1 + $0xf0] sm:$0xff]  ;;  %v473_v7 = vld [vmem:[%s3852_s1 + $0x100] sm:$0xff]  ;;  %s232_s11 = sadd.s32 %s1761_s10, %s1760_s9 }
  0x14   : > { %s2566_s12 = scalar_lea.vmem %s224_s5, %s1978_s14  ;;  %s2456_s14 = smov 64  }
  0x15   : > { %v2579_v24 = vld [vmem:[%s2566_s12 + $0x10] sm:$0xff]  ;;  %v252_v25 = vld [vmem:[%s2566_s12 + $0x20] sm:$0x1]  ;;  %v2594_v33 = vld [vmem:[%s2566_s12 + $0x38] sm:$0xff]  ;;  %1990 = vmatpush1.bf16.msra.mxu0 %v1989_v27  ;;  %s1762_s23 = sshll.u32 %s232_s11, 3  ;;  %s1763_s26 = sshll.u32 %s3867_s16, 2 }
  0x16   : > { %v2583_v26 = vld [vmem:[%s2566_s12] sm:$0xff]  ;;  %v310_v28 = vrot.slane %v2579_v24, 1  ;;  %v315_v29 = vrot.slane %v252_v25, 1  ;;  %v2587_v30 = vld [vmem:[%s2566_s12 + $0x30] sm:$0xff]  ;;  %v2600_v38 = vld [vmem:[%s2566_s12 + $0x48] sm:$0xff]  ;;  %v322_v46 = vrot.slane %v2594_v33, 1  ;;  %1992 = vmatprep.subr.bf16.mxu0 %v1991_v34  ;;  %s3748_s25 = scalar_lea.vmem %s3854_s3, %s1762_s23 }
  0x17   : > { %v2590_v31 = vld [vmem:[%s2566_s12 + $0x40] sm:$0xff]  ;;  %v309_v32 = vrot.slane %v2583_v26, 1  ;;  %v319_v35 = vrot.slane %v2587_v30, 1  ;;  %v258_v37 = vld [vmem:[%s2566_s12 + $0x50] sm:$0x1]  ;;  %v323_v47 = vrot.slane %v2600_v38, 1 }
  0x18   : > { %v320_v36 = vrot.slane %v2590_v31, 1  ;;  %v316_v39 = vsel %vm308_vm0, %v310_v28, %v315_v29  ;;  %v325_v41 = vrot.slane %v258_v37, 1  ;;  %v2605_v42 = vld [vmem:[%s2566_s12 + $0x70] sm:$0xff]  ;;  %v264_v43 = vld [vmem:[%s2566_s12 + $0x80] sm:$0x1]  ;;  %v2659_v10 = vld [vmem:[%s2566_s12 + $0x8] sm:$0xff] }
  0x19   : > { %v311_v40 = vsel %vm308_vm0, %v309_v32, %v310_v28  ;;  %363 = vrot.lane.b32.xlu1 %v316_v39, %s2456_s14  ;;  %v330_v52 = vrot.slane %v2605_v42, 1  ;;  %v335_v53 = vrot.slane %v264_v43, 1  ;;  %v2618_v54 = vld [vmem:[%s2566_s12 + $0x60] sm:$0xff]  ;;  %v270_v58 = vld [vmem:[%s2566_s12 + $0xb0] sm:$0x1]  ;;  %v324_v60 = vsel %vm308_vm0, %v322_v46, %v323_v47  ;;  %1994 = vmatpush1.bf16.msra.mxu0 %v1993_v44  ;;  %v2662_v11 = vld [vmem:[%s2566_s12 + $0x18] sm:$0xff] }
  0x1a   : > { %v321_v45 = vsel %vm308_vm0, %v319_v35, %v320_v36  ;;  %v326_v51 = vsel %vm308_vm0, %v320_v36, %v325_v41  ;;  %v2627_v57 = vld [vmem:[%s2566_s12 + $0xa0] sm:$0xff]  ;;  %v329_v61 = vrot.slane %v2618_v54, 1  ;;  %v345_v1 = vrot.slane %v270_v58, 1  ;;  %v2642_v2 = vld [vmem:[%s2566_s12 + $0x90] sm:$0xff]  ;;  %1996 = vmatprep.subr.bf16.mxu0 %v1995_v48  ;;  %v259_v6 = vld [vmem:[%s2566_s12 + $0x58] sm:$0x1] }
  0x1b   : > { %v2390_v50 = vpack.i.bf16 %v321_v45, %v311_v40  ;;  %v336_v63 = vsel %vm308_vm0, %v330_v52, %v335_v53  ;;  %v340_v0 = vrot.slane %v2627_v57, 1  ;;  %v339_v9 = vrot.slane %v2642_v2, 1  ;;  %v2675_v19 = vld [vmem:[%s2566_s12 + $0x68] sm:$0xff]  ;;  %v2678_v20 = vld [vmem:[%s2566_s12 + $0x78] sm:$0xff]  ;;  %v2694_v32 = vld [vmem:[%s2566_s12 + $0xe0] sm:$0x1] }
  0x1c   : > { %v331_v8 = vsel %vm308_vm0, %v329_v61, %v330_v52  ;;  %v327_v15 = vrot.slane %v259_v6, 1  ;;  %v265_v21 = vld [vmem:[%s2566_s12 + $0x88] sm:$0x1]  ;;  %v472_v25 = vld [vmem:[%s3852_s1 + $0xf8] sm:$0xff]  ;;  %v312_v27 = vrot.slane %v2659_v10, 1  ;;  %v313_v28 = vrot.slane %v2662_v11, 1 }
  0x1d   : > { %2391 = vrot.lane.b32.xlu0 %v2390_v50, %s2456_s14  ;;  %371 = vrot.lane.b32.xlu1 %v326_v51, %s2456_s14  ;;  %v346_v14 = vsel %vm308_vm0, %v340_v0, %v345_v1  ;;  %v2691_v29 = vld [vmem:[%s2566_s12 + $0xb8] sm:$0x1]  ;;  %v341_v34 = vsel %vm308_vm0, %v339_v9, %v340_v0  ;;  %v2699_v35 = vld [vmem:[%s2566_s12 + $0xe8] sm:$0x1]  ;;  %v2005_v36 = vpack.c.bf16 %v467_v18, %v465_v17  ;;  %v337_v43 = vrot.slane %v265_v21, 1 }
  0x1e   : > { %1998 = vmatpush1.bf16.msra.mxu0 %v1997_v62  ;;  %v1929_v37 = vld [vmem:[%s3852_s1 + $0x808] sm:$0xff]  ;;  %v1931_v39 = vld [vmem:[%s3852_s1 + $0x818] sm:$0xff]  ;;  %v1928_v40 = vld [vmem:[%s3852_s1 + $0x800] sm:$0xff]  ;;  %v328_v41 = vsel %vm308_vm0, %v323_v47, %v327_v15  ;;  %v2007_v46 = vpack.c.bf16 %v472_v25, %v470_v22  ;;  %v314_v59 = vsel %vm308_vm0, %v312_v27, %v313_v28  ;;  %v333_v61 = vrot.slane %v2678_v20, 1 }
  0x1f   : > { %2000 = vmatprep.subr.bf16.mxu0 %v1999_v3  ;;  %v2714_v44 = vld [vmem:[%s2566_s12 + $0xa8] sm:$0xff]  ;;  %v2717_v45 = vld [vmem:[%s2566_s12 + $0xd0] sm:$0xff]  ;;  %v469_v48 = vld [vmem:[%s3852_s1 + $0xe0] sm:$0xff]  ;;  %v2139_v50 = vpack.c.bf16 %v1931_v39, %v1929_v37  ;;  %v347_v4 = vrot.slane %v2691_v29, 1  ;;  %v355_v5 = vrot.slane %v2694_v32, 1  ;;  %v357_v13 = vrot.slane %v2699_v35, 1 }
  0x20   : > { %v1930_v47 = vld [vmem:[%s3852_s1 + $0x810] sm:$0xff]  ;;  %v2729_v51 = vld [vmem:[%s2566_s12 + $0x98] sm:$0xff]  ;;  %v2732_v52 = vld [vmem:[%s2566_s12 + $0xc0] sm:$0xff]  ;;  %v2009_v6 = vpack.c.bf16 %v471_v49, %v469_v48  ;;  %v343_v21 = vrot.slane %v2714_v44, 1  ;;  %v350_v22 = vrot.slane %v2717_v45, 1 }
  0x21   : > { %369 = vrot.lane.b32.xlu0 %v324_v60, %s2456_s14  ;;  %379 = vrot.lane.b32.xlu1 %v336_v63, %s2456_s14  ;;  %v474_v53 = vld [vmem:[%s3852_s1 + $0x108] sm:$0xff]  ;;  %v2141_v56 = vpack.c.bf16 %v1930_v47, %v1928_v40  ;;  %v332_v60 = vrot.slane %v2675_v19, 1  ;;  %v1935_v63 = vld [vmem:[%s3852_s1 + $0x838] sm:$0xff]  ;;  %v342_v35 = vrot.slane %v2729_v51, 1 }
  0x22   : > { %2002 = vmatpush1.bf16.msra.mxu0 %v2001_v12  ;;  %v1933_v58 = vld [vmem:[%s3852_s1 + $0x828] sm:$0xff]  ;;  %2140 = vmatprep.subr.bf16.mxu1 %v2139_v50  ;;  %v1932_v0 = vld [vmem:[%s3852_s1 + $0x820] sm:$0xff]  ;;  %v1934_v1 = vld [vmem:[%s3852_s1 + $0x830] sm:$0xff]  ;;  %v338_v12 = vsel %vm308_vm0, %v333_v61, %v337_v43  ;;  %v348_v40 = vsel %vm308_vm0, %v343_v21, %v347_v4 }
  0x23   : > { %2004 = vmatprep.subr.bf16.mxu0 %v2003_v16  ;;  %v2750_v62 = vld [vmem:[%s2566_s12 + $0xc8] sm:$0xff]  ;;  %v2763_v3 = vld [vmem:[%s2566_s12 + $0xd8] sm:$0xff]  ;;  %v2143_v9 = vpack.c.bf16 %v1935_v63, %v1933_v58  ;;  %2142 = vmatpush1.bf16.msra.mxu1 %v2141_v56  ;;  %v2145_v16 = vpack.c.bf16 %v1934_v1, %v1932_v0  ;;  %v1936_v29 = vld [vmem:[%s3852_s1 + $0x840] sm:$0xff] }
  0x24   : > { %v478_v15 = vld [vmem:[%s3852_s1 + $0x128] sm:$0xff]  ;;  %v1939_v18 = vld [vmem:[%s3852_s1 + $0x858] sm:$0xff]  ;;  %v1938_v32 = vld [vmem:[%s3852_s1 + $0x850] sm:$0xff]  ;;  %v353_v37 = vrot.slane %v2763_v3, 1  ;;  %v352_v39 = vrot.slane %v2750_v62, 1 }
  0x25   : > { %375 = vrot.lane.b32.xlu0 %v331_v8, %s2456_s14  ;;  %387 = vrot.lane.b32.xlu1 %v346_v14, %s2456_s14  ;;  %v475_v8 = vld [vmem:[%s3852_s1 + $0x110] sm:$0xff]  ;;  %v2011_v14 = vpack.c.bf16 %v476_v55, %v474_v53  ;;  %v1937_v17 = vld [vmem:[%s3852_s1 + $0x848] sm:$0xff]  ;;  %v2149_v53 = vpack.c.bf16 %v1938_v32, %v1936_v29 }
  0x26   : > { %2006 = vmatpush1.bf16.msra.mxu0 %v2005_v36  ;;  %v480_v25 = vld [vmem:[%s3852_s1 + $0x138] sm:$0xff]  ;;  %2144 = vmatprep.subr.bf16.mxu1 %v2143_v9  ;;  %v2147_v27 = vpack.c.bf16 %v1939_v18, %v1937_v17  ;;  %v349_v36 = vrot.slane %v2732_v52, 1  ;;  %v2013_v43 = vpack.c.bf16 %v475_v8, %v473_v7  ;;  %v1941_v45 = vld [vmem:[%s3852_s1 + $0x868] sm:$0xff]  ;;  %v358_v48 = vsel %vm308_vm0, %v353_v37, %v357_v13  ;;  %v477_v50 = vld [vmem:[%s3852_s1 + $0x120] sm:$0xff] }
  0x27   : > { %2008 = vmatprep.subr.bf16.mxu0 %v2007_v46  ;;  %v1943_v46 = vld [vmem:[%s3852_s1 + $0x878] sm:$0xff]  ;;  %v2015_v49 = vpack.c.bf16 %v480_v25, %v478_v15  ;;  %v479_v47 = vld [vmem:[%s3852_s1 + $0x130] sm:$0xff]  ;;  %2146 = vmatpush1.bf16.msra.mxu1 %v2145_v16  ;;  %v482_v52 = vld [vmem:[%s3852_s1 + $0x148] sm:$0xff]  ;;  %v354_v1 = vsel %vm308_vm0, %v352_v39, %v353_v37 }
  0x28   : > { %v484_v55 = vld [vmem:[%s3852_s1 + $0x158] sm:$0xff]  ;;  %2148 = vmatprep.subr.bf16.mxu1 %v2147_v27  ;;  %v2151_v56 = vpack.c.bf16 %v1943_v46, %v1941_v45  ;;  %v1940_v58 = vld [vmem:[%s3852_s1 + $0x860] sm:$0xff]  ;;  %v1945_v63 = vld [vmem:[%s3852_s1 + $0x888] sm:$0xff] }
  0x29   : > { %383 = vrot.lane.b32.xlu0 %v341_v34, %s2456_s14  ;;  %373 = vrot.lane.b32.xlu1 %v328_v41, %s2456_s14  ;;  %v334_v34 = vsel %vm308_vm0, %v332_v60, %v333_v61  ;;  %v356_v41 = vsel %vm308_vm0, %v350_v22, %v355_v5  ;;  %v344_v60 = vsel %vm308_vm0, %v342_v35, %v343_v21  ;;  %v1947_v0 = vld [vmem:[%s3852_s1 + $0x898] sm:$0xff]  ;;  %v253_v4 = vld [vmem:[%s2566_s12 + $0x28] sm:$0x1] }
  0x2a   : > { %2010 = vmatpush1.bf16.msra.mxu0 %v2009_v6  ;;  %v351_v61 = vsel %vm308_vm0, %v349_v36, %v350_v22  ;;  %v2400_v5 = vpack.i.bf16 %v358_v48, %v356_v41  ;;  %v2017_v6 = vpack.c.bf16 %v479_v47, %v477_v50  ;;  %v2019_v7 = vpack.c.bf16 %v484_v55, %v482_v52  ;;  %v481_v8 = vld [vmem:[%s3852_s1 + $0x140] sm:$0xff]  ;;  %v483_v9 = vld [vmem:[%s3852_s1 + $0x150] sm:$0xff]  ;;  %v1949_v21 = vld [vmem:[%s3852_s1 + $0x8a8] sm:$0xff] }
  0x2b   : > { %2012 = vmatprep.subr.bf16.mxu0 %v2011_v14  ;;  %2150 = vmatpush1.bf16.msra.mxu1 %v2149_v53  ;;  %v488_v14 = vld [vmem:[%s3852_s1 + $0x178] sm:$0xff]  ;;  %v2155_v15 = vpack.c.bf16 %v1947_v0, %v1945_v63  ;;  %v1944_v16 = vld [vmem:[%s3852_s1 + $0x880] sm:$0xff]  ;;  %v1946_v17 = vld [vmem:[%s3852_s1 + $0x890] sm:$0xff]  ;;  %v2395_v18 = vpack.i.bf16 %v354_v1, %v351_v61  ;;  %v317_v25 = vrot.slane %v253_v4, 1  ;;  %v2021_v27 = vpack.c.bf16 %v483_v9, %v481_v8 }
  0x2c   : > { %2152 = vmatprep.subr.bf16.mxu1 %v2151_v56  ;;  %v1951_v22 = vld [vmem:[%s3852_s1 + $0x8b8] sm:$0xff]  ;;  %v485_v32 = vld [vmem:[%s3852_s1 + $0x160] sm:$0xff]  ;;  %v490_v35 = vld [vmem:[%s3852_s1 + $0x188] sm:$0xff]  ;;  %v2157_v36 = vpack.c.bf16 %v1946_v17, %v1944_v16 }
  0x2d   : > { %361 = vrot.lane.b32.xlu0 %v314_v59, %s2456_s14  ;;  %381 = vrot.lane.b32.xlu1 %v338_v12, %s2456_s14  ;;  %v1942_v59 = vld [vmem:[%s3852_s1 + $0x870] sm:$0xff]  ;;  %v486_v12 = vld [vmem:[%s3852_s1 + $0x168] sm:$0xff]  ;;  %v2159_v39 = vpack.c.bf16 %v1951_v22, %v1949_v21  ;;  %v318_v46 = vsel %vm308_vm0, %v313_v28, %v317_v25 }
  0x2e   : > { %2014 = vmatpush1.bf16.msra.mxu0 %v2013_v43  ;;  %v2153_v13 = vpack.c.bf16 %v1942_v59, %v1940_v58  ;;  %v2023_v29 = vpack.c.bf16 %v488_v14, %v486_v12  ;;  %v492_v37 = vld [vmem:[%s3852_s1 + $0x198] sm:$0xff]  ;;  %v1950_v41 = vld [vmem:[%s3852_s1 + $0x8b0] sm:$0xff]  ;;  %v1953_v43 = vld [vmem:[%s3852_s1 + $0x8c8] sm:$0xff] }
  0x2f   : > { %2016 = vmatprep.subr.bf16.mxu0 %v2015_v49  ;;  %v1955_v45 = vld [vmem:[%s3852_s1 + $0x8d8] sm:$0xff]  ;;  %v2027_v49 = vpack.c.bf16 %v492_v37, %v490_v35  ;;  %v489_v50 = vld [vmem:[%s3852_s1 + $0x180] sm:$0xff]  ;;  %v491_v47 = vld [vmem:[%s3852_s1 + $0x190] sm:$0xff] }
  0x30   : > { %2154 = vmatpush1.bf16.msra.mxu1 %v2153_v13  ;;  %v494_v52 = vld [vmem:[%s3852_s1 + $0x1a8] sm:$0xff]  ;;  %v496_v28 = vld [vmem:[%s3852_s1 + $0x1b8] sm:$0xff]  ;;  %v2163_v55 = vpack.c.bf16 %v1955_v45, %v1953_v43  ;;  %v1952_v56 = vld [vmem:[%s3852_s1 + $0x8c0] sm:$0xff]  ;;  %v2029_v61 = vpack.c.bf16 %v491_v47, %v489_v50 }
  0x31   : > { %377 = vrot.lane.b32.xlu0 %v334_v34, %s2456_s14  ;;  %389 = vrot.lane.b32.xlu1 %v348_v40, %s2456_s14  ;;  %v487_v34 = vld [vmem:[%s3852_s1 + $0x170] sm:$0xff]  ;;  %v1948_v40 = vld [vmem:[%s3852_s1 + $0x8a0] sm:$0xff]  ;;  %v2031_v63 = vpack.c.bf16 %v496_v28, %v494_v52 }
  0x32   : > { %2018 = vmatpush1.bf16.msra.mxu0 %v2017_v6  ;;  %2156 = vmatprep.subr.bf16.mxu1 %v2155_v15  ;;  %v2025_v48 = vpack.c.bf16 %v487_v34, %v485_v32  ;;  %v2161_v53 = vpack.c.bf16 %v1950_v41, %v1948_v40  ;;  %v1954_v58 = vld [vmem:[%s3852_s1 + $0x8d0] sm:$0xff]  ;;  %v1957_v59 = vld [vmem:[%s3852_s1 + $0x8e8] sm:$0xff]  ;;  %v493_v0 = vld [vmem:[%s3852_s1 + $0x1a0] sm:$0xff] }
  0x33   : > { %2020 = vmatprep.subr.bf16.mxu0 %v2019_v7  ;;  %v495_v1 = vld [vmem:[%s3852_s1 + $0x1b0] sm:$0xff]  ;;  %v498_v4 = vld [vmem:[%s3852_s1 + $0x1c8] sm:$0xff]  ;;  %v500_v6 = vld [vmem:[%s3852_s1 + $0x1d8] sm:$0xff] }
  0x34   : > { %2158 = vmatpush1.bf16.msra.mxu1 %v2157_v36  ;;  %v1956_v8 = vld [vmem:[%s3852_s1 + $0x8e0] sm:$0xff]  ;;  %v1958_v9 = vld [vmem:[%s3852_s1 + $0x8f0] sm:$0xff]  ;;  %v1769_v12 = vld [vmem:[%s3852_s1 + $0x308] sm:$0xff]  ;;  %v2033_v14 = vpack.c.bf16 %v495_v1, %v493_v0  ;;  %v2035_v15 = vpack.c.bf16 %v500_v6, %v498_v4 }
  0x35   : > { %385 = vrot.lane.b32.xlu0 %v344_v60, %s2456_s14  ;;  %2401 = vrot.lane.b32.xlu1 %v2400_v5, %s2456_s14  ;;  %v1959_v60 = vld [vmem:[%s3852_s1 + $0x8f8] sm:$0xff]  ;;  %v2165_v5 = vpack.c.bf16 %v1954_v58, %v1952_v56  ;;  %v497_v16 = vld [vmem:[%s3852_s1 + $0x1c0] sm:$0xff] }
  0x36   : > { %2022 = vmatpush1.bf16.msra.mxu0 %v2021_v27  ;;  %2160 = vmatprep.subr.bf16.mxu1 %v2159_v39  ;;  %v2167_v7 = vpack.c.bf16 %v1959_v60, %v1957_v59  ;;  %v1771_v13 = vld [vmem:[%s3852_s1 + $0x318] sm:$0xff]  ;;  %v499_v17 = vld [vmem:[%s3852_s1 + $0x1d0] sm:$0xff]  ;;  %v502_v21 = vld [vmem:[%s3852_s1 + $0x1e8] sm:$0xff] }
  0x37   : > { %2024 = vmatprep.subr.bf16.mxu0 %v2023_v29  ;;  %v504_v22 = vld [vmem:[%s3852_s1 + $0x1f8] sm:$0xff]  ;;  %v2171_v25 = vpack.c.bf16 %v1771_v13, %v1769_v12  ;;  %v2037_v27 = vpack.c.bf16 %v499_v17, %v497_v16  ;;  %v501_v32 = vld [vmem:[%s3852_s1 + $0x1e0] sm:$0xff]  ;;  %v503_v34 = vld [vmem:[%s3852_s1 + $0x1f0] sm:$0xff] }
  0x38   : > { %2162 = vmatpush1.bf16.msra.mxu1 %v2161_v53  ;;  %v2039_v29 = vpack.c.bf16 %v504_v22, %v502_v21  ;;  %v506_v35 = vld [vmem:[%s3852_s1 + $0x208] sm:$0xff]  ;;  %v508_v36 = vld [vmem:[%s3852_s1 + $0x218] sm:$0xff]  ;;  %v2041_v37 = vpack.c.bf16 %v503_v34, %v501_v32  ;;  %v505_v41 = vld [vmem:[%s3852_s1 + $0x200] sm:$0xff] }
  0x39   : > { %2396 = vrot.lane.b32.xlu0 %v2395_v18, %s2456_s14  ;;  %2164 = vmatprep.subr.bf16.mxu1 %v2163_v55  ;;  %v2169_v18 = vpack.c.bf16 %v1958_v9, %v1956_v8  ;;  %v2043_v39 = vpack.c.bf16 %v508_v36, %v506_v35  ;;  %v507_v43 = vld [vmem:[%s3852_s1 + $0x210] sm:$0xff]  ;;  %v512_v52 = vld [vmem:[%s3852_s1 + $0x238] sm:$0xff]  ;;  %v1773_v53 = vld [vmem:[%s3852_s1 + $0x328] sm:$0xff] }
  0x3a   : > { %2026 = vmatpush1.bf16.msra.mxu0 %v2025_v48  ;;  %v1770_v48 = vld [vmem:[%s3852_s1 + $0x310] sm:$0xff]  ;;  %v1775_v28 = vld [vmem:[%s3852_s1 + $0x338] sm:$0xff]  ;;  %v2045_v55 = vpack.c.bf16 %v507_v43, %v505_v41  ;;  %v509_v60 = vld [vmem:[%s3852_s1 + $0x220] sm:$0xff] }
  0x3b   : > { %2028 = vmatprep.subr.bf16.mxu0 %v2027_v49  ;;  %v510_v49 = vld [vmem:[%s3852_s1 + $0x228] sm:$0xff]  ;;  %v2175_v4 = vpack.c.bf16 %v1775_v28, %v1773_v53  ;;  %v1779_v12 = vld [vmem:[%s3852_s1 + $0x358] sm:$0xff]  ;;  %v515_v16 = vld [vmem:[%s3852_s1 + $0x250] sm:$0xff] }
  0x3c   : > { %2166 = vmatpush1.bf16.msra.mxu1 %v2165_v5  ;;  %v2047_v1 = vpack.c.bf16 %v512_v52, %v510_v49  ;;  %v1774_v5 = vld [vmem:[%s3852_s1 + $0x330] sm:$0xff]  ;;  %v514_v6 = vld [vmem:[%s3852_s1 + $0x248] sm:$0xff]  ;;  %v1776_v17 = vld [vmem:[%s3852_s1 + $0x340] sm:$0xff] }
  0x3d   : > { %365 = vrot.lane.b32.xlu0 %v318_v46, %s2456_s14  ;;  %2168 = vmatprep.subr.bf16.mxu1 %v2167_v7  ;;  %v1768_v46 = vld [vmem:[%s3852_s1 + $0x300] sm:$0xff]  ;;  %v516_v7 = vld [vmem:[%s3852_s1 + $0x258] sm:$0xff]  ;;  %v1777_v9 = vld [vmem:[%s3852_s1 + $0x348] sm:$0xff]  ;;  %s241_s14 = sadd.s32 %s1763_s26, %s3871_s15 }
  0x3e   : > { %2030 = vmatpush1.bf16.msra.mxu0 %v2029_v61  ;;  %v2173_v59 = vpack.c.bf16 %v1770_v48, %v1768_v46  ;;  %v511_v61 = vld [vmem:[%s3852_s1 + $0x230] sm:$0xff]  ;;  %v2179_v21 = vpack.c.bf16 %v1779_v12, %v1777_v9  ;;  %v1781_v34 = vld [vmem:[%s3852_s1 + $0x368] sm:$0xff]  ;;  %v1783_v35 = vld [vmem:[%s3852_s1 + $0x378] sm:$0xff]  ;;  %s1764_s27 = sshll.u32 %s241_s14, 1 }
  0x3f   : > { %2032 = vmatprep.subr.bf16.mxu0 %v2031_v63  ;;  %v1772_v63 = vld [vmem:[%s3852_s1 + $0x320] sm:$0xff]  ;;  %v2049_v13 = vpack.c.bf16 %v511_v61, %v509_v60  ;;  %v1778_v22 = vld [vmem:[%s3852_s1 + $0x350] sm:$0xff]  ;;  %v2183_v48 = vpack.c.bf16 %v1783_v35, %v1781_v34  ;;  %v522_v49 = vld [vmem:[%s3852_s1 + $0x288] sm:$0xff]  ;;  %s243_s29 = scalar_lea.vmem %s3855_s4, %s1764_s27 }
  0x40   : > { %2170 = vmatpush1.bf16.msra.mxu1 %v2169_v18  ;;  %v519_v41 = vld [vmem:[%s3852_s1 + $0x270] sm:$0xff]  ;;  %v1780_v43 = vld [vmem:[%s3852_s1 + $0x360] sm:$0xff]  ;;  %v524_v52 = vld [vmem:[%s3852_s1 + $0x298] sm:$0xff] }
  0x41   : > { %2172 = vmatprep.subr.bf16.mxu1 %v2171_v25  ;;  %v518_v25 = vld [vmem:[%s3852_s1 + $0x268] sm:$0xff]  ;;  %v2059_v61 = vpack.c.bf16 %v524_v52, %v522_v49  ;;  %v532_v34 = vld [vmem:[%s3852_s1 + $0x2d8] sm:$0xff]  ;;  %v1794_v49 = vld [vmem:[%s3852_s1 + $0x3d0] sm:$0xff] }
  0x42   : > { %2034 = vmatpush1.bf16.msra.mxu0 %v2033_v14  ;;  %v2051_v14 = vpack.c.bf16 %v516_v7, %v514_v6  ;;  %v1785_v28 = vld [vmem:[%s3852_s1 + $0x388] sm:$0xff]  ;;  %v528_v7 = vld [vmem:[%s3852_s1 + $0x2b8] sm:$0xff] }
  0x43   : > { %2036 = vmatprep.subr.bf16.mxu0 %v2035_v15  ;;  %v513_v15 = vld [vmem:[%s3852_s1 + $0x240] sm:$0xff]  ;;  %v526_v6 = vld [vmem:[%s3852_s1 + $0x2a8] sm:$0xff] }
  0x44   : > { %v1789_v12 = vld [vmem:[%s3852_s1 + $0x3a8] sm:$0xff] }
  0x46   : > { %2038 = vmatpush1.bf16.msra.mxu0 %v2037_v27  ;;  %v520_v27 = vld [vmem:[%s3852_s1 + $0x278] sm:$0xff] }
  0x47   : > { %2040 = vmatprep.subr.bf16.mxu0 %v2039_v29 }
  0x4a   : > { %2042 = vmatpush1.bf16.msra.mxu0 %v2041_v37  ;;  %v2055_v37 = vpack.c.bf16 %v520_v27, %v518_v25 }
  0x4b   : > { %2044 = vmatprep.subr.bf16.mxu0 %v2043_v39  ;;  %v517_v39 = vld [vmem:[%s3852_s1 + $0x260] sm:$0xff] }
  0x8b   : > { %v2968_v40 = vpop.permute.xlu1 %363 }
  0x8f   : > { %v2976_v45 = vpop.permute.xlu0 %2391  ;;  %v2988_v47 = vpop.permute.xlu1 %371 }
  0x90   : > { %v2393_v50 = vunpack.i.l.bf16 %v2976_v45  ;;  %v2394_v56 = vunpack.i.h.bf16 %v2976_v45  ;;  %v3082_v36 = vsel %vm399_vm1, %v2600_v38, %v2988_v47  ;;  %v1782_v38 = vld [vmem:[%s3852_s1 + $0x370] sm:$0xff] }
  0x92   : > { %v3004_v58 = vsel %vm399_vm1, %v2659_v10, %v2393_v50  ;;  %v3019_v10 = vsel %vm399_vm1, %v2662_v11, %v2968_v40  ;;  %v3067_v29 = vsel %vm399_vm1, %v2594_v33, %v2394_v56  ;;  %v2181_v33 = vpack.c.bf16 %v1778_v22, %v1776_v17  ;;  %v1790_v22 = vld [vmem:[%s3852_s1 + $0x3b0] sm:$0xff] }
  0x93   : > { %v370_v0 = vpop.permute.xlu0 %369  ;;  %612 = vmatprep.mubr.f32.mxu0 %v3004_v58  ;;  %v3034_v11 = vpop.permute.xlu1 %379  ;;  %v2063_v17 = vpack.c.bf16 %v528_v7, %v526_v6  ;;  %v1798_v6 = vld [vmem:[%s3852_s1 + $0x3f0] sm:$0xff] }
  0x94   : > { %613 = vmatmul.mubr.f32.vlgmr.msra.gmra.mrb[0].mxu0 %v2583_v26  ;;  %v3032_v8 = vsel %vm399_vm1, %v2394_v56, %v370_v0  ;;  %v2177_v26 = vpack.c.bf16 %v1774_v5, %v1772_v63  ;;  %v2057_v56 = vpack.c.bf16 %v519_v41, %v517_v39  ;;  %v521_v63 = vld [vmem:[%s3852_s1 + $0x280] sm:$0xff]  ;;  %v523_v0 = vld [vmem:[%s3852_s1 + $0x290] sm:$0xff] }
  0x95   : > { %2046 = vmatpush1.bf16.msra.mxu0 %v2045_v55  ;;  %1146 = vmatmul.mubr.f32.vlgmr.msra.gmra.mrb[0].mxu1 %v3032_v8  ;;  %v1787_v55 = vld [vmem:[%s3852_s1 + $0x398] sm:$0xff]  ;;  %v2061_v9 = vpack.c.bf16 %v523_v0, %v521_v63  ;;  %v529_v39 = vld [vmem:[%s3852_s1 + $0x2c0] sm:$0xff]  ;;  %v531_v41 = vld [vmem:[%s3852_s1 + $0x2d0] sm:$0xff] }
  0x96   : > { %2174 = vmatpush1.bf16.msra.mxu1 %v2173_v59  ;;  %618 = vmatprep.mubr.f32.mxu0 %v3019_v10  ;;  %v533_v0 = vld [vmem:[%s3852_s1 + $0x2e0] sm:$0xff] }
  0x97   : > { %v3053_v18 = vpop.permute.xlu0 %375  ;;  %2048 = vmatprep.subr.bf16.mxu0 %v2047_v1  ;;  %2176 = vmatprep.subr.bf16.mxu1 %v2175_v4  ;;  %v3069_v32 = vpop.permute.xlu1 %387  ;;  %v1786_v4 = vld [vmem:[%s3852_s1 + $0x390] sm:$0xff] }
  0x98   : > { %619 = vmatmul.mubr.f32.gmra.mrb[2].mxu0 %v2579_v24  ;;  %1151 = vmatprep.mubr.f32.mxu1 %v2455_v23  ;;  %v2053_v24 = vpack.c.bf16 %v515_v16, %v513_v15  ;;  %v3119_v60 = vsel %vm399_vm1, %v2675_v19, %v3053_v18  ;;  %v1784_v19 = vld [vmem:[%s3852_s1 + $0x380] sm:$0xff]  ;;  %v3160_v16 = vsel %vm399_vm1, %v2678_v20, %v3034_v11  ;;  %v530_v20 = vld [vmem:[%s3852_s1 + $0x2c8] sm:$0xff] }
  0x99   : > { %2050 = vmatpush1.bf16.msra.mxu0 %v2049_v13  ;;  %624 = vmatprep.mubr.f32.mxu0 %v3067_v29  ;;  %v2189_v13 = vpack.c.bf16 %v1786_v4, %v1784_v19  ;;  %v3241_v4 = vsel %vm399_vm1, %v2714_v44, %v3069_v32 }
  0x9a   : > { %2178 = vmatpush1.bf16.msra.mxu1 %v2177_v26  ;;  %2052 = vmatprep.subr.bf16.mxu0 %v2051_v14  ;;  %v525_v26 = vld [vmem:[%s3852_s1 + $0x2a0] sm:$0xff]  ;;  %v527_v14 = vld [vmem:[%s3852_s1 + $0x2b0] sm:$0xff] }
  0x9b   : > { %v3093_v46 = vpop.permute.xlu0 %383  ;;  %2180 = vmatprep.subr.bf16.mxu1 %v2179_v21  ;;  %v374_v53 = vpop.permute.xlu1 %373  ;;  %v1788_v21 = vld [vmem:[%s3852_s1 + $0x3a0] sm:$0xff] }
  0x9c   : > { %625 = vmatmul.mubr.f32.gmra.mrb[4].mxu0 %v2587_v30  ;;  %v3114_v59 = vsel %vm399_vm1, %v2988_v47, %v374_v53  ;;  %v2185_v30 = vpack.c.bf16 %v1782_v38, %v1780_v43  ;;  %v2187_v47 = vpack.c.bf16 %v1787_v55, %v1785_v28  ;;  %v1792_v38 = vld [vmem:[%s3852_s1 + $0x3c0] sm:$0xff]  ;;  %v534_v53 = vld [vmem:[%s3852_s1 + $0x2e8] sm:$0xff]  ;;  %v2069_v55 = vpack.c.bf16 %v531_v41, %v529_v39 }
  0x9d   : > { %2054 = vmatpush1.bf16.msra.mxu0 %v2053_v24  ;;  %630 = vmatprep.mubr.f32.mxu0 %v3082_v36  ;;  %v2065_v24 = vpack.c.bf16 %v527_v14, %v525_v26  ;;  %v2197_v63 = vpack.c.bf16 %v1794_v49, %v1792_v38  ;;  %v1868_v41 = vld [vmem:[%s3852_s1 + $0x620] sm:$0xff] }
  0x9e   : > { %2182 = vmatpush1.bf16.msra.mxu1 %v2181_v33  ;;  %2056 = vmatprep.subr.bf16.mxu0 %v2055_v37  ;;  %v2193_v37 = vpack.c.bf16 %v1790_v22, %v1788_v21  ;;  %v1866_v21 = vld [vmem:[%s3852_s1 + $0x610] sm:$0xff]  ;;  %v1804_v49 = vld [vmem:[%s3852_s1 + $0x420] sm:$0xff] }
  0x9f   : > { %v3127_v1 = vpop.permute.xlu0 %361  ;;  %2184 = vmatprep.subr.bf16.mxu1 %v2183_v48  ;;  %1152 = vmatmul.mubr.f32.gmra.mrb[2].mxu1 %v3114_v59  ;;  %v382_v5 = vpop.permute.xlu1 %381  ;;  %v3201_v48 = vsel %vm399_vm1, %v2729_v51, %v3093_v46  ;;  %v536_v51 = vld [vmem:[%s3852_s1 + $0x2f8] sm:$0xff] }
  0xa0   : > { %631 = vmatmul.mubr.f32.gmra.mrb[6].mxu0 %v2590_v31  ;;  %1157 = vmatprep.mubr.f32.mxu1 %v2455_v23  ;;  %v1791_v31 = vld [vmem:[%s3852_s1 + $0x3b8] sm:$0xff]  ;;  %v3189_v33 = vsel %vm399_vm1, %v3034_v11, %v382_v5  ;;  %v2067_v11 = vpack.c.bf16 %v532_v34, %v530_v20  ;;  %v1796_v5 = vld [vmem:[%s3852_s1 + $0x3e0] sm:$0xff]  ;;  %v1802_v20 = vld [vmem:[%s3852_s1 + $0x410] sm:$0xff] }
  0xa1   : > { %2058 = vmatpush1.bf16.msra.mxu0 %v2057_v56  ;;  %636 = vmatprep.mubr.f32.mxu0 %v3119_v60  ;;  %v2191_v27 = vpack.c.bf16 %v1791_v31, %v1789_v12  ;;  %v1799_v56 = vld [vmem:[%s3852_s1 + $0x3f8] sm:$0xff]  ;;  %v1865_v12 = vld [vmem:[%s3852_s1 + $0x608] sm:$0xff] }
  0xa2   : > { %2186 = vmatpush1.bf16.msra.mxu1 %v2185_v30  ;;  %2060 = vmatprep.subr.bf16.mxu0 %v2059_v61  ;;  %v1867_v31 = vld [vmem:[%s3852_s1 + $0x618] sm:$0xff] }
  0xa3   : > { %v378_v15 = vpop.permute.xlu0 %377  ;;  %2188 = vmatprep.subr.bf16.mxu1 %v2187_v47  ;;  %v390_v35 = vpop.permute.xlu1 %389  ;;  %v535_v47 = vld [vmem:[%s3852_s1 + $0x2f0] sm:$0xff] }
  0xa4   : > { %637 = vmatmul.mubr.f32.gmra.mrb[8].mxu0 %v2618_v54  ;;  %v3171_v25 = vsel %vm399_vm1, %v3053_v18, %v378_v15  ;;  %v1793_v54 = vld [vmem:[%s3852_s1 + $0x3c8] sm:$0xff]  ;;  %v1795_v18 = vld [vmem:[%s3852_s1 + $0x3d8] sm:$0xff]  ;;  %v3272_v14 = vsel %vm399_vm1, %v3069_v32, %v390_v35  ;;  %v2201_v15 = vpack.c.bf16 %v1798_v6, %v1796_v5  ;;  %v1800_v32 = vld [vmem:[%s3852_s1 + $0x400] sm:$0xff] }
  0xa5   : > { %2062 = vmatpush1.bf16.msra.mxu0 %v2061_v9  ;;  %1158 = vmatmul.mubr.f32.gmra.mrb[4].mxu1 %v3171_v25  ;;  %v2195_v52 = vpack.c.bf16 %v1795_v18, %v1793_v54  ;;  %v1871_v35 = vld [vmem:[%s3852_s1 + $0x638] sm:$0xff]  ;;  %v1805_v54 = vld [vmem:[%s3852_s1 + $0x428] sm:$0xff]  ;;  %v2205_v39 = vpack.c.bf16 %v1802_v20, %v1800_v32 }
  0xa6   : > { %2190 = vmatpush1.bf16.msra.mxu1 %v2189_v13  ;;  %642 = vmatprep.mubr.f32.mxu0 %v3160_v16  ;;  %v2073_v13 = vpack.c.bf16 %v535_v47, %v533_v0  ;;  %v1872_v0 = vld [vmem:[%s3852_s1 + $0x640] sm:$0xff]  ;;  %v1874_v47 = vld [vmem:[%s3852_s1 + $0x650] sm:$0xff]  ;;  %v1877_v5 = vld [vmem:[%s3852_s1 + $0x668] sm:$0xff] }
  0xa7   : > { %v386_v43 = vpop.permute.xlu0 %385  ;;  %2064 = vmatprep.subr.bf16.mxu0 %v2063_v17  ;;  %1163 = vmatprep.mubr.f32.mxu1 %v2455_v23  ;;  %v3216_v28 = vpop.permute.xlu1 %2401  ;;  %v1864_v17 = vld [vmem:[%s3852_s1 + $0x600] sm:$0xff]  ;;  %v1879_v6 = vld [vmem:[%s3852_s1 + $0x678] sm:$0xff] }
  0xa8   : > { %643 = vmatmul.mubr.f32.gmra.mrb[10].mxu0 %v2605_v42  ;;  %2192 = vmatprep.subr.bf16.mxu1 %v2191_v27  ;;  %v1797_v42 = vld [vmem:[%s3852_s1 + $0x3e8] sm:$0xff]  ;;  %v2403_v30 = vunpack.i.l.bf16 %v3216_v28  ;;  %v3229_v61 = vsel %vm399_vm1, %v3093_v46, %v386_v43  ;;  %v2071_v46 = vpack.c.bf16 %v536_v51, %v534_v53  ;;  %v2075_v27 = vpack.c.bf16 %v1867_v31, %v1865_v12  ;;  %v1870_v43 = vld [vmem:[%s3852_s1 + $0x630] sm:$0xff]  ;;  %v1819_v32 = vld [vmem:[%s3852_s1 + $0x498] sm:$0xff] }
  0xa9   : > { %2066 = vmatpush1.bf16.msra.mxu0 %v2065_v24  ;;  %1164 = vmatmul.mubr.f32.gmra.mrb[6].mxu1 %v3189_v33  ;;  %v2199_v44 = vpack.c.bf16 %v1799_v56, %v1797_v42  ;;  %v2077_v24 = vpack.c.bf16 %v1866_v21, %v1864_v17  ;;  %v2404_v18 = vunpack.i.h.bf16 %v3216_v28  ;;  %v2081_v51 = vpack.c.bf16 %v1870_v43, %v1868_v41  ;;  %v1811_v42 = vld [vmem:[%s3852_s1 + $0x458] sm:$0xff]  ;;  %v1881_v17 = vld [vmem:[%s3852_s1 + $0x688] sm:$0xff] }
  0xaa   : > { %2194 = vmatpush1.bf16.msra.mxu1 %v2193_v37  ;;  %648 = vmatprep.mubr.f32.mxu0 %v3201_v48  ;;  %v3253_v7 = vsel %vm399_vm1, %v2763_v3, %v2403_v30  ;;  %v1801_v3 = vld [vmem:[%s3852_s1 + $0x408] sm:$0xff]  ;;  %v2085_v12 = vpack.c.bf16 %v1874_v47, %v1872_v0  ;;  %v1883_v21 = vld [vmem:[%s3852_s1 + $0x698] sm:$0xff] }
  0xab   : > { %v2397_v19 = vpop.permute.xlu0 %2396  ;;  %2068 = vmatprep.subr.bf16.mxu0 %v2067_v11  ;;  %1169 = vmatprep.mubr.f32.mxu1 %v2455_v23  ;;  %v3318_v11 = vsel %vm399_vm1, %v2393_v50, %v3127_v1  ;;  %v1873_v50 = vld [vmem:[%s3852_s1 + $0x648] sm:$0xff]  ;;  %v1875_v1 = vld [vmem:[%s3852_s1 + $0x658] sm:$0xff]  ;;  %v409_v56 = vsel %vm399_vm1, %v2403_v30, %v2404_v18  ;;  %v1810_v30 = vld [vmem:[%s3852_s1 + $0x450] sm:$0xff] }
  0xac   : > { %v2398_v9 = vunpack.i.l.bf16 %v2397_v19  ;;  %649 = vmatmul.mubr.f32.gmra.mrb[12].mxu0 %v2642_v2  ;;  %2196 = vmatprep.subr.bf16.mxu1 %v2195_v52  ;;  %v1803_v2 = vld [vmem:[%s3852_s1 + $0x418] sm:$0xff]  ;;  %v2399_v26 = vunpack.i.h.bf16 %v2397_v19  ;;  %v1806_v52 = vld [vmem:[%s3852_s1 + $0x430] sm:$0xff]  ;;  %v1808_v19 = vld [vmem:[%s3852_s1 + $0x440] sm:$0xff]  ;;  %v2083_v28 = vpack.c.bf16 %v1875_v1, %v1873_v50 }
  0xad   : > { %2070 = vmatpush1.bf16.msra.mxu0 %v2069_v55  ;;  %1170 = vmatmul.mubr.f32.gmra.mrb[8].mxu1 %v3229_v61  ;;  %v2203_v34 = vpack.c.bf16 %v1803_v2, %v1801_v3  ;;  %v1809_v55 = vld [vmem:[%s3852_s1 + $0x448] sm:$0xff]  ;;  %v2213_v31 = vpack.c.bf16 %v1810_v30, %v1808_v19  ;;  %v1876_v3 = vld [vmem:[%s3852_s1 + $0x660] sm:$0xff]  ;;  %v1878_v2 = vld [vmem:[%s3852_s1 + $0x670] sm:$0xff] }
  0xae   : > { %2198 = vmatpush1.bf16.msra.mxu1 %v2197_v63  ;;  %654 = vmatprep.mubr.f32.mxu0 %v3241_v4  ;;  %v3282_v22 = vsel %vm399_vm1, %v2750_v62, %v2398_v9  ;;  %v1869_v62 = vld [vmem:[%s3852_s1 + $0x628] sm:$0xff]  ;;  %v408_v37 = vsel %vm399_vm1, %v2398_v9, %v2399_v26  ;;  %v2209_v63 = vpack.c.bf16 %v1806_v52, %v1804_v49  ;;  %v1812_v26 = vld [vmem:[%s3852_s1 + $0x460] sm:$0xff]  ;;  %v1818_v18 = vld [vmem:[%s3852_s1 + $0x490] sm:$0xff] }
  0xaf   : > { %2072 = vmatprep.subr.bf16.mxu0 %v2071_v46  ;;  %1175 = vmatprep.mubr.f32.mxu1 %v2455_v23  ;;  %v2079_v38 = vpack.c.bf16 %v1871_v35, %v1869_v62  ;;  %v366_v53 = vpop.permute.xlu0 %365  ;;  %v1813_v9 = vld [vmem:[%s3852_s1 + $0x468] sm:$0xff]  ;;  %v2089_v20 = vpack.c.bf16 %v1878_v2, %v1876_v3  ;;  %v2091_v62 = vpack.c.bf16 %v1883_v21, %v1881_v17  ;;  %v1880_v35 = vld [vmem:[%s3852_s1 + $0x680] sm:$0xff]  ;;  %v1823_v43 = vld [vmem:[%s3852_s1 + $0x4b8] sm:$0xff] }
  0xb0   : > { %655 = vmatmul.mubr.f32.gmra.mrb[14].mxu0 %v2627_v57  ;;  %2200 = vmatprep.subr.bf16.mxu1 %v2199_v44  ;;  %v1807_v57 = vld [vmem:[%s3852_s1 + $0x438] sm:$0xff]  ;;  %v3355_v46 = vsel %vm399_vm1, %v2968_v40, %v366_v53  ;;  %v2211_v40 = vpack.c.bf16 %v1811_v42, %v1809_v55  ;;  %v1821_v41 = vld [vmem:[%s3852_s1 + $0x4a8] sm:$0xff]  ;;  %v1884_v53 = vld [vmem:[%s3852_s1 + $0x6a0] sm:$0xff] }
  0xb1   : > { %2074 = vmatpush1.bf16.msra.mxu0 %v2073_v13  ;;  %1176 = vmatmul.mubr.f32.gmra.mrb[10].mxu1 %v3272_v14  ;;  %v2207_v45 = vpack.c.bf16 %v1807_v57, %v1805_v54  ;;  %v1815_v44 = vld [vmem:[%s3852_s1 + $0x478] sm:$0xff]  ;;  %v2087_v13 = vpack.c.bf16 %v1879_v6, %v1877_v5  ;;  %v1816_v54 = vld [vmem:[%s3852_s1 + $0x480] sm:$0xff]  ;;  %v2223_v1 = vpack.c.bf16 %v1823_v43, %v1821_v41  ;;  %v1889_v55 = vld [vmem:[%s3852_s1 + $0x6c8] sm:$0xff] }
  0xb2   : > { %2202 = vmatpush1.bf16.msra.mxu1 %v2201_v15  ;;  %725 = vmatprep.mubr.f32.mxu0 %v2455_v23  ;;  %v2215_v15 = vpack.c.bf16 %v1815_v44, %v1813_v9  ;;  %v2221_v49 = vpack.c.bf16 %v1818_v18, %v1816_v54  ;;  %v1820_v50 = vld [vmem:[%s3852_s1 + $0x4a0] sm:$0xff]  ;;  %v1891_v42 = vld [vmem:[%s3852_s1 + $0x6d8] sm:$0xff]  ;;  %v1890_v30 = vld [vmem:[%s3852_s1 + $0x6d0] sm:$0xff] }
  0xb3   : > { %2076 = vmatprep.subr.bf16.mxu0 %v2075_v27  ;;  %1181 = vmatprep.mubr.f32.mxu1 %v2455_v23  ;;  %v1817_v27 = vld [vmem:[%s3852_s1 + $0x488] sm:$0xff]  ;;  %v2099_v19 = vpack.c.bf16 %v1891_v42, %v1889_v55  ;;  %v1824_v5 = vld [vmem:[%s3852_s1 + $0x4c0] sm:$0xff]  ;;  %v1895_v44 = vld [vmem:[%s3852_s1 + $0x6f8] sm:$0xff] }
  0xb4   : > { %726 = vmatmul.mubr.f32.vlgmr.msra.gmra.mrb[0].mxu0 %v3318_v11  ;;  %2204 = vmatprep.subr.bf16.mxu1 %v2203_v34  ;;  %v2219_v57 = vpack.c.bf16 %v1819_v32, %v1817_v27  ;;  %v1893_v9 = vld [vmem:[%s3852_s1 + $0x6e8] sm:$0xff]  ;;  %v1830_v21 = vld [vmem:[%s3852_s1 + $0x4f0] sm:$0xff]  ;;  %v1899_v32 = vld [vmem:[%s3852_s1 + $0x718] sm:$0xff] }
  0xb5   : > { %2078 = vmatpush1.bf16.msra.mxu0 %v2077_v24  ;;  %1182 = vmatmul.mubr.f32.gmra.mrb[12].mxu1 %v408_v37  ;;  %v1882_v24 = vld [vmem:[%s3852_s1 + $0x690] sm:$0xff]  ;;  %v1885_v37 = vld [vmem:[%s3852_s1 + $0x6a8] sm:$0xff]  ;;  %v2103_v2 = vpack.c.bf16 %v1895_v44, %v1893_v9  ;;  %v1896_v54 = vld [vmem:[%s3852_s1 + $0x700] sm:$0xff] }
  0xb6   : > { %2206 = vmatpush1.bf16.msra.mxu1 %v2205_v39  ;;  %731 = vmatprep.mubr.f32.mxu0 %v2455_v23  ;;  %v1887_v39 = vld [vmem:[%s3852_s1 + $0x6b8] sm:$0xff]  ;;  %v1897_v27 = vld [vmem:[%s3852_s1 + $0x708] sm:$0xff]  ;;  %v1836_v55 = vld [vmem:[%s3852_s1 + $0x520] sm:$0xff] }
  0xb7   : > { %2080 = vmatprep.subr.bf16.mxu0 %v2079_v38  ;;  %1187 = vmatprep.mubr.f32.mxu1 %v2455_v23  ;;  %v2093_v38 = vpack.c.bf16 %v1882_v24, %v1880_v35  ;;  %v2095_v52 = vpack.c.bf16 %v1887_v39, %v1885_v37  ;;  %v2107_v24 = vpack.c.bf16 %v1899_v32, %v1897_v27  ;;  %v1832_v37 = vld [vmem:[%s3852_s1 + $0x500] sm:$0xff]  ;;  %v1834_v39 = vld [vmem:[%s3852_s1 + $0x510] sm:$0xff]  ;;  %v1901_v41 = vld [vmem:[%s3852_s1 + $0x728] sm:$0xff] }
  0xb8   : > { %732 = vmatmul.mubr.f32.gmra.mrb[2].mxu0 %v3355_v46  ;;  %2208 = vmatprep.subr.bf16.mxu1 %v2207_v45  ;;  %v1886_v45 = vld [vmem:[%s3852_s1 + $0x6b0] sm:$0xff]  ;;  %v1903_v43 = vld [vmem:[%s3852_s1 + $0x738] sm:$0xff]  ;;  %v1840_v44 = vld [vmem:[%s3852_s1 + $0x540] sm:$0xff] }
  0xb9   : > { %2082 = vmatpush1.bf16.msra.mxu0 %v2081_v51  ;;  %1188 = vmatmul.mubr.f32.gmra.mrb[14].mxu1 %v409_v56  ;;  %v1822_v51 = vld [vmem:[%s3852_s1 + $0x4b0] sm:$0xff]  ;;  %v1825_v56 = vld [vmem:[%s3852_s1 + $0x4c8] sm:$0xff]  ;;  %v2097_v0 = vpack.c.bf16 %v1886_v45, %v1884_v53  ;;  %v2237_v53 = vpack.c.bf16 %v1834_v39, %v1832_v37  ;;  %v1900_v45 = vld [vmem:[%s3852_s1 + $0x720] sm:$0xff] }
  0xba   : > { %2210 = vmatpush1.bf16.msra.mxu1 %v2209_v63  ;;  %1258 = vmatprep.mubr.f32.mxu1 %v3004_v58  ;;  %v1814_v58 = vld [vmem:[%s3852_s1 + $0x470] sm:$0xff]  ;;  %v1827_v63 = vld [vmem:[%s3852_s1 + $0x4d8] sm:$0xff]  ;;  %v2225_v47 = vpack.c.bf16 %v1822_v51, %v1820_v50  ;;  %v1844_v32 = vld [vmem:[%s3852_s1 + $0x560] sm:$0xff] }
  0xbb   : > { %737 = vmatprep.mubr.f32.mxu0 %v2455_v23  ;;  %2084 = vmatprep.subr.bf16.mxu0 %v2083_v28  ;;  %v2217_v34 = vpack.c.bf16 %v1814_v58, %v1812_v26  ;;  %v1888_v28 = vld [vmem:[%s3852_s1 + $0x6c0] sm:$0xff]  ;;  %v2227_v6 = vpack.c.bf16 %v1827_v63, %v1825_v56  ;;  %v1902_v50 = vld [vmem:[%s3852_s1 + $0x730] sm:$0xff]  ;;  %v1905_v56 = vld [vmem:[%s3852_s1 + $0x748] sm:$0xff] }
  0xbc   : > { %738 = vmatmul.mubr.f32.gmra.mrb[4].mxu0 %v3032_v8  ;;  %2212 = vmatprep.subr.bf16.mxu1 %v2211_v40  ;;  %v1826_v40 = vld [vmem:[%s3852_s1 + $0x4d0] sm:$0xff]  ;;  %v1892_v26 = vld [vmem:[%s3852_s1 + $0x6e0] sm:$0xff]  ;;  %v1907_v63 = vld [vmem:[%s3852_s1 + $0x758] sm:$0xff] }
  0xbd   : > { %2086 = vmatpush1.bf16.msra.mxu0 %v2085_v12  ;;  %743 = vmatprep.mubr.f32.mxu0 %v2455_v23  ;;  %v1829_v12 = vld [vmem:[%s3852_s1 + $0x4e8] sm:$0xff]  ;;  %v2229_v3 = vpack.c.bf16 %v1826_v40, %v1824_v5  ;;  %v1828_v58 = vld [vmem:[%s3852_s1 + $0x4e0] sm:$0xff]  ;;  %v1838_v42 = vld [vmem:[%s3852_s1 + $0x530] sm:$0xff]  ;;  %v2115_v40 = vpack.c.bf16 %v1907_v63, %v1905_v56 }
  0xbe   : > { %2214 = vmatpush1.bf16.msra.mxu1 %v2213_v31  ;;  %2088 = vmatprep.subr.bf16.mxu0 %v2087_v13  ;;  %v1831_v31 = vld [vmem:[%s3852_s1 + $0x4f8] sm:$0xff]  ;;  %v2101_v13 = vpack.c.bf16 %v1890_v30, %v1888_v28  ;;  %v2233_v35 = vpack.c.bf16 %v1830_v21, %v1828_v58  ;;  %v2113_v28 = vpack.c.bf16 %v1902_v50, %v1900_v45  ;;  %v1904_v5 = vld [vmem:[%s3852_s1 + $0x740] sm:$0xff]  ;;  %v1914_v37 = vld [vmem:[%s3852_s1 + $0x790] sm:$0xff] }
  0xbf   : > { %2216 = vmatprep.subr.bf16.mxu1 %v2215_v15  ;;  %v1894_v15 = vld [vmem:[%s3852_s1 + $0x6f0] sm:$0xff]  ;;  %v2231_v17 = vpack.c.bf16 %v1831_v31, %v1829_v12  ;;  %v2241_v30 = vpack.c.bf16 %v1838_v42, %v1836_v55  ;;  %v1909_v12 = vld [vmem:[%s3852_s1 + $0x768] sm:$0xff]  ;;  %v1911_v31 = vld [vmem:[%s3852_s1 + $0x778] sm:$0xff] }
  0xc0   : > { %744 = vmatmul.mubr.f32.gmra.mrb[6].mxu0 %v3114_v59  ;;  %v1908_v58 = vld [vmem:[%s3852_s1 + $0x760] sm:$0xff]  ;;  %v2119_v21 = vpack.c.bf16 %v1911_v31, %v1909_v12  ;;  %v1855_v45 = vld [vmem:[%s3852_s1 + $0x5b8] sm:$0xff]  ;;  %v1918_v42 = vld [vmem:[%s3852_s1 + $0x7b0] sm:$0xff] }
  0xc1   : > { %2090 = vmatpush1.bf16.msra.mxu0 %v2089_v20  ;;  %749 = vmatprep.mubr.f32.mxu0 %v2455_v23  ;;  %v1833_v20 = vld [vmem:[%s3852_s1 + $0x508] sm:$0xff]  ;;  %v3638_v50 = vld [vmem:[%s2566_s12 + $0x40] sm:$0xff] }
  0xc2   : > { %2218 = vmatpush1.bf16.msra.mxu1 %v2217_v34  ;;  %2092 = vmatprep.subr.bf16.mxu0 %v2091_v62  ;;  %v1835_v34 = vld [vmem:[%s3852_s1 + $0x518] sm:$0xff]  ;;  %v2105_v62 = vpack.c.bf16 %v1894_v15, %v1892_v26  ;;  %v1916_v55 = vld [vmem:[%s3852_s1 + $0x7a0] sm:$0xff] }
  0xc3   : > { %2220 = vmatprep.subr.bf16.mxu1 %v2219_v57  ;;  %v1898_v57 = vld [vmem:[%s3852_s1 + $0x710] sm:$0xff]  ;;  %v2235_v18 = vpack.c.bf16 %v1835_v34, %v1833_v20  ;;  %v1913_v20 = vld [vmem:[%s3852_s1 + $0x788] sm:$0xff]  ;;  %v1915_v34 = vld [vmem:[%s3852_s1 + $0x798] sm:$0xff] }
  0xc4   : > { %750 = vmatmul.mubr.f32.gmra.mrb[8].mxu0 %v3171_v25  ;;  %v2123_v39 = vpack.c.bf16 %v1915_v34, %v1913_v20 }
  0xc5   : > { %2094 = vmatpush1.bf16.msra.mxu0 %v2093_v38  ;;  %755 = vmatprep.mubr.f32.mxu0 %v2455_v23  ;;  %v1837_v38 = vld [vmem:[%s3852_s1 + $0x528] sm:$0xff] }
  0xc6   : > { %2222 = vmatpush1.bf16.msra.mxu1 %v2221_v49  ;;  %2096 = vmatprep.subr.bf16.mxu0 %v2095_v52  ;;  %v1839_v49 = vld [vmem:[%s3852_s1 + $0x538] sm:$0xff]  ;;  %v2109_v52 = vpack.c.bf16 %v1898_v57, %v1896_v54 }
  0xc7   : > { %2224 = vmatprep.subr.bf16.mxu1 %v2223_v1  ;;  %v2111_v1 = vpack.c.bf16 %v1903_v43, %v1901_v41  ;;  %v2239_v51 = vpack.c.bf16 %v1839_v49, %v1837_v38  ;;  %v1848_v43 = vld [vmem:[%s3852_s1 + $0x580] sm:$0xff]  ;;  %v1850_v38 = vld [vmem:[%s3852_s1 + $0x590] sm:$0xff]  ;;  %v1917_v49 = vld [vmem:[%s3852_s1 + $0x7a8] sm:$0xff] }
  0xc8   : > { %756 = vmatmul.mubr.f32.gmra.mrb[10].mxu0 %v3189_v33 }
  0xc9   : > { %2098 = vmatpush1.bf16.msra.mxu0 %v2097_v0  ;;  %761 = vmatprep.mubr.f32.mxu0 %v2455_v23  ;;  %v1841_v0 = vld [vmem:[%s3852_s1 + $0x548] sm:$0xff] }
  0xca   : > { %2226 = vmatpush1.bf16.msra.mxu1 %v2225_v47  ;;  %2100 = vmatprep.subr.bf16.mxu0 %v2099_v19  ;;  %v1843_v47 = vld [vmem:[%s3852_s1 + $0x558] sm:$0xff]  ;;  %v2405_v19 = vld [vmem:[%s2566_s12] sm:$0xff] }
  0xcb   : > { %2228 = vmatprep.subr.bf16.mxu1 %v2227_v6  ;;  %v1906_v6 = vld [vmem:[%s3852_s1 + $0x750] sm:$0xff]  ;;  %v2243_v9 = vpack.c.bf16 %v1843_v47, %v1841_v0  ;;  %v1852_v0 = vld [vmem:[%s3852_s1 + $0x5a0] sm:$0xff] }
  0xcc   : > { %762 = vmatmul.mubr.f32.gmra.mrb[12].mxu0 %v3229_v61  ;;  %v2117_v26 = vpack.c.bf16 %v1906_v6, %v1904_v5  ;;  %v1854_v47 = vld [vmem:[%s3852_s1 + $0x5b0] sm:$0xff]  ;;  %v1859_v5 = vld [vmem:[%s3852_s1 + $0x5d8] sm:$0xff]  ;;  %v2409_v6 = vld [vmem:[%s2566_s12 + $0x60] sm:$0xff] }
  0xcd   : > { %2102 = vmatpush1.bf16.msra.mxu0 %v2101_v13  ;;  %767 = vmatprep.mubr.f32.mxu0 %v2455_v23  ;;  %v1845_v13 = vld [vmem:[%s3852_s1 + $0x568] sm:$0xff] }
  0xce   : > { %2230 = vmatpush1.bf16.msra.mxu1 %v2229_v3  ;;  %2104 = vmatprep.subr.bf16.mxu0 %v2103_v2  ;;  %v1847_v3 = vld [vmem:[%s3852_s1 + $0x578] sm:$0xff]  ;;  %v2406_v2 = vld [vmem:[%s2566_s12 + $0x10] sm:$0xff] }
  0xcf   : > { %2232 = vmatprep.subr.bf16.mxu1 %v2231_v17  ;;  %v1910_v17 = vld [vmem:[%s3852_s1 + $0x770] sm:$0xff]  ;;  %v2247_v27 = vpack.c.bf16 %v1847_v3, %v1845_v13  ;;  %v1856_v13 = vld [vmem:[%s3852_s1 + $0x5c0] sm:$0xff] }
  0xd0   : > { %768 = vmatmul.mubr.f32.gmra.mrb[14].mxu0 %v3272_v14  ;;  %v2121_v54 = vpack.c.bf16 %v1910_v17, %v1908_v58  ;;  %v1858_v3 = vld [vmem:[%s3852_s1 + $0x5d0] sm:$0xff]  ;;  %v1863_v58 = vld [vmem:[%s3852_s1 + $0x5f8] sm:$0xff] }
  0xd1   : > { %2106 = vmatpush1.bf16.msra.mxu0 %v2105_v62  ;;  %1032 = vmatprep.mubr.f32.mxu0 %v3067_v29  ;;  %v1849_v62 = vld [vmem:[%s3852_s1 + $0x588] sm:$0xff]  ;;  %v2410_v17 = vld [vmem:[%s2566_s12 + $0x70] sm:$0xff] }
  0xd2   : > { %2234 = vmatpush1.bf16.msra.mxu1 %v2233_v35  ;;  %2108 = vmatprep.subr.bf16.mxu0 %v2107_v24  ;;  %v1851_v35 = vld [vmem:[%s3852_s1 + $0x598] sm:$0xff]  ;;  %v3609_v24 = vld [vmem:[%s2566_s12 + $0x30] sm:$0xff] }
  0xd3   : > { %2236 = vmatprep.subr.bf16.mxu1 %v2235_v18  ;;  %v1912_v18 = vld [vmem:[%s3852_s1 + $0x780] sm:$0xff]  ;;  %v2251_v41 = vpack.c.bf16 %v1851_v35, %v1849_v62  ;;  %v1862_v35 = vld [vmem:[%s3852_s1 + $0x5f0] sm:$0xff] }
  0xd4   : > { %v1860_v62 = vld [vmem:[%s3852_s1 + $0x5e0] sm:$0xff] }
  0xd5   : > { %2110 = vmatpush1.bf16.msra.mxu0 %v2109_v52  ;;  %1259 = vmatmul.mubr.f32.vlgmr.msra.gmra.mrb[0].mxu1 %v2405_v19  ;;  %v1919_v52 = vld [vmem:[%s3852_s1 + $0x7b8] sm:$0xff]  ;;  %v1921_v19 = vld [vmem:[%s3852_s1 + $0x7c8] sm:$0xff] }
  0xd6   : > { %1264 = vmatprep.mubr.f32.mxu1 %v3019_v10  ;;  %2238 = vmatpush1.bf16.msra.mxu1 %v2237_v53  ;;  %v1842_v10 = vld [vmem:[%s3852_s1 + $0x550] sm:$0xff]  ;;  %v1853_v53 = vld [vmem:[%s3852_s1 + $0x5a8] sm:$0xff]  ;;  %v2127_v56 = vpack.c.bf16 %v1919_v52, %v1917_v49 }
  0xd7   : > { %2112 = vmatprep.subr.bf16.mxu0 %v2111_v1  ;;  %2240 = vmatprep.subr.bf16.mxu1 %v2239_v51  ;;  %v2245_v15 = vpack.c.bf16 %v1842_v10, %v1840_v44  ;;  %v2125_v1 = vpack.c.bf16 %v1914_v37, %v1912_v18  ;;  %v2253_v51 = vpack.c.bf16 %v1850_v38, %v1848_v43  ;;  %v1920_v44 = vld [vmem:[%s3852_s1 + $0x7c0] sm:$0xff]  ;;  %v1922_v10 = vld [vmem:[%s3852_s1 + $0x7d0] sm:$0xff] }
  0xd8   : > { %v2255_v63 = vpack.c.bf16 %v1855_v45, %v1853_v53  ;;  %v2265_v18 = vpack.c.bf16 %v1862_v35, %v1860_v62  ;;  %v2412_v37 = vld [vmem:[%s2566_s12 + $0xa0] sm:$0xff] }
  0xd9   : > { %2114 = vmatpush1.bf16.msra.mxu0 %v2113_v28  ;;  %1265 = vmatmul.mubr.f32.gmra.mrb[2].mxu1 %v2406_v2  ;;  %v1923_v28 = vld [vmem:[%s3852_s1 + $0x7d8] sm:$0xff]  ;;  %v1925_v2 = vld [vmem:[%s3852_s1 + $0x7e8] sm:$0xff] }
  0xda   : > { %1270 = vmatprep.mubr.f32.mxu1 %v3067_v29  ;;  %2242 = vmatpush1.bf16.msra.mxu1 %v2241_v30  ;;  %v1846_v29 = vld [vmem:[%s3852_s1 + $0x570] sm:$0xff]  ;;  %v1857_v30 = vld [vmem:[%s3852_s1 + $0x5c8] sm:$0xff]  ;;  %v2131_v12 = vpack.c.bf16 %v1923_v28, %v1921_v19 }
  0xdb   : > { %2116 = vmatprep.subr.bf16.mxu0 %v2115_v40  ;;  %2244 = vmatprep.subr.bf16.mxu1 %v2243_v9  ;;  %v2249_v57 = vpack.c.bf16 %v1846_v29, %v1844_v32  ;;  %v2129_v40 = vpack.c.bf16 %v1918_v42, %v1916_v55  ;;  %v2257_v9 = vpack.c.bf16 %v1854_v47, %v1852_v0  ;;  %v1924_v32 = vld [vmem:[%s3852_s1 + $0x7e0] sm:$0xff]  ;;  %v1926_v29 = vld [vmem:[%s3852_s1 + $0x7f0] sm:$0xff] }
  0xdc   : > { %v2259_v31 = vpack.c.bf16 %v1859_v5, %v1857_v30 }
  0xdd   : > { %2118 = vmatpush1.bf16.msra.mxu0 %v2117_v26  ;;  %1271 = vmatmul.mubr.f32.gmra.mrb[4].mxu1 %v3609_v24  ;;  %v1927_v26 = vld [vmem:[%s3852_s1 + $0x7f8] sm:$0xff] }
  0xde   : > { %1276 = vmatprep.mubr.f32.mxu1 %v3082_v36  ;;  %2246 = vmatpush1.bf16.msra.mxu1 %v2245_v15  ;;  %v1861_v15 = vld [vmem:[%s3852_s1 + $0x5e8] sm:$0xff]  ;;  %v2135_v20 = vpack.c.bf16 %v1927_v26, %v1925_v2 }
  0xdf   : > { %2120 = vmatprep.subr.bf16.mxu0 %v2119_v21  ;;  %2248 = vmatprep.subr.bf16.mxu1 %v2247_v27  ;;  %v2133_v21 = vpack.c.bf16 %v1922_v10, %v1920_v44  ;;  %v2261_v27 = vpack.c.bf16 %v1858_v3, %v1856_v13  ;;  %v2263_v34 = vpack.c.bf16 %v1863_v58, %v1861_v15 }
  0xe1   : > { %2122 = vmatpush1.bf16.msra.mxu0 %v2121_v54  ;;  %1277 = vmatmul.mubr.f32.gmra.mrb[6].mxu1 %v3638_v50  ;;  %v2411_v54 = vld [vmem:[%s2566_s12 + $0x90] sm:$0xff] }
  0xe2   : > { %1282 = vmatprep.mubr.f32.mxu1 %v3119_v60  ;;  %2250 = vmatpush1.bf16.msra.mxu1 %v2249_v57  ;;  %v2137_v57 = vpack.c.bf16 %v1926_v29, %v1924_v32 }
  0xe3   : > { %2124 = vmatprep.subr.bf16.mxu0 %v2123_v39  ;;  %2252 = vmatprep.subr.bf16.mxu1 %v2251_v41 }
  0xe5   : > { %2126 = vmatpush1.bf16.msra.mxu0 %v2125_v1  ;;  %1283 = vmatmul.mubr.f32.gmra.mrb[8].mxu1 %v2409_v6 }
  0xe6   : > { %1288 = vmatprep.mubr.f32.mxu1 %v3160_v16  ;;  %2254 = vmatpush1.bf16.msra.mxu1 %v2253_v51 }
  0xe7   : > { %2128 = vmatprep.subr.bf16.mxu0 %v2127_v56  ;;  %2256 = vmatprep.subr.bf16.mxu1 %v2255_v63 }
  0xe9   : > { %2130 = vmatpush1.bf16.msra.mxu0 %v2129_v40  ;;  %1289 = vmatmul.mubr.f32.gmra.mrb[10].mxu1 %v2410_v17 }
  0xea   : > { %1294 = vmatprep.mubr.f32.mxu1 %v3201_v48  ;;  %2258 = vmatpush1.bf16.msra.mxu1 %v2257_v9 }
  0xeb   : > { %2132 = vmatprep.subr.bf16.mxu0 %v2131_v12  ;;  %2260 = vmatprep.subr.bf16.mxu1 %v2259_v31 }
  0xed   : > { %2134 = vmatpush1.bf16.msra.mxu0 %v2133_v21  ;;  %1295 = vmatmul.mubr.f32.gmra.mrb[12].mxu1 %v2411_v54 }
  0xee   : > { %1300 = vmatprep.mubr.f32.mxu1 %v3241_v4  ;;  %2262 = vmatpush1.bf16.msra.mxu1 %v2261_v27 }
  0xef   : > { %2136 = vmatprep.subr.bf16.mxu0 %v2135_v20  ;;  %2264 = vmatprep.subr.bf16.mxu1 %v2263_v34 }
  0xf1   : > { %2138 = vmatpush1.bf16.msra.mxu0 %v2137_v57  ;;  %1301 = vmatmul.mubr.f32.gmra.mrb[14].mxu1 %v2412_v37 }
  0xf2   : > { %2266 = vmatpush1.bf16.msra.mxu1 %v2265_v18  ;;  %1371 = vmatprep.mubr.f32.mxu1 %v2455_v23 }
  0xf4   : > { %1033 = vmatmul.mubr.f32.vlgmr.msra.gmra.mrb[16].mxu0 %v3609_v24 }
  0xf5   : > { %1038 = vmatprep.mubr.f32.mxu0 %v3082_v36  ;;  %1372 = vmatmul.mubr.f32.vlgmr.msra.gmra.mrb[0].mxu1 %v3318_v11  ;;  %v2414_v36 = vld [vmem:[%s2566_s12 + $0xd0] sm:$0xff] }
  0xf6   : > { %1377 = vmatprep.mubr.f32.mxu1 %v2455_v23 }
  0xf8   : > { %1039 = vmatmul.mubr.f32.gmra.mrb[18].mxu0 %v3638_v50 }
  0xf9   : > { %1044 = vmatprep.mubr.f32.mxu0 %v3119_v60  ;;  %1378 = vmatmul.mubr.f32.gmra.mrb[2].mxu1 %v3355_v46 }
  0xfa   : > { %1383 = vmatprep.mubr.f32.mxu1 %v2455_v23 }
  0xfc   : > { %1045 = vmatmul.mubr.f32.gmra.mrb[20].mxu0 %v2409_v6 }
  0xfd   : > { %1050 = vmatprep.mubr.f32.mxu0 %v3160_v16  ;;  %1384 = vmatmul.mubr.f32.gmra.mrb[4].mxu1 %v3032_v8  ;;  %v2413_v8 = vld [vmem:[%s2566_s12 + $0xc0] sm:$0xff] }
  0xfe   : > { %1389 = vmatprep.mubr.f32.mxu1 %v2455_v23 }
 0x100   : > { %1051 = vmatmul.mubr.f32.gmra.mrb[22].mxu0 %v2410_v17 }
 0x101   : > { %1056 = vmatprep.mubr.f32.mxu0 %v3201_v48  ;;  %1390 = vmatmul.mubr.f32.gmra.mrb[6].mxu1 %v3114_v59  ;;  %v538_v59 = vlaneseq }
 0x102   : > { %1395 = vmatprep.mubr.f32.mxu1 %v2455_v23 }
 0x103   : > { %v539_v60 = vshrl.u32 %v538_v59, 7 }
 0x104   : > { %1057 = vmatmul.mubr.f32.gmra.mrb[24].mxu0 %v2411_v54 }
 0x105   : > { %1062 = vmatprep.mubr.f32.mxu0 %v3241_v4  ;;  %1396 = vmatmul.mubr.f32.gmra.mrb[8].mxu1 %v3171_v25  ;;  %v540_v16 = vsub.s32 0, %v539_v60  ;;  %v440_v25 = vld [vmem:[%s3853_s2] sm:$0x3] }
 0x106   : > { %1401 = vmatprep.mubr.f32.mxu1 %v2455_v23 }
 0x108   : > { %1063 = vmatmul.mubr.f32.gmra.mrb[26].mxu0 %v2412_v37 }
 0x109   : > { %1068 = vmatprep.mubr.f32.mxu0 %v3282_v22  ;;  %1402 = vmatmul.mubr.f32.gmra.mrb[10].mxu1 %v3189_v33  ;;  %v544_v33 = vsub.s32 1, %v539_v60 }
 0x10a   : > { %1407 = vmatprep.mubr.f32.mxu1 %v2455_v23 }
 0x10b   : > { %v3743_v48 = vrot.slane %v440_v25, %v544_v33 }
 0x10c   : > { %1069 = vmatmul.mubr.f32.gmra.mrb[28].mxu0 %v2413_v8 }
 0x10d   : > { %1074 = vmatprep.mubr.f32.mxu0 %v3253_v7  ;;  %1408 = vmatmul.mubr.f32.gmra.mrb[12].mxu1 %v3229_v61 }
 0x10e   : > { %1413 = vmatprep.mubr.f32.mxu1 %v2455_v23  ;;  %v3741_v23 = vrot.slane %v440_v25, %v540_v16 }
 0x110   : > { %1075 = vmatmul.mubr.f32.gmra.mrb[30].mxu0 %v2414_v36 }
 0x111   : > { %1414 = vmatmul.mubr.f32.gmra.mrb[14].mxu1 %v3272_v14 }
 0x187   : > { %v727_v61 = vpop.f32.mrb[0].mxu0 }
 0x188   : > { %v2267_v4 = vadd.f32 %v727_v61, %v3741_v23  ;;  %v729_v7 = vpop.f32.mrb[1].mxu0 }
 0x189   : > { %v2268_v14 = vadd.f32 %v729_v7, %v3743_v48 }
 0x18a   : > { %1436 = vst [vmem:[%s3748_s25] sm:$0xff] %v2267_v4  ;;  %v1523_v39 = vmul.f32 %v2267_v4, %v2267_v4 }
 0x18b   : > { %1437 = vst [vmem:[%s3748_s25 + $0x8] sm:$0xff] %v2268_v14  ;;  %v733_v22 = vpop.f32.mrb[2].mxu0  ;;  %v1524_v38 = vmul.f32 %v2268_v14, %v2268_v14 }
 0x18c   : > { %v2269_v11 = vadd.f32 %v733_v22, %v3741_v23  ;;  %v735_v46 = vpop.f32.mrb[3].mxu0 }
 0x18d   : > { %v2270_v24 = vadd.f32 %v735_v46, %v3743_v48 }
 0x18e   : > { %1438 = vst [vmem:[%s3748_s25 + $0x10] sm:$0xff] %v2269_v11  ;;  %v1469_v41 = vadd.f32 %v2269_v11, %v2267_v4  ;;  %v1525_v43 = vmul.f32 %v2269_v11, %v2269_v11 }
 0x18f   : > { %1439 = vst [vmem:[%s3748_s25 + $0x18] sm:$0xff] %v2270_v24  ;;  %v1482_v49 = vadd.f32 %v2270_v24, %v2268_v14  ;;  %v1526_v52 = vmul.f32 %v2270_v24, %v2270_v24  ;;  %v739_v53 = vpop.f32.mrb[4].mxu0 }
 0x190   : > { %v1539_v45 = vadd.f32 %v1525_v43, %v1523_v39  ;;  %v2271_v50 = vadd.f32 %v739_v53, %v3741_v23  ;;  %v741_v1 = vpop.f32.mrb[5].mxu0 }
 0x191   : > { %v1552_v51 = vadd.f32 %v1526_v52, %v1524_v38  ;;  %v2272_v55 = vadd.f32 %v741_v1, %v3743_v48 }
 0x192   : > { %1440 = vst [vmem:[%s3748_s25 + $0x40] sm:$0xff] %v2271_v50  ;;  %v1470_v42 = vadd.f32 %v2271_v50, %v1469_v41  ;;  %v1527_v56 = vmul.f32 %v2271_v50, %v2271_v50 }
 0x193   : > { %1441 = vst [vmem:[%s3748_s25 + $0x48] sm:$0xff] %v2272_v55  ;;  %v1483_v63 = vadd.f32 %v2272_v55, %v1482_v49  ;;  %v1528_v0 = vmul.f32 %v2272_v55, %v2272_v55  ;;  %v745_v47 = vpop.f32.mrb[6].mxu0 }
 0x194   : > { %v1540_v19 = vadd.f32 %v1539_v45, %v1527_v56  ;;  %v2273_v28 = vadd.f32 %v745_v47, %v3741_v23  ;;  %v747_v30 = vpop.f32.mrb[7].mxu0 }
 0x195   : > { %v1553_v5 = vadd.f32 %v1552_v51, %v1528_v0  ;;  %v2274_v6 = vadd.f32 %v747_v30, %v3743_v48 }
 0x196   : > { %1442 = vst [vmem:[%s3748_s25 + $0x50] sm:$0xff] %v2273_v28  ;;  %v1471_v40 = vadd.f32 %v2273_v28, %v1470_v42  ;;  %v1529_v9 = vmul.f32 %v2273_v28, %v2273_v28 }
 0x197   : > { %1443 = vst [vmem:[%s3748_s25 + $0x58] sm:$0xff] %v2274_v6  ;;  %v1484_v44 = vadd.f32 %v2274_v6, %v1483_v63  ;;  %v1530_v10 = vmul.f32 %v2274_v6, %v2274_v6  ;;  %v751_v12 = vpop.f32.mrb[8].mxu0 }
 0x198   : > { %v1541_v31 = vadd.f32 %v1540_v19, %v1529_v9  ;;  %v2275_v13 = vadd.f32 %v751_v12, %v3741_v23  ;;  %v753_v3 = vpop.f32.mrb[9].mxu0 }
 0x199   : > { %v1554_v2 = vadd.f32 %v1553_v5, %v1530_v10  ;;  %v2276_v26 = vadd.f32 %v753_v3, %v3743_v48 }
 0x19a   : > { %1444 = vst [vmem:[%s3748_s25 + $0x80] sm:$0xff] %v2275_v13  ;;  %v1472_v15 = vadd.f32 %v2275_v13, %v1471_v40  ;;  %v1531_v58 = vmul.f32 %v2275_v13, %v2275_v13 }
 0x19b   : > { %1445 = vst [vmem:[%s3748_s25 + $0x88] sm:$0xff] %v2276_v26  ;;  %v1485_v17 = vadd.f32 %v2276_v26, %v1484_v44  ;;  %v1532_v21 = vmul.f32 %v2276_v26, %v2276_v26  ;;  %v757_v27 = vpop.f32.mrb[10].mxu0 }
 0x19c   : > { %v1542_v32 = vadd.f32 %v1541_v31, %v1531_v58  ;;  %v2277_v29 = vadd.f32 %v757_v27, %v3741_v23  ;;  %v759_v20 = vpop.f32.mrb[11].mxu0 }
 0x19d   : > { %v1555_v34 = vadd.f32 %v1554_v2, %v1532_v21  ;;  %v2278_v62 = vadd.f32 %v759_v20, %v3743_v48 }
 0x19e   : > { %1446 = vst [vmem:[%s3748_s25 + $0x90] sm:$0xff] %v2277_v29  ;;  %v1473_v35 = vadd.f32 %v2277_v29, %v1472_v15  ;;  %v1533_v54 = vmul.f32 %v2277_v29, %v2277_v29 }
 0x19f   : > { %1447 = vst [vmem:[%s3748_s25 + $0x98] sm:$0xff] %v2278_v62  ;;  %v1486_v57 = vadd.f32 %v2278_v62, %v1485_v17  ;;  %v1534_v18 = vmul.f32 %v2278_v62, %v2278_v62  ;;  %v763_v37 = vpop.f32.mrb[12].mxu0 }
 0x1a0   : > { %v1543_v8 = vadd.f32 %v1542_v32, %v1533_v54  ;;  %v2279_v36 = vadd.f32 %v763_v37, %v3741_v23  ;;  %v765_v59 = vpop.f32.mrb[13].mxu0 }
 0x1a1   : > { %v1556_v60 = vadd.f32 %v1555_v34, %v1534_v18  ;;  %v2280_v16 = vadd.f32 %v765_v59, %v3743_v48 }
 0x1a2   : > { %1448 = vst [vmem:[%s3748_s25 + $0xc0] sm:$0xff] %v2279_v36  ;;  %v1474_v25 = vadd.f32 %v2279_v36, %v1473_v35  ;;  %v1535_v33 = vmul.f32 %v2279_v36, %v2279_v36 }
 0x1a3   : > { %1449 = vst [vmem:[%s3748_s25 + $0xc8] sm:$0xff] %v2280_v16  ;;  %v1487_v61 = vadd.f32 %v2280_v16, %v1486_v57  ;;  %v1536_v4 = vmul.f32 %v2280_v16, %v2280_v16  ;;  %v769_v7 = vpop.f32.mrb[14].mxu0 }
 0x1a4   : > { %v1544_v14 = vadd.f32 %v1543_v8, %v1535_v33  ;;  %v2281_v22 = vadd.f32 %v769_v7, %v3741_v23  ;;  %v771_v11 = vpop.f32.mrb[15].mxu0 }
 0x1a5   : > { %v1557_v46 = vadd.f32 %v1556_v60, %v1536_v4  ;;  %v2282_v24 = vadd.f32 %v771_v11, %v3743_v48 }
 0x1a6   : > { %1450 = vst [vmem:[%s3748_s25 + $0xd0] sm:$0xff] %v2281_v22  ;;  %v3781_v39 = vadd.f32 %v2281_v22, %v1474_v25  ;;  %v1537_v41 = vmul.f32 %v2281_v22, %v2281_v22 }
 0x1a7   : > { %1451 = vst [vmem:[%s3748_s25 + $0xd8] sm:$0xff] %v2282_v24  ;;  %v3784_v43 = vadd.f32 %v2282_v24, %v1487_v61  ;;  %v1538_v38 = vmul.f32 %v2282_v24, %v2282_v24 }
 0x1a8   : > { %v3786_v49 = vadd.f32 %v1544_v14, %v1537_v41 }
 0x1a9   : > { %v3788_v52 = vadd.f32 %v1557_v46, %v1538_v38 }
 0x1c7   : > { %v1034_v53 = vpop.f32.mrb[16].mxu0 }
 0x1c8   : > { %v1373_v45 = vpop.f32.mrb[0].mxu1  ;;  %v1036_v50 = vpop.f32.mrb[17].mxu0 }
 0x1c9   : > { %v2283_v1 = vadd.f32 %v1373_v45, %v1034_v53  ;;  %v1375_v51 = vpop.f32.mrb[1].mxu1 }
 0x1ca   : > { %v2284_v55 = vadd.f32 %v1375_v51, %v1036_v50 }
 0x1cb   : > { %v1420_v42 = vadd.f32 %v2283_v1, %v3741_v23  ;;  %v1040_v56 = vpop.f32.mrb[18].mxu0 }
 0x1cc   : > { %v1421_v63 = vadd.f32 %v2284_v55, %v3743_v48  ;;  %v1379_v0 = vpop.f32.mrb[2].mxu1  ;;  %v1042_v47 = vpop.f32.mrb[19].mxu0 }
 0x1cd   : > { %1960 = vst [vmem:[%s3748_s25 + $0x20] sm:$0xff] %v1420_v42  ;;  %v2285_v19 = vadd.f32 %v1379_v0, %v1040_v56  ;;  %v1381_v28 = vpop.f32.mrb[3].mxu1  ;;  %v1565_v10 = vmul.f32 %v1420_v42, %v1420_v42 }
 0x1ce   : > { %1961 = vst [vmem:[%s3748_s25 + $0x28] sm:$0xff] %v1421_v63  ;;  %v2286_v30 = vadd.f32 %v1381_v28, %v1042_v47  ;;  %v1566_v2 = vmul.f32 %v1421_v63, %v1421_v63 }
 0x1cf   : > { %v1422_v5 = vadd.f32 %v2285_v19, %v3741_v23  ;;  %v1046_v6 = vpop.f32.mrb[20].mxu0 }
 0x1d0   : > { %v1423_v40 = vadd.f32 %v2286_v30, %v3743_v48  ;;  %v1385_v9 = vpop.f32.mrb[4].mxu1  ;;  %v1048_v44 = vpop.f32.mrb[21].mxu0 }
 0x1d1   : > { %1962 = vst [vmem:[%s3748_s25 + $0x30] sm:$0xff] %v1422_v5  ;;  %v1495_v12 = vadd.f32 %v1422_v5, %v1420_v42  ;;  %v1567_v31 = vmul.f32 %v1422_v5, %v1422_v5  ;;  %v2287_v13 = vadd.f32 %v1385_v9, %v1046_v6  ;;  %v1387_v3 = vpop.f32.mrb[5].mxu1 }
 0x1d2   : > { %1963 = vst [vmem:[%s3748_s25 + $0x38] sm:$0xff] %v1423_v40  ;;  %v1508_v26 = vadd.f32 %v1423_v40, %v1421_v63  ;;  %v1568_v15 = vmul.f32 %v1423_v40, %v1423_v40  ;;  %v2288_v58 = vadd.f32 %v1387_v3, %v1048_v44 }
 0x1d3   : > { %v1581_v17 = vadd.f32 %v1567_v31, %v1565_v10  ;;  %v1424_v21 = vadd.f32 %v2287_v13, %v3741_v23  ;;  %v1052_v27 = vpop.f32.mrb[22].mxu0  ;;  %v1476_v10 = vrot.slane %v3781_v39, 4 }
 0x1d4   : > { %v1594_v32 = vadd.f32 %v1568_v15, %v1566_v2  ;;  %v1425_v29 = vadd.f32 %v2288_v58, %v3743_v48  ;;  %v1391_v20 = vpop.f32.mrb[6].mxu1  ;;  %v1054_v34 = vpop.f32.mrb[23].mxu0  ;;  %v1489_v2 = vrot.slane %v3784_v43, 4 }
 0x1d5   : > { %1964 = vst [vmem:[%s3748_s25 + $0x60] sm:$0xff] %v1424_v21  ;;  %v1496_v62 = vadd.f32 %v1495_v12, %v1424_v21  ;;  %v1569_v35 = vmul.f32 %v1424_v21, %v1424_v21  ;;  %v2289_v54 = vadd.f32 %v1391_v20, %v1052_v27  ;;  %v1393_v57 = vpop.f32.mrb[7].mxu1 }
 0x1d6   : > { %1965 = vst [vmem:[%s3748_s25 + $0x68] sm:$0xff] %v1425_v29  ;;  %v1509_v18 = vadd.f32 %v1508_v26, %v1425_v29  ;;  %v1570_v37 = vmul.f32 %v1425_v29, %v1425_v29  ;;  %v2290_v8 = vadd.f32 %v1393_v57, %v1054_v34  ;;  %v1559_v29 = vrot.slane %v3788_v52, 4 }
 0x1d7   : > { %v1582_v36 = vadd.f32 %v1581_v17, %v1569_v35  ;;  %v1426_v59 = vadd.f32 %v2289_v54, %v3741_v23  ;;  %v1058_v60 = vpop.f32.mrb[24].mxu0  ;;  %v1546_v17 = vrot.slane %v3786_v49, 4  ;;  %v1477_v54 = vadd.f32 %v1476_v10, %v3781_v39 }
 0x1d8   : > { %v1595_v16 = vadd.f32 %v1594_v32, %v1570_v37  ;;  %v1427_v25 = vadd.f32 %v2290_v8, %v3743_v48  ;;  %v1397_v33 = vpop.f32.mrb[8].mxu1  ;;  %v1060_v61 = vpop.f32.mrb[25].mxu0  ;;  %v1560_v39 = vadd.f32 %v1559_v29, %v3788_v52 }
 0x1d9   : > { %1966 = vst [vmem:[%s3748_s25 + $0x70] sm:$0xff] %v1426_v59  ;;  %v1497_v4 = vadd.f32 %v1496_v62, %v1426_v59  ;;  %v1571_v7 = vmul.f32 %v1426_v59, %v1426_v59  ;;  %v2291_v14 = vadd.f32 %v1397_v33, %v1058_v60  ;;  %v1399_v22 = vpop.f32.mrb[9].mxu1 }
 0x1da   : > { %1967 = vst [vmem:[%s3748_s25 + $0x78] sm:$0xff] %v1427_v25  ;;  %v1510_v11 = vadd.f32 %v1509_v18, %v1427_v25  ;;  %v1572_v46 = vmul.f32 %v1427_v25, %v1427_v25  ;;  %v2292_v24 = vadd.f32 %v1399_v22, %v1060_v61  ;;  %v1547_v25 = vadd.f32 %v1546_v17, %v3786_v49 }
 0x1db   : > { %v1583_v41 = vadd.f32 %v1582_v36, %v1571_v7  ;;  %v1428_v38 = vadd.f32 %v2291_v14, %v3741_v23  ;;  %v1064_v53 = vpop.f32.mrb[26].mxu0  ;;  %v1490_v36 = vadd.f32 %v1489_v2, %v3784_v43  ;;  %v1478_v14 = vrot.slane %v1477_v54, 2 }
 0x1dc   : > { %v1596_v45 = vadd.f32 %v1595_v16, %v1572_v46  ;;  %v1429_v50 = vadd.f32 %v2292_v24, %v3743_v48  ;;  %v1403_v1 = vpop.f32.mrb[10].mxu1  ;;  %v1066_v51 = vpop.f32.mrb[27].mxu0 }
 0x1dd   : > { %1968 = vst [vmem:[%s3748_s25 + $0xa0] sm:$0xff] %v1428_v38  ;;  %v1498_v55 = vadd.f32 %v1497_v4, %v1428_v38  ;;  %v1573_v42 = vmul.f32 %v1428_v38, %v1428_v38  ;;  %v2293_v56 = vadd.f32 %v1403_v1, %v1064_v53  ;;  %v1405_v63 = vpop.f32.mrb[11].mxu1  ;;  %v1561_v53 = vrot.slane %v1560_v39, 2 }
 0x1de   : > { %1969 = vst [vmem:[%s3748_s25 + $0xa8] sm:$0xff] %v1429_v50  ;;  %v1511_v0 = vadd.f32 %v1510_v11, %v1429_v50  ;;  %v1574_v47 = vmul.f32 %v1429_v50, %v1429_v50  ;;  %v2294_v19 = vadd.f32 %v1405_v63, %v1066_v51  ;;  %v1491_v11 = vrot.slane %v1490_v36, 2 }
 0x1df   : > { %v1584_v28 = vadd.f32 %v1583_v41, %v1573_v42  ;;  %v1430_v30 = vadd.f32 %v2293_v56, %v3741_v23  ;;  %v1070_v5 = vpop.f32.mrb[28].mxu0  ;;  %v1548_v41 = vrot.slane %v1547_v25, 2  ;;  %v1479_v50 = vadd.f32 %v1478_v14, %v1477_v54 }
 0x1e0   : > { %v1597_v6 = vadd.f32 %v1596_v45, %v1574_v47  ;;  %v1431_v40 = vadd.f32 %v2294_v19, %v3743_v48  ;;  %v1409_v9 = vpop.f32.mrb[12].mxu1  ;;  %v1072_v44 = vpop.f32.mrb[29].mxu0 }
 0x1e1   : > { %1970 = vst [vmem:[%s3748_s25 + $0xb0] sm:$0xff] %v1430_v30  ;;  %v1499_v12 = vadd.f32 %v1498_v55, %v1430_v30  ;;  %v1575_v31 = vmul.f32 %v1430_v30, %v1430_v30  ;;  %v2295_v13 = vadd.f32 %v1409_v9, %v1070_v5  ;;  %v1411_v3 = vpop.f32.mrb[13].mxu1  ;;  %v1549_v42 = vadd.f32 %v1548_v41, %v1547_v25 }
 0x1e2   : > { %1971 = vst [vmem:[%s3748_s25 + $0xb8] sm:$0xff] %v1431_v40  ;;  %v1512_v26 = vadd.f32 %v1511_v0, %v1431_v40  ;;  %v1576_v15 = vmul.f32 %v1431_v40, %v1431_v40  ;;  %v2296_v58 = vadd.f32 %v1411_v3, %v1072_v44  ;;  %v1562_v0 = vadd.f32 %v1561_v53, %v1560_v39 }
 0x1e3   : > { %v1585_v21 = vadd.f32 %v1584_v28, %v1575_v31  ;;  %v1432_v27 = vadd.f32 %v2295_v13, %v3741_v23  ;;  %v1076_v32 = vpop.f32.mrb[30].mxu0  ;;  %v1480_v28 = vrot.slane %v1479_v50, 1  ;;  %v1550_v44 = vrot.slane %v1549_v42, 1 }
 0x1e4   : > { %v1598_v20 = vadd.f32 %v1597_v6, %v1576_v15  ;;  %v1433_v34 = vadd.f32 %v2296_v58, %v3743_v48  ;;  %v1415_v62 = vpop.f32.mrb[14].mxu1  ;;  %v1078_v35 = vpop.f32.mrb[31].mxu0  ;;  %v1563_v31 = vrot.slane %v1562_v0, 1 }
 0x1e5   : > { %1972 = vst [vmem:[%s3748_s25 + $0xe0] sm:$0xff] %v1432_v27  ;;  %v1500_v57 = vadd.f32 %v1499_v12, %v1432_v27  ;;  %v1577_v18 = vmul.f32 %v1432_v27, %v1432_v27  ;;  %v2297_v37 = vadd.f32 %v1415_v62, %v1076_v32  ;;  %v1417_v8 = vpop.f32.mrb[15].mxu1  ;;  %v1481_v2 = vadd.f32 %v1480_v28, %v1479_v50 }
 0x1e6   : > { %1973 = vst [vmem:[%s3748_s25 + $0xe8] sm:$0xff] %v1433_v34  ;;  %v1513_v59 = vadd.f32 %v1512_v26, %v1433_v34  ;;  %v1578_v60 = vmul.f32 %v1433_v34, %v1433_v34  ;;  %v2298_v16 = vadd.f32 %v1417_v8, %v1078_v35  ;;  %v1551_v27 = vadd.f32 %v1550_v44, %v1549_v42 }
 0x1e7   : > { %v1586_v33 = vadd.f32 %v1585_v21, %v1577_v18  ;;  %v1434_v61 = vadd.f32 %v2297_v37, %v3741_v23 }
 0x1e8   : > { %v1599_v4 = vadd.f32 %v1598_v20, %v1578_v60  ;;  %v1435_v7 = vadd.f32 %v2298_v16, %v3743_v48  ;;  %v1492_v48 = vadd.f32 %v1491_v11, %v1490_v36  ;;  %v1564_v20 = vadd.f32 %v1563_v31, %v1562_v0 }
 0x1e9   : > { %1974 = vst [vmem:[%s3748_s25 + $0xf0] sm:$0xff] %v1434_v61  ;;  %v1501_v22 = vadd.f32 %v1500_v57, %v1434_v61  ;;  %v1579_v43 = vmul.f32 %v1434_v61, %v1434_v61 }
 0x1ea   : > { %1975 = vst [vmem:[%s3748_s25 + $0xf8] sm:$0xff] %v1435_v7  ;;  %v1514_v46 = vadd.f32 %v1513_v59, %v1435_v7  ;;  %v1580_v24 = vmul.f32 %v1435_v7, %v1435_v7  ;;  %v1493_v6 = vrot.slane %v1492_v48, 1 }
 0x1eb   : > { %v1502_v38 = vrot.slane %v1501_v22, 4  ;;  %v1587_v49 = vadd.f32 %v1586_v33, %v1579_v43 }
 0x1ec   : > { %v1515_v45 = vrot.slane %v1514_v46, 4  ;;  %v1600_v23 = vadd.f32 %v1599_v4, %v1580_v24  ;;  %v1494_v58 = vadd.f32 %v1493_v6, %v1492_v48 }
 0x1ed   : > { %v1503_v52 = vadd.f32 %v1502_v38, %v1501_v22  ;;  %v1588_v1 = vrot.slane %v1587_v49, 4 }
 0x1ee   : > { %v1516_v51 = vadd.f32 %v1515_v45, %v1514_v46  ;;  %v1601_v55 = vrot.slane %v1600_v23, 4 }
 0x1ef   : > { %v1504_v56 = vrot.slane %v1503_v52, 2  ;;  %v1589_v63 = vadd.f32 %v1588_v1, %v1587_v49 }
 0x1f0   : > { %v1517_v47 = vrot.slane %v1516_v51, 2  ;;  %v1602_v19 = vadd.f32 %v1601_v55, %v1600_v23 }
 0x1f1   : > { %v1505_v30 = vadd.f32 %v1504_v56, %v1503_v52  ;;  %v1590_v5 = vrot.slane %v1589_v63, 2 }
 0x1f2   : > { %v1518_v40 = vadd.f32 %v1517_v47, %v1516_v51  ;;  %v1603_v9 = vrot.slane %v1602_v19, 2 }
 0x1f3   : > { %v1506_v10 = vrot.slane %v1505_v30, 1  ;;  %v1591_v12 = vadd.f32 %v1590_v5, %v1589_v63 }
 0x1f4   : > { %v1519_v13 = vrot.slane %v1518_v40, 1  ;;  %v1604_v3 = vadd.f32 %v1603_v9, %v1602_v19 }
 0x1f5   : > { %v1507_v26 = vadd.f32 %v1506_v10, %v1505_v30  ;;  %v1592_v15 = vrot.slane %v1591_v12, 1 }
 0x1f6   : > { %v1520_v17 = vadd.f32 %v1519_v13, %v1518_v40  ;;  %v1605_v21 = vrot.slane %v1604_v3, 1 }
 0x1f7   : > { %v1521_v32 = vadd.f32 %v1507_v26, %v1481_v2  ;;  %v1593_v29 = vadd.f32 %v1592_v15, %v1591_v12 }
 0x1f8   : > { %v1522_v34 = vadd.f32 %v1520_v17, %v1494_v58  ;;  %v1606_v62 = vadd.f32 %v1605_v21, %v1604_v3 }
 0x1f9   : > { %v1607_v35 = vadd.f32 %v1593_v29, %v1551_v27 }
 0x1fa   : > { %v1608_v54 = vadd.f32 %v1606_v62, %v1564_v20  ;;  %v1609_v57 = vadd.f32 %v1522_v34, %v1521_v32 }
 0x1fc   : > { %v1610_v18 = vadd.f32 %v1608_v54, %v1607_v35 }
 0x1fe   : > { %v1612_v37 = vsel %vm1611_vm2, %v1609_v57, %v1610_v18 }
 0x1ff   : > { %1613 = vst [vmem:[%s243_s29] sm:$0x3] %v1612_v37 }
 0x200 PF: > { %s15_s19 = sadd.s32 1, %s2453_s19   ;;  %s3856_s15 = smov %s2445_s17 }
 0x201   : > { %p12_p8 = scmp.ge.s32.totalorder %s15_s19, 10   ;;  %s3857_s16 = smov %s2449_s18 }
 0x202   : > { %s3858_s17 = smov %s3861_s20  ;;  %s3859_s18 = smov %s3865_s21 }
 0x203   :  { %14 = sbr.rel (!%p12_p8) target bundleno = 3 (0x3), region = 78 }

// kernel: generator_forward.4
= control target key start
LH: loop header
LB: loop body
LE: loop exit
PB: predicated region body
PF: predicated region fallthrough
CT: control target
= control target key end

     0   :  { %s2123_s18 = smov 0   ;;  %s2125_s19 = smov 0   ;;  %s3355_s0 = inlined_call_operand.vmem [shape: f32[2,33,33,128], index: 0, kind: input, shape index: {}]   ;;  %s3356_s1 = inlined_call_operand.vmem [shape: f32[3,256,128], index: 1, kind: input, shape index: {}]   ;;  %s3357_s2 = inlined_call_operand.vmem [shape: f32[1,128], index: 2, kind: input, shape index: {}]   ;;  %s3358_s3 = inlined_call_operand.vmem [shape: f32[2,128], index: 3, kind: input, shape index: {}]   ;;  %s3359_s4 = inlined_call_operand.vmem [shape: f32[2,32,2,32,128], index: 4, kind: output, shape index: {0}]   ;;  %s3360_s5 = inlined_call_operand.vmem [shape: f32[2,8,2,64], index: 5, kind: output, shape index: {1}]  }
   0x1   :  { %s2127_s20 = smov 0   ;;  %s2129_s21 = smov 0  }
   0x2   :  { %s2131_s22 = smov 0  }
   0x3 LB: > { %s25_s23 = sadd.s32 1, %s2081_s20  ;;  %s28_s24 = sadd.s32 1, %s2085_s21  ;;  %s2089_s22 = sphi %s2131_s22, %s16_s22   ;;  %s2085_s21 = sphi %s2129_s21, %s3421_s21   ;;  %s2081_s20 = sphi %s2127_s20, %s3420_s20   ;;  %s2077_s19 = sphi %s2125_s19, %s3419_s19   ;;  %s2073_s18 = sphi %s2123_s18, %s3418_s18  }
   0x4   : > { %p26_p0 = scmp.ge.s32.totalorder %s25_s23, 8  ;;  %p1513_p1 = scmp.ge.s32.totalorder %s2089_s22, 1 }
   0x5   : > { %p206_p2 = scmp.lt.s32.totalorder %s2089_s22, 17 }
   0x6   : > { %s3423_s23 = smov (%p26_p0, %s25_s23), 0  ;;  %s3425_s24 = smov (!%p26_p0, %s28_s24), %s2085_s21 }
   0x7   : > { %p207_p3 = pnand %p1513_p1, %p206_p2  ;;  %p30_p4 = scmp.ge.s32.totalorder %s3425_s24, 2 }
   0x9   : > { %s3427_s24 = smov (%p30_p4, %s3425_s24), 0  ;;  %210 = sbr.rel (%p207_p3) target bundleno = 506 (0x1fa), region = 36 }
  0x10   : > { %v663_v0 = vld [vmem:[%s3356_s1 + $0x80] sm:$0xff]  ;;  %v664_v1 = vld [vmem:[%s3356_s1 + $0x88] sm:$0xff]  ;;  %p247_p5 = scmp.lt.s32.totalorder %s2077_s19, 1  ;;  %v665_v5 = vld [vmem:[%s3356_s1 + $0x90] sm:$0xff]  ;;  %s2188_s27 = sshll.u32 %s2073_s18, 2  ;;  %vm580_vm0 = vcmask 1046528  }
  0x11   : > { %v647_v2 = vld [vmem:[%s3356_s1] sm:$0xff]  ;;  %v1896_v3 = vpack.c.bf16 %v664_v1, %v663_v0  ;;  %v648_v4 = vld [vmem:[%s3356_s1 + $0x8] sm:$0xff]  ;;  %v666_v6 = vld [vmem:[%s3356_s1 + $0x98] sm:$0xff]  ;;  %s1522_s28 = smul.u32 160, %s2073_s18  ;;  %v2214_v21 = vstv %s2188_s27  ;;  %p255_p6 = scmp.lt.s32.totalorder %s2188_s27, 31 }
  0x12   : > { %v1898_v7 = vpack.c.bf16 %v648_v4, %v647_v2  ;;  %v1900_v8 = vpack.c.bf16 %v666_v6, %v665_v5  ;;  %v649_v9 = vld [vmem:[%s3356_s1 + $0x10] sm:$0xff]  ;;  %v650_v10 = vld [vmem:[%s3356_s1 + $0x18] sm:$0xff]  ;;  %v667_v11 = vld [vmem:[%s3356_s1 + $0xa0] sm:$0xff]  ;;  %s3429_s19 = smov (!%p247_p5, %s2077_s19), 1  ;;  %v2249_v34 = vadd.s32 2, %v2214_v21  ;;  %v2262_v39 = vadd.s32 1, %v2214_v21 }
  0x13   : > { %1897 = vmatprep.subr.bf16.mxu0 %v1896_v3  ;;  %1992 = vmatprep.subr.bf16.mxu1 %v1896_v3  ;;  %v668_v12 = vld [vmem:[%s3356_s1 + $0xa8] sm:$0xff]  ;;  %v1902_v13 = vpack.c.bf16 %v650_v10, %v649_v9  ;;  %s2008_s29 = smul.u32 1320, %s3429_s19  ;;  %v651_v15 = vld [vmem:[%s3356_s1 + $0x20] sm:$0xff]  ;;  %v669_v17 = vld [vmem:[%s3356_s1 + $0xb0] sm:$0xff]  ;;  %v2276_v45 = vadd.s32 3, %v2214_v21  ;;  %vm445_vm1 = vcmp.lt.s32.totalorder %v2214_v21, 32 }
  0x14   : > { %1899 = vmatpush3.bf16.msra.mxu0 %v1898_v7  ;;  %2000 = vmatpush3.bf16.msra.mxu1 %v1898_v7  ;;  %v1904_v14 = vpack.c.bf16 %v668_v12, %v667_v11  ;;  %v652_v16 = vld [vmem:[%s3356_s1 + $0x28] sm:$0xff]  ;;  %v670_v18 = vld [vmem:[%s3356_s1 + $0xb8] sm:$0xff]  ;;  %v653_v19 = vld [vmem:[%s3356_s1 + $0x30] sm:$0xff]  ;;  %vm447_vm2 = vcmp.lt.s32.totalorder %v2249_v34, 32  ;;  %vm446_vm9 = vcmp.lt.s32.totalorder %v2262_v39, 32  ;;  %s3431_s27 = smov (!%p255_p6, %s2188_s27), 31 }
  0x15   : > { %1901 = vmatprep.subr.bf16.mxu0 %v1900_v8  ;;  %1993 = vmatprep.subr.bf16.mxu1 %v1900_v8  ;;  %v654_v20 = vld [vmem:[%s3356_s1 + $0x38] sm:$0xff]  ;;  %s251_s26 = scalar_lea.vmem %s3355_s0, %s2008_s29  ;;  %v671_v22 = vld [vmem:[%s3356_s1 + $0xc0] sm:$0xff]  ;;  %v672_v23 = vld [vmem:[%s3356_s1 + $0xc8] sm:$0xff]  ;;  %v1906_v25 = vpack.c.bf16 %v652_v16, %v651_v15  ;;  %v1908_v29 = vpack.c.bf16 %v670_v18, %v669_v17  ;;  %vm448_vm12 = vcmp.lt.s32.totalorder %v2276_v45, 32  ;;  %s1516_s8 = sshll.u32 %s3431_s27, 3 }
  0x16   : > { %v655_v24 = vld [vmem:[%s3356_s1 + $0x40] sm:$0xff]  ;;  %s2225_s11 = scalar_lea.vmem %s251_s26, %s1522_s28  ;;  %v656_v26 = vld [vmem:[%s3356_s1 + $0x48] sm:$0xff]  ;;  %v673_v27 = vld [vmem:[%s3356_s1 + $0xd0] sm:$0xff]  ;;  %v1910_v40 = vpack.c.bf16 %v654_v20, %v653_v19  ;;  %v1912_v41 = vpack.c.bf16 %v672_v23, %v671_v22  ;;  %s1517_s9 = sshll.u32 %s3429_s19, 8 }
  0x17   : > { %v674_v28 = vld [vmem:[%s3356_s1 + $0xd8] sm:$0xff]  ;;  %v657_v30 = vld [vmem:[%s3356_s1 + $0x50] sm:$0xff]  ;;  %v675_v32 = vld [vmem:[%s3356_s1 + $0xe0] sm:$0xff]  ;;  %v1914_v46 = vpack.c.bf16 %v656_v26, %v655_v24  ;;  %s259_s10 = sadd.s32 %s1517_s9, %s1516_s8  ;;  %s2092_s27 = smov 64  }
  0x18   : > { %1903 = vmatpush3.bf16.msra.mxu0 %v1902_v13  ;;  %2001 = vmatpush3.bf16.msra.mxu1 %v1902_v13  ;;  %v658_v31 = vld [vmem:[%s3356_s1 + $0x58] sm:$0xff]  ;;  %v676_v33 = vld [vmem:[%s3356_s1 + $0xe8] sm:$0xff]  ;;  %v659_v35 = vld [vmem:[%s3356_s1 + $0x60] sm:$0xff]  ;;  %v1916_v52 = vpack.c.bf16 %v674_v28, %v673_v27  ;;  %s1518_s29 = sshll.u32 %s259_s10, 3  ;;  %p265_p7 = scmp.lt.s32.totalorder %s2073_s18, 7 }
  0x19   : > { %1905 = vmatprep.subr.bf16.mxu0 %v1904_v14  ;;  %1994 = vmatprep.subr.bf16.mxu1 %v1904_v14  ;;  %v660_v36 = vld [vmem:[%s3356_s1 + $0x68] sm:$0xff]  ;;  %v677_v37 = vld [vmem:[%s3356_s1 + $0xf0] sm:$0xff]  ;;  %v274_v38 = vld [vmem:[%s2225_s11] sm:$0xff]  ;;  %v2289_v55 = vpack.c.bf16 %v658_v31, %v657_v30  ;;  %v2291_v56 = vpack.c.bf16 %v676_v33, %v675_v32  ;;  %s3212_s15 = scalar_lea.vmem %s3359_s4, %s1518_s29  ;;  %s1519_s16 = sshll.u32 %s3429_s19, 3 }
  0x1a   : > { %v275_v42 = vld [vmem:[%s2225_s11 + $0x8] sm:$0xff]  ;;  %v2268_v43 = vld [vmem:[%s3358_s3] ss:$0 sm:$0xff]  ;;  %v2273_v44 = vld [vmem:[%s3358_s3 + $0x1] ss:$0 sm:$0xff]  ;;  %v2295_v59 = vpack.c.bf16 %v660_v36, %v659_v35  ;;  %s3433_s18 = smov (!%p265_p7, %s2073_s18), 7 }
  0x1b   : > { %v678_v47 = vld [vmem:[%s3356_s1 + $0xf8] sm:$0xff]  ;;  %v305_v48 = vmul.f32 %v2268_v43, %v274_v38  ;;  %v306_v49 = vmul.f32 %v2268_v43, %v275_v42  ;;  %v284_v50 = vld [vmem:[%s2225_s11 + $0x50] sm:$0xff]  ;;  %v2311_v6 = vld [vmem:[%s3356_s1 + $0x280] sm:$0xff]  ;;  %s268_s28 = sadd.s32 %s1519_s16, %s3433_s18 }
  0x1c   : > { %1907 = vmatpush3.bf16.msra.mxu0 %v1906_v25  ;;  %2002 = vmatpush3.bf16.msra.mxu1 %v1906_v25  ;;  %v285_v51 = vld [vmem:[%s2225_s11 + $0x58] sm:$0xff]  ;;  %v315_v53 = vmul.f32 %v2268_v43, %v284_v50  ;;  %v2297_v60 = vpack.c.bf16 %v678_v47, %v677_v37  ;;  %v661_v61 = vld [vmem:[%s3356_s1 + $0x70] sm:$0xff]  ;;  %v2322_v10 = vld [vmem:[%s3356_s1 + $0x288] sm:$0xff]  ;;  %s1520_s17 = sshll.u32 %s268_s28, 1 }
  0x1d   : > { %1909 = vmatprep.subr.bf16.mxu0 %v1908_v29  ;;  %1995 = vmatprep.subr.bf16.mxu1 %v1908_v29  ;;  %v316_v54 = vmul.f32 %v2268_v43, %v285_v51  ;;  %v334_v57 = vadd.f32 %v2273_v44, %v305_v48  ;;  %v335_v58 = vadd.f32 %v2273_v44, %v306_v49  ;;  %v662_v62 = vld [vmem:[%s3356_s1 + $0x78] sm:$0xff]  ;;  %v276_v1 = vld [vmem:[%s2225_s11 + $0x10] sm:$0xff]  ;;  %v2327_v11 = vld [vmem:[%s3356_s1 + $0x180] sm:$0xff]  ;;  %s270_s30 = scalar_lea.vmem %s3360_s5, %s1520_s17 }
  0x1e   : > { %v344_v63 = vadd.f32 %v2273_v44, %v315_v53  ;;  %v2313_v7 = vpack.c.bf16 %v662_v62, %v661_v61  ;;  %v307_v12 = vmul.f32 %v2268_v43, %v276_v1  ;;  %v286_v13 = vld [vmem:[%s2225_s11 + $0x60] sm:$0xff]  ;;  %v2346_v18 = vld [vmem:[%s3356_s1 + $0x188] sm:$0xff]  ;;  %v2383_v32 = vld [vmem:[%s3356_s1 + $0x290] sm:$0xff]  ;;  %v2091_v62 = vmov 0.0  }
  0x1f   : > { %v345_v0 = vadd.f32 %v2273_v44, %v316_v54  ;;  %vm359_vm3 = vcmp.ge.f32.partialorder %v334_v57, 0.0  ;;  %vm360_vm4 = vcmp.ge.f32.partialorder %v335_v58, 0.0  ;;  %v384_v2 = vmul.f32 0.01, %v334_v57  ;;  %v2351_v19 = vld [vmem:[%s3356_s1 + $0x200] sm:$0xff]  ;;  %v2356_v20 = vld [vmem:[%s3356_s1 + $0x208] sm:$0xff] }
  0x20   : > { %1911 = vmatpush3.bf16.msra.mxu0 %v1910_v40  ;;  %2003 = vmatpush3.bf16.msra.mxu1 %v1910_v40  ;;  %v385_v3 = vmul.f32 0.01, %v335_v58  ;;  %vm369_vm5 = vcmp.ge.f32.partialorder %v344_v63, 0.0  ;;  %v394_v4 = vmul.f32 0.01, %v344_v63  ;;  %v2370_v26 = vld [vmem:[%s3356_s1 + $0x100] sm:$0xff]  ;;  %v336_v30 = vadd.f32 %v2273_v44, %v307_v12 }
  0x21   : > { %1913 = vmatprep.subr.bf16.mxu0 %v1912_v41  ;;  %1996 = vmatprep.subr.bf16.mxu1 %v1912_v41  ;;  %vm370_vm6 = vcmp.ge.f32.partialorder %v345_v0, 0.0  ;;  %v395_v5 = vmul.f32 0.01, %v345_v0  ;;  %v2315_v8 = vsel %vm359_vm3, %v334_v57, %v384_v2  ;;  %v2375_v27 = vld [vmem:[%s3356_s1 + $0x108] sm:$0xff]  ;;  %v317_v31 = vmul.f32 %v2268_v43, %v286_v13  ;;  %v277_v33 = vld [vmem:[%s2225_s11 + $0x18] sm:$0xff]  ;;  %v2406_v42 = vld [vmem:[%s3356_s1 + $0x190] sm:$0xff] }
  0x22   : > { %v2317_v9 = vsel %vm360_vm4, %v335_v58, %v385_v3  ;;  %v530_v14 = vsel %vm445_vm1, %v2315_v8, 0.0  ;;  %v2339_v16 = vsel %vm369_vm5, %v344_v63, %v394_v4  ;;  %v287_v35 = vld [vmem:[%s2225_s11 + $0x68] sm:$0xff]  ;;  %v2401_v41 = vld [vmem:[%s3356_s1 + $0x298] sm:$0xff]  ;;  %vm361_vm7 = vcmp.ge.f32.partialorder %v336_v30, 0.0  ;;  %v2423_v50 = vld [vmem:[%s3356_s1 + $0x210] sm:$0xff] }
  0x23   : > { %v2337_v15 = vsel %vm445_vm1, %v2317_v9, 0.0  ;;  %v2341_v17 = vsel %vm370_vm6, %v345_v0, %v395_v5  ;;  %v581_v22 = vrot.slane %v530_v14, 1  ;;  %v540_v24 = vsel %vm447_vm2, %v2339_v16, 0.0  ;;  %v2428_v51 = vld [vmem:[%s3356_s1 + $0x218] sm:$0xff]  ;;  %v2449_v61 = vld [vmem:[%s3356_s1 + $0x2a0] sm:$0xff]  ;;  %v2473_v4 = vld [vmem:[%s3356_s1 + $0x1a8] sm:$0xff] }
  0x24   : > { %1915 = vmatpush3.bf16.msra.mxu0 %v1914_v46  ;;  %2004 = vmatpush3.bf16.msra.mxu1 %v1914_v46  ;;  %v582_v23 = vrot.slane %v2337_v15, 1  ;;  %v2365_v25 = vsel %vm447_vm2, %v2341_v17, 0.0  ;;  %v599_v28 = vrot.slane %v540_v24, 1  ;;  %v2411_v46 = vld [vmem:[%s3356_s1 + $0x198] sm:$0xff]  ;;  %v386_v48 = vmul.f32 0.01, %v336_v30 }
  0x25   : > { %1917 = vmatprep.subr.bf16.mxu0 %v1916_v52  ;;  %1997 = vmatprep.subr.bf16.mxu1 %v1916_v52  ;;  %v3361_v29 = vrot.slane %v2365_v25, 1  ;;  %v346_v49 = vadd.f32 %v2273_v44, %v317_v31  ;;  %v2433_v52 = vld [vmem:[%s3356_s1 + $0x110] sm:$0xff]  ;;  %v2442_v54 = vld [vmem:[%s3356_s1 + $0x118] sm:$0xff]  ;;  %v308_v57 = vmul.f32 %v2268_v43, %v277_v33  ;;  %v318_v58 = vmul.f32 %v2268_v43, %v287_v35  ;;  %v2468_v3 = vld [vmem:[%s3356_s1 + $0x1a0] sm:$0xff] }
  0x26   : > { %v2390_v36 = vsel %vm580_vm0, %v581_v22, %v582_v23  ;;  %v2456_v63 = vrot.slane %v2091_v62, 1  ;;  %v2461_v0 = vsel %vm361_vm7, %v336_v30, %v386_v48  ;;  %v2493_v22 = vld [vmem:[%s3356_s1 + $0x228] sm:$0xff]  ;;  %v2498_v24 = vld [vmem:[%s3356_s1 + $0x120] sm:$0xff]  ;;  %v2517_v48 = vld [vmem:[%s3356_s1 + $0x2b0] sm:$0xff] }
  0x27   : > { %3377 = vst [vmem:[#allocation2_spill] sm:$0xff] %v2390_v36  ;;  %749 = vmatprep.mubr.f32.mxu0 %v2390_v36  ;;  %v2417_v47 = vsel %vm580_vm0, %v599_v28, %v3361_v29  ;;  %vm371_vm8 = vcmp.ge.f32.partialorder %v346_v49, 0.0  ;;  %v396_v1 = vmul.f32 0.01, %v346_v49  ;;  %v2484_v5 = vsel %vm445_vm1, %v2461_v0, 0.0  ;;  %v2503_v28 = vld [vmem:[%s3356_s1 + $0x128] sm:$0xff] }
  0x28   : > { %3378 = vst [vmem:[#allocation3_spill] sm:$0xff] %v2417_v47  ;;  %1919 = vmatpush3.bf16.msra.mxu0 %v2289_v55  ;;  %2005 = vmatpush3.bf16.msra.mxu1 %v2289_v55  ;;  %v2454_v55 = vld [vmem:[%s3356_s1 + $0x2a8] sm:$0xff]  ;;  %v337_v13 = vadd.f32 %v2273_v44, %v308_v57  ;;  %v347_v14 = vadd.f32 %v2273_v44, %v318_v58  ;;  %v3362_v30 = vrot.slane %v2484_v5, 1  ;;  %v2522_v57 = vld [vmem:[%s3356_s1 + $0x2b8] sm:$0xff]  ;;  %v280_v53 = vld [vmem:[%s2225_s11 + $0x30] sm:$0xff] }
  0x29   : > { %1921 = vmatprep.subr.bf16.mxu0 %v2291_v56  ;;  %1998 = vmatprep.subr.bf16.mxu1 %v2291_v56  ;;  %v2478_v56 = vld [vmem:[%s3356_s1 + $0x220] sm:$0xff]  ;;  %v2508_v31 = vsel %vm371_vm8, %v346_v49, %v396_v1  ;;  %v2527_v49 = vld [vmem:[%s3356_s1 + $0x1b0] sm:$0xff]  ;;  %v279_v1 = vld [vmem:[%s2225_s11 + $0x28] sm:$0xff]  ;;  %v311_v12 = vmul.f32 %v2268_v43, %v280_v53 }
  0x2a   : > { %789 = vmatprep.mubr.f32.mxu1 %v2417_v47  ;;  %3379 = vst [vmem:[#allocation4_spill] sm:$0xff] %v2527_v49  ;;  %v2534_v58 = vsel %vm447_vm2, %v2508_v31, 0.0  ;;  %vm362_vm10 = vcmp.ge.f32.partialorder %v337_v13, 0.0  ;;  %v387_v62 = vmul.f32 0.01, %v337_v13  ;;  %vm372_vm11 = vcmp.ge.f32.partialorder %v347_v14, 0.0 }
  0x2b   : > { %v397_v35 = vmul.f32 0.01, %v347_v14  ;;  %v2549_v2 = vld [vmem:[%s3356_s1 + $0x1b8] sm:$0xff]  ;;  %v290_v29 = vld [vmem:[%s2225_s11 + $0x80] sm:$0xff]  ;;  %v3383_v47 = vpack.c.bf16 %v2346_v18, %v2327_v11 }
  0x2c   : > { %1923 = vmatpush3.bf16.msra.mxu0 %v2295_v59  ;;  %2006 = vmatpush3.bf16.msra.mxu1 %v2295_v59  ;;  %v289_v40 = vld [vmem:[%s2225_s11 + $0x78] sm:$0xff]  ;;  %v602_v59 = vrot.slane %v2534_v58, 1  ;;  %v2562_v33 = vsel %vm362_vm10, %v337_v13, %v387_v62  ;;  %v2588_v58 = vld [vmem:[%s3356_s1 + $0x130] sm:$0xff]  ;;  %v3382_v62 = vpack.c.bf16 %v2322_v10, %v2311_v6  ;;  %v340_v10 = vadd.f32 %v2273_v44, %v311_v12 }
  0x2d   : > { %1925 = vmatprep.subr.bf16.mxu0 %v2297_v60  ;;  %1999 = vmatprep.subr.bf16.mxu1 %v2297_v60  ;;  %v2558_v60 = vsel %vm580_vm0, %v582_v23, %v3362_v30  ;;  %3380 = vst [vmem:[#allocation5_spill] sm:$0xff] %v2562_v33  ;;  %v533_v38 = vsel %vm445_vm1, %v2562_v33, 0.0  ;;  %v2571_v37 = vsel %vm372_vm11, %v347_v14, %v397_v35  ;;  %v2578_v23 = vld [vmem:[%s3356_s1 + $0x230] sm:$0xff]  ;;  %v2583_v13 = vld [vmem:[%s3356_s1 + $0x238] sm:$0xff]  ;;  %v2615_v30 = vld [vmem:[%s3356_s1 + $0x2c8] sm:$0xff]  ;;  %v3384_v33 = vrot.slane %v2365_v25, 1 }
  0x2e   : > { %3381 = vst [vmem:[#allocation6_spill] sm:$0xff] %v2571_v37  ;;  %v310_v14 = vmul.f32 %v2268_v43, %v279_v1  ;;  %v2596_v35 = vsel %vm447_vm2, %v2571_v37, 0.0  ;;  %v2603_v15 = vld [vmem:[%s3356_s1 + $0x138] sm:$0xff]  ;;  %v320_v1 = vmul.f32 %v2268_v43, %v289_v40  ;;  %v586_v53 = vrot.slane %v533_v38, 1 }
  0x2f   : > { %v604_v40 = vrot.slane %v2596_v35, 1  ;;  %v321_v37 = vmul.f32 %v2268_v43, %v290_v29  ;;  %v2629_v49 = vsel %vm580_vm0, %v3384_v33, %v602_v59  ;;  %v3385_v38 = vpack.c.bf16 %v2356_v20, %v2351_v19 }
  0x30   : > { %1927 = vmatpush3.bf16.msra.mxu0 %v2313_v7  ;;  %2007 = vmatpush3.bf16.msra.mxu1 %v2313_v7  ;;  %v2610_v7 = vld [vmem:[%s3356_s1 + $0x2c0] sm:$0xff]  ;;  %v339_v36 = vadd.f32 %v2273_v44, %v310_v14  ;;  %v349_v11 = vadd.f32 %v2273_v44, %v320_v1  ;;  %vm365_vm14 = vcmp.ge.f32.partialorder %v340_v10, 0.0  ;;  %v390_v12 = vmul.f32 0.01, %v340_v10 }
  0x31   : > { %1929 = vmatprep.subr.bf16.mxu1 %v3382_v62  ;;  %1961 = vmatprep.subr.bf16.mxu0 %v3383_v47  ;;  %v3386_v47 = vpack.c.bf16 %v2375_v27, %v2370_v26  ;;  %v350_v33 = vadd.f32 %v2273_v44, %v321_v37  ;;  %v3387_v14 = vrot.slane %v2484_v5, 1  ;;  %v2660_v19 = vsel %vm580_vm0, %v602_v59, %v604_v40  ;;  %v2667_v27 = vld [vmem:[%s3356_s1 + $0x1c0] sm:$0xff]  ;;  %v281_v37 = vld [vmem:[%s2225_s11 + $0x38] sm:$0xff] }
  0x32   : > { %vm364_vm13 = vcmp.ge.f32.partialorder %v339_v36, 0.0  ;;  %v389_v25 = vmul.f32 0.01, %v339_v36  ;;  %vm374_vm15 = vcmp.ge.f32.partialorder %v349_v11, 0.0  ;;  %v399_v26 = vmul.f32 0.01, %v349_v11 }
  0x33   : > { %1526 = vmatmul.mubr.msk.f32.vlgmr.msra.gmra.mrb[0].mxu0 %vm445_vm1, %v2315_v8  ;;  %1534 = vmatmul.mubr.msk.f32.vlgmr.msra.gmra.mrb[0].mxu1 %vm447_vm2, %v2339_v16  ;;  %v2657_v35 = vsel %vm580_vm0, %v3387_v14, %v586_v53  ;;  %v3388_v62 = vpack.c.bf16 %v2401_v41, %v2383_v32  ;;  %v3389_v5 = vpack.c.bf16 %v2411_v46, %v2406_v42  ;;  %vm375_vm3 = vcmp.ge.f32.partialorder %v350_v33, 0.0 }
  0x34   : > { %1931 = vmatpush3.bf16.msra.mxu1 %v3385_v38  ;;  %1963 = vmatpush3.bf16.msra.mxu0 %v3386_v47  ;;  %v2662_v20 = vsel %vm364_vm13, %v339_v36, %v389_v25  ;;  %v2676_v1 = vsel %vm365_vm14, %v340_v10, %v390_v12  ;;  %v400_v59 = vmul.f32 0.01, %v350_v33  ;;  %v2684_v25 = vld [vmem:[%s3356_s1 + $0x1c8] sm:$0xff]  ;;  %v2695_v32 = vsel %vm580_vm0, %v586_v53, %v2456_v63  ;;  %v2708_v10 = vld [vmem:[%s3356_s1 + $0x240] sm:$0xff] }
  0x35   : > { %754 = vmatprep.mubr.f32.mxu0 %v2558_v60  ;;  %794 = vmatprep.mubr.f32.mxu1 %v2629_v49  ;;  %v535_v36 = vsel %vm446_vm9, %v2662_v20, 0.0  ;;  %v291_v38 = vld [vmem:[%s2225_s11 + $0x88] sm:$0xff]  ;;  %v2700_v41 = vsel %vm446_vm9, %v2676_v1, 0.0  ;;  %v2703_v46 = vsel %vm374_vm15, %v349_v11, %v399_v26  ;;  %v2718_v53 = vld [vmem:[%s3356_s1 + $0x140] sm:$0xff]  ;;  %v3390_v12 = vpack.c.bf16 %v2428_v51, %v2423_v50  ;;  %v2742_v51 = vld [vmem:[%s3356_s1 + $0x2d0] sm:$0xff] }
  0x36   : > { %1933 = vmatprep.subr.bf16.mxu1 %v3388_v62  ;;  %1965 = vmatprep.subr.bf16.mxu0 %v3389_v5  ;;  %v590_v42 = vrot.slane %v535_v36, 1  ;;  %v2713_v47 = vld [vmem:[%s3356_s1 + $0x248] sm:$0xff]  ;;  %v3391_v11 = vpack.c.bf16 %v2442_v54, %v2433_v52  ;;  %v3371_v14 = vrot.slane %v2700_v41, 1  ;;  %v2728_v26 = vsel %vm375_vm3, %v350_v33, %v400_v59  ;;  %v2747_v52 = vld [vmem:[%s3356_s1 + $0x2d8] sm:$0xff]  ;;  %v282_v59 = vld [vmem:[%s2225_s11 + $0x40] sm:$0xff] }
  0x37   : > { %1527 = vmatmul.mubr.msk.f32.gmra.mrb[2].mxu0 %vm445_vm1, %v2317_v9  ;;  %1535 = vmatmul.mubr.msk.f32.gmra.mrb[2].mxu1 %vm447_vm2, %v2341_v17  ;;  %v545_v62 = vsel %vm448_vm12, %v2703_v46, 0.0  ;;  %v2736_v5 = vld [vmem:[%s3356_s1 + $0x148] sm:$0xff]  ;;  %v312_v50 = vmul.f32 %v2268_v43, %v281_v37  ;;  %v2753_v54 = vsel %vm580_vm0, %v604_v40, %v2456_v63  ;;  %v2758_v33 = vsel %vm448_vm12, %v2728_v26, 0.0 }
  0x38   : > { %1935 = vmatpush3.bf16.msra.mxu1 %v3390_v12  ;;  %1967 = vmatpush3.bf16.msra.mxu0 %v3391_v11  ;;  %3392 = vst [vmem:[#allocation7_spill] sm:$0xff] %v2753_v54  ;;  %v322_v36 = vmul.f32 %v2268_v43, %v291_v38  ;;  %v3393_v12 = vpack.c.bf16 %v2454_v55, %v2449_v61  ;;  %v608_v40 = vrot.slane %v545_v62, 1  ;;  %v3372_v29 = vrot.slane %v2758_v33, 1  ;;  %v2777_v38 = vld [vmem:[%s3356_s1 + $0x1d0] sm:$0xff]  ;;  %v2782_v61 = vld [vmem:[%s3356_s1 + $0x1d8] sm:$0xff]  ;;  %v2899_v37 = vld [vmem:[%s3356_s1 + $0x268] sm:$0xff] }
  0x39   : > { %759 = vmatprep.mubr.f32.mxu0 %v2657_v35  ;;  %799 = vmatprep.mubr.f32.mxu1 %v2660_v19  ;;  %v3394_v11 = vpack.c.bf16 %v2473_v4, %v2468_v3  ;;  %v341_v6 = vadd.f32 %v2273_v44, %v312_v50  ;;  %v292_v55 = vld [vmem:[%s2225_s11 + $0x90] sm:$0xff]  ;;  %v3395_v50 = vpack.c.bf16 %v2493_v22, %v2478_v56  ;;  %v2815_v56 = vld [vmem:[%s3356_s1 + $0x258] sm:$0xff] }
  0x3a   : > { %1937 = vmatprep.subr.bf16.mxu1 %v3393_v12  ;;  %v351_v4 = vadd.f32 %v2273_v44, %v322_v36  ;;  %v3396_v12 = vpack.c.bf16 %v2503_v28, %v2498_v24  ;;  %v2810_v36 = vld [vmem:[%s3356_s1 + $0x250] sm:$0xff]  ;;  %v313_v22 = vmul.f32 %v2268_v43, %v282_v59  ;;  %v2837_v18 = vsel %vm580_vm0, %v608_v40, %v3372_v29 }
  0x3b   : > { %1969 = vmatprep.subr.bf16.mxu0 %v3394_v11  ;;  %1528 = vmatmul.mubr.msk.f32.gmra.mrb[4].mxu0 %vm445_vm1, %v2461_v0  ;;  %v2805_v11 = vsel %vm580_vm0, %v590_v42, %v3371_v14  ;;  %vm366_vm4 = vcmp.ge.f32.partialorder %v341_v6, 0.0  ;;  %v391_v3 = vmul.f32 0.01, %v341_v6  ;;  %v2825_v42 = vld [vmem:[%s3356_s1 + $0x150] sm:$0xff]  ;;  %v2844_v14 = vld [vmem:[%s3356_s1 + $0x158] sm:$0xff] }
  0x3c   : > { %1536 = vmatmul.mubr.msk.f32.gmra.mrb[4].mxu1 %vm447_vm2, %v2508_v31  ;;  %1971 = vmatpush3.bf16.msra.mxu0 %v3396_v12  ;;  %vm376_vm5 = vcmp.ge.f32.partialorder %v351_v4, 0.0  ;;  %v401_v24 = vmul.f32 0.01, %v351_v4  ;;  %v3397_v12 = vpack.c.bf16 %v2522_v57, %v2517_v48  ;;  %v3398_v59 = vld [vmem:[#allocation4_spill] sm:$0xff]  ;;  %v2850_v48 = vld [vmem:[%s3356_s1 + $0x2e0] sm:$0xff]  ;;  %v3401_v57 = vld [vmem:[#allocation5_spill] sm:$0xff] }
  0x3d   : > { %1939 = vmatpush3.bf16.msra.mxu1 %v3395_v50  ;;  %764 = vmatprep.mubr.f32.mxu0 %v2695_v32  ;;  %v323_v50 = vmul.f32 %v2268_v43, %v292_v55  ;;  %v3399_v62 = vpack.c.bf16 %v2549_v2, %v3398_v59  ;;  %3400 = vst [vmem:[#allocation4_spill] sm:$0xff] %v2837_v18  ;;  %v2855_v2 = vld [vmem:[%s3356_s1 + $0x2e8] sm:$0xff] }
  0x3e   : > { %804 = vmatprep.mubr.f32.mxu1 %v2753_v54  ;;  %1941 = vmatprep.subr.bf16.mxu1 %v3397_v12  ;;  %v2839_v28 = vsel %vm366_vm4, %v341_v6, %v391_v3  ;;  %v342_v55 = vadd.f32 %v2273_v44, %v313_v22  ;;  %v3402_v6 = vld [vmem:[#allocation6_spill] sm:$0xff]  ;;  %v2867_v3 = vsel %vm376_vm5, %v351_v4, %v401_v24  ;;  %v2880_v59 = vld [vmem:[%s3356_s1 + $0x1e8] sm:$0xff] }
  0x3f   : > { %1973 = vmatprep.subr.bf16.mxu0 %v3399_v62  ;;  %1529 = vmatmul.mubr.msk.f32.gmra.mrb[6].mxu0 %vm445_vm1, %v3401_v57  ;;  %v537_v40 = vsel %vm446_vm9, %v2839_v28, 0.0  ;;  %v1950_v62 = vpack.c.bf16 %v2815_v56, %v2810_v36  ;;  %v352_v22 = vadd.f32 %v2273_v44, %v323_v50  ;;  %v2875_v12 = vld [vmem:[%s3356_s1 + $0x1e0] sm:$0xff]  ;;  %v3403_v36 = vpack.c.bf16 %v2583_v13, %v2578_v23  ;;  %v295_v54 = vld [vmem:[%s2225_s11 + $0xa8] sm:$0xff] }
  0x40   : > { %1537 = vmatmul.mubr.msk.f32.gmra.mrb[6].mxu1 %vm447_vm2, %v3402_v6  ;;  %v2885_v4 = vld [vmem:[%s3356_s1 + $0x260] sm:$0xff]  ;;  %v3404_v56 = vpack.c.bf16 %v2603_v15, %v2588_v58  ;;  %v593_v24 = vrot.slane %v537_v40, 1  ;;  %v547_v50 = vsel %vm448_vm12, %v2867_v3, 0.0  ;;  %vm367_vm6 = vcmp.ge.f32.partialorder %v342_v55, 0.0  ;;  %769 = vmatprep.mubr.f32.mxu0 %v2805_v11  ;;  %v2913_v40 = vld [vmem:[%s3356_s1 + $0x168] sm:$0xff] }
  0x41   : > { %1943 = vmatpush3.bf16.msra.mxu1 %v3403_v36  ;;  %v392_v29 = vmul.f32 0.01, %v342_v55  ;;  %809 = vmatprep.mubr.f32.mxu1 %v2837_v18  ;;  %v611_v15 = vrot.slane %v547_v50, 1  ;;  %v1982_v23 = vpack.c.bf16 %v2844_v14, %v2825_v42  ;;  %vm377_vm7 = vcmp.ge.f32.partialorder %v352_v22, 0.0  ;;  %v2908_v58 = vld [vmem:[%s3356_s1 + $0x160] sm:$0xff] }
  0x42   : > { %1975 = vmatpush3.bf16.msra.mxu0 %v3404_v56  ;;  %v402_v13 = vmul.f32 0.01, %v352_v22  ;;  %v3405_v36 = vpack.c.bf16 %v2615_v30, %v2610_v7  ;;  %v3406_v56 = vpack.c.bf16 %v2684_v25, %v2667_v27  ;;  %v3407_v14 = vrot.slane %v2700_v41, 1  ;;  %v294_v6 = vld [vmem:[%s2225_s11 + $0xa0] sm:$0xff]  ;;  %v296_v7 = vld [vmem:[%s2225_s11 + $0xb0] sm:$0xff] }
  0x43   : > { %v2926_v50 = vsel %vm367_vm6, %v342_v55, %v392_v29  ;;  %v1952_v18 = vpack.c.bf16 %v2855_v2, %v2850_v48  ;;  %v2933_v30 = vadd.s32 4, %v2214_v21  ;;  %1530 = vmatmul.mubr.msk.f32.gmra.mrb[8].mxu0 %vm446_vm9, %v2662_v20  ;;  %v3408_v29 = vrot.slane %v2758_v33, 1  ;;  %v2958_v48 = vld [vmem:[%s3356_s1 + $0x2f0] sm:$0xff]  ;;  %v2963_v33 = vld [vmem:[%s3356_s1 + $0x2f8] sm:$0xff]  ;;  %v3415_v21 = vld [vmem:[#allocation7_spill] sm:$0xff] }
  0x44   : > { %1945 = vmatprep.subr.bf16.mxu1 %v3405_v36  ;;  %1977 = vmatprep.subr.bf16.mxu0 %v3406_v56  ;;  %v2924_v42 = vsel %vm580_vm0, %v3407_v14, %v593_v24  ;;  %v538_v25 = vsel %vm446_vm9, %v2926_v50, 0.0  ;;  %v2951_v41 = vsel %vm377_vm7, %v352_v22, %v402_v13  ;;  %v1984_v55 = vpack.c.bf16 %v2880_v59, %v2875_v12  ;;  %v297_v2 = vld [vmem:[%s2225_s11 + $0xb8] sm:$0xff] }
  0x45   : > { %1538 = vmatmul.mubr.msk.f32.gmra.mrb[8].mxu1 %vm448_vm12, %v2703_v46  ;;  %v2945_v27 = vsel %vm580_vm0, %v3408_v29, %v611_v15  ;;  %v3409_v36 = vpack.c.bf16 %v2713_v47, %v2708_v10  ;;  %v3410_v22 = vpack.c.bf16 %v2736_v5, %v2718_v53  ;;  %v595_v12 = vrot.slane %v538_v25, 1  ;;  %v1572_v10 = vld [vmem:[%s3356_s1 + $0x1f0] sm:$0xff]  ;;  %v1573_v47 = vld [vmem:[%s3356_s1 + $0x1f8] sm:$0xff]  ;;  %774 = vmatprep.mubr.f32.mxu0 %v2924_v42 }
  0x46   : > { %v548_v59 = vsel %vm448_vm12, %v2951_v41, 0.0  ;;  %v1954_v13 = vpack.c.bf16 %v2899_v37, %v2885_v4  ;;  %v1986_v56 = vpack.c.bf16 %v2913_v40, %v2908_v58  ;;  %814 = vmatprep.mubr.f32.mxu1 %v2945_v27  ;;  %v325_v5 = vmul.f32 %v2268_v43, %v294_v6 }
  0x47   : > { %1947 = vmatpush3.bf16.msra.mxu1 %v3409_v36  ;;  %1979 = vmatpush3.bf16.msra.mxu0 %v3410_v22  ;;  %v613_v53 = vrot.slane %v548_v59, 1  ;;  %v326_v37 = vmul.f32 %v2268_v43, %v295_v54  ;;  %v327_v4 = vmul.f32 %v2268_v43, %v296_v7  ;;  %v3411_v58 = vpack.c.bf16 %v2747_v52, %v2742_v51  ;;  %v1556_v7 = vld [vmem:[%s3356_s1 + $0x170] sm:$0xff] }
  0x48   : > { %v3412_v40 = vpack.c.bf16 %v2782_v61, %v2777_v38  ;;  %v2997_v14 = vsel %vm580_vm0, %v593_v24, %v595_v12  ;;  %v1956_v29 = vpack.c.bf16 %v2963_v33, %v2958_v48  ;;  %v328_v6 = vmul.f32 %v2268_v43, %v297_v2  ;;  %1531 = vmatmul.mubr.msk.f32.gmra.mrb[10].mxu0 %vm446_vm9, %v2676_v1  ;;  %v1588_v43 = vld [vmem:[%s3356_s1 + $0x270] sm:$0xff]  ;;  %v1589_v38 = vld [vmem:[%s3356_s1 + $0x278] sm:$0xff] }
  0x49   : > { %1949 = vmatprep.subr.bf16.mxu1 %v3411_v58  ;;  %1539 = vmatmul.mubr.msk.f32.gmra.mrb[10].mxu1 %vm448_vm12, %v2728_v26  ;;  %v3009_v51 = vsel %vm580_vm0, %v611_v15, %v613_v53  ;;  %v1988_v52 = vpack.c.bf16 %v1573_v47, %v1572_v10  ;;  %v354_v54 = vadd.f32 %v2273_v44, %v325_v5  ;;  %vm449_vm8 = vcmp.lt.s32.totalorder %v2933_v30, 32 }
  0x4a   : > { %1981 = vmatprep.subr.bf16.mxu0 %v3412_v40  ;;  %v355_v61 = vadd.f32 %v2273_v44, %v326_v37  ;;  %v356_v24 = vadd.f32 %v2273_v44, %v327_v4  ;;  %v357_v15 = vadd.f32 %v2273_v44, %v328_v6  ;;  %779 = vmatprep.mubr.f32.mxu0 %v2997_v14  ;;  %v1557_v44 = vld [vmem:[%s3356_s1 + $0x178] sm:$0xff] }
  0x4b   : > { %1951 = vmatpush3.bf16.msra.mxu1 %v1950_v62  ;;  %1983 = vmatpush3.bf16.msra.mxu0 %v1982_v23  ;;  %v3026_v62 = vsel %vm580_vm0, %v595_v12, %v2456_v63  ;;  %v3030_v23 = vsel %vm580_vm0, %v613_v53, %v2456_v63  ;;  %vm379_vm10 = vcmp.ge.f32.partialorder %v354_v54, 0.0  ;;  %v404_v25 = vmul.f32 0.01, %v354_v54 }
  0x4c   : > { %819 = vmatprep.mubr.f32.mxu1 %v3009_v51  ;;  %1953 = vmatprep.subr.bf16.mxu1 %v1952_v18  ;;  %vm380_vm11 = vcmp.ge.f32.partialorder %v355_v61, 0.0  ;;  %v405_v48 = vmul.f32 0.01, %v355_v61  ;;  %vm381_vm13 = vcmp.ge.f32.partialorder %v356_v24, 0.0  ;;  %v406_v33 = vmul.f32 0.01, %v356_v24 }
  0x4d   : > { %1985 = vmatprep.subr.bf16.mxu0 %v1984_v55  ;;  %1532 = vmatmul.mubr.msk.f32.gmra.mrb[12].mxu0 %vm446_vm9, %v2839_v28  ;;  %v1958_v2 = vpack.c.bf16 %v1589_v38, %v1588_v43  ;;  %v3044_v36 = vsel %vm379_vm10, %v354_v54, %v404_v25  ;;  %vm382_vm14 = vcmp.ge.f32.partialorder %v357_v15, 0.0  ;;  %v407_v22 = vmul.f32 0.01, %v357_v15 }
  0x4e   : > { %1540 = vmatmul.mubr.msk.f32.gmra.mrb[12].mxu1 %vm448_vm12, %v2867_v3  ;;  %v1990_v18 = vpack.c.bf16 %v1557_v44, %v1556_v7  ;;  %v3046_v55 = vsel %vm380_vm11, %v355_v61, %v405_v48  ;;  %v550_v12 = vsel %vm449_vm8, %v3044_v36, 0.0  ;;  %v3051_v59 = vsel %vm381_vm13, %v356_v24, %v406_v33  ;;  %784 = vmatprep.mubr.f32.mxu0 %v3026_v62 }
  0x4f   : > { %1955 = vmatpush3.bf16.msra.mxu1 %v1954_v13  ;;  %1987 = vmatpush3.bf16.msra.mxu0 %v1986_v56  ;;  %v551_v10 = vsel %vm449_vm8, %v3046_v55, 0.0  ;;  %v617_v47 = vrot.slane %v550_v12, 1  ;;  %v552_v13 = vsel %vm449_vm8, %v3051_v59, 0.0  ;;  %v3061_v56 = vsel %vm382_vm14, %v357_v15, %v407_v22 }
  0x50   : > { %824 = vmatprep.mubr.f32.mxu1 %v3030_v23  ;;  %1957 = vmatprep.subr.bf16.mxu1 %v1956_v29  ;;  %v618_v53 = vrot.slane %v551_v10, 1  ;;  %v620_v5 = vrot.slane %v552_v13, 1  ;;  %v553_v37 = vsel %vm449_vm8, %v3061_v56, 0.0  ;;  %v3413_v29 = vld [vmem:[#allocation2_spill] sm:$0xff] }
  0x51   : > { %1989 = vmatprep.subr.bf16.mxu0 %v1988_v52  ;;  %1533 = vmatmul.mubr.msk.f32.gmra.mrb[14].mxu0 %vm446_vm9, %v2926_v50  ;;  %v622_v4 = vrot.slane %v553_v37, 1 }
  0x52   : > { %1541 = vmatmul.mubr.msk.f32.gmra.mrb[14].mxu1 %vm448_vm12, %v2951_v41  ;;  %v619_v58 = vsel %vm580_vm0, %v617_v47, %v618_v53  ;;  %v621_v40 = vsel %vm580_vm0, %v618_v53, %v620_v5  ;;  %1105 = vmatprep.mubr.f32.mxu0 %v3413_v29 }
  0x53   : > { %1959 = vmatpush3.bf16.msra.mxu1 %v1958_v2  ;;  %1991 = vmatpush3.bf16.msra.mxu0 %v1990_v18  ;;  %v623_v6 = vsel %vm580_vm0, %v620_v5, %v622_v4  ;;  %v625_v52 = vsel %vm580_vm0, %v622_v4, %v2456_v63  ;;  %v3417_v63 = vld [vmem:[#allocation4_spill] sm:$0xff]  ;;  %vm1366_vm0 = vcmask 1040384  }
  0x54   : > { %960 = vmatprep.mubr.f32.mxu1 %v2805_v11 }
  0x56   : > { %1606 = vmatmul.mubr.msk.f32.vlgmr.msra.gmra.mrb[16].mxu1 %vm446_vm9, %v2662_v20  ;;  %1622 = vmatmul.mubr.msk.f32.vlgmr.msra.gmra.mrb[16].mxu0 %vm445_vm1, %v2315_v8  ;;  %v3414_v8 = vld [vmem:[#allocation3_spill] sm:$0xff] }
  0x57   : > { %965 = vmatprep.mubr.f32.mxu1 %v2924_v42  ;;  %1110 = vmatprep.mubr.f32.mxu0 %v2558_v60 }
  0x5a   : > { %1607 = vmatmul.mubr.msk.f32.gmra.mrb[18].mxu1 %vm446_vm9, %v2676_v1  ;;  %1623 = vmatmul.mubr.msk.f32.gmra.mrb[18].mxu0 %vm445_vm1, %v2317_v9  ;;  %v3416_v9 = vld [vmem:[#allocation6_spill] sm:$0xff] }
  0x5b   : > { %970 = vmatprep.mubr.f32.mxu1 %v2997_v14  ;;  %1115 = vmatprep.mubr.f32.mxu0 %v2657_v35 }
  0x5e   : > { %1608 = vmatmul.mubr.msk.f32.gmra.mrb[20].mxu1 %vm446_vm9, %v2839_v28  ;;  %1624 = vmatmul.mubr.msk.f32.gmra.mrb[20].mxu0 %vm445_vm1, %v2461_v0 }
  0x5f   : > { %975 = vmatprep.mubr.f32.mxu1 %v3026_v62  ;;  %1120 = vmatprep.mubr.f32.mxu0 %v2695_v32 }
  0x62   : > { %1609 = vmatmul.mubr.msk.f32.gmra.mrb[22].mxu1 %vm446_vm9, %v2926_v50  ;;  %1625 = vmatmul.mubr.msk.f32.gmra.mrb[22].mxu0 %vm445_vm1, %v3401_v57  ;;  %vm1368_vm1 = vcmask 517120  }
  0x63   : > { %980 = vmatprep.mubr.f32.mxu1 %v3414_v8  ;;  %1125 = vmatprep.mubr.f32.mxu0 %v2805_v11 }
  0x66   : > { %1610 = vmatmul.mubr.msk.f32.gmra.mrb[24].mxu1 %vm447_vm2, %v2339_v16  ;;  %1626 = vmatmul.mubr.msk.f32.gmra.mrb[24].mxu0 %vm446_vm9, %v2662_v20 }
  0x67   : > { %985 = vmatprep.mubr.f32.mxu1 %v2629_v49  ;;  %1130 = vmatprep.mubr.f32.mxu0 %v2924_v42 }
  0x6a   : > { %1611 = vmatmul.mubr.msk.f32.gmra.mrb[26].mxu1 %vm447_vm2, %v2341_v17  ;;  %1627 = vmatmul.mubr.msk.f32.gmra.mrb[26].mxu0 %vm446_vm9, %v2676_v1 }
  0x6b   : > { %990 = vmatprep.mubr.f32.mxu1 %v2660_v19  ;;  %1135 = vmatprep.mubr.f32.mxu0 %v2997_v14 }
  0x6e   : > { %1612 = vmatmul.mubr.msk.f32.gmra.mrb[28].mxu1 %vm447_vm2, %v2508_v31  ;;  %1628 = vmatmul.mubr.msk.f32.gmra.mrb[28].mxu0 %vm446_vm9, %v2839_v28 }
  0x6f   : > { %995 = vmatprep.mubr.f32.mxu1 %v3415_v21  ;;  %1140 = vmatprep.mubr.f32.mxu0 %v3026_v62 }
  0x72   : > { %1613 = vmatmul.mubr.msk.f32.gmra.mrb[30].mxu1 %vm447_vm2, %v3416_v9  ;;  %1629 = vmatmul.mubr.msk.f32.gmra.mrb[30].mxu0 %vm446_vm9, %v2926_v50 }
  0x73   : > { %1000 = vmatprep.mubr.f32.mxu1 %v3417_v63  ;;  %1145 = vmatprep.mubr.f32.mxu0 %v3414_v8 }
  0x76   : > { %1614 = vmatmul.mubr.msk.f32.gmra.mrb[32].mxu1 %vm448_vm12, %v2703_v46  ;;  %1630 = vmatmul.mubr.msk.f32.gmra.mrb[32].mxu0 %vm447_vm2, %v2339_v16  ;;  %v3207_v16 = vld [vmem:[%s3357_s2] ss:$0 sm:$0xff] }
  0x77   : > { %1005 = vmatprep.mubr.f32.mxu1 %v2945_v27  ;;  %1150 = vmatprep.mubr.f32.mxu0 %v2629_v49 }
  0x7a   : > { %1615 = vmatmul.mubr.msk.f32.gmra.mrb[34].mxu1 %vm448_vm12, %v2728_v26  ;;  %1631 = vmatmul.mubr.msk.f32.gmra.mrb[34].mxu0 %vm447_vm2, %v2341_v17 }
  0x7b   : > { %1010 = vmatprep.mubr.f32.mxu1 %v3009_v51  ;;  %1155 = vmatprep.mubr.f32.mxu0 %v2660_v19 }
  0x7e   : > { %1616 = vmatmul.mubr.msk.f32.gmra.mrb[36].mxu1 %vm448_vm12, %v2867_v3  ;;  %1632 = vmatmul.mubr.msk.f32.gmra.mrb[36].mxu0 %vm447_vm2, %v2508_v31 }
  0x7f   : > { %1015 = vmatprep.mubr.f32.mxu1 %v3030_v23  ;;  %1160 = vmatprep.mubr.f32.mxu0 %v3415_v21 }
  0x82   : > { %1617 = vmatmul.mubr.msk.f32.gmra.mrb[38].mxu1 %vm448_vm12, %v2951_v41  ;;  %1633 = vmatmul.mubr.msk.f32.gmra.mrb[38].mxu0 %vm447_vm2, %v3416_v9 }
  0x83   : > { %1020 = vmatprep.mubr.f32.mxu1 %v619_v58  ;;  %1165 = vmatprep.mubr.f32.mxu0 %v3417_v63 }
  0x86   : > { %1618 = vmatmul.mubr.msk.f32.gmra.mrb[40].mxu1 %vm449_vm8, %v3044_v36  ;;  %1634 = vmatmul.mubr.msk.f32.gmra.mrb[40].mxu0 %vm448_vm12, %v2703_v46 }
  0x87   : > { %1025 = vmatprep.mubr.f32.mxu1 %v621_v40  ;;  %1170 = vmatprep.mubr.f32.mxu0 %v2945_v27 }
  0x8a   : > { %1619 = vmatmul.mubr.msk.f32.gmra.mrb[42].mxu1 %vm449_vm8, %v3046_v55  ;;  %1635 = vmatmul.mubr.msk.f32.gmra.mrb[42].mxu0 %vm448_vm12, %v2728_v26 }
  0x8b   : > { %1030 = vmatprep.mubr.f32.mxu1 %v623_v6  ;;  %1175 = vmatprep.mubr.f32.mxu0 %v3009_v51 }
  0x8e   : > { %1620 = vmatmul.mubr.msk.f32.gmra.mrb[44].mxu1 %vm449_vm8, %v3051_v59  ;;  %1636 = vmatmul.mubr.msk.f32.gmra.mrb[44].mxu0 %vm448_vm12, %v2867_v3 }
  0x8f   : > { %1035 = vmatprep.mubr.f32.mxu1 %v625_v52  ;;  %1180 = vmatprep.mubr.f32.mxu0 %v3030_v23 }
  0x92   : > { %1621 = vmatmul.mubr.msk.f32.gmra.mrb[46].mxu1 %vm449_vm8, %v3061_v56  ;;  %1637 = vmatmul.mubr.msk.f32.gmra.mrb[46].mxu0 %vm448_vm12, %v2951_v41 }
 0x106   : > { %v1688_v34 = vpop.f32.mrb[0].mxu0  ;;  %v1712_v39 = vpop.f32.mrb[0].mxu1 }
 0x107   : > { %v1689_v17 = vpop.f32.mrb[1].mxu0  ;;  %v1713_v0 = vpop.f32.mrb[1].mxu1 }
 0x108   : > { %v1690_v31 = vadd.f32 %v1689_v17, %v1688_v34  ;;  %v1714_v49 = vadd.f32 %v1713_v0, %v1712_v39 }
 0x10a   : > { %v752_v45 = vadd.f32 %v1690_v31, %v3207_v16  ;;  %v3216_v60 = vadd.f32 %v1714_v49, %v3207_v16  ;;  %v1691_v35 = vpop.f32.mrb[2].mxu0  ;;  %v1715_v19 = vpop.f32.mrb[2].mxu1 }
 0x10b   : > { %v1692_v20 = vpop.f32.mrb[3].mxu0  ;;  %v1716_v1 = vpop.f32.mrb[3].mxu1 }
 0x10c   : > { %1202 = vst [vmem:[%s3212_s15] sm:$0xff] %v752_v45  ;;  %1210 = vst [vmem:[%s3212_s15 + $0x80] sm:$0xff] %v3216_v60  ;;  %v1693_v32 = vadd.f32 %v1692_v20, %v1691_v35  ;;  %v1717_v46 = vadd.f32 %v1716_v1, %v1715_v19  ;;  %v1278_v50 = vmul.f32 %v752_v45, %v752_v45 }
 0x10e   : > { %v757_v26 = vadd.f32 %v1693_v32, %v3207_v16  ;;  %v3223_v11 = vadd.f32 %v1717_v46, %v3207_v16  ;;  %v1694_v28 = vpop.f32.mrb[4].mxu0 }
 0x10f   : > { %v1718_v57 = vpop.f32.mrb[4].mxu1  ;;  %v1695_v3 = vpop.f32.mrb[5].mxu0 }
 0x110   : > { %v1719_v42 = vpop.f32.mrb[5].mxu1  ;;  %1203 = vst [vmem:[%s3212_s15 + $0x8] sm:$0xff] %v757_v26  ;;  %v1235_v30 = vadd.f32 %v757_v26, %v752_v45  ;;  %v1279_v27 = vmul.f32 %v757_v26, %v757_v26  ;;  %1211 = vst [vmem:[%s3212_s15 + $0x88] sm:$0xff] %v3223_v11  ;;  %v1696_v41 = vadd.f32 %v1695_v3, %v1694_v28 }
 0x111   : > { %v1720_v14 = vadd.f32 %v1719_v42, %v1718_v57 }
 0x112   : > { %v1294_v51 = vadd.f32 %v1279_v27, %v1278_v50  ;;  %v762_v54 = vadd.f32 %v1696_v41, %v3207_v16  ;;  %v1697_v43 = vpop.f32.mrb[6].mxu0 }
 0x113   : > { %v1721_v38 = vpop.f32.mrb[6].mxu1  ;;  %v3230_v61 = vadd.f32 %v1720_v14, %v3207_v16  ;;  %v1698_v24 = vpop.f32.mrb[7].mxu0 }
 0x114   : > { %v1722_v15 = vpop.f32.mrb[7].mxu1  ;;  %1204 = vst [vmem:[%s3212_s15 + $0x10] sm:$0xff] %v762_v54  ;;  %v1236_v62 = vadd.f32 %v1235_v30, %v762_v54  ;;  %v1280_v23 = vmul.f32 %v762_v54, %v762_v54  ;;  %v1699_v7 = vadd.f32 %v1698_v24, %v1697_v43 }
 0x115   : > { %v1723_v44 = vadd.f32 %v1722_v15, %v1721_v38  ;;  %1212 = vst [vmem:[%s3212_s15 + $0x90] sm:$0xff] %v3230_v61  ;;  %v1286_v15 = vmul.f32 %v3216_v60, %v3216_v60 }
 0x116   : > { %v1295_v25 = vadd.f32 %v1294_v51, %v1280_v23  ;;  %v767_v48 = vadd.f32 %v1699_v7, %v3207_v16  ;;  %v1700_v2 = vpop.f32.mrb[8].mxu0 }
 0x117   : > { %v3237_v33 = vadd.f32 %v1723_v44, %v3207_v16  ;;  %v1701_v22 = vpop.f32.mrb[9].mxu0 }
 0x118   : > { %v1724_v36 = vpop.f32.mrb[8].mxu1  ;;  %1205 = vst [vmem:[%s3212_s15 + $0x18] sm:$0xff] %v767_v48  ;;  %v1237_v55 = vadd.f32 %v1236_v62, %v767_v48  ;;  %v1281_v12 = vmul.f32 %v767_v48, %v767_v48  ;;  %v1702_v59 = vadd.f32 %v1701_v22, %v1700_v2 }
 0x119   : > { %v1725_v18 = vpop.f32.mrb[9].mxu1  ;;  %1213 = vst [vmem:[%s3212_s15 + $0x98] sm:$0xff] %v3237_v33 }
 0x11a   : > { %v1726_v10 = vadd.f32 %v1725_v18, %v1724_v36  ;;  %v1296_v47 = vadd.f32 %v1295_v25, %v1281_v12  ;;  %v772_v13 = vadd.f32 %v1702_v59, %v3207_v16  ;;  %v1287_v25 = vmul.f32 %v3223_v11, %v3223_v11 }
 0x11b   : > { %v1703_v56 = vpop.f32.mrb[10].mxu0 }
 0x11c   : > { %v1727_v53 = vpop.f32.mrb[10].mxu1  ;;  %v3244_v5 = vadd.f32 %v1726_v10, %v3207_v16  ;;  %v1704_v37 = vpop.f32.mrb[11].mxu0  ;;  %1206 = vst [vmem:[%s3212_s15 + $0x40] sm:$0xff] %v772_v13  ;;  %v1238_v58 = vadd.f32 %v1237_v55, %v772_v13  ;;  %v1282_v40 = vmul.f32 %v772_v13, %v772_v13 }
 0x11d   : > { %v1728_v4 = vpop.f32.mrb[11].mxu1  ;;  %v1705_v29 = vadd.f32 %v1704_v37, %v1703_v56  ;;  %v1289_v37 = vmul.f32 %v3237_v33, %v3237_v33 }
 0x11e   : > { %v1729_v6 = vadd.f32 %v1728_v4, %v1727_v53  ;;  %1214 = vst [vmem:[%s3212_s15 + $0xc0] sm:$0xff] %v3244_v5  ;;  %v1297_v52 = vadd.f32 %v1296_v47, %v1282_v40 }
 0x11f   : > { %v777_v8 = vadd.f32 %v1705_v29, %v3207_v16 }
 0x120   : > { %v3251_v21 = vadd.f32 %v1729_v6, %v3207_v16  ;;  %v1706_v9 = vpop.f32.mrb[12].mxu0 }
 0x121   : > { %v1730_v63 = vpop.f32.mrb[12].mxu1  ;;  %v1707_v34 = vpop.f32.mrb[13].mxu0  ;;  %1207 = vst [vmem:[%s3212_s15 + $0x48] sm:$0xff] %v777_v8  ;;  %v1239_v17 = vadd.f32 %v1238_v58, %v777_v8  ;;  %v1283_v0 = vmul.f32 %v777_v8, %v777_v8 }
 0x122   : > { %v1731_v39 = vpop.f32.mrb[13].mxu1  ;;  %1215 = vst [vmem:[%s3212_s15 + $0xc8] sm:$0xff] %v3251_v21  ;;  %v1708_v31 = vadd.f32 %v1707_v34, %v1706_v9 }
 0x123   : > { %v1732_v49 = vadd.f32 %v1731_v39, %v1730_v63  ;;  %v1298_v45 = vadd.f32 %v1297_v52, %v1283_v0 }
 0x124   : > { %v782_v35 = vadd.f32 %v1708_v31, %v3207_v16  ;;  %v1709_v19 = vpop.f32.mrb[14].mxu0  ;;  %v1291_v31 = vmul.f32 %v3251_v21, %v3251_v21 }
 0x125   : > { %v1733_v20 = vpop.f32.mrb[14].mxu1  ;;  %v3258_v1 = vadd.f32 %v1732_v49, %v3207_v16  ;;  %v1710_v32 = vpop.f32.mrb[15].mxu0 }
 0x126   : > { %v1734_v46 = vpop.f32.mrb[15].mxu1  ;;  %1208 = vst [vmem:[%s3212_s15 + $0x50] sm:$0xff] %v782_v35  ;;  %v1240_v26 = vadd.f32 %v1239_v17, %v782_v35  ;;  %v1284_v28 = vmul.f32 %v782_v35, %v782_v35  ;;  %v1711_v57 = vadd.f32 %v1710_v32, %v1709_v19 }
 0x127   : > { %v1735_v3 = vadd.f32 %v1734_v46, %v1733_v20  ;;  %1216 = vst [vmem:[%s3212_s15 + $0xd0] sm:$0xff] %v3258_v1 }
 0x128   : > { %v1299_v42 = vadd.f32 %v1298_v45, %v1284_v28  ;;  %v787_v50 = vadd.f32 %v1711_v57, %v3207_v16 }
 0x129   : > { %v3265_v30 = vadd.f32 %v1735_v3, %v3207_v16  ;;  %v1768_v27 = vpop.f32.mrb[16].mxu1  ;;  %v1848_v41 = vpop.f32.mrb[16].mxu0 }
 0x12a   : > { %v1769_v14 = vpop.f32.mrb[17].mxu1  ;;  %v1849_v51 = vpop.f32.mrb[17].mxu0  ;;  %1209 = vst [vmem:[%s3212_s15 + $0x58] sm:$0xff] %v787_v50  ;;  %v1241_v54 = vadd.f32 %v1240_v26, %v787_v50  ;;  %v1285_v43 = vmul.f32 %v787_v50, %v787_v50  ;;  %v1292_v26 = vmul.f32 %v3258_v1, %v3258_v1 }
 0x12b   : > { %1217 = vst [vmem:[%s3212_s15 + $0xd8] sm:$0xff] %v3265_v30  ;;  %v1770_v38 = vadd.f32 %v1769_v14, %v1768_v27  ;;  %v1850_v24 = vadd.f32 %v1849_v51, %v1848_v41  ;;  %v1293_v50 = vmul.f32 %v3265_v30, %v3265_v30 }
 0x12c   : > { %v1242_v62 = vadd.f32 %v1241_v54, %v3216_v60  ;;  %v1300_v23 = vadd.f32 %v1299_v42, %v1285_v43  ;;  %v1288_v60 = vmul.f32 %v3230_v61, %v3230_v61 }
 0x12d   : > { %v1771_v7 = vpop.f32.mrb[18].mxu1  ;;  %v1851_v44 = vpop.f32.mrb[18].mxu0  ;;  %v1108_v48 = vadd.f32 %v1850_v24, %v1770_v38 }
 0x12e   : > { %v1772_v2 = vpop.f32.mrb[19].mxu1  ;;  %v1852_v36 = vpop.f32.mrb[19].mxu0  ;;  %v1243_v22 = vadd.f32 %v1242_v62, %v3223_v11  ;;  %v1301_v18 = vadd.f32 %v1300_v23, %v1286_v15 }
 0x12f   : > { %v1773_v55 = vadd.f32 %v1772_v2, %v1771_v7  ;;  %v1853_v12 = vadd.f32 %v1852_v36, %v1851_v44  ;;  %v1186_v59 = vadd.f32 %v3207_v16, %v1108_v48 }
 0x130   : > { %v1244_v10 = vadd.f32 %v1243_v22, %v3230_v61  ;;  %v1302_v47 = vadd.f32 %v1301_v18, %v1287_v25  ;;  %v1290_v61 = vmul.f32 %v3244_v5, %v3244_v5 }
 0x131   : > { %v1113_v13 = vadd.f32 %v1853_v12, %v1773_v55  ;;  %v1774_v56 = vpop.f32.mrb[20].mxu1  ;;  %v1854_v53 = vpop.f32.mrb[20].mxu0  ;;  %1638 = vst [vmem:[%s3212_s15 + $0x20] sm:$0xff] %v1186_v59  ;;  %v1315_v52 = vmul.f32 %v1186_v59, %v1186_v59 }
 0x132   : > { %v1775_v11 = vpop.f32.mrb[21].mxu1  ;;  %v1855_v4 = vpop.f32.mrb[21].mxu0  ;;  %v1303_v58 = vadd.f32 %v1302_v47, %v1288_v60  ;;  %v1245_v40 = vadd.f32 %v1244_v10, %v3237_v33 }
 0x133   : > { %v1187_v29 = vadd.f32 %v3207_v16, %v1113_v13  ;;  %v1776_v6 = vadd.f32 %v1775_v11, %v1774_v56  ;;  %v1856_v8 = vadd.f32 %v1855_v4, %v1854_v53 }
 0x134   : > { %v1246_v9 = vadd.f32 %v1245_v40, %v3244_v5  ;;  %v1304_v63 = vadd.f32 %v1303_v58, %v1289_v37 }
 0x135   : > { %1639 = vst [vmem:[%s3212_s15 + $0x28] sm:$0xff] %v1187_v29  ;;  %v1256_v34 = vadd.f32 %v1187_v29, %v1186_v59  ;;  %v1316_v39 = vmul.f32 %v1187_v29, %v1187_v29  ;;  %v1777_v17 = vpop.f32.mrb[22].mxu1  ;;  %v1857_v0 = vpop.f32.mrb[22].mxu0  ;;  %v1118_v33 = vadd.f32 %v1856_v8, %v1776_v6 }
 0x136   : > { %v1778_v49 = vpop.f32.mrb[23].mxu1  ;;  %v1858_v45 = vpop.f32.mrb[23].mxu0  ;;  %v1247_v35 = vadd.f32 %v1246_v9, %v3251_v21  ;;  %v1305_v19 = vadd.f32 %v1304_v63, %v1290_v61 }
 0x137   : > { %v1331_v20 = vadd.f32 %v1316_v39, %v1315_v52  ;;  %v1779_v32 = vadd.f32 %v1778_v49, %v1777_v17  ;;  %v1188_v5 = vadd.f32 %v3207_v16, %v1118_v33  ;;  %v1859_v46 = vadd.f32 %v1858_v45, %v1857_v0 }
 0x138   : > { %v1248_v28 = vadd.f32 %v1247_v35, %v3258_v1  ;;  %v1306_v57 = vadd.f32 %v1305_v19, %v1291_v31 }
 0x139   : > { %v1780_v3 = vpop.f32.mrb[24].mxu1  ;;  %v1860_v42 = vpop.f32.mrb[24].mxu0  ;;  %1640 = vst [vmem:[%s3212_s15 + $0x30] sm:$0xff] %v1188_v5  ;;  %v1257_v21 = vadd.f32 %v1256_v34, %v1188_v5  ;;  %v1317_v27 = vmul.f32 %v1188_v5, %v1188_v5  ;;  %v1123_v41 = vadd.f32 %v1859_v46, %v1779_v32 }
 0x13a   : > { %v1781_v14 = vpop.f32.mrb[25].mxu1  ;;  %v1861_v51 = vpop.f32.mrb[25].mxu0  ;;  %v3300_v54 = vadd.f32 %v1248_v28, %v3265_v30  ;;  %v1307_v43 = vadd.f32 %v1306_v57, %v1292_v26 }
 0x13b   : > { %v1782_v38 = vadd.f32 %v1781_v14, %v1780_v3  ;;  %v1862_v24 = vadd.f32 %v1861_v51, %v1860_v42  ;;  %v1332_v1 = vadd.f32 %v1331_v20, %v1317_v27  ;;  %v1189_v15 = vadd.f32 %v3207_v16, %v1123_v41 }
 0x13c   : > { %v3303_v62 = vadd.f32 %v1307_v43, %v1293_v50 }
 0x13d   : > { %v1128_v23 = vadd.f32 %v1862_v24, %v1782_v38  ;;  %v1783_v7 = vpop.f32.mrb[26].mxu1  ;;  %v1863_v44 = vpop.f32.mrb[26].mxu0  ;;  %1641 = vst [vmem:[%s3212_s15 + $0x38] sm:$0xff] %v1189_v15  ;;  %v1258_v25 = vadd.f32 %v1257_v21, %v1189_v15  ;;  %v1318_v48 = vmul.f32 %v1189_v15, %v1189_v15 }
 0x13e   : > { %v1784_v2 = vpop.f32.mrb[27].mxu1  ;;  %v1864_v36 = vpop.f32.mrb[27].mxu0 }
 0x13f   : > { %v1190_v30 = vadd.f32 %v3207_v16, %v1128_v23  ;;  %v1785_v22 = vadd.f32 %v1784_v2, %v1783_v7  ;;  %v1865_v18 = vadd.f32 %v1864_v36, %v1863_v44  ;;  %v1333_v55 = vadd.f32 %v1332_v1, %v1318_v48 }
 0x141   : > { %1642 = vst [vmem:[%s3212_s15 + $0x60] sm:$0xff] %v1190_v30  ;;  %v1259_v12 = vadd.f32 %v1258_v25, %v1190_v30  ;;  %v1319_v59 = vmul.f32 %v1190_v30, %v1190_v30  ;;  %v1133_v60 = vadd.f32 %v1865_v18, %v1785_v22  ;;  %v1786_v10 = vpop.f32.mrb[28].mxu1  ;;  %v1866_v47 = vpop.f32.mrb[28].mxu0 }
 0x142   : > { %v1787_v13 = vpop.f32.mrb[29].mxu1  ;;  %v1867_v56 = vpop.f32.mrb[29].mxu0 }
 0x143   : > { %v1334_v53 = vadd.f32 %v1333_v55, %v1319_v59  ;;  %v1191_v37 = vadd.f32 %v3207_v16, %v1133_v60  ;;  %v1788_v11 = vadd.f32 %v1787_v13, %v1786_v10  ;;  %v1868_v4 = vadd.f32 %v1867_v56, %v1866_v47 }
 0x145   : > { %1643 = vst [vmem:[%s3212_s15 + $0x68] sm:$0xff] %v1191_v37  ;;  %v1260_v58 = vadd.f32 %v1259_v12, %v1191_v37  ;;  %v1320_v40 = vmul.f32 %v1191_v37, %v1191_v37  ;;  %v1138_v29 = vadd.f32 %v1868_v4, %v1788_v11  ;;  %v1789_v6 = vpop.f32.mrb[30].mxu1  ;;  %v1869_v61 = vpop.f32.mrb[30].mxu0 }
 0x146   : > { %v1790_v52 = vpop.f32.mrb[31].mxu1  ;;  %v1870_v8 = vpop.f32.mrb[31].mxu0 }
 0x147   : > { %v1335_v9 = vadd.f32 %v1334_v53, %v1320_v40  ;;  %v1192_v63 = vadd.f32 %v3207_v16, %v1138_v29  ;;  %v1791_v34 = vadd.f32 %v1790_v52, %v1789_v6  ;;  %v1871_v39 = vadd.f32 %v1870_v8, %v1869_v61 }
 0x149   : > { %1644 = vst [vmem:[%s3212_s15 + $0x70] sm:$0xff] %v1192_v63  ;;  %v1261_v17 = vadd.f32 %v1260_v58, %v1192_v63  ;;  %v1321_v0 = vmul.f32 %v1192_v63, %v1192_v63  ;;  %v1143_v31 = vadd.f32 %v1871_v39, %v1791_v34  ;;  %v1792_v33 = vpop.f32.mrb[32].mxu1  ;;  %v1872_v49 = vpop.f32.mrb[32].mxu0 }
 0x14a   : > { %v1793_v45 = vpop.f32.mrb[33].mxu1  ;;  %v1873_v35 = vpop.f32.mrb[33].mxu0 }
 0x14b   : > { %v1336_v19 = vadd.f32 %v1335_v9, %v1321_v0  ;;  %v1193_v20 = vadd.f32 %v3207_v16, %v1143_v31  ;;  %v1794_v32 = vadd.f32 %v1793_v45, %v1792_v33  ;;  %v1874_v5 = vadd.f32 %v1873_v35, %v1872_v49 }
 0x14d   : > { %1645 = vst [vmem:[%s3212_s15 + $0x78] sm:$0xff] %v1193_v20  ;;  %v1262_v46 = vadd.f32 %v1261_v17, %v1193_v20  ;;  %v1322_v26 = vmul.f32 %v1193_v20, %v1193_v20  ;;  %v1148_v28 = vadd.f32 %v1874_v5, %v1794_v32  ;;  %v1795_v57 = vpop.f32.mrb[34].mxu1  ;;  %v1875_v3 = vpop.f32.mrb[34].mxu0 }
 0x14e   : > { %v1796_v42 = vpop.f32.mrb[35].mxu1  ;;  %v1876_v50 = vpop.f32.mrb[35].mxu0 }
 0x14f   : > { %v1337_v21 = vadd.f32 %v1336_v19, %v1322_v26  ;;  %v1194_v27 = vadd.f32 %v3207_v16, %v1148_v28  ;;  %v1797_v41 = vadd.f32 %v1796_v42, %v1795_v57  ;;  %v1877_v14 = vadd.f32 %v1876_v50, %v1875_v3 }
 0x150   : > { %v1250_v42 = vrot.slane %v3300_v54, 4 }
 0x151   : > { %1646 = vst [vmem:[%s3212_s15 + $0xa0] sm:$0xff] %v1194_v27  ;;  %v1263_v51 = vadd.f32 %v1262_v46, %v1194_v27  ;;  %v1323_v43 = vmul.f32 %v1194_v27, %v1194_v27  ;;  %v1153_v38 = vadd.f32 %v1877_v14, %v1797_v41  ;;  %v1798_v24 = vpop.f32.mrb[36].mxu1  ;;  %v1878_v1 = vpop.f32.mrb[36].mxu0 }
 0x152   : > { %v1799_v15 = vpop.f32.mrb[37].mxu1  ;;  %v1879_v23 = vpop.f32.mrb[37].mxu0 }
 0x153   : > { %v1338_v7 = vadd.f32 %v1337_v21, %v1323_v43  ;;  %v1195_v44 = vadd.f32 %v3207_v16, %v1153_v38  ;;  %v1800_v25 = vadd.f32 %v1799_v15, %v1798_v24  ;;  %v1880_v48 = vadd.f32 %v1879_v23, %v1878_v1 }
 0x154   : > { %v1309_v38 = vrot.slane %v3303_v62, 4 }
 0x155   : > { %1647 = vst [vmem:[%s3212_s15 + $0xa8] sm:$0xff] %v1195_v44  ;;  %v1264_v2 = vadd.f32 %v1263_v51, %v1195_v44  ;;  %v1324_v36 = vmul.f32 %v1195_v44, %v1195_v44  ;;  %v1158_v30 = vadd.f32 %v1880_v48, %v1800_v25  ;;  %v1801_v22 = vpop.f32.mrb[38].mxu1  ;;  %v1881_v18 = vpop.f32.mrb[38].mxu0 }
 0x156   : > { %v1802_v55 = vpop.f32.mrb[39].mxu1  ;;  %v1882_v12 = vpop.f32.mrb[39].mxu0 }
 0x157   : > { %v1339_v59 = vadd.f32 %v1338_v7, %v1324_v36  ;;  %v1196_v60 = vadd.f32 %v3207_v16, %v1158_v30  ;;  %v1803_v10 = vadd.f32 %v1802_v55, %v1801_v22  ;;  %v1883_v47 = vadd.f32 %v1882_v12, %v1881_v18 }
 0x158   : > { %v1251_v7 = vadd.f32 %v1250_v42, %v3300_v54  ;;  %v1310_v30 = vadd.f32 %v1309_v38, %v3303_v62 }
 0x159   : > { %1648 = vst [vmem:[%s3212_s15 + $0xb0] sm:$0xff] %v1196_v60  ;;  %v1265_v13 = vadd.f32 %v1264_v2, %v1196_v60  ;;  %v1325_v56 = vmul.f32 %v1196_v60, %v1196_v60  ;;  %v1163_v53 = vadd.f32 %v1883_v47, %v1803_v10  ;;  %v1804_v37 = vpop.f32.mrb[40].mxu1  ;;  %v1884_v11 = vpop.f32.mrb[40].mxu0 }
 0x15a   : > { %v1805_v4 = vpop.f32.mrb[41].mxu1  ;;  %v1885_v58 = vpop.f32.mrb[41].mxu0  ;;  %v1252_v55 = vrot.slane %v1251_v7, 2 }
 0x15b   : > { %v1340_v40 = vadd.f32 %v1339_v59, %v1325_v56  ;;  %v1197_v29 = vadd.f32 %v3207_v16, %v1163_v53  ;;  %v1806_v6 = vadd.f32 %v1805_v4, %v1804_v37  ;;  %v1886_v61 = vadd.f32 %v1885_v58, %v1884_v11 }
 0x15c   : > { %v1311_v59 = vrot.slane %v1310_v30, 2  ;;  %v1253_v47 = vadd.f32 %v1252_v55, %v1251_v7 }
 0x15d   : > { %1649 = vst [vmem:[%s3212_s15 + $0xb8] sm:$0xff] %v1197_v29  ;;  %v1266_v52 = vadd.f32 %v1265_v13, %v1197_v29  ;;  %v1326_v8 = vmul.f32 %v1197_v29, %v1197_v29  ;;  %v1168_v9 = vadd.f32 %v1886_v61, %v1806_v6  ;;  %v1807_v63 = vpop.f32.mrb[42].mxu1  ;;  %v1887_v34 = vpop.f32.mrb[42].mxu0 }
 0x15e   : > { %v1808_v39 = vpop.f32.mrb[43].mxu1  ;;  %v1888_v17 = vpop.f32.mrb[43].mxu0  ;;  %v1312_v54 = vadd.f32 %v1311_v59, %v1310_v30  ;;  %v1254_v11 = vrot.slane %v1253_v47, 1 }
 0x15f   : > { %v1341_v0 = vadd.f32 %v1340_v40, %v1326_v8  ;;  %v1198_v31 = vadd.f32 %v3207_v16, %v1168_v9  ;;  %v1809_v33 = vadd.f32 %v1808_v39, %v1807_v63  ;;  %v1889_v49 = vadd.f32 %v1888_v17, %v1887_v34 }
 0x160   : > { %v1313_v62 = vrot.slane %v1312_v54, 1  ;;  %v1255_v29 = vadd.f32 %v1254_v11, %v1253_v47 }
 0x161   : > { %1650 = vst [vmem:[%s3212_s15 + $0xe0] sm:$0xff] %v1198_v31  ;;  %v1267_v45 = vadd.f32 %v1266_v52, %v1198_v31  ;;  %v1327_v35 = vmul.f32 %v1198_v31, %v1198_v31  ;;  %v1173_v19 = vadd.f32 %v1889_v49, %v1809_v33  ;;  %v1810_v20 = vpop.f32.mrb[44].mxu1  ;;  %v1890_v32 = vpop.f32.mrb[44].mxu0 }
 0x162   : > { %v1811_v5 = vpop.f32.mrb[45].mxu1  ;;  %v1891_v46 = vpop.f32.mrb[45].mxu0  ;;  %v1314_v61 = vadd.f32 %v1313_v62, %v1312_v54 }
 0x163   : > { %v1342_v26 = vadd.f32 %v1341_v0, %v1327_v35  ;;  %v1199_v28 = vadd.f32 %v3207_v16, %v1173_v19  ;;  %v1812_v57 = vadd.f32 %v1811_v5, %v1810_v20  ;;  %v1892_v3 = vadd.f32 %v1891_v46, %v1890_v32 }
 0x165   : > { %1651 = vst [vmem:[%s3212_s15 + $0xe8] sm:$0xff] %v1199_v28  ;;  %v1268_v50 = vadd.f32 %v1267_v45, %v1199_v28  ;;  %v1328_v21 = vmul.f32 %v1199_v28, %v1199_v28  ;;  %v1178_v27 = vadd.f32 %v1892_v3, %v1812_v57  ;;  %v1813_v41 = vpop.f32.mrb[46].mxu1  ;;  %v1893_v14 = vpop.f32.mrb[46].mxu0 }
 0x166   : > { %v1814_v51 = vpop.f32.mrb[47].mxu1  ;;  %v1894_v43 = vpop.f32.mrb[47].mxu0 }
 0x167   : > { %v1343_v24 = vadd.f32 %v1342_v26, %v1328_v21  ;;  %v1200_v1 = vadd.f32 %v3207_v16, %v1178_v27  ;;  %v1815_v15 = vadd.f32 %v1814_v51, %v1813_v41  ;;  %v1895_v23 = vadd.f32 %v1894_v43, %v1893_v14 }
 0x169   : > { %1652 = vst [vmem:[%s3212_s15 + $0xf0] sm:$0xff] %v1200_v1  ;;  %v1269_v44 = vadd.f32 %v1268_v50, %v1200_v1  ;;  %v1329_v25 = vmul.f32 %v1200_v1, %v1200_v1  ;;  %v1183_v48 = vadd.f32 %v1895_v23, %v1815_v15 }
 0x16b   : > { %v1344_v2 = vadd.f32 %v1343_v24, %v1329_v25  ;;  %v1201_v36 = vadd.f32 %v3207_v16, %v1183_v48 }
 0x16d   : > { %1653 = vst [vmem:[%s3212_s15 + $0xf8] sm:$0xff] %v1201_v36  ;;  %v1270_v22 = vadd.f32 %v1269_v44, %v1201_v36  ;;  %v1330_v18 = vmul.f32 %v1201_v36, %v1201_v36 }
 0x16f   : > { %v1271_v12 = vrot.slane %v1270_v22, 4  ;;  %v1345_v60 = vadd.f32 %v1344_v2, %v1330_v18 }
 0x171   : > { %v1346_v10 = vrot.slane %v1345_v60, 4  ;;  %v1272_v13 = vadd.f32 %v1271_v12, %v1270_v22 }
 0x173   : > { %v1347_v56 = vadd.f32 %v1346_v10, %v1345_v60  ;;  %v1273_v53 = vrot.slane %v1272_v13, 2 }
 0x175   : > { %v1348_v37 = vrot.slane %v1347_v56, 2  ;;  %v1274_v16 = vadd.f32 %v1273_v53, %v1272_v13 }
 0x177   : > { %v1349_v4 = vadd.f32 %v1348_v37, %v1347_v56  ;;  %v1275_v58 = vrot.slane %v1274_v16, 1 }
 0x179   : > { %v1350_v40 = vrot.slane %v1349_v4, 1  ;;  %v1276_v6 = vadd.f32 %v1275_v58, %v1274_v16 }
 0x17b   : > { %v1351_v52 = vadd.f32 %v1350_v40, %v1349_v4  ;;  %v1277_v8 = vadd.f32 %v1276_v6, %v1255_v29 }
 0x17d   : > { %v1352_v9 = vadd.f32 %v1351_v52, %v1314_v61 }
 0x17f   : > { %1359 = vrot.lane.b32.xlu0 %v1352_v9, %s2092_s27 }
 0x183   : > { %1354 = vrot.lane.b32.xlu0 %v1277_v8, %s2092_s27 }
 0x1f1   : > { %v1360_v63 = vpop.permute.xlu0 %1359 }
 0x1f2   : > { %v1362_v34 = vadd.f32 %v1360_v63, %v1352_v9 }
 0x1f4   : > { %v1364_v17 = vrot.slane %v1362_v34, 7 }
 0x1f5   : > { %v1355_v39 = vpop.permute.xlu0 %1354 }
 0x1f6   : > { %v1357_v0 = vadd.f32 %v1355_v39, %v1277_v8 }
 0x1f8   : > { %v1367_v31 = vsel %vm1366_vm0, %v1357_v0, %v1364_v17 }
 0x1f9   : > { %1369 = vst.msk [vmem:[%s270_s30] sm:$0x3] %vm1368_vm1, %v1367_v31 }
 0x1fa PF: > { %s16_s22 = sadd.s32 1, %s2089_s22   ;;  %s3418_s18 = smov %s2081_s20 }
 0x1fb   : > { %p13_p8 = scmp.ge.s32.totalorder %s16_s22, 18   ;;  %s3419_s19 = smov %s2085_s21 }
 0x1fc   : > { %s3420_s20 = smov %s3423_s23  ;;  %s3421_s21 = smov %s3427_s24 }
 0x1fd   :  { %15 = sbr.rel (!%p13_p8) target bundleno = 3 (0x3), region = 82 }

// kernel: generator_forward.5
= control target key start
LH: loop header
LB: loop body
LE: loop exit
PB: predicated region body
PF: predicated region fallthrough
CT: control target
= control target key end

     0   :  { %s11263_s15 = smov 0   ;;  %s11265_s16 = smov 0   ;;  %s15949_s0 = inlined_call_operand.vmem [shape: f32[2,70,72,64], index: 0, kind: input, shape index: {}]   ;;  %s15950_s1 = inlined_call_operand.vmem [shape: f32[7,64,21], index: 1, kind: input, shape index: {}]   ;;  %s15951_s2 = inlined_call_operand.vmem [shape: f32[1,3], index: 2, kind: input, shape index: {}]   ;;  %s15952_s3 = inlined_call_operand.vmem [shape: f32[2,64], index: 3, kind: input, shape index: {}]   ;;  %s15953_s4 = inlined_call_operand.vmem [shape: f32[2,64,64,3], index: 4, kind: output, shape index: {}]  }
   0x1   :  { %s11267_s17 = smov 0   ;;  %s11269_s18 = smov 0  }
   0x2   :  { %s11271_s19 = smov 0  }
   0x3 LB: > { %s23_s20 = sadd.s32 1, %s11222_s17  ;;  %s26_s21 = sadd.s32 1, %s11226_s18  ;;  %s11230_s19 = sphi %s11271_s19, %s14_s19   ;;  %s11226_s18 = sphi %s11269_s18, %s16403_s18   ;;  %s11222_s17 = sphi %s11267_s17, %s16402_s17   ;;  %s11218_s16 = sphi %s11265_s16, %s16401_s16   ;;  %s11214_s15 = sphi %s11263_s15, %s16400_s15  }
   0x4   : > { %p24_p0 = scmp.ge.s32.totalorder %s23_s20, 8  ;;  %p8336_p1 = scmp.ge.s32.totalorder %s11230_s19, 1 }
   0x5   : > { %p176_p2 = scmp.lt.s32.totalorder %s11230_s19, 17 }
   0x6   : > { %s16405_s20 = smov (%p24_p0, %s23_s20), 0  ;;  %s16407_s21 = smov (!%p24_p0, %s26_s21), %s11226_s18 }
   0x7   : > { %p177_p3 = pnand %p8336_p1, %p176_p2  ;;  %p28_p4 = scmp.ge.s32.totalorder %s16407_s21, 2 }
   0x9   : > { %s16409_s21 = smov (%p28_p4, %s16407_s21), 0  ;;  %180 = sbr.rel (%p177_p3) target bundleno = 1545 (0x609), region = 36 }
  0x10   : > { %v8346_v0 = vld [vmem:[%s15950_s1 + $0x40] sm:$0xff]  ;;  %v8347_v1 = vld [vmem:[%s15950_s1 + $0x48] sm:$0xff]  ;;  %p207_p5 = scmp.lt.s32.totalorder %s11218_s16, 1  ;;  %s11308_s28 = sshll.u32 %s11214_s15, 3  ;;  %v1006_v3 = vlaneseq  ;;  %v8348_v6 = vld [vmem:[%s15950_s1 + $0x50] sm:$0xff]  ;;  %vm1723_vm4 = vcmask 523264  }
  0x11   : > { %v8578_v2 = vld [vmem:[%s15950_s1 + $0xc0] sm:$0xff]  ;;  %v10329_v4 = vpack.c.bf16 %v8347_v1, %v8346_v0  ;;  %v8579_v5 = vld [vmem:[%s15950_s1 + $0xc8] sm:$0xff]  ;;  %v8349_v7 = vld [vmem:[%s15950_s1 + $0x58] sm:$0xff]  ;;  %v11320_v8 = vstv %s11308_s28  ;;  %s8343_s29 = smul.u32 576, %s11214_s15  ;;  %s11233_s24 = smov 122  }
  0x12   : > { %16120 = vst [vmem:[#allocation2_spill] sm:$0xff] %v11320_v8  ;;  %v11322_v9 = vpack.c.bf16 %v8579_v5, %v8578_v2  ;;  %v10333_v10 = vpack.c.bf16 %v8349_v7, %v8348_v6  ;;  %v8580_v11 = vld [vmem:[%s15950_s1 + $0xd0] sm:$0xff]  ;;  %v8581_v12 = vld [vmem:[%s15950_s1 + $0xd8] sm:$0xff]  ;;  %v8350_v13 = vld [vmem:[%s15950_s1 + $0x60] sm:$0xff]  ;;  %s16411_s16 = smov (!%p207_p5, %s11218_s16), 1  ;;  %v993_v14 = vadd.s32 1, %v11320_v8 }
  0x13   : > { %10330 = vmatprep.subr.bf16.mxu1 %v10329_v4  ;;  %v11337_v15 = vpack.c.bf16 %v8581_v12, %v8580_v11  ;;  %v8351_v16 = vld [vmem:[%s15950_s1 + $0x68] sm:$0xff]  ;;  %v8582_v17 = vld [vmem:[%s15950_s1 + $0xe0] sm:$0xff]  ;;  %v995_v19 = vadd.s32 3, %v11320_v8  ;;  %v8352_v20 = vld [vmem:[%s15950_s1 + $0x70] sm:$0xff]  ;;  %s10881_s6 = smul.u32 5040, %s16411_s16  ;;  %v11355_v21 = vshrl.u32 %v1006_v3, 7 }
  0x14   : > { %v8583_v18 = vld [vmem:[%s15950_s1 + $0xe8] sm:$0xff]  ;;  %10378 = vmatprep.subr.bf16.mxu0 %v11322_v9  ;;  %10332 = vmatpush3.bf16.msra.mxu1 %v10329_v4  ;;  %v10337_v22 = vpack.c.bf16 %v8351_v16, %v8350_v13  ;;  %v8353_v23 = vld [vmem:[%s15950_s1 + $0x78] sm:$0xff]  ;;  %v8584_v24 = vld [vmem:[%s15950_s1 + $0xf0] sm:$0xff]  ;;  %vm1017_vm0 = vcmp.ge.s32.totalorder %v993_v14, 3  ;;  %vm1031_vm1 = vcmp.lt.s32.totalorder %v993_v14, 67  ;;  %v11392_v31 = vadd.s32 2, %v11320_v8 }
  0x15   : > { %16121 = vst [vmem:[#allocation3_spill] sm:$0xff] %v11337_v15  ;;  %16122 = vst [vmem:[#allocation4_spill] sm:$0xff] %v11355_v21  ;;  %10380 = vmatpush3.bf16.msra.mxu0 %v11322_v9  ;;  %10334 = vmatprep.subr.bf16.mxu1 %v10333_v10  ;;  %v8585_v25 = vld [vmem:[%s15950_s1 + $0xf8] sm:$0xff]  ;;  %v11368_v26 = vpack.c.bf16 %v8583_v18, %v8582_v17  ;;  %s211_s14 = scalar_lea.vmem %s15949_s0, %s10881_s6  ;;  %v11376_v27 = vld [vmem:[%s15952_s3] ss:$0 sm:$0xff]  ;;  %vm1019_vm2 = vcmp.ge.s32.totalorder %v995_v19, 3  ;;  %v10341_v34 = vpack.c.bf16 %v8353_v23, %v8352_v20 }
  0x16   : > { %10382 = vmatprep.subr.bf16.mxu0 %v11337_v15  ;;  %vm1033_vm3 = vcmp.lt.s32.totalorder %v995_v19, 67  ;;  %v8658_v28 = vld [vmem:[%s15950_s1 + $0x100] sm:$0xff]  ;;  %v8659_v29 = vld [vmem:[%s15950_s1 + $0x108] sm:$0xff]  ;;  %s11384_s30 = scalar_lea.vmem %s211_s14, %s8343_s29  ;;  %v8660_v32 = vld [vmem:[%s15950_s1 + $0x110] sm:$0xff]  ;;  %v11400_v35 = vpack.c.bf16 %v8585_v25, %v8584_v24  ;;  %vm1058_vm6 = vcmp.ge.s32.totalorder %v11355_v21, 3  ;;  %v11412_v39 = vadd.s32 4, %v11320_v8 }
  0x17   : > { %16123 = vst [vmem:[#allocation5_spill] sm:$0xff] %v11368_v26  ;;  %v11389_v30 = vld [vmem:[%s15952_s3 + $0x1] ss:$0 sm:$0xff]  ;;  %v8661_v33 = vld [vmem:[%s15950_s1 + $0x118] sm:$0xff]  ;;  %v235_v36 = vld [vmem:[%s11384_s30 + $0x48] sm:$0xff]  ;;  %v11425_v45 = vpack.c.bf16 %v8659_v29, %v8658_v28  ;;  %v11428_v46 = vadd.s32 64, %v11355_v21 }
  0x18   : > { %10336 = vmatpush3.bf16.msra.mxu1 %v10333_v10  ;;  %16124 = vst [vmem:[#allocation6_spill] sm:$0xff] %v11400_v35  ;;  %vm11405_vm5 = vmand %vm1017_vm0, %vm1031_vm1  ;;  %v253_v38 = vld [vmem:[%s11384_s30 + $0xd8] sm:$0xff]  ;;  %v367_v40 = vmul.f32 %v11376_v27, %v235_v36  ;;  %v236_v43 = vld [vmem:[%s11384_s30 + $0x50] sm:$0xff]  ;;  %v11436_v52 = vpack.c.bf16 %v8661_v33, %v8660_v32  ;;  %v11439_v53 = vadd.s32 5, %v11320_v8  ;;  %s11234_s25 = smov 119   ;;  %s11235_s26 = smov 116  }
  0x19   : > { %10384 = vmatpush3.bf16.msra.mxu0 %v11337_v15  ;;  %10338 = vmatprep.subr.bf16.mxu1 %v10337_v22  ;;  %v385_v41 = vmul.f32 %v11376_v27, %v253_v38  ;;  %vm11419_vm7 = vmand %vm1019_vm2, %vm1033_vm3  ;;  %v254_v44 = vld [vmem:[%s11384_s30 + $0xe0] sm:$0xff]  ;;  %16129 = vst [vmem:[#allocation7_spill] sm:$0xff] %v11428_v46  ;;  %v368_v47 = vmul.f32 %v11376_v27, %v236_v43  ;;  %v237_v49 = vld [vmem:[%s11384_s30 + $0x58] sm:$0xff]  ;;  %vm1201_vm2 = vcmp.lt.s32.totalorder %v11428_v46, 67  ;;  %s11236_s27 = smov 113   ;;  %s11237_s5 = smov 110  }
  0x1a   : > { %10386 = vmatprep.subr.bf16.mxu0 %v11368_v26  ;;  %v386_v48 = vmul.f32 %v11376_v27, %v254_v44  ;;  %v255_v50 = vld [vmem:[%s11384_s30 + $0xe8] sm:$0xff]  ;;  %v238_v51 = vld [vmem:[%s11384_s30 + $0x60] sm:$0xff]  ;;  %v497_v54 = vadd.f32 %v11389_v30, %v367_v40  ;;  %v369_v56 = vmul.f32 %v11376_v27, %v237_v49  ;;  %v256_v58 = vld [vmem:[%s11384_s30 + $0xf0] sm:$0xff]  ;;  %p215_p6 = scmp.lt.s32.totalorder %s11308_s28, 63  ;;  %s8340_s15 = sshll.u32 %s16411_s16, 9 }
  0x1b   : > { %v515_v55 = vadd.f32 %v11389_v30, %v385_v41  ;;  %v387_v57 = vmul.f32 %v11376_v27, %v255_v50  ;;  %vm11450_vm8 = vmand %vm11405_vm5, %vm1058_vm6  ;;  %v498_v60 = vadd.f32 %v11389_v30, %v368_v47  ;;  %v370_v62 = vmul.f32 %v11376_v27, %v238_v51  ;;  %v239_v14 = vld [vmem:[%s11384_s30 + $0x68] sm:$0xff]  ;;  %v257_v16 = vld [vmem:[%s11384_s30 + $0xf8] sm:$0xff] }
  0x1c   : > { %10340 = vmatpush3.bf16.msra.mxu1 %v10337_v22  ;;  %v516_v61 = vadd.f32 %v11389_v30, %v386_v48  ;;  %v388_v63 = vmul.f32 %v11376_v27, %v256_v58  ;;  %vm623_vm9 = vcmp.ge.f32.partialorder %v497_v54, 0.0  ;;  %v749_v0 = vmul.f32 0.01, %v497_v54  ;;  %vm1094_vm11 = vmand %vm11419_vm7, %vm1058_vm6  ;;  %v240_v17 = vld [vmem:[%s11384_s30 + $0x70] sm:$0xff]  ;;  %v258_v33 = vld [vmem:[%s11384_s30 + $0x100] sm:$0xff]  ;;  %s16413_s28 = smov (!%p215_p6, %s11308_s28), 63 }
  0x1d   : > { %10388 = vmatpush3.bf16.msra.mxu0 %v11368_v26  ;;  %10342 = vmatprep.subr.bf16.mxu1 %v10341_v34  ;;  %vm641_vm10 = vcmp.ge.f32.partialorder %v515_v55, 0.0  ;;  %v767_v1 = vmul.f32 0.01, %v515_v55  ;;  %vm624_vm12 = vcmp.ge.f32.partialorder %v498_v60, 0.0  ;;  %v750_v2 = vmul.f32 0.01, %v498_v60 }
  0x1e   : > { %10390 = vmatprep.subr.bf16.mxu0 %v11400_v35  ;;  %vm642_vm13 = vcmp.ge.f32.partialorder %v516_v61, 0.0  ;;  %v768_v3 = vmul.f32 0.01, %v516_v61  ;;  %v875_v4 = vsel %vm623_vm9, %v497_v54, %v749_v0  ;;  %v499_v6 = vadd.f32 %v11389_v30, %v369_v56  ;;  %v241_v49 = vld [vmem:[%s11384_s30 + $0x78] sm:$0xff]  ;;  %v242_v56 = vld [vmem:[%s11384_s30 + $0x80] sm:$0xff]  ;;  %v280_v26 = vld [vmem:[%s11384_s30 + $0x1b0] sm:$0xff] }
  0x1f   : > { %v893_v5 = vsel %vm641_vm10, %v515_v55, %v767_v1  ;;  %v517_v7 = vadd.f32 %v11389_v30, %v387_v57  ;;  %v11468_v10 = vsel %vm11450_vm8, %v875_v4, 0.0  ;;  %v876_v12 = vsel %vm624_vm12, %v498_v60, %v750_v2  ;;  %v259_v55 = vld [vmem:[%s11384_s30 + $0x108] sm:$0xff]  ;;  %s8339_s8 = sshll.u32 %s16413_s28, 3 }
  0x20   : > { %10344 = vmatpush3.bf16.msra.mxu1 %v10341_v34  ;;  %v11470_v11 = vsel %vm1094_vm11, %v893_v5, 0.0  ;;  %v894_v13 = vsel %vm642_vm13, %v516_v61, %v768_v3  ;;  %9477 = vmatprep.mubr.msk.f32.mxu1 %vm1723_vm4, %v11468_v10  ;;  %v11480_v18 = vsel %vm11405_vm5, %v876_v12, 0.0  ;;  %vm625_vm14 = vcmp.ge.f32.partialorder %v499_v6, 0.0  ;;  %v260_v3 = vld [vmem:[%s11384_s30 + $0x110] sm:$0xff]  ;;  %v243_v4 = vld [vmem:[%s11384_s30 + $0x88] sm:$0xff]  ;;  %v261_v5 = vld [vmem:[%s11384_s30 + $0x118] sm:$0xff]  ;;  %s219_s9 = sadd.s32 %s8340_s15, %s8339_s8 }
  0x21   : > { %16132 = vst [vmem:[#allocation8_spill] sm:$0xff] %v11470_v11  ;;  %10392 = vmatpush3.bf16.msra.mxu0 %v11400_v35  ;;  %v11484_v19 = vsel %vm11419_vm7, %v894_v13, 0.0  ;;  %v751_v20 = vmul.f32 0.01, %v499_v6  ;;  %9849 = vmatprep.mubr.msk.f32.mxu0 %vm1723_vm4, %v11470_v11  ;;  %vm643_vm15 = vcmp.ge.f32.partialorder %v517_v7, 0.0  ;;  %v500_v23 = vadd.f32 %v11389_v30, %v370_v62  ;;  %s8341_s16 = sshll.u32 %s219_s9, 3 }
  0x22   : > { %16133 = vst [vmem:[#allocation9_spill] sm:$0xff] %v11484_v19  ;;  %10394 = vmatprep.subr.bf16.mxu0 %v11425_v45  ;;  %v769_v22 = vmul.f32 0.01, %v517_v7  ;;  %v518_v24 = vadd.f32 %v11389_v30, %v388_v63  ;;  %v371_v28 = vmul.f32 %v11376_v27, %v239_v14  ;;  %v389_v29 = vmul.f32 %v11376_v27, %v257_v16  ;;  %s14282_s10 = scalar_lea.vmem %s15953_s4, %s8341_s16 }
  0x23   : > { %9478 = vmatmul.mubr.msk.f32.vlgmr.msra.gmra.mrb[0].mxu1 %vm1723_vm4, %v11480_v18  ;;  %v877_v25 = vsel %vm625_vm14, %v499_v6, %v751_v20  ;;  %v372_v32 = vmul.f32 %v11376_v27, %v240_v17  ;;  %vm626_vm0 = vcmp.ge.f32.partialorder %v500_v23, 0.0  ;;  %v752_v38 = vmul.f32 0.01, %v500_v23 }
  0x24   : > { %9850 = vmatmul.mubr.msk.f32.vlgmr.msra.gmra.mrb[0].mxu0 %vm1723_vm4, %v11484_v19  ;;  %v11501_v34 = vsel %vm11405_vm5, %v877_v25, 0.0  ;;  %v895_v36 = vsel %vm643_vm15, %v517_v7, %v769_v22  ;;  %vm644_vm1 = vcmp.ge.f32.partialorder %v518_v24, 0.0  ;;  %v770_v41 = vmul.f32 0.01, %v518_v24 }
  0x25   : > { %10396 = vmatpush3.bf16.msra.mxu0 %v11425_v45  ;;  %9480 = vmatprep.mubr.msk.f32.mxu1 %vm1723_vm4, %v11501_v34  ;;  %v11508_v40 = vsel %vm11419_vm7, %v895_v36, 0.0  ;;  %v501_v43 = vadd.f32 %v11389_v30, %v371_v28  ;;  %v878_v44 = vsel %vm626_vm0, %v500_v23, %v752_v38  ;;  %v519_v45 = vadd.f32 %v11389_v30, %v389_v29 }
  0x26   : > { %16134 = vst [vmem:[#allocation10_spill] sm:$0xff] %v11508_v40  ;;  %9852 = vmatprep.mubr.msk.f32.mxu0 %vm1723_vm4, %v11508_v40  ;;  %v502_v47 = vadd.f32 %v11389_v30, %v372_v32  ;;  %v390_v48 = vmul.f32 %v11376_v27, %v258_v33  ;;  %v11520_v50 = vsel %vm11405_vm5, %v878_v44, 0.0  ;;  %v896_v51 = vsel %vm644_vm1, %v518_v24, %v770_v41  ;;  %v244_v24 = vld [vmem:[%s11384_s30 + $0x90] sm:$0xff] }
  0x27   : > { %vm627_vm3 = vcmp.ge.f32.partialorder %v501_v43, 0.0  ;;  %v753_v54 = vmul.f32 0.01, %v501_v43  ;;  %10398 = vmatprep.subr.bf16.mxu0 %v11436_v52  ;;  %9481 = vmatmul.mubr.msk.f32.gmra.mrb[2].mxu1 %vm1723_vm4, %v11520_v50  ;;  %v11529_v57 = vsel %vm11419_vm7, %v896_v51, 0.0  ;;  %vm645_vm8 = vcmp.ge.f32.partialorder %v519_v45, 0.0  ;;  %v245_v51 = vld [vmem:[%s11384_s30 + $0x98] sm:$0xff] }
  0x28   : > { %16135 = vst [vmem:[#allocation11_spill] sm:$0xff] %v11529_v57  ;;  %v771_v58 = vmul.f32 0.01, %v519_v45  ;;  %vm628_vm9 = vcmp.ge.f32.partialorder %v502_v47, 0.0  ;;  %vm1018_vm10 = vcmp.ge.s32.totalorder %v11392_v31, 3  ;;  %vm1032_vm11 = vcmp.lt.s32.totalorder %v11392_v31, 67  ;;  %9853 = vmatmul.mubr.msk.f32.gmra.mrb[2].mxu0 %vm1723_vm4, %v11529_v57 }
  0x29   : > { %v879_v59 = vsel %vm627_vm3, %v501_v43, %v753_v54  ;;  %v754_v60 = vmul.f32 0.01, %v502_v47  ;;  %v520_v61 = vadd.f32 %v11389_v30, %v390_v48  ;;  %v373_v62 = vmul.f32 %v11376_v27, %v241_v49  ;;  %10400 = vmatpush3.bf16.msra.mxu0 %v11436_v52  ;;  %vm11583_vm3 = vmand %vm11405_vm5, %vm1201_vm2  ;;  %v262_v49 = vld [vmem:[%s11384_s30 + $0x120] sm:$0xff]  ;;  %v263_v54 = vld [vmem:[%s11384_s30 + $0x128] sm:$0xff] }
  0x2a   : > { %v11539_v63 = vsel %vm11405_vm5, %v879_v59, 0.0  ;;  %v897_v0 = vsel %vm645_vm8, %v519_v45, %v771_v58  ;;  %v391_v1 = vmul.f32 %v11376_v27, %v259_v55  ;;  %v374_v2 = vmul.f32 %v11376_v27, %v242_v56  ;;  %v266_v59 = vld [vmem:[%s11384_s30 + $0x140] sm:$0xff] }
  0x2b   : > { %vm1020_vm12 = vcmp.ge.s32.totalorder %v11412_v39, 3  ;;  %vm1034_vm13 = vcmp.lt.s32.totalorder %v11412_v39, 67  ;;  %9483 = vmatprep.mubr.msk.f32.mxu1 %vm1723_vm4, %v11539_v63  ;;  %v11553_v6 = vsel %vm11419_vm7, %v897_v0, 0.0  ;;  %v880_v7 = vsel %vm628_vm9, %v502_v47, %v754_v60 }
  0x2c   : > { %16136 = vst [vmem:[#allocation12_spill] sm:$0xff] %v11553_v6  ;;  %vm646_vm14 = vcmp.ge.f32.partialorder %v520_v61, 0.0  ;;  %v772_v12 = vmul.f32 0.01, %v520_v61  ;;  %9855 = vmatprep.mubr.msk.f32.mxu0 %vm1723_vm4, %v11553_v6  ;;  %v11560_v13 = vsel %vm11405_vm5, %v880_v7, 0.0  ;;  %v503_v52 = vadd.f32 %v11389_v30, %v373_v62 }
  0x2d   : > { %v521_v14 = vadd.f32 %v11389_v30, %v391_v1  ;;  %v504_v16 = vadd.f32 %v11389_v30, %v374_v2  ;;  %9484 = vmatmul.mubr.msk.f32.gmra.mrb[4].mxu1 %vm1723_vm4, %v11560_v13  ;;  %v392_v20 = vmul.f32 %v11376_v27, %v260_v3  ;;  %v375_v22 = vmul.f32 %v11376_v27, %v243_v4  ;;  %v246_v4 = vld [vmem:[%s11384_s30 + $0xa0] sm:$0xff] }
  0x2e   : > { %v898_v17 = vsel %vm646_vm14, %v520_v61, %v772_v12  ;;  %v393_v23 = vmul.f32 %v11376_v27, %v261_v5  ;;  %vm629_vm15 = vcmp.ge.f32.partialorder %v503_v52, 0.0  ;;  %v755_v28 = vmul.f32 0.01, %v503_v52  ;;  %vm11610_vm14 = vmand %vm11419_vm7, %vm1201_vm2 }
  0x2f   : > { %v11573_v25 = vsel %vm11419_vm7, %v898_v17, 0.0  ;;  %vm647_vm0 = vcmp.ge.f32.partialorder %v521_v14, 0.0  ;;  %v773_v29 = vmul.f32 0.01, %v521_v14  ;;  %vm630_vm1 = vcmp.ge.f32.partialorder %v504_v16, 0.0 }
  0x30   : > { %16137 = vst [vmem:[#allocation13_spill] sm:$0xff] %v11573_v25  ;;  %9856 = vmatmul.mubr.msk.f32.gmra.mrb[4].mxu0 %vm1723_vm4, %v11573_v25  ;;  %v756_v32 = vmul.f32 0.01, %v504_v16  ;;  %v522_v33 = vadd.f32 %v11389_v30, %v392_v20  ;;  %v881_v36 = vsel %vm629_vm15, %v503_v52, %v755_v28  ;;  %v505_v38 = vadd.f32 %v11389_v30, %v375_v22  ;;  %vm11623_vm15 = vmand %vm1018_vm10, %vm1032_vm11  ;;  %v264_v52 = vld [vmem:[%s11384_s30 + $0x130] sm:$0xff] }
  0x31   : > { %v523_v43 = vadd.f32 %v11389_v30, %v393_v23  ;;  %v376_v44 = vmul.f32 %v11376_v27, %v244_v24  ;;  %v11591_v45 = vsel %vm11405_vm5, %v881_v36, 0.0  ;;  %v899_v47 = vsel %vm647_vm0, %v521_v14, %v773_v29  ;;  %vm11640_vm10 = vmand %vm1020_vm12, %vm1034_vm13 }
  0x32   : > { %v882_v48 = vsel %vm630_vm1, %v504_v16, %v756_v32  ;;  %vm648_vm8 = vcmp.ge.f32.partialorder %v522_v33, 0.0  ;;  %9486 = vmatprep.mubr.msk.f32.mxu1 %vm1723_vm4, %v11591_v45  ;;  %v11600_v55 = vsel %vm11419_vm7, %v899_v47, 0.0  ;;  %v774_v58 = vmul.f32 0.01, %v522_v33  ;;  %vm1103_vm12 = vmand %vm11640_vm10, %vm1058_vm6  ;;  %v247_v32 = vld [vmem:[%s11384_s30 + $0xa8] sm:$0xff] }
  0x33   : > { %16140 = vst [vmem:[#allocation14_spill] sm:$0xff] %v11600_v55  ;;  %v11604_v56 = vsel %vm11405_vm5, %v882_v48, 0.0  ;;  %vm631_vm9 = vcmp.ge.f32.partialorder %v505_v38, 0.0  ;;  %9858 = vmatprep.mubr.msk.f32.mxu0 %vm1723_vm4, %v11600_v55  ;;  %v757_v37 = vmul.f32 0.01, %v505_v38  ;;  %vm649_vm5 = vcmp.ge.f32.partialorder %v523_v43, 0.0 }
  0x34   : > { %9487 = vmatmul.mubr.msk.f32.gmra.mrb[6].mxu1 %vm1723_vm4, %v11604_v56  ;;  %v775_v60 = vmul.f32 0.01, %v523_v43  ;;  %v506_v61 = vadd.f32 %v11389_v30, %v376_v44  ;;  %v900_v0 = vsel %vm648_vm8, %v522_v33, %v774_v58  ;;  %v394_v1 = vmul.f32 %v11376_v27, %v262_v49  ;;  %v265_v33 = vld [vmem:[%s11384_s30 + $0x138] sm:$0xff]  ;;  %v248_v58 = vld [vmem:[%s11384_s30 + $0xb0] sm:$0xff] }
  0x35   : > { %v377_v2 = vmul.f32 %v11376_v27, %v245_v51  ;;  %v395_v3 = vmul.f32 %v11376_v27, %v263_v54  ;;  %v11634_v5 = vsel %vm11419_vm7, %v900_v0, 0.0  ;;  %v883_v7 = vsel %vm631_vm9, %v505_v38, %v757_v37  ;;  %vm1085_vm7 = vmand %vm11623_vm15, %vm1058_vm6 }
  0x36   : > { %16145 = vst [vmem:[#allocation15_spill] sm:$0xff] %v11634_v5  ;;  %v901_v12 = vsel %vm649_vm5, %v523_v43, %v775_v60  ;;  %vm632_vm0 = vcmp.ge.f32.partialorder %v506_v61, 0.0  ;;  %9859 = vmatmul.mubr.msk.f32.gmra.mrb[6].mxu0 %vm1723_vm4, %v11634_v5  ;;  %v11649_v42 = vsel %vm11583_vm3, %v883_v7, 0.0  ;;  %v758_v16 = vmul.f32 0.01, %v506_v61 }
  0x37   : > { %v11653_v14 = vsel %vm11610_vm14, %v901_v12, 0.0  ;;  %v524_v39 = vadd.f32 %v11389_v30, %v394_v1  ;;  %9489 = vmatprep.mubr.msk.f32.mxu1 %vm1723_vm4, %v11649_v42  ;;  %v507_v17 = vadd.f32 %v11389_v30, %v377_v2  ;;  %v525_v20 = vadd.f32 %v11389_v30, %v395_v3 }
  0x38   : > { %16148 = vst [vmem:[#allocation16_spill] sm:$0xff] %v11653_v14  ;;  %9861 = vmatprep.mubr.msk.f32.mxu0 %vm1723_vm4, %v11653_v14  ;;  %v378_v22 = vmul.f32 %v11376_v27, %v246_v4  ;;  %v11668_v23 = vadd.s32 6, %v11320_v8  ;;  %v884_v24 = vsel %vm632_vm0, %v506_v61, %v758_v16  ;;  %v396_v29 = vmul.f32 %v11376_v27, %v264_v52  ;;  %v249_v52 = vld [vmem:[%s11384_s30 + $0xb8] sm:$0xff]  ;;  %v267_v16 = vld [vmem:[%s11384_s30 + $0x148] sm:$0xff] }
  0x39   : > { %vm650_vm11 = vcmp.ge.f32.partialorder %v524_v39, 0.0  ;;  %v776_v28 = vmul.f32 0.01, %v524_v39  ;;  %v11677_v36 = vsel %vm1085_vm7, %v884_v24, 0.0  ;;  %vm633_vm13 = vcmp.ge.f32.partialorder %v507_v17, 0.0 }
  0x3a   : > { %v759_v38 = vmul.f32 0.01, %v507_v17  ;;  %vm651_vm1 = vcmp.ge.f32.partialorder %v525_v20, 0.0  ;;  %9490 = vmatmul.mubr.msk.f32.gmra.mrb[8].mxu1 %vm1723_vm4, %v11677_v36  ;;  %v777_v43 = vmul.f32 0.01, %v525_v20  ;;  %v508_v44 = vadd.f32 %v11389_v30, %v378_v22 }
  0x3b   : > { %v902_v41 = vsel %vm650_vm11, %v524_v39, %v776_v28  ;;  %v526_v47 = vadd.f32 %v11389_v30, %v396_v29  ;;  %v379_v51 = vmul.f32 %v11376_v27, %v247_v32  ;;  %v397_v54 = vmul.f32 %v11376_v27, %v265_v33 }
  0x3c   : > { %v11683_v48 = vsel %vm1103_vm12, %v902_v41, 0.0  ;;  %v885_v49 = vsel %vm633_vm13, %v507_v17, %v759_v38  ;;  %v903_v60 = vsel %vm651_vm1, %v525_v20, %v777_v43  ;;  %vm634_vm3 = vcmp.ge.f32.partialorder %v508_v44, 0.0  ;;  %v250_v41 = vld [vmem:[%s11384_s30 + $0xc0] sm:$0xff]  ;;  %v268_v43 = vld [vmem:[%s11384_s30 + $0x150] sm:$0xff] }
  0x3d   : > { %9862 = vmatmul.mubr.msk.f32.gmra.mrb[8].mxu0 %vm1723_vm4, %v11683_v48  ;;  %v11693_v37 = vsel %vm11623_vm15, %v885_v49, 0.0  ;;  %v760_v61 = vmul.f32 0.01, %v508_v44  ;;  %v11699_v0 = vsel %vm11640_vm10, %v903_v60, 0.0  ;;  %vm652_vm8 = vcmp.ge.f32.partialorder %v526_v47, 0.0 }
  0x3e   : > { %9492 = vmatprep.mubr.msk.f32.mxu1 %vm1723_vm4, %v11693_v37  ;;  %v778_v1 = vmul.f32 0.01, %v526_v47  ;;  %v509_v2 = vadd.f32 %v11389_v30, %v379_v51  ;;  %9864 = vmatprep.mubr.msk.f32.mxu0 %vm1723_vm4, %v11699_v0  ;;  %v527_v4 = vadd.f32 %v11389_v30, %v397_v54  ;;  %v380_v7 = vmul.f32 %v11376_v27, %v248_v58 }
  0x3f   : > { %v886_v3 = vsel %vm634_vm3, %v508_v44, %v760_v61  ;;  %v398_v12 = vmul.f32 %v11376_v27, %v266_v59  ;;  %v381_v33 = vmul.f32 %v11376_v27, %v249_v52  ;;  %v399_v38 = vmul.f32 %v11376_v27, %v267_v16 }
  0x40   : > { %v11711_v39 = vsel %vm11623_vm15, %v886_v3, 0.0  ;;  %v904_v17 = vsel %vm652_vm8, %v526_v47, %v778_v1  ;;  %vm635_vm9 = vcmp.ge.f32.partialorder %v509_v2, 0.0  ;;  %v761_v20 = vmul.f32 0.01, %v509_v2  ;;  %v269_v3 = vld [vmem:[%s11384_s30 + $0x158] sm:$0xff] }
  0x41   : > { %9493 = vmatmul.mubr.msk.f32.gmra.mrb[10].mxu1 %vm1723_vm4, %v11711_v39  ;;  %v11717_v22 = vsel %vm11640_vm10, %v904_v17, 0.0  ;;  %vm653_vm14 = vcmp.ge.f32.partialorder %v527_v4, 0.0  ;;  %v779_v24 = vmul.f32 0.01, %v527_v4  ;;  %v510_v28 = vadd.f32 %v11389_v30, %v380_v7 }
  0x42   : > { %9865 = vmatmul.mubr.msk.f32.gmra.mrb[10].mxu0 %vm1723_vm4, %v11717_v22  ;;  %v887_v29 = vsel %vm635_vm9, %v509_v2, %v761_v20  ;;  %v528_v32 = vadd.f32 %v11389_v30, %v398_v12  ;;  %v511_v58 = vadd.f32 %v11389_v30, %v381_v33  ;;  %vm1021_vm7 = vcmp.ge.s32.totalorder %v11439_v53, 3  ;;  %v251_v2 = vld [vmem:[%s11384_s30 + $0xc8] sm:$0xff]  ;;  %v270_v33 = vld [vmem:[%s11384_s30 + $0x160] sm:$0xff] }
  0x43   : > { %v11729_v44 = vsel %vm11623_vm15, %v887_v29, 0.0  ;;  %v905_v47 = vsel %vm653_vm14, %v527_v4, %v779_v24  ;;  %vm636_vm5 = vcmp.ge.f32.partialorder %v510_v28, 0.0  ;;  %v762_v49 = vmul.f32 0.01, %v510_v28  ;;  %vm11798_vm14 = vmand %vm11623_vm15, %vm1201_vm2 }
  0x44   : > { %9495 = vmatprep.mubr.msk.f32.mxu1 %vm1723_vm4, %v11729_v44  ;;  %v11735_v51 = vsel %vm11640_vm10, %v905_v47, 0.0  ;;  %vm654_vm0 = vcmp.ge.f32.partialorder %v528_v32, 0.0  ;;  %v780_v54 = vmul.f32 0.01, %v528_v32  ;;  %vm1035_vm11 = vcmp.lt.s32.totalorder %v11439_v53, 67 }
  0x45   : > { %16149 = vst [vmem:[#allocation17_spill] sm:$0xff] %v11735_v51  ;;  %9867 = vmatprep.mubr.msk.f32.mxu0 %vm1723_vm4, %v11735_v51  ;;  %v888_v59 = vsel %vm636_vm5, %v510_v28, %v762_v49  ;;  %v529_v60 = vadd.f32 %v11389_v30, %v399_v38  ;;  %v382_v61 = vmul.f32 %v11376_v27, %v250_v41  ;;  %vm637_vm12 = vcmp.ge.f32.partialorder %v511_v58, 0.0 }
  0x46   : > { %v400_v1 = vmul.f32 %v11376_v27, %v268_v43  ;;  %v11749_v4 = vsel %vm11623_vm15, %v888_v59, 0.0  ;;  %v906_v7 = vsel %vm654_vm0, %v528_v32, %v780_v54  ;;  %v763_v12 = vmul.f32 0.01, %v511_v58  ;;  %v252_v32 = vld [vmem:[%s11384_s30 + $0xd0] sm:$0xff]  ;;  %vm11822_vm0 = vmand %vm1021_vm7, %vm1035_vm11 }
  0x47   : > { %9496 = vmatmul.mubr.msk.f32.gmra.mrb[12].mxu1 %vm1723_vm4, %v11749_v4  ;;  %v11755_v52 = vsel %vm11640_vm10, %v906_v7, 0.0  ;;  %vm655_vm13 = vcmp.ge.f32.partialorder %v529_v60, 0.0  ;;  %v781_v16 = vmul.f32 0.01, %v529_v60  ;;  %v512_v17 = vadd.f32 %v11389_v30, %v382_v61  ;;  %vm11851_vm7 = vmand %vm11822_vm0, %vm1058_vm6 }
  0x48   : > { %16150 = vst [vmem:[#allocation18_spill] sm:$0xff] %v11755_v52  ;;  %9868 = vmatmul.mubr.msk.f32.gmra.mrb[12].mxu0 %vm1723_vm4, %v11755_v52  ;;  %v889_v20 = vsel %vm637_vm12, %v511_v58, %v763_v12  ;;  %v530_v24 = vadd.f32 %v11389_v30, %v400_v1  ;;  %v383_v28 = vmul.f32 %v11376_v27, %v251_v2  ;;  %v271_v1 = vld [vmem:[%s11384_s30 + $0x168] sm:$0xff]  ;;  %v272_v2 = vld [vmem:[%s11384_s30 + $0x170] sm:$0xff]  ;;  %vm1246_vm12 = vmand %vm11640_vm10, %vm1201_vm2 }
  0x49   : > { %v401_v29 = vmul.f32 %v11376_v27, %v269_v3  ;;  %v11767_v38 = vsel %vm11623_vm15, %v889_v20, 0.0  ;;  %v907_v41 = vsel %vm655_vm13, %v529_v60, %v781_v16  ;;  %vm638_vm1 = vcmp.ge.f32.partialorder %v512_v17, 0.0 }
  0x4a   : > { %v764_v43 = vmul.f32 0.01, %v512_v17  ;;  %9498 = vmatprep.mubr.msk.f32.mxu1 %vm1723_vm4, %v11767_v38  ;;  %v11773_v47 = vsel %vm11640_vm10, %v907_v41, 0.0  ;;  %vm656_vm3 = vcmp.ge.f32.partialorder %v530_v24, 0.0  ;;  %v782_v49 = vmul.f32 0.01, %v530_v24 }
  0x4b   : > { %16151 = vst [vmem:[#allocation19_spill] sm:$0xff] %v11773_v47  ;;  %v513_v54 = vadd.f32 %v11389_v30, %v383_v28  ;;  %9870 = vmatprep.mubr.msk.f32.mxu0 %vm1723_vm4, %v11773_v47  ;;  %v531_v59 = vadd.f32 %v11389_v30, %v401_v29  ;;  %v384_v60 = vmul.f32 %v11376_v27, %v252_v32  ;;  %v8662_v41 = vld [vmem:[%s15950_s1 + $0x120] sm:$0xff]  ;;  %vm1022_vm13 = vcmp.ge.s32.totalorder %v11668_v23, 3 }
  0x4c   : > { %v890_v58 = vsel %vm638_vm1, %v512_v17, %v764_v43  ;;  %v402_v61 = vmul.f32 %v11376_v27, %v270_v33  ;;  %v908_v7 = vsel %vm656_vm3, %v530_v24, %v782_v49  ;;  %v403_v32 = vmul.f32 %v11376_v27, %v271_v1  ;;  %v8663_v43 = vld [vmem:[%s15950_s1 + $0x128] sm:$0xff]  ;;  %v273_v49 = vld [vmem:[%s11384_s30 + $0x178] sm:$0xff] }
  0x4d   : > { %v11785_v3 = vsel %vm11623_vm15, %v890_v58, 0.0  ;;  %vm639_vm8 = vcmp.ge.f32.partialorder %v513_v54, 0.0  ;;  %v765_v12 = vmul.f32 0.01, %v513_v54  ;;  %v11791_v16 = vsel %vm11640_vm10, %v908_v7, 0.0  ;;  %v16241_v46 = vld [vmem:[#allocation17_spill] sm:$0xff] }
  0x4e   : > { %9499 = vmatmul.mubr.msk.f32.gmra.mrb[14].mxu1 %vm1723_vm4, %v11785_v3  ;;  %16152 = vst [vmem:[#allocation20_spill] sm:$0xff] %v11791_v16  ;;  %vm657_vm9 = vcmp.ge.f32.partialorder %v531_v59, 0.0  ;;  %v783_v17 = vmul.f32 0.01, %v531_v59  ;;  %v514_v20 = vadd.f32 %v11389_v30, %v384_v60  ;;  %9871 = vmatmul.mubr.msk.f32.gmra.mrb[14].mxu0 %vm1723_vm4, %v11791_v16  ;;  %v532_v29 = vadd.f32 %v11389_v30, %v402_v61 }
  0x4f   : > { %v891_v28 = vsel %vm639_vm8, %v513_v54, %v765_v12  ;;  %v404_v33 = vmul.f32 %v11376_v27, %v272_v2  ;;  %v533_v53 = vadd.f32 %v11389_v30, %v403_v32  ;;  %v10401_v7 = vpack.c.bf16 %v8663_v43, %v8662_v41  ;;  %v276_v41 = vld [vmem:[%s11384_s30 + $0x190] sm:$0xff] }
  0x50   : > { %v11816_v58 = vsel %vm11623_vm15, %v891_v28, 0.0  ;;  %v909_v54 = vsel %vm657_vm9, %v531_v59, %v783_v17  ;;  %vm640_vm5 = vcmp.ge.f32.partialorder %v514_v20, 0.0  ;;  %v766_v60 = vmul.f32 0.01, %v514_v20  ;;  %v274_v17 = vld [vmem:[%s11384_s30 + $0x180] sm:$0xff]  ;;  %v275_v28 = vld [vmem:[%s11384_s30 + $0x188] sm:$0xff] }
  0x51   : > { %9501 = vmatprep.mubr.msk.f32.mxu1 %vm1723_vm4, %v11816_v58  ;;  %v11830_v62 = vsel %vm11640_vm10, %v909_v54, 0.0  ;;  %vm658_vm15 = vcmp.ge.f32.partialorder %v532_v29, 0.0  ;;  %v784_v59 = vmul.f32 0.01, %v532_v29  ;;  %v534_v2 = vadd.f32 %v11389_v30, %v404_v33  ;;  %10402 = vmatprep.subr.bf16.mxu0 %v10401_v7 }
  0x52   : > { %16157 = vst [vmem:[#allocation21_spill] sm:$0xff] %v11830_v62  ;;  %9873 = vmatprep.mubr.msk.f32.mxu0 %vm1723_vm4, %v11830_v62  ;;  %v892_v1 = vsel %vm640_vm5, %v514_v20, %v766_v60  ;;  %v405_v12 = vmul.f32 %v11376_v27, %v273_v49  ;;  %vm659_vm10 = vcmp.ge.f32.partialorder %v533_v53, 0.0  ;;  %v785_v32 = vmul.f32 0.01, %v533_v53  ;;  %10404 = vmatpush3.bf16.msra.mxu0 %v10401_v7 }
  0x53   : > { %v11845_v54 = vsel %vm11798_vm14, %v892_v1, 0.0  ;;  %v910_v31 = vsel %vm658_vm15, %v532_v29, %v784_v59  ;;  %vm660_vm11 = vcmp.ge.f32.partialorder %v534_v2, 0.0  ;;  %v786_v29 = vmul.f32 0.01, %v534_v2  ;;  %v277_v59 = vld [vmem:[%s11384_s30 + $0x198] sm:$0xff]  ;;  %v278_v1 = vld [vmem:[%s11384_s30 + $0x1a0] sm:$0xff] }
  0x54   : > { %16158 = vst [vmem:[#allocation22_spill] sm:$0xff] %v11845_v54  ;;  %9502 = vmatmul.mubr.msk.f32.gmra.mrb[16].mxu1 %vm1723_vm4, %v11845_v54  ;;  %v11857_v24 = vsel %vm1246_vm12, %v910_v31, 0.0  ;;  %v535_v33 = vadd.f32 %v11389_v30, %v405_v12  ;;  %v911_v43 = vsel %vm659_vm10, %v533_v53, %v785_v32  ;;  %v406_v49 = vmul.f32 %v11376_v27, %v274_v17  ;;  %v279_v31 = vld [vmem:[%s11384_s30 + $0x1a8] sm:$0xff]  ;;  %vm11939_vm10 = vmand %vm11822_vm0, %vm1201_vm2  ;;  %v1708_v54 = vld [vmem:[%s15950_s1 + $0x10] sm:$0xff] }
  0x55   : > { %16161 = vst [vmem:[#allocation23_spill] sm:$0xff] %v11857_v24  ;;  %9874 = vmatmul.mubr.msk.f32.gmra.mrb[16].mxu0 %vm1723_vm4, %v11857_v24  ;;  %9504 = vmatprep.mubr.msk.f32.mxu1 %vm1723_vm4, %v11470_v11  ;;  %v407_v60 = vmul.f32 %v11376_v27, %v275_v28  ;;  %vm1036_vm1 = vcmp.lt.s32.totalorder %v11668_v23, 67  ;;  %v11874_v12 = vsel %vm11851_vm7, %v911_v43, 0.0  ;;  %v912_v35 = vsel %vm660_vm11, %v534_v2, %v786_v29 }
  0x56   : > { %16162 = vst [vmem:[#allocation24_spill] sm:$0xff] %v11874_v12  ;;  %vm661_vm3 = vcmp.ge.f32.partialorder %v535_v33, 0.0  ;;  %v787_v53 = vmul.f32 0.01, %v535_v33  ;;  %9876 = vmatprep.mubr.msk.f32.mxu0 %vm1723_vm4, %v11874_v12  ;;  %v11881_v17 = vsel %vm11822_vm0, %v912_v35, 0.0  ;;  %v536_v28 = vadd.f32 %v11389_v30, %v406_v49  ;;  %v8664_v35 = vld [vmem:[%s15950_s1 + $0x130] sm:$0xff]  ;;  %vm11958_vm7 = vmand %vm1022_vm13, %vm1036_vm1 }
  0x57   : > { %16163 = vst [vmem:[#allocation25_spill] sm:$0xff] %v11881_v17  ;;  %v537_v32 = vadd.f32 %v11389_v30, %v407_v60  ;;  %v408_v20 = vmul.f32 %v11376_v27, %v276_v41  ;;  %v409_v7 = vmul.f32 %v11376_v27, %v277_v59  ;;  %v410_v29 = vmul.f32 %v11376_v27, %v278_v1  ;;  %v8665_v49 = vld [vmem:[%s15950_s1 + $0x138] sm:$0xff] }
  0x58   : > { %9505 = vmatmul.mubr.msk.f32.gmra.mrb[18].mxu1 %vm1723_vm4, %v11484_v19  ;;  %v913_v2 = vsel %vm661_vm3, %v535_v33, %v787_v53  ;;  %v411_v43 = vmul.f32 %v11376_v27, %v279_v31  ;;  %vm662_vm8 = vcmp.ge.f32.partialorder %v536_v28, 0.0  ;;  %v788_v41 = vmul.f32 0.01, %v536_v28 }
  0x59   : > { %9877 = vmatmul.mubr.msk.f32.gmra.mrb[18].mxu0 %vm1723_vm4, %v11881_v17  ;;  %9507 = vmatprep.mubr.msk.f32.mxu1 %vm1723_vm4, %v11508_v40  ;;  %v11904_v33 = vsel %vm11822_vm0, %v913_v2, 0.0  ;;  %vm663_vm9 = vcmp.ge.f32.partialorder %v537_v32, 0.0  ;;  %v789_v60 = vmul.f32 0.01, %v537_v32  ;;  %v538_v59 = vadd.f32 %v11389_v30, %v408_v20 }
  0x5a   : > { %16164 = vst [vmem:[#allocation26_spill] sm:$0xff] %v11904_v33  ;;  %9879 = vmatprep.mubr.msk.f32.mxu0 %vm1723_vm4, %v11904_v33  ;;  %v539_v1 = vadd.f32 %v11389_v30, %v409_v7  ;;  %v540_v31 = vadd.f32 %v11389_v30, %v410_v29  ;;  %v914_v53 = vsel %vm662_vm8, %v536_v28, %v788_v41  ;;  %v281_v7 = vld [vmem:[%s11384_s30 + $0x1b8] sm:$0xff]  ;;  %v282_v29 = vld [vmem:[%s11384_s30 + $0x1c0] sm:$0xff] }
  0x5b   : > { %v541_v15 = vadd.f32 %v11389_v30, %v411_v43  ;;  %v412_v2 = vmul.f32 %v11376_v27, %v280_v26  ;;  %v10405_v40 = vpack.c.bf16 %v8665_v49, %v8664_v35  ;;  %v11917_v19 = vsel %vm11822_vm0, %v914_v53, 0.0  ;;  %v283_v53 = vld [vmem:[%s11384_s30 + $0x1c8] sm:$0xff] }
  0x5c   : > { %9508 = vmatmul.mubr.msk.f32.gmra.mrb[20].mxu1 %vm1723_vm4, %v11529_v57  ;;  %16165 = vst [vmem:[#allocation27_spill] sm:$0xff] %v11917_v19  ;;  %v915_v11 = vsel %vm663_vm9, %v537_v32, %v789_v60  ;;  %vm664_vm14 = vcmp.ge.f32.partialorder %v538_v59, 0.0  ;;  %v790_v20 = vmul.f32 0.01, %v538_v59  ;;  %vm665_vm5 = vcmp.ge.f32.partialorder %v539_v1, 0.0 }
  0x5d   : > { %9880 = vmatmul.mubr.msk.f32.gmra.mrb[20].mxu0 %vm1723_vm4, %v11917_v19  ;;  %9510 = vmatprep.mubr.msk.f32.mxu1 %vm1723_vm4, %v11553_v6  ;;  %v11926_v26 = vsel %vm11822_vm0, %v915_v11, 0.0  ;;  %v791_v28 = vmul.f32 0.01, %v539_v1  ;;  %vm666_vm15 = vcmp.ge.f32.partialorder %v540_v31, 0.0  ;;  %v792_v43 = vmul.f32 0.01, %v540_v31 }
  0x5e   : > { %16166 = vst [vmem:[#allocation28_spill] sm:$0xff] %v11926_v26  ;;  %9882 = vmatprep.mubr.msk.f32.mxu0 %vm1723_vm4, %v11926_v26  ;;  %v916_v32 = vsel %vm664_vm14, %v538_v59, %v790_v20  ;;  %vm667_vm12 = vcmp.ge.f32.partialorder %v541_v15, 0.0  ;;  %v793_v35 = vmul.f32 0.01, %v541_v15  ;;  %10406 = vmatprep.subr.bf16.mxu0 %v10405_v40  ;;  %v542_v60 = vadd.f32 %v11389_v30, %v412_v2  ;;  %v284_v20 = vld [vmem:[%s11384_s30 + $0x1d0] sm:$0xff]  ;;  %v286_v6 = vld [vmem:[%s11384_s30 + $0x1e0] sm:$0xff] }
  0x5f   : > { %v11933_v11 = vsel %vm11822_vm0, %v916_v32, 0.0  ;;  %v917_v49 = vsel %vm665_vm5, %v539_v1, %v791_v28  ;;  %v413_v59 = vmul.f32 %v11376_v27, %v281_v7  ;;  %10408 = vmatpush3.bf16.msra.mxu0 %v10405_v40  ;;  %v918_v28 = vsel %vm666_vm15, %v540_v31, %v792_v43  ;;  %v285_v7 = vld [vmem:[%s11384_s30 + $0x1d8] sm:$0xff]  ;;  %v287_v31 = vld [vmem:[%s11384_s30 + $0x1e8] sm:$0xff]  ;;  %v8740_v2 = vld [vmem:[%s15950_s1 + $0x150] sm:$0xff] }
  0x60   : > { %16167 = vst [vmem:[#allocation29_spill] sm:$0xff] %v11933_v11  ;;  %9511 = vmatmul.mubr.msk.f32.gmra.mrb[22].mxu1 %vm1723_vm4, %v11573_v25  ;;  %v11951_v1 = vsel %vm11822_vm0, %v917_v49, 0.0  ;;  %v919_v32 = vsel %vm667_vm12, %v541_v15, %v793_v35  ;;  %v414_v40 = vmul.f32 %v11376_v27, %v282_v29  ;;  %v11971_v15 = vsel %vm11822_vm0, %v918_v28, 0.0  ;;  %vm11988_vm0 = vmand %vm11958_vm7, %vm1058_vm6  ;;  %v1707_v28 = vld [vmem:[%s15950_s1 + $0x8] sm:$0xff] }
  0x61   : > { %16170 = vst [vmem:[#allocation30_spill] sm:$0xff] %v11951_v1  ;;  %9883 = vmatmul.mubr.msk.f32.gmra.mrb[22].mxu0 %vm1723_vm4, %v11933_v11  ;;  %9513 = vmatprep.mubr.msk.f32.mxu1 %vm1723_vm4, %v11600_v55  ;;  %16173 = vst [vmem:[#allocation31_spill] sm:$0xff] %v11971_v15  ;;  %vm668_vm11 = vcmp.ge.f32.partialorder %v542_v60, 0.0  ;;  %v794_v23 = vmul.f32 0.01, %v542_v60  ;;  %v543_v29 = vadd.f32 %v11389_v30, %v413_v59  ;;  %v11982_v55 = vsel %vm11939_vm10, %v919_v32, 0.0 }
  0x62   : > { %9885 = vmatprep.mubr.msk.f32.mxu0 %vm1723_vm4, %v11951_v1  ;;  %v544_v43 = vadd.f32 %v11389_v30, %v414_v40  ;;  %v415_v35 = vmul.f32 %v11376_v27, %v283_v53  ;;  %v416_v49 = vmul.f32 %v11376_v27, %v284_v20  ;;  %16174 = vst [vmem:[#allocation32_spill] sm:$0xff] %v11982_v55  ;;  %v288_v53 = vld [vmem:[%s11384_s30 + $0x1f0] sm:$0xff]  ;;  %vm1264_vm12 = vmand %vm11958_vm7, %vm1201_vm2 }
  0x63   : > { %v920_v61 = vsel %vm668_vm11, %v542_v60, %v794_v23  ;;  %v417_v59 = vmul.f32 %v11376_v27, %v285_v7  ;;  %v418_v40 = vmul.f32 %v11376_v27, %v286_v6  ;;  %vm669_vm13 = vcmp.ge.f32.partialorder %v543_v29, 0.0 }
  0x64   : > { %9514 = vmatmul.mubr.msk.f32.gmra.mrb[24].mxu1 %vm1723_vm4, %v11634_v5  ;;  %v795_v41 = vmul.f32 0.01, %v543_v29  ;;  %vm670_vm1 = vcmp.ge.f32.partialorder %v544_v43, 0.0  ;;  %v419_v60 = vmul.f32 %v11376_v27, %v287_v31  ;;  %v796_v20 = vmul.f32 0.01, %v544_v43 }
  0x65   : > { %9886 = vmatmul.mubr.msk.f32.gmra.mrb[24].mxu0 %vm1723_vm4, %v11971_v15  ;;  %9516 = vmatprep.mubr.msk.f32.mxu1 %vm1723_vm4, %v11653_v14  ;;  %v545_v32 = vadd.f32 %v11389_v30, %v415_v35  ;;  %v546_v6 = vadd.f32 %v11389_v30, %v416_v49  ;;  %v547_v7 = vadd.f32 %v11389_v30, %v417_v59  ;;  %v12009_v23 = vsel %vm11988_vm0, %v920_v61, 0.0 }
  0x66   : > { %9888 = vmatprep.mubr.msk.f32.mxu0 %vm1723_vm4, %v11982_v55  ;;  %16177 = vst [vmem:[#allocation33_spill] sm:$0xff] %v12009_v23  ;;  %v921_v31 = vsel %vm669_vm13, %v543_v29, %v795_v41  ;;  %v548_v5 = vadd.f32 %v11389_v30, %v418_v40  ;;  %v420_v25 = vmul.f32 %v11376_v27, %v288_v53  ;;  %v8738_v53 = vld [vmem:[%s15950_s1 + $0x140] sm:$0xff]  ;;  %v8739_v41 = vld [vmem:[%s15950_s1 + $0x148] sm:$0xff] }
  0x67   : > { %v12015_v14 = vsel %vm11958_vm7, %v921_v31, 0.0  ;;  %v922_v35 = vsel %vm670_vm1, %v544_v43, %v796_v20  ;;  %vm671_vm3 = vcmp.ge.f32.partialorder %v545_v32, 0.0  ;;  %v797_v49 = vmul.f32 0.01, %v545_v32  ;;  %v1706_v43 = vld [vmem:[%s15950_s1] sm:$0xff] }
  0x68   : > { %16178 = vst [vmem:[#allocation34_spill] sm:$0xff] %v12015_v14  ;;  %9517 = vmatmul.mubr.msk.f32.gmra.mrb[26].mxu1 %vm1723_vm4, %v11683_v48  ;;  %vm672_vm8 = vcmp.ge.f32.partialorder %v546_v6, 0.0  ;;  %v798_v59 = vmul.f32 0.01, %v546_v6  ;;  %v549_v61 = vadd.f32 %v11389_v30, %v419_v60  ;;  %vm673_vm9 = vcmp.ge.f32.partialorder %v547_v7, 0.0 }
  0x69   : > { %9889 = vmatmul.mubr.msk.f32.gmra.mrb[26].mxu0 %vm1723_vm4, %v12009_v23  ;;  %9519 = vmatprep.mubr.msk.f32.mxu1 %vm1723_vm4, %v11699_v0  ;;  %v923_v27 = vsel %vm671_vm3, %v545_v32, %v797_v49  ;;  %v799_v29 = vmul.f32 0.01, %v547_v7  ;;  %v12034_v40 = vsel %vm11958_vm7, %v922_v35, 0.0  ;;  %v800_v32 = vmul.f32 0.01, %v548_v5 }
  0x6a   : > { %9891 = vmatprep.mubr.msk.f32.mxu0 %vm1723_vm4, %v12015_v14  ;;  %16179 = vst [vmem:[#allocation35_spill] sm:$0xff] %v12034_v40  ;;  %v12044_v60 = vsel %vm11958_vm7, %v923_v27, 0.0  ;;  %v924_v20 = vsel %vm672_vm8, %v546_v6, %v798_v59  ;;  %v550_v31 = vadd.f32 %v11389_v30, %v420_v25  ;;  %vm674_vm14 = vcmp.ge.f32.partialorder %v548_v5, 0.0  ;;  %v1709_v27 = vld [vmem:[%s15950_s1 + $0x18] sm:$0xff] }
  0x6b   : > { %16180 = vst [vmem:[#allocation36_spill] sm:$0xff] %v12044_v60  ;;  %v925_v35 = vsel %vm673_vm9, %v547_v7, %v799_v29  ;;  %v801_v49 = vmul.f32 0.01, %v549_v61  ;;  %v10345_v57 = vpack.c.bf16 %v1707_v28, %v1706_v43  ;;  %vm675_vm5 = vcmp.ge.f32.partialorder %v549_v61, 0.0  ;;  %v8741_v28 = vld [vmem:[%s15950_s1 + $0x158] sm:$0xff] }
  0x6c   : > { %9520 = vmatmul.mubr.msk.f32.gmra.mrb[28].mxu1 %vm1723_vm4, %v11717_v22  ;;  %v10409_v30 = vpack.c.bf16 %v8739_v41, %v8738_v53  ;;  %v12063_v25 = vsel %vm11958_vm7, %v924_v20, 0.0  ;;  %v12067_v6 = vsel %vm11958_vm7, %v925_v35, 0.0  ;;  %v926_v7 = vsel %vm674_vm14, %v548_v5, %v800_v32  ;;  %v1710_v41 = vld [vmem:[%s15950_s1 + $0x20] sm:$0xff]  ;;  %v1711_v20 = vld [vmem:[%s15950_s1 + $0x28] sm:$0xff]  ;;  %v1712_v32 = vld [vmem:[%s15950_s1 + $0x30] sm:$0xff] }
  0x6d   : > { %9892 = vmatmul.mubr.msk.f32.gmra.mrb[28].mxu0 %vm1723_vm4, %v12034_v40  ;;  %9522 = vmatprep.mubr.msk.f32.mxu1 %vm1723_vm4, %v11735_v51  ;;  %16181 = vst [vmem:[#allocation37_spill] sm:$0xff] %v12063_v25  ;;  %16182 = vst [vmem:[#allocation38_spill] sm:$0xff] %v12067_v6  ;;  %v802_v59 = vmul.f32 0.01, %v550_v31  ;;  %v10349_v29 = vpack.c.bf16 %v1709_v27, %v1708_v54  ;;  %v927_v43 = vsel %vm675_vm5, %v549_v61, %v801_v49  ;;  %v289_v27 = vld [vmem:[%s11384_s30 + $0x1f8] sm:$0xff] }
  0x6e   : > { %9894 = vmatprep.mubr.msk.f32.mxu0 %vm1723_vm4, %v12044_v60  ;;  %10346 = vmatprep.subr.bf16.mxu1 %v10345_v57  ;;  %vm676_vm15 = vcmp.ge.f32.partialorder %v550_v31, 0.0  ;;  %v12079_v5 = vsel %vm11958_vm7, %v926_v7, 0.0  ;;  %v10413_v53 = vpack.c.bf16 %v8741_v28, %v8740_v2  ;;  %v10353_v35 = vpack.c.bf16 %v1711_v20, %v1710_v41  ;;  %v8743_v7 = vld [vmem:[%s15950_s1 + $0x168] sm:$0xff]  ;;  %v12185_v41 = vld [vmem:[%s15952_s3 + $0x1] ss:$0 sm:$0xff] }
  0x6f   : > { %10410 = vmatprep.subr.bf16.mxu0 %v10409_v30  ;;  %10348 = vmatpush3.bf16.msra.mxu1 %v10345_v57  ;;  %16183 = vst [vmem:[#allocation39_spill] sm:$0xff] %v12079_v5  ;;  %v12083_v57 = vsel %vm11958_vm7, %v927_v43, 0.0  ;;  %v928_v54 = vsel %vm676_vm15, %v550_v31, %v802_v59  ;;  %v1713_v31 = vld [vmem:[%s15950_s1 + $0x38] sm:$0xff]  ;;  %v12167_v59 = vld [vmem:[%s15952_s3] ss:$0 sm:$0xff]  ;;  %v999_v28 = vadd.s32 7, %v11320_v8 }
  0x70   : > { %9523 = vmatmul.mubr.msk.f32.gmra.mrb[30].mxu1 %vm1723_vm4, %v11755_v52  ;;  %10350 = vmatprep.subr.bf16.mxu1 %v10349_v29  ;;  %16184 = vst [vmem:[#allocation40_spill] sm:$0xff] %v12083_v57  ;;  %v12097_v61 = vsel %vm1264_vm12, %v928_v54, 0.0  ;;  %v10357_v49 = vpack.c.bf16 %v1713_v31, %v1712_v32  ;;  %v290_v43 = vld [vmem:[%s11384_s30 + $0x200] sm:$0xff]  ;;  %v291_v54 = vld [vmem:[%s11384_s30 + $0x208] sm:$0xff]  ;;  %v292_v31 = vld [vmem:[%s11384_s30 + $0x210] sm:$0xff] }
  0x71   : > { %9895 = vmatmul.mubr.msk.f32.gmra.mrb[30].mxu0 %vm1723_vm4, %v12063_v25  ;;  %9525 = vmatprep.mubr.msk.f32.mxu1 %vm1723_vm4, %v11773_v47  ;;  %16185 = vst [vmem:[#allocation41_spill] sm:$0xff] %v12097_v61  ;;  %v423_v32 = vmul.f32 %v12167_v59, %v291_v54  ;;  %vm1023_vm10 = vcmp.ge.s32.totalorder %v999_v28, 3  ;;  %vm1037_vm7 = vcmp.lt.s32.totalorder %v999_v28, 67 }
  0x72   : > { %9897 = vmatprep.mubr.msk.f32.mxu0 %vm1723_vm4, %v12067_v6  ;;  %vm12206_vm0 = vmand %vm1023_vm10, %vm1037_vm7 }
  0x73   : > { %10352 = vmatpush3.bf16.msra.mxu1 %v10349_v29  ;;  %v421_v29 = vmul.f32 %v12167_v59, %v289_v27  ;;  %v424_v27 = vmul.f32 %v12167_v59, %v292_v31  ;;  %v296_v31 = vld [vmem:[%s11384_s30 + $0x230] sm:$0xff]  ;;  %vm1130_vm1 = vmand %vm12206_vm0, %vm1058_vm6 }
  0x74   : > { %9526 = vmatmul.mubr.msk.f32.gmra.mrb[32].mxu1 %vm1723_vm4, %v11791_v16  ;;  %10354 = vmatprep.subr.bf16.mxu1 %v10353_v35 }
  0x75   : > { %9898 = vmatmul.mubr.msk.f32.gmra.mrb[32].mxu0 %vm1723_vm4, %v12079_v5  ;;  %9528 = vmatprep.mubr.msk.f32.mxu1 %vm1723_vm4, %v11830_v62  ;;  %v551_v20 = vadd.f32 %v12185_v41, %v421_v29  ;;  %v553_v29 = vadd.f32 %v12185_v41, %v423_v32  ;;  %v554_v32 = vadd.f32 %v12185_v41, %v424_v27 }
  0x76   : > { %9900 = vmatprep.mubr.msk.f32.mxu0 %vm1723_vm4, %v12083_v57  ;;  %v428_v27 = vmul.f32 %v12167_v59, %v296_v31 }
  0x77   : > { %10356 = vmatpush3.bf16.msra.mxu1 %v10353_v35  ;;  %v293_v35 = vld [vmem:[%s11384_s30 + $0x218] sm:$0xff]  ;;  %vm677_vm11 = vcmp.ge.f32.partialorder %v551_v20, 0.0  ;;  %vm679_vm3 = vcmp.ge.f32.partialorder %v553_v29, 0.0  ;;  %vm680_vm8 = vcmp.ge.f32.partialorder %v554_v32, 0.0 }
  0x78   : > { %9529 = vmatmul.mubr.msk.f32.gmra.mrb[34].mxu1 %vm1723_vm4, %v11857_v24  ;;  %10358 = vmatprep.subr.bf16.mxu1 %v10357_v49 }
  0x79   : > { %9901 = vmatmul.mubr.msk.f32.gmra.mrb[34].mxu0 %vm1723_vm4, %v12097_v61  ;;  %9531 = vmatprep.mubr.msk.f32.mxu1 %vm1723_vm4, %v11874_v12 }
  0x7a   : > { %9973 = vmatprep.mubr.msk.f32.mxu0 %vm1723_vm4, %v11683_v48 }
  0x7b   : > { %10360 = vmatpush3.bf16.msra.mxu1 %v10357_v49 }
  0x7c   : > { %9532 = vmatmul.mubr.msk.f32.gmra.mrb[36].mxu1 %vm1723_vm4, %v11881_v17 }
  0x7d   : > { %9974 = vmatmul.mubr.msk.f32.vlgmr.msra.gmra.mrb[0].mxu0 %vm1723_vm4, %v11699_v0  ;;  %9534 = vmatprep.mubr.msk.f32.mxu1 %vm1723_vm4, %v11904_v33 }
  0x7e   : > { %10412 = vmatpush3.bf16.msra.mxu0 %v10409_v30  ;;  %9976 = vmatprep.mubr.msk.f32.mxu0 %vm1723_vm4, %v11717_v22  ;;  %v8742_v30 = vld [vmem:[%s15950_s1 + $0x160] sm:$0xff] }
  0x7f   : > { %10414 = vmatprep.subr.bf16.mxu0 %v10413_v53  ;;  %v10417_v2 = vpack.c.bf16 %v8743_v7, %v8742_v30  ;;  %v294_v30 = vld [vmem:[%s11384_s30 + $0x220] sm:$0xff]  ;;  %v803_v7 = vmul.f32 0.01, %v551_v20 }
  0x80   : > { %9535 = vmatmul.mubr.msk.f32.gmra.mrb[38].mxu1 %vm1723_vm4, %v11917_v19  ;;  %v426_v28 = vmul.f32 %v12167_v59, %v294_v30 }
  0x81   : > { %9977 = vmatmul.mubr.msk.f32.gmra.mrb[2].mxu0 %vm1723_vm4, %v11735_v51  ;;  %9537 = vmatprep.mubr.msk.f32.mxu1 %vm1723_vm4, %v11926_v26 }
  0x82   : > { %9979 = vmatprep.mubr.msk.f32.mxu0 %vm1723_vm4, %v11755_v52  ;;  %10416 = vmatpush3.bf16.msra.mxu0 %v10413_v53  ;;  %v422_v53 = vmul.f32 %v12167_v59, %v290_v43  ;;  %v425_v43 = vmul.f32 %v12167_v59, %v293_v35  ;;  %v929_v35 = vsel %vm677_vm11, %v551_v20, %v803_v7  ;;  %vm12318_vm11 = vmand %vm12206_vm0, %vm1201_vm2 }
  0x83   : > { %10418 = vmatprep.subr.bf16.mxu0 %v10417_v2  ;;  %v556_v20 = vadd.f32 %v12185_v41, %v426_v28  ;;  %v12237_v7 = vsel %vm1130_vm1, %v929_v35, 0.0  ;;  %v299_v28 = vld [vmem:[%s11384_s30 + $0x248] sm:$0xff]  ;;  %v300_v35 = vld [vmem:[%s11384_s30 + $0x250] sm:$0xff] }
  0x84   : > { %9538 = vmatmul.mubr.msk.f32.gmra.mrb[40].mxu1 %vm1723_vm4, %v11933_v11  ;;  %v552_v49 = vadd.f32 %v12185_v41, %v422_v53  ;;  %16188 = vst [vmem:[#allocation42_spill] sm:$0xff] %v12237_v7 }
  0x85   : > { %9980 = vmatmul.mubr.msk.f32.gmra.mrb[4].mxu0 %vm1723_vm4, %v11773_v47  ;;  %9540 = vmatprep.mubr.msk.f32.mxu1 %vm1723_vm4, %v11951_v1  ;;  %vm682_vm14 = vcmp.ge.f32.partialorder %v556_v20, 0.0  ;;  %v808_v31 = vmul.f32 0.01, %v556_v20 }
  0x86   : > { %9982 = vmatprep.mubr.msk.f32.mxu0 %vm1723_vm4, %v11791_v16  ;;  %10420 = vmatpush3.bf16.msra.mxu0 %v10417_v2  ;;  %v295_v2 = vld [vmem:[%s11384_s30 + $0x228] sm:$0xff]  ;;  %vm678_vm13 = vcmp.ge.f32.partialorder %v552_v49, 0.0  ;;  %v804_v53 = vmul.f32 0.01, %v552_v49  ;;  %v297_v16 = vld [vmem:[%s11384_s30 + $0x238] sm:$0xff] }
  0x87   : > { %v427_v30 = vmul.f32 %v12167_v59, %v295_v2  ;;  %v806_v2 = vmul.f32 0.01, %v554_v32  ;;  %v429_v52 = vmul.f32 %v12167_v59, %v297_v16 }
  0x88   : > { %9541 = vmatmul.mubr.msk.f32.gmra.mrb[42].mxu1 %vm1723_vm4, %v11971_v15 }
  0x89   : > { %9983 = vmatmul.mubr.msk.f32.gmra.mrb[6].mxu0 %vm1723_vm4, %v11830_v62  ;;  %9543 = vmatprep.mubr.msk.f32.mxu1 %vm1723_vm4, %v11982_v55  ;;  %v555_v62 = vadd.f32 %v12185_v41, %v425_v43  ;;  %v930_v43 = vsel %vm678_vm13, %v552_v49, %v804_v53  ;;  %v558_v49 = vadd.f32 %v12185_v41, %v428_v27 }
  0x8a   : > { %9985 = vmatprep.mubr.msk.f32.mxu0 %vm1723_vm4, %v11857_v24  ;;  %v805_v24 = vmul.f32 0.01, %v553_v29  ;;  %v932_v53 = vsel %vm680_vm8, %v554_v32, %v806_v2  ;;  %v431_v27 = vmul.f32 %v12167_v59, %v299_v28  ;;  %v934_v2 = vsel %vm682_vm14, %v556_v20, %v808_v31  ;;  %v8744_v31 = vld [vmem:[%s15950_s1 + $0x170] sm:$0xff] }
  0x8b   : > { %vm681_vm9 = vcmp.ge.f32.partialorder %v555_v62, 0.0  ;;  %vm684_vm15 = vcmp.ge.f32.partialorder %v558_v49, 0.0 }
  0x8c   : > { %9544 = vmatmul.mubr.msk.f32.gmra.mrb[44].mxu1 %vm1723_vm4, %v12009_v23  ;;  %v931_v47 = vsel %vm679_vm3, %v553_v29, %v805_v24  ;;  %v12252_v24 = vsel %vm12206_vm0, %v930_v43, 0.0  ;;  %v559_v43 = vadd.f32 %v12185_v41, %v429_v52  ;;  %v810_v52 = vmul.f32 0.01, %v558_v49 }
  0x8d   : > { %9986 = vmatmul.mubr.msk.f32.gmra.mrb[8].mxu0 %vm1723_vm4, %v11874_v12  ;;  %9546 = vmatprep.mubr.msk.f32.mxu1 %vm1723_vm4, %v12015_v14  ;;  %16189 = vst [vmem:[#allocation43_spill] sm:$0xff] %v12252_v24  ;;  %v12260_v29 = vsel %vm12206_vm0, %v931_v47, 0.0  ;;  %v1000_v47 = vadd.s32 8, %v11320_v8 }
  0x8e   : > { %9988 = vmatprep.mubr.msk.f32.mxu0 %vm1723_vm4, %v11881_v17  ;;  %16190 = vst [vmem:[#allocation44_spill] sm:$0xff] %v12260_v29  ;;  %vm685_vm12 = vcmp.ge.f32.partialorder %v559_v43, 0.0 }
  0x8f   : > { %vm1024_vm10 = vcmp.ge.s32.totalorder %v1000_v47, 3  ;;  %vm1038_vm7 = vcmp.lt.s32.totalorder %v1000_v47, 67 }
  0x90   : > { %9547 = vmatmul.mubr.msk.f32.gmra.mrb[46].mxu1 %vm1723_vm4, %v12034_v40  ;;  %vm12328_vm1 = vmand %vm1024_vm10, %vm1038_vm7  ;;  %vm1016_vm10 = vcmp.ge.s32.totalorder %v11320_v8, 3  ;;  %vm1030_vm7 = vcmp.lt.s32.totalorder %v11320_v8, 67 }
  0x91   : > { %9989 = vmatmul.mubr.msk.f32.gmra.mrb[10].mxu0 %vm1723_vm4, %v11904_v33  ;;  %9549 = vmatprep.mubr.msk.f32.mxu1 %vm1723_vm4, %v12044_v60 }
  0x92   : > { %9991 = vmatprep.mubr.msk.f32.mxu0 %vm1723_vm4, %v11917_v19  ;;  %v302_v19 = vld [vmem:[%s11384_s30 + $0x260] sm:$0xff] }
  0x94   : > { %9550 = vmatmul.mubr.msk.f32.gmra.mrb[48].mxu1 %vm1723_vm4, %v12063_v25 }
  0x95   : > { %9992 = vmatmul.mubr.msk.f32.gmra.mrb[12].mxu0 %vm1723_vm4, %v11926_v26  ;;  %9552 = vmatprep.mubr.msk.f32.mxu1 %vm1723_vm4, %v12067_v6  ;;  %v557_v26 = vadd.f32 %v12185_v41, %v427_v30 }
  0x96   : > { %9994 = vmatprep.mubr.msk.f32.mxu0 %vm1723_vm4, %v11933_v11  ;;  %v298_v11 = vld [vmem:[%s11384_s30 + $0x240] sm:$0xff] }
  0x97   : > { %v430_v16 = vmul.f32 %v12167_v59, %v298_v11  ;;  %vm683_vm5 = vcmp.ge.f32.partialorder %v557_v26, 0.0 }
  0x98   : > { %9553 = vmatmul.mubr.msk.f32.gmra.mrb[50].mxu1 %vm1723_vm4, %v12079_v5 }
  0x99   : > { %9995 = vmatmul.mubr.msk.f32.gmra.mrb[14].mxu0 %vm1723_vm4, %v11951_v1  ;;  %9555 = vmatprep.mubr.msk.f32.mxu1 %vm1723_vm4, %v12083_v57  ;;  %v807_v1 = vmul.f32 0.01, %v555_v62  ;;  %v560_v11 = vadd.f32 %v12185_v41, %v430_v16  ;;  %v303_v16 = vld [vmem:[%s11384_s30 + $0x268] sm:$0xff] }
  0x9a   : > { %9997 = vmatprep.mubr.msk.f32.mxu0 %vm1723_vm4, %v11971_v15  ;;  %v301_v15 = vld [vmem:[%s11384_s30 + $0x258] sm:$0xff] }
  0x9b   : > { %v933_v30 = vsel %vm681_vm9, %v555_v62, %v807_v1  ;;  %v12276_v62 = vsel %vm12206_vm0, %v932_v53, 0.0  ;;  %v432_v1 = vmul.f32 %v12167_v59, %v300_v35  ;;  %v433_v28 = vmul.f32 %v12167_v59, %v301_v15  ;;  %v8745_v35 = vld [vmem:[%s15950_s1 + $0x178] sm:$0xff] }
  0x9c   : > { %9556 = vmatmul.mubr.msk.f32.gmra.mrb[52].mxu1 %vm1723_vm4, %v12097_v61  ;;  %16191 = vst [vmem:[#allocation45_spill] sm:$0xff] %v12276_v62  ;;  %v12284_v32 = vsel %vm12206_vm0, %v933_v30, 0.0  ;;  %v812_v15 = vmul.f32 0.01, %v560_v11  ;;  %vm686_vm13 = vcmp.ge.f32.partialorder %v560_v11, 0.0 }
  0x9d   : > { %9998 = vmatmul.mubr.msk.f32.gmra.mrb[16].mxu0 %vm1723_vm4, %v11982_v55  ;;  %9558 = vmatprep.mubr.msk.f32.mxu1 %vm1723_vm4, %v12237_v7  ;;  %v809_v55 = vmul.f32 0.01, %v557_v26  ;;  %16192 = vst [vmem:[#allocation46_spill] sm:$0xff] %v12284_v32  ;;  %v562_v20 = vadd.f32 %v12185_v41, %v432_v1  ;;  %v304_v1 = vld [vmem:[%s11384_s30 + $0x270] sm:$0xff] }
  0x9e   : > { %10000 = vmatprep.mubr.msk.f32.mxu0 %vm1723_vm4, %v12009_v23  ;;  %v561_v23 = vadd.f32 %v12185_v41, %v431_v27  ;;  %v563_v27 = vadd.f32 %v12185_v41, %v433_v28  ;;  %v436_v28 = vmul.f32 %v12167_v59, %v304_v1 }
  0x9f   : > { %v935_v53 = vsel %vm683_vm5, %v557_v26, %v809_v55  ;;  %v12299_v55 = vsel %vm12206_vm0, %v934_v2, 0.0  ;;  %v936_v26 = vsel %vm684_vm15, %v558_v49, %v810_v52  ;;  %v434_v52 = vmul.f32 %v12167_v59, %v302_v19  ;;  %v226_v49 = vld [vmem:[%s11384_s30] sm:$0xff] }
  0xa0   : > { %9559 = vmatmul.mubr.msk.f32.gmra.mrb[54].mxu1 %vm1723_vm4, %v12252_v24  ;;  %16193 = vst [vmem:[#allocation47_spill] sm:$0xff] %v12299_v55  ;;  %v12312_v30 = vsel %vm12206_vm0, %v935_v53, 0.0  ;;  %v12338_v19 = vsel %vm12206_vm0, %v936_v26, 0.0  ;;  %vm687_vm3 = vcmp.ge.f32.partialorder %v561_v23, 0.0  ;;  %vm688_vm8 = vcmp.ge.f32.partialorder %v562_v20, 0.0  ;;  %vm1139_vm0 = vmand %vm12328_vm1, %vm1058_vm6  ;;  %v233_v53 = vld [vmem:[%s11384_s30 + $0x38] sm:$0xff] }
  0xa1   : > { %10001 = vmatmul.mubr.msk.f32.gmra.mrb[18].mxu0 %vm1723_vm4, %v12015_v14  ;;  %9561 = vmatprep.mubr.msk.f32.mxu1 %vm1723_vm4, %v12260_v29  ;;  %v811_v14 = vmul.f32 0.01, %v559_v43  ;;  %16194 = vst [vmem:[#allocation48_spill] sm:$0xff] %v12312_v30  ;;  %16199 = vst [vmem:[#allocation49_spill] sm:$0xff] %v12338_v19  ;;  %v814_v47 = vmul.f32 0.01, %v562_v20 }
  0xa2   : > { %10003 = vmatprep.mubr.msk.f32.mxu0 %vm1723_vm4, %v12034_v40  ;;  %v305_v40 = vld [vmem:[%s11384_s30 + $0x278] sm:$0xff]  ;;  %vm689_vm9 = vcmp.ge.f32.partialorder %v563_v27, 0.0 }
  0xa3   : > { %v937_v2 = vsel %vm685_vm12, %v559_v43, %v811_v14  ;;  %v10421_v14 = vpack.c.bf16 %v8745_v35, %v8744_v31  ;;  %v938_v43 = vsel %vm686_vm13, %v560_v11, %v812_v15  ;;  %v564_v11 = vadd.f32 %v12185_v41, %v434_v52  ;;  %v306_v15 = vld [vmem:[%s11384_s30 + $0x280] sm:$0xff] }
  0xa4   : > { %9562 = vmatmul.mubr.msk.f32.gmra.mrb[56].mxu1 %vm1723_vm4, %v12276_v62  ;;  %v12349_v54 = vsel %vm12318_vm11, %v937_v2, 0.0  ;;  %v437_v26 = vmul.f32 %v12167_v59, %v305_v40  ;;  %v12367_v40 = vsel %vm1139_vm0, %v938_v43, 0.0 }
  0xa5   : > { %10004 = vmatmul.mubr.msk.f32.gmra.mrb[20].mxu0 %vm1723_vm4, %v12044_v60  ;;  %9564 = vmatprep.mubr.msk.f32.mxu1 %vm1723_vm4, %v12284_v32  ;;  %v435_v60 = vmul.f32 %v12167_v59, %v303_v16  ;;  %16200 = vst [vmem:[#allocation50_spill] sm:$0xff] %v12349_v54  ;;  %v815_v16 = vmul.f32 0.01, %v563_v27  ;;  %16201 = vst [vmem:[#allocation51_spill] sm:$0xff] %v12367_v40  ;;  %v816_v2 = vmul.f32 0.01, %v564_v11 }
  0xa6   : > { %10006 = vmatprep.mubr.msk.f32.mxu0 %vm1723_vm4, %v12063_v25  ;;  %v813_v25 = vmul.f32 0.01, %v561_v23  ;;  %10422 = vmatprep.subr.bf16.mxu0 %v10421_v14  ;;  %vm690_vm14 = vcmp.ge.f32.partialorder %v564_v11, 0.0 }
  0xa7   : > { %v565_v35 = vadd.f32 %v12185_v41, %v435_v60  ;;  %10424 = vmatpush3.bf16.msra.mxu0 %v10421_v14  ;;  %v438_v60 = vmul.f32 %v12167_v59, %v306_v15  ;;  %v941_v1 = vsel %vm689_vm9, %v563_v27, %v815_v16  ;;  %v567_v14 = vadd.f32 %v12185_v41, %v437_v26 }
  0xa8   : > { %9565 = vmatmul.mubr.msk.f32.gmra.mrb[58].mxu1 %vm1723_vm4, %v12299_v55  ;;  %v939_v31 = vsel %vm687_vm3, %v561_v23, %v813_v25  ;;  %v940_v23 = vsel %vm688_vm8, %v562_v20, %v814_v47  ;;  %v566_v25 = vadd.f32 %v12185_v41, %v436_v28  ;;  %v227_v20 = vld [vmem:[%s11384_s30 + $0x8] sm:$0xff]  ;;  %v228_v47 = vld [vmem:[%s11384_s30 + $0x10] sm:$0xff]  ;;  %v12394_v27 = vsel %vm12328_vm1, %v941_v1, 0.0  ;;  %vm12434_vm3 = vmand %vm1016_vm10, %vm1030_vm7 }
  0xa9   : > { %10007 = vmatmul.mubr.msk.f32.gmra.mrb[22].mxu0 %vm1723_vm4, %v12067_v6  ;;  %9567 = vmatprep.mubr.msk.f32.mxu1 %vm1723_vm4, %v12312_v30  ;;  %v12376_v52 = vsel %vm12328_vm1, %v939_v31, 0.0  ;;  %v817_v43 = vmul.f32 0.01, %v565_v35  ;;  %v12386_v28 = vsel %vm12328_vm1, %v940_v23, 0.0  ;;  %vm691_vm5 = vcmp.ge.f32.partialorder %v565_v35, 0.0  ;;  %vm1282_vm8 = vmand %vm12328_vm1, %vm1201_vm2 }
  0xaa   : > { %10009 = vmatprep.mubr.msk.f32.mxu0 %vm1723_vm4, %v12079_v5  ;;  %vm692_vm15 = vcmp.ge.f32.partialorder %v566_v25, 0.0  ;;  %v818_v16 = vmul.f32 0.01, %v566_v25  ;;  %v568_v26 = vadd.f32 %v12185_v41, %v438_v60  ;;  %v942_v15 = vsel %vm690_vm14, %v564_v11, %v816_v2  ;;  %v230_v60 = vld [vmem:[%s11384_s30 + $0x20] sm:$0xff]  ;;  %vm12463_vm9 = vmand %vm12434_vm3, %vm1058_vm6 }
  0xab   : > { %v819_v31 = vmul.f32 0.01, %v567_v14  ;;  %v360_v23 = vmul.f32 %v12167_v59, %v228_v47  ;;  %vm693_vm12 = vcmp.ge.f32.partialorder %v567_v14, 0.0  ;;  %v12414_v11 = vsel %vm12328_vm1, %v942_v15, 0.0  ;;  %v231_v15 = vld [vmem:[%s11384_s30 + $0x28] sm:$0xff] }
  0xac   : > { %9568 = vmatmul.mubr.msk.f32.gmra.mrb[60].mxu1 %vm1723_vm4, %v12338_v19  ;;  %vm694_vm11 = vcmp.ge.f32.partialorder %v568_v26, 0.0 }
  0xad   : > { %10010 = vmatmul.mubr.msk.f32.gmra.mrb[24].mxu0 %vm1723_vm4, %v12083_v57  ;;  %9570 = vmatprep.mubr.msk.f32.mxu1 %vm1723_vm4, %v12349_v54  ;;  %v358_v57 = vmul.f32 %v12167_v59, %v226_v49  ;;  %v359_v49 = vmul.f32 %v12167_v59, %v227_v20  ;;  %v945_v20 = vsel %vm693_vm12, %v567_v14, %v819_v31 }
  0xae   : > { %10012 = vmatprep.mubr.msk.f32.mxu0 %vm1723_vm4, %v12097_v61  ;;  %v943_v61 = vsel %vm691_vm5, %v565_v35, %v817_v43  ;;  %v820_v35 = vmul.f32 0.01, %v568_v26 }
  0xaf   : > { %v488_v1 = vadd.f32 %v12185_v41, %v358_v57  ;;  %v944_v57 = vsel %vm692_vm15, %v566_v25, %v818_v16  ;;  %v12422_v43 = vsel %vm12328_vm1, %v943_v61, 0.0  ;;  %v489_v47 = vadd.f32 %v12185_v41, %v359_v49  ;;  %v8505_v61 = vld [vmem:[%s15950_s1 + $0xb8] sm:$0xff] }
  0xb0   : > { %9571 = vmatmul.mubr.msk.f32.gmra.mrb[62].mxu1 %vm1723_vm4, %v12367_v40  ;;  %v362_v25 = vmul.f32 %v12167_v59, %v230_v60  ;;  %v12445_v14 = vsel %vm12328_vm1, %v944_v57, 0.0  ;;  %v12449_v16 = vsel %vm12328_vm1, %v945_v20, 0.0  ;;  %v363_v49 = vmul.f32 %v12167_v59, %v231_v15  ;;  %v234_v20 = vld [vmem:[%s11384_s30 + $0x40] sm:$0xff] }
  0xb1   : > { %10013 = vmatmul.mubr.msk.f32.gmra.mrb[26].mxu0 %vm1723_vm4, %v12237_v7  ;;  %9573 = vmatprep.mubr.msk.f32.mxu1 %vm1723_vm4, %v12376_v52  ;;  %v229_v7 = vld [vmem:[%s11384_s30 + $0x18] sm:$0xff]  ;;  %vm614_vm13 = vcmp.ge.f32.partialorder %v488_v1, 0.0  ;;  %vm615_vm0 = vcmp.ge.f32.partialorder %v489_v47, 0.0  ;;  %v741_v60 = vmul.f32 0.01, %v489_v47  ;;  %v366_v6 = vmul.f32 %v12167_v59, %v234_v20  ;;  %v8500_v20 = vld [vmem:[%s15950_s1 + $0x90] sm:$0xff] }
  0xb2   : > { %10015 = vmatprep.mubr.msk.f32.mxu0 %vm1723_vm4, %v12252_v24  ;;  %v361_v2 = vmul.f32 %v12167_v59, %v229_v7  ;;  %v740_v24 = vmul.f32 0.01, %v488_v1  ;;  %v232_v7 = vld [vmem:[%s11384_s30 + $0x30] sm:$0xff]  ;;  %v493_v15 = vadd.f32 %v12185_v41, %v363_v49 }
  0xb3   : > { %v496_v51 = vadd.f32 %v12185_v41, %v366_v6  ;;  %v310_v6 = vld [vmem:[%s11384_s30 + $0x2a0] sm:$0xff] }
  0xb4   : > { %9574 = vmatmul.mubr.msk.f32.gmra.mrb[64].mxu1 %vm1723_vm4, %v12386_v28  ;;  %v491_v31 = vadd.f32 %v12185_v41, %v361_v2  ;;  %v8499_v2 = vld [vmem:[%s15950_s1 + $0x88] sm:$0xff]  ;;  %vm619_vm15 = vcmp.ge.f32.partialorder %v493_v15, 0.0 }
  0xb5   : > { %10016 = vmatmul.mubr.msk.f32.gmra.mrb[28].mxu0 %vm1723_vm4, %v12260_v29  ;;  %9576 = vmatprep.mubr.msk.f32.mxu1 %vm1723_vm4, %v12394_v27  ;;  %v490_v29 = vadd.f32 %v12185_v41, %v360_v23  ;;  %v946_v23 = vsel %vm694_vm11, %v568_v26, %v820_v35  ;;  %v492_v26 = vadd.f32 %v12185_v41, %v362_v25  ;;  %vm622_vm7 = vcmp.ge.f32.partialorder %v496_v51, 0.0 }
  0xb6   : > { %10018 = vmatprep.mubr.msk.f32.mxu0 %vm1723_vm4, %v12276_v62  ;;  %v364_v35 = vmul.f32 %v12167_v59, %v232_v7  ;;  %vm617_vm1 = vcmp.ge.f32.partialorder %v491_v31, 0.0  ;;  %v867_v7 = vsel %vm615_vm0, %v489_v47, %v741_v60  ;;  %v307_v62 = vld [vmem:[%s11384_s30 + $0x288] sm:$0xff]  ;;  %v308_v47 = vld [vmem:[%s11384_s30 + $0x290] sm:$0xff]  ;;  %vm12572_vm0 = vmand %vm12434_vm3, %vm1201_vm2 }
  0xb7   : > { %v742_v57 = vmul.f32 0.01, %v490_v29  ;;  %vm616_vm14 = vcmp.ge.f32.partialorder %v490_v29, 0.0  ;;  %v744_v5 = vmul.f32 0.01, %v492_v26  ;;  %vm618_vm5 = vcmp.ge.f32.partialorder %v492_v26, 0.0 }
  0xb8   : > { %9577 = vmatmul.mubr.msk.f32.gmra.mrb[66].mxu1 %vm1723_vm4, %v12414_v11  ;;  %v494_v49 = vadd.f32 %v12185_v41, %v364_v35  ;;  %v1581_v60 = vsel %vm12434_vm3, %v867_v7, 0.0  ;;  %v439_v7 = vmul.f32 %v12167_v59, %v307_v62  ;;  %v440_v33 = vmul.f32 %v12167_v59, %v308_v47 }
  0xb9   : > { %10019 = vmatmul.mubr.msk.f32.gmra.mrb[30].mxu0 %vm1723_vm4, %v12284_v32  ;;  %9579 = vmatprep.mubr.msk.f32.mxu1 %vm1723_vm4, %v12422_v43  ;;  %v866_v32 = vsel %vm614_vm13, %v488_v1, %v740_v24  ;;  %v12477_v24 = vsel %vm1282_vm8, %v946_v23, 0.0  ;;  %v743_v1 = vmul.f32 0.01, %v491_v31  ;;  %v8498_v23 = vld [vmem:[%s15950_s1 + $0x80] sm:$0xff]  ;;  %v1001_v62 = vadd.s32 9, %v11320_v8 }
  0xba   : > { %10021 = vmatprep.mubr.msk.f32.mxu0 %vm1723_vm4, %v12299_v55  ;;  %16206 = vst [vmem:[#allocation52_spill] sm:$0xff] %v12477_v24  ;;  %v1580_v25 = vsel %vm12463_vm9, %v866_v32, 0.0  ;;  %v868_v55 = vsel %vm616_vm14, %v490_v29, %v742_v57  ;;  %v8818_v29 = vld [vmem:[%s15950_s1 + $0x180] sm:$0xff]  ;;  %v8819_v32 = vld [vmem:[%s15950_s1 + $0x188] sm:$0xff]  ;;  %vm620_vm12 = vcmp.ge.f32.partialorder %v494_v49, 0.0 }
  0xbb   : > { %v1582_v57 = vsel %vm12434_vm3, %v868_v55, 0.0  ;;  %v869_v35 = vsel %vm617_vm1, %v491_v31, %v743_v1  ;;  %v10361_v55 = vpack.c.bf16 %v8499_v2, %v8498_v23  ;;  %v12522_v31 = vpack.c.bf16 %v8819_v32, %v8818_v29  ;;  %v311_v29 = vld [vmem:[%s11384_s30 + $0x2a8] sm:$0xff] }
  0xbc   : > { %9580 = vmatmul.mubr.msk.f32.gmra.mrb[68].mxu1 %vm1723_vm4, %v12445_v14  ;;  %v870_v1 = vsel %vm618_vm5, %v492_v26, %v744_v5  ;;  %v1583_v5 = vsel %vm12434_vm3, %v869_v35, 0.0  ;;  %v569_v2 = vadd.f32 %v12185_v41, %v439_v7  ;;  %v748_v47 = vmul.f32 0.01, %v496_v51  ;;  %v312_v35 = vld [vmem:[%s11384_s30 + $0x2b0] sm:$0xff]  ;;  %v8502_v7 = vld [vmem:[%s15950_s1 + $0xa0] sm:$0xff] }
  0xbd   : > { %10022 = vmatmul.mubr.msk.f32.gmra.mrb[32].mxu0 %vm1723_vm4, %v12312_v30  ;;  %9582 = vmatprep.mubr.msk.f32.mxu1 %vm1723_vm4, %v12449_v16  ;;  %v365_v30 = vmul.f32 %v12167_v59, %v233_v53  ;;  %v745_v53 = vmul.f32 0.01, %v493_v15  ;;  %v1584_v26 = vsel %vm12434_vm3, %v870_v1, 0.0  ;;  %vm1025_vm11 = vcmp.ge.s32.totalorder %v1001_v62, 3 }
  0xbe   : > { %10024 = vmatprep.mubr.msk.f32.mxu0 %vm1723_vm4, %v12338_v19  ;;  %v746_v19 = vmul.f32 0.01, %v494_v49  ;;  %10362 = vmatprep.subr.bf16.mxu1 %v10361_v55  ;;  %vm1039_vm13 = vcmp.lt.s32.totalorder %v1001_v62, 67  ;;  %vm695_vm8 = vcmp.ge.f32.partialorder %v569_v2, 0.0  ;;  %v874_v1 = vsel %vm622_vm7, %v496_v51, %v748_v47 }
  0xbf   : > { %10426 = vmatprep.subr.bf16.mxu0 %v12522_v31  ;;  %vm12581_vm9 = vmand %vm1025_vm11, %vm1039_vm13  ;;  %v1588_v47 = vsel %vm12572_vm0, %v874_v1, 0.0 }
  0xc0   : > { %9583 = vmatmul.mubr.msk.f32.gmra.mrb[70].mxu1 %vm1723_vm4, %v12477_v24  ;;  %v872_v32 = vsel %vm620_vm12, %v494_v49, %v746_v19  ;;  %v313_v49 = vld [vmem:[%s11384_s30 + $0x2b8] sm:$0xff] }
  0xc1   : > { %10025 = vmatmul.mubr.msk.f32.gmra.mrb[34].mxu0 %vm1723_vm4, %v12349_v54  ;;  %9601 = vmatprep.mubr.msk.f32.mxu1 %vm1723_vm4, %v1580_v25  ;;  %v8501_v54 = vld [vmem:[%s15950_s1 + $0x98] sm:$0xff]  ;;  %v495_v25 = vadd.f32 %v12185_v41, %v365_v30 }
  0xc2   : > { %10027 = vmatprep.mubr.msk.f32.mxu0 %vm1723_vm4, %v12367_v40  ;;  %v309_v40 = vld [vmem:[%s11384_s30 + $0x298] sm:$0xff]  ;;  %v10365_v30 = vpack.c.bf16 %v8501_v54, %v8500_v20  ;;  %v871_v54 = vsel %vm619_vm15, %v493_v15, %v745_v53  ;;  %v442_v15 = vmul.f32 %v12167_v59, %v310_v6  ;;  %v821_v20 = vmul.f32 0.01, %v569_v2 }
  0xc3   : > { %v747_v23 = vmul.f32 0.01, %v495_v25  ;;  %vm621_vm10 = vcmp.ge.f32.partialorder %v495_v25, 0.0  ;;  %v1585_v19 = vsel %vm12434_vm3, %v871_v54, 0.0  ;;  %v444_v6 = vmul.f32 %v12167_v59, %v312_v35  ;;  %v8504_v35 = vld [vmem:[%s15950_s1 + $0xb0] sm:$0xff] }
  0xc4   : > { %9602 = vmatmul.mubr.msk.f32.vlgmr.msra.gmra.mrb[0].mxu1 %vm1723_vm4, %v1581_v60  ;;  %v441_v60 = vmul.f32 %v12167_v59, %v309_v40  ;;  %v443_v40 = vmul.f32 %v12167_v59, %v311_v29  ;;  %v445_v29 = vmul.f32 %v12167_v59, %v313_v49 }
  0xc5   : > { %10028 = vmatmul.mubr.msk.f32.gmra.mrb[36].mxu0 %vm1723_vm4, %v12376_v52  ;;  %9604 = vmatprep.mubr.msk.f32.mxu1 %vm1723_vm4, %v1582_v57  ;;  %v570_v57 = vadd.f32 %v12185_v41, %v440_v33  ;;  %v1586_v33 = vsel %vm12434_vm3, %v872_v32, 0.0  ;;  %v873_v53 = vsel %vm621_vm10, %v495_v25, %v747_v23  ;;  %v572_v23 = vadd.f32 %v12185_v41, %v442_v15  ;;  %v314_v32 = vld [vmem:[%s11384_s30 + $0x2c0] sm:$0xff]  ;;  %v315_v15 = vld [vmem:[%s11384_s30 + $0x2c8] sm:$0xff] }
  0xc6   : > { %10030 = vmatprep.mubr.msk.f32.mxu0 %vm1723_vm4, %v12386_v28  ;;  %10364 = vmatpush3.bf16.msra.mxu1 %v10361_v55  ;;  %v8503_v55 = vld [vmem:[%s15950_s1 + $0xa8] sm:$0xff]  ;;  %v571_v25 = vadd.f32 %v12185_v41, %v441_v60  ;;  %v573_v62 = vadd.f32 %v12185_v41, %v443_v40  ;;  %v947_v60 = vsel %vm695_vm8, %v569_v2, %v821_v20 }
  0xc7   : > { %10366 = vmatprep.subr.bf16.mxu1 %v10365_v30  ;;  %v822_v54 = vmul.f32 0.01, %v570_v57  ;;  %vm696_vm14 = vcmp.ge.f32.partialorder %v570_v57, 0.0  ;;  %v574_v40 = vadd.f32 %v12185_v41, %v444_v6  ;;  %v446_v49 = vmul.f32 %v12167_v59, %v314_v32  ;;  %v317_v6 = vld [vmem:[%s11384_s30 + $0x2d8] sm:$0xff]  ;;  %v318_v32 = vld [vmem:[%s11384_s30 + $0x2e0] sm:$0xff] }
  0xc8   : > { %9605 = vmatmul.mubr.msk.f32.gmra.mrb[2].mxu1 %vm1723_vm4, %v1583_v5  ;;  %v823_v2 = vmul.f32 0.01, %v571_v25  ;;  %vm697_vm1 = vcmp.ge.f32.partialorder %v571_v25, 0.0  ;;  %v824_v20 = vmul.f32 0.01, %v572_v23  ;;  %vm698_vm5 = vcmp.ge.f32.partialorder %v572_v23, 0.0 }
  0xc9   : > { %10031 = vmatmul.mubr.msk.f32.gmra.mrb[38].mxu0 %vm1723_vm4, %v12394_v27  ;;  %9607 = vmatprep.mubr.msk.f32.mxu1 %vm1723_vm4, %v1584_v26  ;;  %v10369_v26 = vpack.c.bf16 %v8503_v55, %v8502_v7  ;;  %v575_v7 = vadd.f32 %v12185_v41, %v445_v29  ;;  %v825_v55 = vmul.f32 0.01, %v573_v62  ;;  %v447_v1 = vmul.f32 %v12167_v59, %v315_v15  ;;  %v316_v5 = vld [vmem:[%s11384_s30 + $0x2d0] sm:$0xff] }
  0xca   : > { %10033 = vmatprep.mubr.msk.f32.mxu0 %vm1723_vm4, %v12414_v11  ;;  %10368 = vmatpush3.bf16.msra.mxu1 %v10365_v30  ;;  %v1587_v30 = vsel %vm12434_vm3, %v873_v53, 0.0  ;;  %vm12610_vm3 = vmand %vm12581_vm9, %vm1058_vm6  ;;  %v948_v53 = vsel %vm696_vm14, %v570_v57, %v822_v54  ;;  %vm699_vm15 = vcmp.ge.f32.partialorder %v573_v62, 0.0  ;;  %v949_v54 = vsel %vm697_vm1, %v571_v25, %v823_v2  ;;  %v319_v2 = vld [vmem:[%s11384_s30 + $0x2e8] sm:$0xff] }
  0xcb   : > { %10370 = vmatprep.subr.bf16.mxu1 %v10369_v26  ;;  %v12628_v57 = vsel %vm12610_vm3, %v947_v60, 0.0  ;;  %vm700_vm12 = vcmp.ge.f32.partialorder %v574_v40, 0.0  ;;  %v576_v29 = vadd.f32 %v12185_v41, %v446_v49  ;;  %v827_v60 = vmul.f32 0.01, %v575_v7  ;;  %v320_v49 = vld [vmem:[%s11384_s30 + $0x2f0] sm:$0xff]  ;;  %vm1291_vm3 = vmand %vm12581_vm9, %vm1201_vm2 }
  0xcc   : > { %9608 = vmatmul.mubr.msk.f32.gmra.mrb[4].mxu1 %vm1723_vm4, %v1585_v19  ;;  %v448_v15 = vmul.f32 %v12167_v59, %v316_v5  ;;  %v951_v25 = vsel %vm699_vm15, %v573_v62, %v825_v55  ;;  %vm701_vm10 = vcmp.ge.f32.partialorder %v575_v7, 0.0  ;;  %v450_v19 = vmul.f32 %v12167_v59, %v318_v32 }
  0xcd   : > { %10034 = vmatmul.mubr.msk.f32.gmra.mrb[40].mxu0 %vm1723_vm4, %v12422_v43  ;;  %9610 = vmatprep.mubr.msk.f32.mxu1 %vm1723_vm4, %v1586_v33  ;;  %v10373_v33 = vpack.c.bf16 %v8505_v61, %v8504_v35  ;;  %v12653_v35 = vsel %vm12581_vm9, %v949_v54, 0.0  ;;  %v1002_v61 = vadd.s32 10, %v11320_v8  ;;  %vm702_vm7 = vcmp.ge.f32.partialorder %v576_v29, 0.0 }
  0xce   : > { %10036 = vmatprep.mubr.msk.f32.mxu0 %vm1723_vm4, %v12445_v14  ;;  %10372 = vmatpush3.bf16.msra.mxu1 %v10369_v26  ;;  %v12633_v26 = vsel %vm12581_vm9, %v948_v53, 0.0  ;;  %v828_v62 = vmul.f32 0.01, %v576_v29  ;;  %v578_v55 = vadd.f32 %v12185_v41, %v448_v15  ;;  %v451_v5 = vmul.f32 %v12167_v59, %v319_v2 }
  0xcf   : > { %10374 = vmatprep.subr.bf16.mxu1 %v10373_v33  ;;  %vm1026_vm13 = vcmp.ge.s32.totalorder %v1002_v61, 3  ;;  %vm1040_vm8 = vcmp.lt.s32.totalorder %v1002_v61, 67 }
  0xd0   : > { %9611 = vmatmul.mubr.msk.f32.gmra.mrb[6].mxu1 %vm1723_vm4, %v1587_v30  ;;  %v950_v30 = vsel %vm698_vm5, %v572_v23, %v824_v20  ;;  %v449_v23 = vmul.f32 %v12167_v59, %v317_v6  ;;  %v953_v20 = vsel %vm701_vm10, %v575_v7, %v827_v60  ;;  %v452_v7 = vmul.f32 %v12167_v59, %v320_v49  ;;  %vm12700_vm14 = vmand %vm1026_vm13, %vm1040_vm8 }
  0xd1   : > { %10037 = vmatmul.mubr.msk.f32.gmra.mrb[42].mxu0 %vm1723_vm4, %v12449_v16  ;;  %9613 = vmatprep.mubr.msk.f32.mxu1 %vm1723_vm4, %v1588_v47  ;;  %v826_v47 = vmul.f32 0.01, %v574_v40  ;;  %v12690_v54 = vsel %vm12581_vm9, %v953_v20, 0.0  ;;  %v954_v32 = vsel %vm702_vm7, %v576_v29, %v828_v62  ;;  %vm704_vm0 = vcmp.ge.f32.partialorder %v578_v55, 0.0  ;;  %vm1157_vm15 = vmand %vm12700_vm14, %vm1058_vm6  ;;  %v324_v62 = vld [vmem:[%s11384_s30 + $0x310] sm:$0xff] }
  0xd2   : > { %10039 = vmatprep.mubr.msk.f32.mxu0 %vm1723_vm4, %v12477_v24  ;;  %10376 = vmatpush3.bf16.msra.mxu1 %v10373_v33  ;;  %v12667_v33 = vsel %vm12581_vm9, %v951_v25, 0.0  ;;  %v581_v29 = vadd.f32 %v12185_v41, %v451_v5  ;;  %v582_v25 = vadd.f32 %v12185_v41, %v452_v7  ;;  %v456_v7 = vmul.f32 %v12167_v59, %v324_v62  ;;  %v328_v62 = vld [vmem:[%s11384_s30 + $0x330] sm:$0xff] }
  0xd3   : > { %10441 = vmatprep.subr.bf16.mxu1 %v11322_v9  ;;  %v952_v53 = vsel %vm700_vm12, %v574_v40, %v826_v47  ;;  %v580_v40 = vadd.f32 %v12185_v41, %v450_v19  ;;  %v322_v47 = vld [vmem:[%s11384_s30 + $0x300] sm:$0xff]  ;;  %v323_v19 = vld [vmem:[%s11384_s30 + $0x308] sm:$0xff] }
  0xd4   : > { %9614 = vmatmul.mubr.msk.f32.gmra.mrb[8].mxu1 %vm1723_vm4, %v11468_v10  ;;  %v577_v10 = vadd.f32 %v12185_v41, %v447_v1  ;;  %v12683_v6 = vsel %vm12581_vm9, %v952_v53, 0.0  ;;  %v454_v61 = vmul.f32 %v12167_v59, %v322_v47  ;;  %v834_v20 = vmul.f32 0.01, %v582_v25 }
  0xd5   : > { %10040 = vmatmul.mubr.msk.f32.gmra.mrb[44].mxu0 %vm1723_vm4, %v12628_v57  ;;  %9616 = vmatprep.mubr.msk.f32.mxu1 %vm1723_vm4, %v11480_v18  ;;  %v12660_v18 = vsel %vm12581_vm9, %v950_v30, 0.0  ;;  %v830_v30 = vmul.f32 0.01, %v578_v55  ;;  %vm706_vm5 = vcmp.ge.f32.partialorder %v580_v40, 0.0  ;;  %vm708_vm12 = vcmp.ge.f32.partialorder %v582_v25, 0.0 }
  0xd6   : > { %10042 = vmatprep.mubr.msk.f32.mxu0 %vm1723_vm4, %v12633_v26  ;;  %vm703_vm11 = vcmp.ge.f32.partialorder %v577_v10, 0.0  ;;  %v829_v1 = vmul.f32 0.01, %v577_v10 }
  0xd7   : > { %v956_v2 = vsel %vm704_vm0, %v578_v55, %v830_v30 }
  0xd8   : > { %9617 = vmatmul.mubr.msk.f32.gmra.mrb[10].mxu1 %vm1723_vm4, %v11501_v34  ;;  %v579_v34 = vadd.f32 %v12185_v41, %v449_v23  ;;  %v955_v60 = vsel %vm703_vm11, %v577_v10, %v829_v1  ;;  %v12715_v23 = vsel %vm12581_vm9, %v954_v32, 0.0  ;;  %vm707_vm9 = vcmp.ge.f32.partialorder %v581_v29, 0.0 }
  0xd9   : > { %10043 = vmatmul.mubr.msk.f32.gmra.mrb[46].mxu0 %vm1723_vm4, %v12653_v35  ;;  %9619 = vmatprep.mubr.msk.f32.mxu1 %vm1723_vm4, %v11520_v50  ;;  %v321_v50 = vld [vmem:[%s11384_s30 + $0x2f8] sm:$0xff]  ;;  %v12730_v51 = vsel %vm1291_vm3, %v955_v60, 0.0  ;;  %v455_v1 = vmul.f32 %v12167_v59, %v323_v19  ;;  %v12736_v5 = vsel %vm1157_vm15, %v956_v2, 0.0  ;;  %v1003_v2 = vadd.s32 11, %v11320_v8 }
  0xda   : > { %10045 = vmatprep.mubr.msk.f32.mxu0 %vm1723_vm4, %v12660_v18  ;;  %v831_v15 = vmul.f32 0.01, %v579_v34  ;;  %vm705_vm1 = vcmp.ge.f32.partialorder %v579_v34, 0.0  ;;  %v453_v10 = vmul.f32 %v12167_v59, %v321_v50  ;;  %v325_v50 = vld [vmem:[%s11384_s30 + $0x318] sm:$0xff] }
  0xdb   : > { %v585_v60 = vadd.f32 %v12185_v41, %v455_v1  ;;  %vm1027_vm8 = vcmp.ge.s32.totalorder %v1003_v2, 3  ;;  %vm1041_vm0 = vcmp.lt.s32.totalorder %v1003_v2, 67 }
  0xdc   : > { %9620 = vmatmul.mubr.msk.f32.gmra.mrb[12].mxu1 %vm1723_vm4, %v11539_v63  ;;  %v957_v49 = vsel %vm705_vm1, %v579_v34, %v831_v15  ;;  %v583_v55 = vadd.f32 %v12185_v41, %v453_v10  ;;  %v326_v34 = vld [vmem:[%s11384_s30 + $0x320] sm:$0xff]  ;;  %v457_v15 = vmul.f32 %v12167_v59, %v325_v50  ;;  %v586_v10 = vadd.f32 %v12185_v41, %v456_v7  ;;  %vm1300_vm1 = vmand %vm12700_vm14, %vm1201_vm2 }
  0xdd   : > { %10046 = vmatmul.mubr.msk.f32.gmra.mrb[48].mxu0 %vm1723_vm4, %v12667_v33  ;;  %9622 = vmatprep.mubr.msk.f32.mxu1 %vm1723_vm4, %v11560_v13  ;;  %v832_v13 = vmul.f32 0.01, %v580_v40  ;;  %vm711_vm11 = vcmp.ge.f32.partialorder %v585_v60, 0.0  ;;  %v12846_v63 = vld [vmem:[%s15952_s3] ss:$0 sm:$0xff] }
  0xde   : > { %10048 = vmatprep.mubr.msk.f32.mxu0 %vm1723_vm4, %v12683_v6  ;;  %v835_v47 = vmul.f32 0.01, %v583_v55  ;;  %vm709_vm10 = vcmp.ge.f32.partialorder %v583_v55, 0.0  ;;  %v838_v1 = vmul.f32 0.01, %v586_v10  ;;  %vm712_vm13 = vcmp.ge.f32.partialorder %v586_v10, 0.0 }
  0xdf   : > { %v958_v53 = vsel %vm706_vm5, %v580_v40, %v832_v13  ;;  %v12750_v40 = vsel %vm12700_vm14, %v957_v49, 0.0  ;;  %vm12813_vm5 = vmand %vm1027_vm8, %vm1041_vm0  ;;  %16220 = vst [vmem:[#allocation54_spill] sm:$0xff] %v12846_v63 }
  0xe0   : > { %9623 = vmatmul.mubr.msk.f32.gmra.mrb[14].mxu1 %vm1723_vm4, %v11591_v45  ;;  %v833_v45 = vmul.f32 0.01, %v581_v29  ;;  %v12754_v32 = vsel %vm12700_vm14, %v958_v53, 0.0  ;;  %v961_v49 = vsel %vm709_vm10, %v583_v55, %v835_v47  ;;  %v587_v53 = vadd.f32 %v12185_v41, %v457_v15  ;;  %vm1309_vm0 = vmand %vm12813_vm5, %vm1201_vm2 }
  0xe1   : > { %10049 = vmatmul.mubr.msk.f32.gmra.mrb[50].mxu0 %vm1723_vm4, %v12690_v54  ;;  %9625 = vmatprep.mubr.msk.f32.mxu1 %vm1723_vm4, %v11604_v56  ;;  %v584_v56 = vadd.f32 %v12185_v41, %v454_v61  ;;  %v458_v61 = vmul.f32 %v12167_v59, %v326_v34  ;;  %v460_v34 = vmul.f32 %v12167_v59, %v328_v62  ;;  %v12795_v55 = vsel %vm12700_vm14, %v961_v49, 0.0  ;;  %v331_v49 = vld [vmem:[%s11384_s30 + $0x348] sm:$0xff]  ;;  %v8820_v62 = vld [vmem:[%s15950_s1 + $0x190] sm:$0xff] }
  0xe2   : > { %10051 = vmatprep.mubr.msk.f32.mxu0 %vm1723_vm4, %v12715_v23  ;;  %v959_v30 = vsel %vm707_vm9, %v581_v29, %v833_v45  ;;  %v327_v29 = vld [vmem:[%s11384_s30 + $0x328] sm:$0xff]  ;;  %v837_v45 = vmul.f32 0.01, %v585_v60  ;;  %vm713_vm3 = vcmp.ge.f32.partialorder %v587_v53, 0.0  ;;  %v839_v15 = vmul.f32 0.01, %v587_v53  ;;  %vm12838_vm9 = vmand %vm12813_vm5, %vm1058_vm6 }
  0xe3   : > { %v836_v13 = vmul.f32 0.01, %v584_v56  ;;  %vm710_vm7 = vcmp.ge.f32.partialorder %v584_v56, 0.0  ;;  %v588_v7 = vadd.f32 %v12185_v41, %v458_v61  ;;  %v459_v50 = vmul.f32 %v12167_v59, %v327_v29 }
  0xe4   : > { %9626 = vmatmul.mubr.msk.f32.gmra.mrb[16].mxu1 %vm1723_vm4, %v11649_v42  ;;  %v960_v42 = vsel %vm708_vm12, %v582_v25, %v834_v20  ;;  %v12772_v25 = vsel %vm12700_vm14, %v959_v30, 0.0  ;;  %v329_v30 = vld [vmem:[%s11384_s30 + $0x338] sm:$0xff]  ;;  %v963_v47 = vsel %vm711_vm11, %v585_v60, %v837_v45  ;;  %v590_v60 = vadd.f32 %v12185_v41, %v460_v34  ;;  %v332_v45 = vld [vmem:[%s11384_s30 + $0x350] sm:$0xff] }
  0xe5   : > { %10052 = vmatmul.mubr.msk.f32.gmra.mrb[52].mxu0 %vm1723_vm4, %v12730_v51  ;;  %9628 = vmatprep.mubr.msk.f32.mxu1 %vm1723_vm4, %v11677_v36  ;;  %v12776_v19 = vsel %vm12700_vm14, %v960_v42, 0.0  ;;  %v962_v20 = vsel %vm710_vm7, %v584_v56, %v836_v13  ;;  %v330_v56 = vld [vmem:[%s11384_s30 + $0x340] sm:$0xff]  ;;  %v964_v13 = vsel %vm712_vm13, %v586_v10, %v838_v1  ;;  %v840_v61 = vmul.f32 0.01, %v588_v7 }
  0xe6   : > { %10054 = vmatprep.mubr.msk.f32.mxu0 %vm1723_vm4, %v12736_v5  ;;  %v12802_v42 = vsel %vm12700_vm14, %v962_v20, 0.0  ;;  %v589_v29 = vadd.f32 %v12185_v41, %v459_v50  ;;  %v461_v2 = vmul.f32 %v12167_v59, %v329_v30  ;;  %vm714_vm15 = vcmp.ge.f32.partialorder %v588_v7, 0.0 }
  0xe7   : > { %v462_v10 = vmul.f32 %v12167_v59, %v330_v56  ;;  %v12829_v20 = vsel %vm12700_vm14, %v963_v47, 0.0  ;;  %v12831_v1 = vsel %vm1300_vm1, %v964_v13, 0.0  ;;  %v965_v59 = vsel %vm713_vm3, %v587_v53, %v839_v15 }
  0xe8   : > { %9629 = vmatmul.mubr.msk.f32.gmra.mrb[18].mxu1 %vm1723_vm4, %v11693_v37  ;;  %16217 = vst [vmem:[#allocation53_spill] sm:$0xff] %v12831_v1  ;;  %v966_v34 = vsel %vm714_vm15, %v588_v7, %v840_v61  ;;  %v841_v30 = vmul.f32 0.01, %v589_v29  ;;  %v591_v56 = vadd.f32 %v12185_v41, %v461_v2  ;;  %v463_v47 = vmul.f32 %v12846_v63, %v331_v49  ;;  %v333_v7 = vld [vmem:[%s11384_s30 + $0x358] sm:$0xff]  ;;  %v16221_v61 = vld [vmem:[#allocation22_spill] sm:$0xff] }
  0xe9   : > { %10055 = vmatmul.mubr.msk.f32.gmra.mrb[54].mxu0 %vm1723_vm4, %v12750_v40  ;;  %9631 = vmatprep.mubr.msk.f32.mxu1 %vm1723_vm4, %v11711_v39  ;;  %vm715_vm14 = vcmp.ge.f32.partialorder %v589_v29, 0.0  ;;  %v842_v53 = vmul.f32 0.01, %v590_v60  ;;  %v592_v15 = vadd.f32 %v12185_v41, %v462_v10  ;;  %v464_v13 = vmul.f32 %v12846_v63, %v332_v45  ;;  %v12871_v45 = vld [vmem:[%s15952_s3 + $0x1] ss:$0 sm:$0xff] }
  0xea   : > { %10057 = vmatprep.mubr.msk.f32.mxu0 %vm1723_vm4, %v12754_v32  ;;  %vm716_vm12 = vcmp.ge.f32.partialorder %v590_v60, 0.0  ;;  %v12862_v2 = vsel %vm12838_vm9, %v965_v59, 0.0  ;;  %v12866_v41 = vsel %vm12813_vm5, %v966_v34, 0.0  ;;  %v967_v10 = vsel %vm715_vm14, %v589_v29, %v841_v30  ;;  %v16225_v29 = vld [vmem:[#allocation9_spill] sm:$0xff] }
  0xeb   : > { %16222 = vst [vmem:[#allocation22_spill] sm:$0xff] %v12862_v2  ;;  %16223 = vst [vmem:[#allocation55_spill] sm:$0xff] %v12866_v41  ;;  %v843_v49 = vmul.f32 0.01, %v591_v56  ;;  %v593_v21 = vadd.f32 %v12871_v45, %v463_v47  ;;  %v465_v8 = vmul.f32 %v12846_v63, %v333_v7  ;;  %v968_v59 = vsel %vm716_vm12, %v590_v60, %v842_v53  ;;  %v16228_v7 = vld [vmem:[#allocation10_spill] sm:$0xff] }
  0xec   : > { %9632 = vmatmul.mubr.msk.f32.gmra.mrb[20].mxu1 %vm1723_vm4, %v11729_v44  ;;  %vm717_vm10 = vcmp.ge.f32.partialorder %v591_v56, 0.0  ;;  %v844_v50 = vmul.f32 0.01, %v592_v15  ;;  %v594_v34 = vadd.f32 %v12871_v45, %v464_v13  ;;  %vm718_vm7 = vcmp.ge.f32.partialorder %v592_v15, 0.0 }
  0xed   : > { %10058 = vmatmul.mubr.msk.f32.gmra.mrb[56].mxu0 %vm1723_vm4, %v12772_v25  ;;  %9634 = vmatprep.mubr.msk.f32.mxu1 %vm1723_vm4, %v11749_v4  ;;  %v12886_v30 = vsel %vm12813_vm5, %v967_v10, 0.0  ;;  %v12890_v60 = vsel %vm12813_vm5, %v968_v59, 0.0  ;;  %v969_v47 = vsel %vm717_vm10, %v591_v56, %v843_v49  ;;  %v845_v53 = vmul.f32 0.01, %v593_v21  ;;  %v16232_v49 = vld [vmem:[#allocation12_spill] sm:$0xff] }
  0xee   : > { %10060 = vmatprep.mubr.msk.f32.mxu0 %vm1723_vm4, %v12776_v19  ;;  %16227 = vst [vmem:[#allocation9_spill] sm:$0xff] %v12890_v60  ;;  %v595_v13 = vadd.f32 %v12871_v45, %v465_v8  ;;  %v970_v63 = vsel %vm718_vm7, %v592_v15, %v844_v50  ;;  %vm719_vm11 = vcmp.ge.f32.partialorder %v593_v21, 0.0  ;;  %vm720_vm13 = vcmp.ge.f32.partialorder %v594_v34, 0.0  ;;  %v16233_v50 = vld [vmem:[#allocation13_spill] sm:$0xff] }
  0xef   : > { %v12903_v56 = vsel %vm12813_vm5, %v969_v47, 0.0  ;;  %v12907_v8 = vsel %vm12813_vm5, %v970_v63, 0.0  ;;  %v971_v15 = vsel %vm719_vm11, %v593_v21, %v845_v53 }
  0xf0   : > { %9635 = vmatmul.mubr.msk.f32.gmra.mrb[22].mxu1 %vm1723_vm4, %v11767_v38  ;;  %16230 = vst [vmem:[#allocation10_spill] sm:$0xff] %v12903_v56  ;;  %v847_v10 = vmul.f32 0.01, %v595_v13  ;;  %vm721_vm8 = vcmp.ge.f32.partialorder %v595_v13, 0.0  ;;  %v12919_v63 = vsel %vm12813_vm5, %v971_v15, 0.0  ;;  %v8821_v15 = vld [vmem:[%s15950_s1 + $0x198] sm:$0xff] }
  0xf1   : > { %10061 = vmatmul.mubr.msk.f32.gmra.mrb[58].mxu0 %vm1723_vm4, %v12795_v55  ;;  %9637 = vmatprep.mubr.msk.f32.mxu1 %vm1723_vm4, %v11785_v3  ;;  %16234 = vst [vmem:[#allocation12_spill] sm:$0xff] %v12919_v63 }
  0xf2   : > { %10063 = vmatprep.mubr.msk.f32.mxu0 %vm1723_vm4, %v12802_v42  ;;  %v973_v47 = vsel %vm721_vm8, %v595_v13, %v847_v10  ;;  %v16239_v13 = vld [vmem:[#allocation16_spill] sm:$0xff]  ;;  %v10429_v10 = vpack.c.bf16 %v8821_v15, %v8820_v62  ;;  %v16240_v62 = vld [vmem:[#allocation26_spill] sm:$0xff] }
  0xf3   : > { %v12937_v53 = vsel %vm1309_vm0, %v973_v47, 0.0  ;;  %v8823_v47 = vld [vmem:[%s15950_s1 + $0x1a8] sm:$0xff] }
  0xf4   : > { %9638 = vmatmul.mubr.msk.f32.gmra.mrb[24].mxu1 %vm1723_vm4, %v11816_v58 }
  0xf5   : > { %10064 = vmatmul.mubr.msk.f32.gmra.mrb[60].mxu0 %vm1723_vm4, %v12829_v20  ;;  %9640 = vmatprep.mubr.msk.f32.mxu1 %vm1723_vm4, %v16221_v61 }
  0xf6   : > { %10066 = vmatprep.mubr.msk.f32.mxu0 %vm1723_vm4, %v12831_v1  ;;  %v16224_v1 = vld [vmem:[#allocation8_spill] sm:$0xff] }
  0xf7   : > { %16226 = vst [vmem:[#allocation8_spill] sm:$0xff] %v12886_v30 }
  0xf8   : > { %9641 = vmatmul.mubr.msk.f32.gmra.mrb[26].mxu1 %vm1723_vm4, %v16224_v1 }
  0xf9   : > { %10067 = vmatmul.mubr.msk.f32.gmra.mrb[62].mxu0 %vm1723_vm4, %v12862_v2  ;;  %9643 = vmatprep.mubr.msk.f32.mxu1 %vm1723_vm4, %v16225_v29  ;;  %v846_v2 = vmul.f32 0.01, %v594_v34 }
  0xfa   : > { %10069 = vmatprep.mubr.msk.f32.mxu0 %vm1723_vm4, %v12866_v41  ;;  %v16229_v41 = vld [vmem:[#allocation11_spill] sm:$0xff] }
  0xfb   : > { %16231 = vst [vmem:[#allocation11_spill] sm:$0xff] %v12907_v8  ;;  %v972_v59 = vsel %vm720_vm13, %v594_v34, %v846_v2  ;;  %v16236_v2 = vld [vmem:[#allocation14_spill] sm:$0xff]  ;;  %v16237_v34 = vld [vmem:[#allocation15_spill] sm:$0xff] }
  0xfc   : > { %9644 = vmatmul.mubr.msk.f32.gmra.mrb[28].mxu1 %vm1723_vm4, %v16228_v7  ;;  %v12923_v21 = vsel %vm12813_vm5, %v972_v59, 0.0  ;;  %16238 = vst [vmem:[#allocation14_spill] sm:$0xff] %v12937_v53  ;;  %v8822_v59 = vld [vmem:[%s15950_s1 + $0x1a0] sm:$0xff] }
  0xfd   : > { %10070 = vmatmul.mubr.msk.f32.gmra.mrb[64].mxu0 %vm1723_vm4, %v12886_v30  ;;  %9646 = vmatprep.mubr.msk.f32.mxu1 %vm1723_vm4, %v16229_v41  ;;  %16235 = vst [vmem:[#allocation13_spill] sm:$0xff] %v12923_v21  ;;  %v10433_v15 = vpack.c.bf16 %v8823_v47, %v8822_v59  ;;  %v16245_v47 = vld [vmem:[#allocation19_spill] sm:$0xff] }
  0xfe   : > { %10072 = vmatprep.mubr.msk.f32.mxu0 %vm1723_vm4, %v12890_v60  ;;  %v16247_v60 = vld [vmem:[#allocation20_spill] sm:$0xff] }
 0x100   : > { %9647 = vmatmul.mubr.msk.f32.gmra.mrb[30].mxu1 %vm1723_vm4, %v16232_v49 }
 0x101   : > { %10073 = vmatmul.mubr.msk.f32.gmra.mrb[66].mxu0 %vm1723_vm4, %v12903_v56  ;;  %9649 = vmatprep.mubr.msk.f32.mxu1 %vm1723_vm4, %v16233_v50  ;;  %v16246_v56 = vld [vmem:[#allocation29_spill] sm:$0xff] }
 0x102   : > { %10075 = vmatprep.mubr.msk.f32.mxu0 %vm1723_vm4, %v12907_v8  ;;  %v16244_v8 = vld [vmem:[#allocation28_spill] sm:$0xff] }
 0x104   : > { %9650 = vmatmul.mubr.msk.f32.gmra.mrb[32].mxu1 %vm1723_vm4, %v16236_v2 }
 0x105   : > { %10076 = vmatmul.mubr.msk.f32.gmra.mrb[68].mxu0 %vm1723_vm4, %v12919_v63  ;;  %9652 = vmatprep.mubr.msk.f32.mxu1 %vm1723_vm4, %v16237_v34  ;;  %v16242_v63 = vld [vmem:[#allocation27_spill] sm:$0xff] }
 0x106   : > { %10078 = vmatprep.mubr.msk.f32.mxu0 %vm1723_vm4, %v12923_v21  ;;  %v8825_v21 = vld [vmem:[%s15950_s1 + $0x1b8] sm:$0xff] }
 0x108   : > { %9653 = vmatmul.mubr.msk.f32.gmra.mrb[34].mxu1 %vm1723_vm4, %v16239_v13 }
 0x109   : > { %10079 = vmatmul.mubr.msk.f32.gmra.mrb[70].mxu0 %vm1723_vm4, %v12937_v53  ;;  %9655 = vmatprep.mubr.msk.f32.mxu1 %vm1723_vm4, %v11683_v48  ;;  %v8824_v53 = vld [vmem:[%s15950_s1 + $0x1b0] sm:$0xff] }
 0x10a   : > { %10097 = vmatprep.mubr.msk.f32.mxu0 %vm1723_vm4, %v11874_v12  ;;  %v10437_v59 = vpack.c.bf16 %v8825_v21, %v8824_v53  ;;  %v16251_v21 = vld [vmem:[#allocation23_spill] sm:$0xff]  ;;  %v16252_v53 = vld [vmem:[#allocation32_spill] sm:$0xff] }
 0x10c   : > { %9656 = vmatmul.mubr.msk.f32.gmra.mrb[36].mxu1 %vm1723_vm4, %v11699_v0 }
 0x10d   : > { %10098 = vmatmul.mubr.msk.f32.vlgmr.msra.gmra.mrb[0].mxu0 %vm1723_vm4, %v11881_v17  ;;  %9658 = vmatprep.mubr.msk.f32.mxu1 %vm1723_vm4, %v11717_v22 }
 0x10e   : > { %10428 = vmatpush3.bf16.msra.mxu0 %v12522_v31  ;;  %10100 = vmatprep.mubr.msk.f32.mxu0 %vm1723_vm4, %v16240_v62  ;;  %v16243_v31 = vld [vmem:[#allocation18_spill] sm:$0xff] }
 0x10f   : > { %10430 = vmatprep.subr.bf16.mxu0 %v10429_v10 }
 0x110   : > { %9659 = vmatmul.mubr.msk.f32.gmra.mrb[38].mxu1 %vm1723_vm4, %v16241_v46  ;;  %v16248_v46 = vld [vmem:[#allocation30_spill] sm:$0xff] }
 0x111   : > { %10101 = vmatmul.mubr.msk.f32.gmra.mrb[2].mxu0 %vm1723_vm4, %v16242_v63  ;;  %9661 = vmatprep.mubr.msk.f32.mxu1 %vm1723_vm4, %v16243_v31  ;;  %v16249_v31 = vld [vmem:[#allocation21_spill] sm:$0xff] }
 0x112   : > { %10103 = vmatprep.mubr.msk.f32.mxu0 %vm1723_vm4, %v16244_v8  ;;  %10432 = vmatpush3.bf16.msra.mxu0 %v10429_v10  ;;  %v16250_v10 = vld [vmem:[#allocation31_spill] sm:$0xff] }
 0x113   : > { %10434 = vmatprep.subr.bf16.mxu0 %v10433_v15 }
 0x114   : > { %9662 = vmatmul.mubr.msk.f32.gmra.mrb[40].mxu1 %vm1723_vm4, %v16245_v47 }
 0x115   : > { %10104 = vmatmul.mubr.msk.f32.gmra.mrb[4].mxu0 %vm1723_vm4, %v16246_v56  ;;  %9664 = vmatprep.mubr.msk.f32.mxu1 %vm1723_vm4, %v16247_v60  ;;  %v16253_v60 = vld [vmem:[#allocation33_spill] sm:$0xff] }
 0x116   : > { %10106 = vmatprep.mubr.msk.f32.mxu0 %vm1723_vm4, %v16248_v46  ;;  %10436 = vmatpush3.bf16.msra.mxu0 %v10433_v15  ;;  %v16254_v15 = vld [vmem:[#allocation34_spill] sm:$0xff] }
 0x117   : > { %10438 = vmatprep.subr.bf16.mxu0 %v10437_v59 }
 0x118   : > { %9665 = vmatmul.mubr.msk.f32.gmra.mrb[42].mxu1 %vm1723_vm4, %v16249_v31 }
 0x119   : > { %10107 = vmatmul.mubr.msk.f32.gmra.mrb[6].mxu0 %vm1723_vm4, %v16250_v10  ;;  %9667 = vmatprep.mubr.msk.f32.mxu1 %vm1723_vm4, %v16251_v21  ;;  %v16255_v21 = vld [vmem:[#allocation35_spill] sm:$0xff] }
 0x11a   : > { %10109 = vmatprep.mubr.msk.f32.mxu0 %vm1723_vm4, %v16252_v53  ;;  %10440 = vmatpush3.bf16.msra.mxu0 %v10437_v59  ;;  %v16256_v59 = vld [vmem:[#allocation36_spill] sm:$0xff] }
 0x11c   : > { %9668 = vmatmul.mubr.msk.f32.gmra.mrb[44].mxu1 %vm1723_vm4, %v11874_v12  ;;  %v16257_v12 = vld [vmem:[#allocation37_spill] sm:$0xff] }
 0x11d   : > { %10110 = vmatmul.mubr.msk.f32.gmra.mrb[8].mxu0 %vm1723_vm4, %v16253_v60  ;;  %9670 = vmatprep.mubr.msk.f32.mxu1 %vm1723_vm4, %v11881_v17  ;;  %v16258_v17 = vld [vmem:[#allocation38_spill] sm:$0xff] }
 0x11e   : > { %10112 = vmatprep.mubr.msk.f32.mxu0 %vm1723_vm4, %v16254_v15 }
 0x120   : > { %9671 = vmatmul.mubr.msk.f32.gmra.mrb[46].mxu1 %vm1723_vm4, %v16240_v62  ;;  %v16259_v62 = vld [vmem:[#allocation39_spill] sm:$0xff] }
 0x121   : > { %10113 = vmatmul.mubr.msk.f32.gmra.mrb[10].mxu0 %vm1723_vm4, %v16255_v21  ;;  %9673 = vmatprep.mubr.msk.f32.mxu1 %vm1723_vm4, %v16242_v63  ;;  %v16260_v63 = vld [vmem:[#allocation40_spill] sm:$0xff] }
 0x122   : > { %10115 = vmatprep.mubr.msk.f32.mxu0 %vm1723_vm4, %v16256_v59 }
 0x124   : > { %9674 = vmatmul.mubr.msk.f32.gmra.mrb[48].mxu1 %vm1723_vm4, %v16244_v8  ;;  %v16261_v8 = vld [vmem:[#allocation41_spill] sm:$0xff] }
 0x125   : > { %10116 = vmatmul.mubr.msk.f32.gmra.mrb[12].mxu0 %vm1723_vm4, %v16257_v12  ;;  %9676 = vmatprep.mubr.msk.f32.mxu1 %vm1723_vm4, %v16246_v56  ;;  %v16262_v56 = vld [vmem:[#allocation42_spill] sm:$0xff] }
 0x126   : > { %10118 = vmatprep.mubr.msk.f32.mxu0 %vm1723_vm4, %v16258_v17 }
 0x128   : > { %9677 = vmatmul.mubr.msk.f32.gmra.mrb[50].mxu1 %vm1723_vm4, %v16248_v46  ;;  %v16263_v46 = vld [vmem:[#allocation43_spill] sm:$0xff] }
 0x129   : > { %10119 = vmatmul.mubr.msk.f32.gmra.mrb[14].mxu0 %vm1723_vm4, %v16259_v62  ;;  %9679 = vmatprep.mubr.msk.f32.mxu1 %vm1723_vm4, %v16250_v10  ;;  %v16264_v10 = vld [vmem:[#allocation44_spill] sm:$0xff] }
 0x12a   : > { %10121 = vmatprep.mubr.msk.f32.mxu0 %vm1723_vm4, %v16260_v63 }
 0x12c   : > { %9680 = vmatmul.mubr.msk.f32.gmra.mrb[52].mxu1 %vm1723_vm4, %v16252_v53  ;;  %v16265_v53 = vld [vmem:[#allocation45_spill] sm:$0xff] }
 0x12d   : > { %10122 = vmatmul.mubr.msk.f32.gmra.mrb[16].mxu0 %vm1723_vm4, %v16261_v8  ;;  %9682 = vmatprep.mubr.msk.f32.mxu1 %vm1723_vm4, %v16253_v60  ;;  %v16266_v60 = vld [vmem:[#allocation46_spill] sm:$0xff] }
 0x12e   : > { %10124 = vmatprep.mubr.msk.f32.mxu0 %vm1723_vm4, %v16262_v56 }
 0x130   : > { %9683 = vmatmul.mubr.msk.f32.gmra.mrb[54].mxu1 %vm1723_vm4, %v16254_v15  ;;  %v16267_v15 = vld [vmem:[#allocation47_spill] sm:$0xff] }
 0x131   : > { %10125 = vmatmul.mubr.msk.f32.gmra.mrb[18].mxu0 %vm1723_vm4, %v16263_v46  ;;  %9685 = vmatprep.mubr.msk.f32.mxu1 %vm1723_vm4, %v16255_v21  ;;  %v16268_v21 = vld [vmem:[#allocation48_spill] sm:$0xff] }
 0x132   : > { %10127 = vmatprep.mubr.msk.f32.mxu0 %vm1723_vm4, %v16264_v10 }
 0x134   : > { %9686 = vmatmul.mubr.msk.f32.gmra.mrb[56].mxu1 %vm1723_vm4, %v16256_v59  ;;  %v16269_v59 = vld [vmem:[#allocation49_spill] sm:$0xff] }
 0x135   : > { %10128 = vmatmul.mubr.msk.f32.gmra.mrb[20].mxu0 %vm1723_vm4, %v16265_v53  ;;  %9688 = vmatprep.mubr.msk.f32.mxu1 %vm1723_vm4, %v16257_v12  ;;  %v16270_v12 = vld [vmem:[#allocation50_spill] sm:$0xff] }
 0x136   : > { %10130 = vmatprep.mubr.msk.f32.mxu0 %vm1723_vm4, %v16266_v60 }
 0x138   : > { %9689 = vmatmul.mubr.msk.f32.gmra.mrb[58].mxu1 %vm1723_vm4, %v16258_v17  ;;  %v16271_v17 = vld [vmem:[#allocation51_spill] sm:$0xff] }
 0x139   : > { %10131 = vmatmul.mubr.msk.f32.gmra.mrb[22].mxu0 %vm1723_vm4, %v16267_v15  ;;  %9691 = vmatprep.mubr.msk.f32.mxu1 %vm1723_vm4, %v16259_v62 }
 0x13a   : > { %10133 = vmatprep.mubr.msk.f32.mxu0 %vm1723_vm4, %v16268_v21 }
 0x13c   : > { %9692 = vmatmul.mubr.msk.f32.gmra.mrb[60].mxu1 %vm1723_vm4, %v16260_v63 }
 0x13d   : > { %10134 = vmatmul.mubr.msk.f32.gmra.mrb[24].mxu0 %vm1723_vm4, %v16269_v59  ;;  %9694 = vmatprep.mubr.msk.f32.mxu1 %vm1723_vm4, %v16261_v8 }
 0x13e   : > { %10136 = vmatprep.mubr.msk.f32.mxu0 %vm1723_vm4, %v16270_v12 }
 0x140   : > { %9695 = vmatmul.mubr.msk.f32.gmra.mrb[62].mxu1 %vm1723_vm4, %v16262_v56 }
 0x141   : > { %10137 = vmatmul.mubr.msk.f32.gmra.mrb[26].mxu0 %vm1723_vm4, %v16271_v17  ;;  %9697 = vmatprep.mubr.msk.f32.mxu1 %vm1723_vm4, %v16263_v46 }
 0x142   : > { %10139 = vmatprep.mubr.msk.f32.mxu0 %vm1723_vm4, %v12376_v52 }
 0x144   : > { %9698 = vmatmul.mubr.msk.f32.gmra.mrb[64].mxu1 %vm1723_vm4, %v16264_v10 }
 0x145   : > { %10140 = vmatmul.mubr.msk.f32.gmra.mrb[28].mxu0 %vm1723_vm4, %v12386_v28  ;;  %9700 = vmatprep.mubr.msk.f32.mxu1 %vm1723_vm4, %v16265_v53 }
 0x146   : > { %10142 = vmatprep.mubr.msk.f32.mxu0 %vm1723_vm4, %v12394_v27 }
 0x148   : > { %9701 = vmatmul.mubr.msk.f32.gmra.mrb[66].mxu1 %vm1723_vm4, %v16266_v60 }
 0x149   : > { %10143 = vmatmul.mubr.msk.f32.gmra.mrb[30].mxu0 %vm1723_vm4, %v12414_v11  ;;  %9703 = vmatprep.mubr.msk.f32.mxu1 %vm1723_vm4, %v16267_v15 }
 0x14a   : > { %10145 = vmatprep.mubr.msk.f32.mxu0 %vm1723_vm4, %v12422_v43 }
 0x14c   : > { %9704 = vmatmul.mubr.msk.f32.gmra.mrb[68].mxu1 %vm1723_vm4, %v16268_v21 }
 0x14d   : > { %10146 = vmatmul.mubr.msk.f32.gmra.mrb[32].mxu0 %vm1723_vm4, %v12445_v14  ;;  %9706 = vmatprep.mubr.msk.f32.mxu1 %vm1723_vm4, %v16269_v59 }
 0x14e   : > { %10148 = vmatprep.mubr.msk.f32.mxu0 %vm1723_vm4, %v12449_v16 }
 0x150   : > { %9707 = vmatmul.mubr.msk.f32.gmra.mrb[70].mxu1 %vm1723_vm4, %v16270_v12 }
 0x151   : > { %10149 = vmatmul.mubr.msk.f32.gmra.mrb[34].mxu0 %vm1723_vm4, %v12477_v24  ;;  %9725 = vmatprep.mubr.msk.f32.mxu1 %vm1723_vm4, %v11677_v36  ;;  %v16272_v24 = vld [vmem:[#allocation3_spill] sm:$0xff]  ;;  %v16273_v36 = vld [vmem:[#allocation5_spill] sm:$0xff] }
 0x152   : > { %10151 = vmatprep.mubr.msk.f32.mxu0 %vm1723_vm4, %v12628_v57 }
 0x154   : > { %9726 = vmatmul.mubr.msk.f32.vlgmr.msra.gmra.mrb[0].mxu1 %vm1723_vm4, %v11693_v37  ;;  %v334_v37 = vld [vmem:[%s11384_s30 + $0x360] sm:$0xff] }
 0x155   : > { %10152 = vmatmul.mubr.msk.f32.gmra.mrb[36].mxu0 %vm1723_vm4, %v12633_v26  ;;  %9728 = vmatprep.mubr.msk.f32.mxu1 %vm1723_vm4, %v11711_v39  ;;  %v335_v39 = vld [vmem:[%s11384_s30 + $0x368] sm:$0xff] }
 0x156   : > { %10154 = vmatprep.mubr.msk.f32.mxu0 %vm1723_vm4, %v12653_v35  ;;  %10445 = vmatpush3.bf16.msra.mxu1 %v11322_v9  ;;  %v16274_v9 = vld [vmem:[#allocation6_spill] sm:$0xff] }
 0x157   : > { %10442 = vmatprep.subr.bf16.mxu1 %v16272_v24 }
 0x158   : > { %9729 = vmatmul.mubr.msk.f32.gmra.mrb[2].mxu1 %vm1723_vm4, %v11729_v44  ;;  %v16275_v44 = vld [vmem:[#allocation53_spill] sm:$0xff] }
 0x159   : > { %10155 = vmatmul.mubr.msk.f32.gmra.mrb[38].mxu0 %vm1723_vm4, %v12660_v18  ;;  %9731 = vmatprep.mubr.msk.f32.mxu1 %vm1723_vm4, %v11749_v4  ;;  %v16276_v4 = vld [vmem:[#allocation22_spill] sm:$0xff] }
 0x15a   : > { %10157 = vmatprep.mubr.msk.f32.mxu0 %vm1723_vm4, %v12667_v33  ;;  %10446 = vmatpush3.bf16.msra.mxu1 %v16272_v24  ;;  %v336_v24 = vld [vmem:[%s11384_s30 + $0x370] sm:$0xff] }
 0x15b   : > { %10443 = vmatprep.subr.bf16.mxu1 %v16273_v36 }
 0x15c   : > { %9732 = vmatmul.mubr.msk.f32.gmra.mrb[4].mxu1 %vm1723_vm4, %v11767_v38  ;;  %v16277_v38 = vld [vmem:[#allocation54_spill] sm:$0xff] }
 0x15d   : > { %10158 = vmatmul.mubr.msk.f32.gmra.mrb[40].mxu0 %vm1723_vm4, %v12683_v6  ;;  %9734 = vmatprep.mubr.msk.f32.mxu1 %vm1723_vm4, %v11785_v3  ;;  %v466_v3 = vmul.f32 %v16277_v38, %v334_v37 }
 0x15e   : > { %10160 = vmatprep.mubr.msk.f32.mxu0 %vm1723_vm4, %v12690_v54  ;;  %10447 = vmatpush3.bf16.msra.mxu1 %v16273_v36  ;;  %v16283_v36 = vld [vmem:[#allocation10_spill] sm:$0xff] }
 0x15f   : > { %10444 = vmatprep.subr.bf16.mxu1 %v16274_v9 }
 0x160   : > { %9735 = vmatmul.mubr.msk.f32.gmra.mrb[6].mxu1 %vm1723_vm4, %v11816_v58  ;;  %v467_v58 = vmul.f32 %v16277_v38, %v335_v39 }
 0x161   : > { %10161 = vmatmul.mubr.msk.f32.gmra.mrb[42].mxu0 %vm1723_vm4, %v12715_v23  ;;  %9737 = vmatprep.mubr.msk.f32.mxu1 %vm1723_vm4, %v16221_v61 }
 0x162   : > { %10163 = vmatprep.mubr.msk.f32.mxu0 %vm1723_vm4, %v12730_v51  ;;  %10448 = vmatpush3.bf16.msra.mxu1 %v16274_v9 }
 0x164   : > { %9738 = vmatmul.mubr.msk.f32.gmra.mrb[8].mxu1 %vm1723_vm4, %v16224_v1  ;;  %v16278_v1 = vld [vmem:[#allocation55_spill] sm:$0xff] }
 0x165   : > { %10164 = vmatmul.mubr.msk.f32.gmra.mrb[44].mxu0 %vm1723_vm4, %v12736_v5  ;;  %9740 = vmatprep.mubr.msk.f32.mxu1 %vm1723_vm4, %v16225_v29  ;;  %v596_v29 = vadd.f32 %v12871_v45, %v466_v3 }
 0x166   : > { %10166 = vmatprep.mubr.msk.f32.mxu0 %vm1723_vm4, %v12750_v40 }
 0x167   : > { %v848_v9 = vmul.f32 0.01, %v596_v29  ;;  %vm722_vm5 = vcmp.ge.f32.partialorder %v596_v29, 0.0 }
 0x168   : > { %9741 = vmatmul.mubr.msk.f32.gmra.mrb[10].mxu1 %vm1723_vm4, %v16228_v7  ;;  %v597_v7 = vadd.f32 %v12871_v45, %v467_v58  ;;  %v16303_v58 = vld [vmem:[#allocation33_spill] sm:$0xff] }
 0x169   : > { %10167 = vmatmul.mubr.msk.f32.gmra.mrb[46].mxu0 %vm1723_vm4, %v12754_v32  ;;  %9743 = vmatprep.mubr.msk.f32.mxu1 %vm1723_vm4, %v16229_v41  ;;  %v337_v41 = vld [vmem:[%s11384_s30 + $0x378] sm:$0xff] }
 0x16a   : > { %10169 = vmatprep.mubr.msk.f32.mxu0 %vm1723_vm4, %v12772_v25  ;;  %v849_v37 = vmul.f32 0.01, %v597_v7  ;;  %vm723_vm9 = vcmp.ge.f32.partialorder %v597_v7, 0.0 }
 0x16c   : > { %9744 = vmatmul.mubr.msk.f32.gmra.mrb[12].mxu1 %vm1723_vm4, %v16232_v49  ;;  %v16280_v49 = vld [vmem:[#allocation17_spill] sm:$0xff] }
 0x16d   : > { %10170 = vmatmul.mubr.msk.f32.gmra.mrb[48].mxu0 %vm1723_vm4, %v12776_v19  ;;  %9746 = vmatprep.mubr.msk.f32.mxu1 %vm1723_vm4, %v16233_v50  ;;  %v469_v50 = vmul.f32 %v16277_v38, %v337_v41  ;;  %v340_v41 = vld [vmem:[%s11384_s30 + $0x390] sm:$0xff] }
 0x16e   : > { %10172 = vmatprep.mubr.msk.f32.mxu0 %vm1723_vm4, %v12795_v55 }
 0x170   : > { %9747 = vmatmul.mubr.msk.f32.gmra.mrb[14].mxu1 %vm1723_vm4, %v16236_v2  ;;  %v338_v2 = vld [vmem:[%s11384_s30 + $0x380] sm:$0xff] }
 0x171   : > { %10173 = vmatmul.mubr.msk.f32.gmra.mrb[50].mxu0 %vm1723_vm4, %v12802_v42  ;;  %9749 = vmatprep.mubr.msk.f32.mxu1 %vm1723_vm4, %v16237_v34  ;;  %v16281_v34 = vld [vmem:[#allocation9_spill] sm:$0xff]  ;;  %v470_v3 = vmul.f32 %v16277_v38, %v338_v2 }
 0x172   : > { %10175 = vmatprep.mubr.msk.f32.mxu0 %vm1723_vm4, %v12829_v20  ;;  %v341_v2 = vld [vmem:[%s11384_s30 + $0x398] sm:$0xff] }
 0x174   : > { %9750 = vmatmul.mubr.msk.f32.gmra.mrb[16].mxu1 %vm1723_vm4, %v16239_v13  ;;  %v339_v13 = vld [vmem:[%s11384_s30 + $0x388] sm:$0xff] }
 0x175   : > { %10176 = vmatmul.mubr.msk.f32.gmra.mrb[52].mxu0 %vm1723_vm4, %v16275_v44  ;;  %9752 = vmatprep.mubr.msk.f32.mxu1 %vm1723_vm4, %v11683_v48  ;;  %v16279_v48 = vld [vmem:[#allocation2_spill] sm:$0xff] }
 0x176   : > { %10178 = vmatprep.mubr.msk.f32.mxu0 %vm1723_vm4, %v16276_v4  ;;  %v1004_v61 = vadd.s32 12, %v16279_v48  ;;  %v16290_v48 = vld [vmem:[#allocation13_spill] sm:$0xff] }
 0x178   : > { %9753 = vmatmul.mubr.msk.f32.gmra.mrb[18].mxu1 %vm1723_vm4, %v11699_v0  ;;  %v468_v0 = vmul.f32 %v16277_v38, %v336_v24  ;;  %vm1028_vm3 = vcmp.ge.s32.totalorder %v1004_v61, 3  ;;  %vm1042_vm1 = vcmp.lt.s32.totalorder %v1004_v61, 67  ;;  %v599_v24 = vadd.f32 %v12871_v45, %v469_v50 }
 0x179   : > { %10179 = vmatmul.mubr.msk.f32.gmra.mrb[54].mxu0 %vm1723_vm4, %v16278_v1  ;;  %9755 = vmatprep.mubr.msk.f32.mxu1 %vm1723_vm4, %v11717_v22  ;;  %v16282_v22 = vld [vmem:[#allocation18_spill] sm:$0xff]  ;;  %vm13222_vm15 = vmand %vm1028_vm3, %vm1042_vm1  ;;  %v471_v61 = vmul.f32 %v16277_v38, %v339_v13  ;;  %v975_v50 = vsel %vm723_vm9, %v597_v7, %v849_v37 }
 0x17a   : > { %10181 = vmatprep.mubr.msk.f32.mxu0 %vm1723_vm4, %v12886_v30  ;;  %v598_v39 = vadd.f32 %v12871_v45, %v468_v0  ;;  %v16287_v0 = vld [vmem:[#allocation20_spill] sm:$0xff]  ;;  %vm1175_vm14 = vmand %vm13222_vm15, %vm1058_vm6  ;;  %vm725_vm10 = vcmp.ge.f32.partialorder %v599_v24, 0.0  ;;  %v16292_v7 = vld [vmem:[#allocation14_spill] sm:$0xff] }
 0x17b   : > { %vm1318_vm3 = vmand %vm13222_vm15, %vm1201_vm2 }
 0x17c   : > { %9756 = vmatmul.mubr.msk.f32.gmra.mrb[20].mxu1 %vm1723_vm4, %v16280_v49  ;;  %v16286_v49 = vld [vmem:[#allocation11_spill] sm:$0xff]  ;;  %v850_v13 = vmul.f32 0.01, %v598_v39  ;;  %vm724_vm12 = vcmp.ge.f32.partialorder %v598_v39, 0.0 }
 0x17d   : > { %10182 = vmatmul.mubr.msk.f32.gmra.mrb[56].mxu0 %vm1723_vm4, %v16281_v34  ;;  %9758 = vmatprep.mubr.msk.f32.mxu1 %vm1723_vm4, %v16282_v22  ;;  %v16288_v22 = vld [vmem:[#allocation12_spill] sm:$0xff]  ;;  %v472_v34 = vmul.f32 %v16277_v38, %v340_v41 }
 0x17e   : > { %10184 = vmatprep.mubr.msk.f32.mxu0 %vm1723_vm4, %v16283_v36  ;;  %v600_v36 = vadd.f32 %v12871_v45, %v470_v3  ;;  %v976_v3 = vsel %vm724_vm12, %v598_v39, %v850_v13  ;;  %v16295_v13 = vld [vmem:[#allocation26_spill] sm:$0xff] }
 0x17f   : > { %v602_v41 = vadd.f32 %v12871_v45, %v472_v34  ;;  %v13272_v34 = vsel %vm13222_vm15, %v976_v3, 0.0 }
 0x180   : > { %9759 = vmatmul.mubr.msk.f32.gmra.mrb[22].mxu1 %vm1723_vm4, %v16245_v47  ;;  %v974_v47 = vsel %vm722_vm5, %v596_v29, %v848_v9  ;;  %v473_v29 = vmul.f32 %v16277_v38, %v341_v2  ;;  %v342_v9 = vld [vmem:[%s11384_s30 + $0x3a0] sm:$0xff]  ;;  %vm726_vm7 = vcmp.ge.f32.partialorder %v600_v36, 0.0 }
 0x181   : > { %10185 = vmatmul.mubr.msk.f32.gmra.mrb[58].mxu0 %vm1723_vm4, %v16286_v49  ;;  %9761 = vmatprep.mubr.msk.f32.mxu1 %vm1723_vm4, %v16287_v0  ;;  %v851_v0 = vmul.f32 0.01, %v599_v24  ;;  %v601_v49 = vadd.f32 %v12871_v45, %v471_v61  ;;  %v13253_v37 = vsel %vm1175_vm14, %v974_v47, 0.0  ;;  %v852_v61 = vmul.f32 0.01, %v600_v36  ;;  %v16294_v47 = vld [vmem:[#allocation25_spill] sm:$0xff] }
 0x182   : > { %10187 = vmatprep.mubr.msk.f32.mxu0 %vm1723_vm4, %v16288_v22  ;;  %v16291_v22 = vld [vmem:[#allocation23_spill] sm:$0xff]  ;;  %v474_v2 = vmul.f32 %v16277_v38, %v342_v9  ;;  %vm728_vm13 = vcmp.ge.f32.partialorder %v602_v41, 0.0 }
 0x183   : > { %v853_v30 = vmul.f32 0.01, %v601_v49  ;;  %vm727_vm11 = vcmp.ge.f32.partialorder %v601_v49, 0.0  ;;  %v978_v39 = vsel %vm726_vm7, %v600_v36, %v852_v61  ;;  %v16296_v9 = vld [vmem:[#allocation27_spill] sm:$0xff]  ;;  %v16297_v61 = vld [vmem:[#allocation28_spill] sm:$0xff] }
 0x184   : > { %9762 = vmatmul.mubr.msk.f32.gmra.mrb[24].mxu1 %vm1723_vm4, %v16249_v31  ;;  %v13257_v31 = vsel %vm13222_vm15, %v975_v50, 0.0  ;;  %v604_v50 = vadd.f32 %v12871_v45, %v474_v2  ;;  %v13289_v36 = vsel %vm13222_vm15, %v978_v39, 0.0 }
 0x185   : > { %10188 = vmatmul.mubr.msk.f32.gmra.mrb[60].mxu0 %vm1723_vm4, %v16290_v48  ;;  %9764 = vmatprep.mubr.msk.f32.mxu1 %vm1723_vm4, %v16291_v22  ;;  %v16293_v48 = vld [vmem:[#allocation24_spill] sm:$0xff]  ;;  %v977_v22 = vsel %vm725_vm10, %v599_v24, %v851_v0  ;;  %v854_v24 = vmul.f32 0.01, %v602_v41  ;;  %v979_v0 = vsel %vm727_vm11, %v601_v49, %v853_v30 }
 0x186   : > { %10190 = vmatprep.mubr.msk.f32.mxu0 %vm1723_vm4, %v16292_v7  ;;  %v603_v7 = vadd.f32 %v12871_v45, %v473_v29  ;;  %v13293_v3 = vsel %vm13222_vm15, %v979_v0, 0.0  ;;  %v856_v49 = vmul.f32 0.01, %v604_v50  ;;  %vm730_vm0 = vcmp.ge.f32.partialorder %v604_v50, 0.0 }
 0x187   : > { %v980_v30 = vsel %vm728_vm13, %v602_v41, %v854_v24  ;;  %v16300_v24 = vld [vmem:[#allocation30_spill] sm:$0xff] }
 0x188   : > { %9765 = vmatmul.mubr.msk.f32.gmra.mrb[26].mxu1 %vm1723_vm4, %v16293_v48  ;;  %v13276_v48 = vsel %vm13222_vm15, %v977_v22, 0.0  ;;  %v855_v29 = vmul.f32 0.01, %v603_v7  ;;  %vm729_vm8 = vcmp.ge.f32.partialorder %v603_v7, 0.0  ;;  %v16298_v22 = vld [vmem:[#allocation29_spill] sm:$0xff]  ;;  %v982_v39 = vsel %vm730_vm0, %v604_v50, %v856_v49  ;;  %v16302_v50 = vld [vmem:[#allocation32_spill] sm:$0xff] }
 0x189   : > { %10191 = vmatmul.mubr.msk.f32.gmra.mrb[62].mxu0 %vm1723_vm4, %v13253_v37  ;;  %9767 = vmatprep.mubr.msk.f32.mxu1 %vm1723_vm4, %v16294_v47  ;;  %v13305_v47 = vsel %vm13222_vm15, %v980_v30, 0.0  ;;  %v13323_v0 = vsel %vm1318_vm3, %v982_v39, 0.0  ;;  %v16306_v30 = vld [vmem:[#allocation36_spill] sm:$0xff]  ;;  %v16307_v49 = vld [vmem:[#allocation37_spill] sm:$0xff] }
 0x18a   : > { %10193 = vmatprep.mubr.msk.f32.mxu0 %vm1723_vm4, %v13257_v31  ;;  %v981_v2 = vsel %vm729_vm8, %v603_v7, %v855_v29  ;;  %v16304_v29 = vld [vmem:[#allocation34_spill] sm:$0xff] }
 0x18b   : > { %v13309_v41 = vsel %vm13222_vm15, %v981_v2, 0.0 }
 0x18c   : > { %9768 = vmatmul.mubr.msk.f32.gmra.mrb[28].mxu1 %vm1723_vm4, %v16295_v13  ;;  %v16301_v13 = vld [vmem:[#allocation31_spill] sm:$0xff] }
 0x18d   : > { %10194 = vmatmul.mubr.msk.f32.gmra.mrb[64].mxu0 %vm1723_vm4, %v13272_v34  ;;  %9770 = vmatprep.mubr.msk.f32.mxu1 %vm1723_vm4, %v16296_v9  ;;  %v16305_v9 = vld [vmem:[#allocation35_spill] sm:$0xff] }
 0x18e   : > { %10196 = vmatprep.mubr.msk.f32.mxu0 %vm1723_vm4, %v13276_v48 }
 0x190   : > { %9771 = vmatmul.mubr.msk.f32.gmra.mrb[30].mxu1 %vm1723_vm4, %v16297_v61  ;;  %v16308_v61 = vld [vmem:[#allocation38_spill] sm:$0xff] }
 0x191   : > { %10197 = vmatmul.mubr.msk.f32.gmra.mrb[66].mxu0 %vm1723_vm4, %v13289_v36  ;;  %9773 = vmatprep.mubr.msk.f32.mxu1 %vm1723_vm4, %v16298_v22 }
 0x192   : > { %10199 = vmatprep.mubr.msk.f32.mxu0 %vm1723_vm4, %v13293_v3 }
 0x194   : > { %9774 = vmatmul.mubr.msk.f32.gmra.mrb[32].mxu1 %vm1723_vm4, %v16300_v24 }
 0x195   : > { %10200 = vmatmul.mubr.msk.f32.gmra.mrb[68].mxu0 %vm1723_vm4, %v13305_v47  ;;  %9776 = vmatprep.mubr.msk.f32.mxu1 %vm1723_vm4, %v16301_v13 }
 0x196   : > { %10202 = vmatprep.mubr.msk.f32.mxu0 %vm1723_vm4, %v13309_v41 }
 0x198   : > { %9777 = vmatmul.mubr.msk.f32.gmra.mrb[34].mxu1 %vm1723_vm4, %v16302_v50  ;;  %v351_v50 = vld [vmem:[%s11384_s30 + $0x3e8] sm:$0xff] }
 0x199   : > { %10203 = vmatmul.mubr.msk.f32.gmra.mrb[70].mxu0 %vm1723_vm4, %v13323_v0  ;;  %9779 = vmatprep.mubr.msk.f32.mxu1 %vm1723_vm4, %v16303_v58 }
 0x19a   : > { %10221 = vmatprep.mubr.msk.f32.mxu0 %vm1723_vm4, %v16303_v58 }
 0x19c   : > { %9780 = vmatmul.mubr.msk.f32.gmra.mrb[36].mxu1 %vm1723_vm4, %v16304_v29 }
 0x19d   : > { %10222 = vmatmul.mubr.msk.f32.vlgmr.msra.gmra.mrb[0].mxu0 %vm1723_vm4, %v16304_v29  ;;  %9782 = vmatprep.mubr.msk.f32.mxu1 %vm1723_vm4, %v16305_v9 }
 0x19e   : > { %10224 = vmatprep.mubr.msk.f32.mxu0 %vm1723_vm4, %v16305_v9 }
 0x1a0   : > { %9783 = vmatmul.mubr.msk.f32.gmra.mrb[38].mxu1 %vm1723_vm4, %v16306_v30 }
 0x1a1   : > { %10225 = vmatmul.mubr.msk.f32.gmra.mrb[2].mxu0 %vm1723_vm4, %v16306_v30  ;;  %9785 = vmatprep.mubr.msk.f32.mxu1 %vm1723_vm4, %v16307_v49 }
 0x1a2   : > { %10227 = vmatprep.mubr.msk.f32.mxu0 %vm1723_vm4, %v16307_v49  ;;  %v483_v49 = vmul.f32 %v16277_v38, %v351_v50 }
 0x1a4   : > { %9786 = vmatmul.mubr.msk.f32.gmra.mrb[40].mxu1 %vm1723_vm4, %v16308_v61 }
 0x1a5   : > { %10228 = vmatmul.mubr.msk.f32.gmra.mrb[4].mxu0 %vm1723_vm4, %v16308_v61  ;;  %9788 = vmatprep.mubr.msk.f32.mxu1 %vm1723_vm4, %v16259_v62 }
 0x1a6   : > { %10230 = vmatprep.mubr.msk.f32.mxu0 %vm1723_vm4, %v16259_v62  ;;  %v346_v62 = vld [vmem:[%s11384_s30 + $0x3c0] sm:$0xff] }
 0x1a8   : > { %9789 = vmatmul.mubr.msk.f32.gmra.mrb[42].mxu1 %vm1723_vm4, %v16260_v63 }
 0x1a9   : > { %10231 = vmatmul.mubr.msk.f32.gmra.mrb[6].mxu0 %vm1723_vm4, %v16260_v63  ;;  %9791 = vmatprep.mubr.msk.f32.mxu1 %vm1723_vm4, %v16261_v8 }
 0x1aa   : > { %10233 = vmatprep.mubr.msk.f32.mxu0 %vm1723_vm4, %v16261_v8  ;;  %v16309_v8 = vld [vmem:[#allocation52_spill] sm:$0xff] }
 0x1ac   : > { %9792 = vmatmul.mubr.msk.f32.gmra.mrb[44].mxu1 %vm1723_vm4, %v16262_v56 }
 0x1ad   : > { %10234 = vmatmul.mubr.msk.f32.gmra.mrb[8].mxu0 %vm1723_vm4, %v16262_v56  ;;  %9794 = vmatprep.mubr.msk.f32.mxu1 %vm1723_vm4, %v16263_v46 }
 0x1ae   : > { %10236 = vmatprep.mubr.msk.f32.mxu0 %vm1723_vm4, %v16263_v46 }
 0x1b0   : > { %9795 = vmatmul.mubr.msk.f32.gmra.mrb[46].mxu1 %vm1723_vm4, %v16264_v10 }
 0x1b1   : > { %10237 = vmatmul.mubr.msk.f32.gmra.mrb[10].mxu0 %vm1723_vm4, %v16264_v10  ;;  %9797 = vmatprep.mubr.msk.f32.mxu1 %vm1723_vm4, %v16265_v53 }
 0x1b2   : > { %10239 = vmatprep.mubr.msk.f32.mxu0 %vm1723_vm4, %v16265_v53 }
 0x1b4   : > { %9798 = vmatmul.mubr.msk.f32.gmra.mrb[48].mxu1 %vm1723_vm4, %v16266_v60 }
 0x1b5   : > { %10240 = vmatmul.mubr.msk.f32.gmra.mrb[12].mxu0 %vm1723_vm4, %v16266_v60  ;;  %9800 = vmatprep.mubr.msk.f32.mxu1 %vm1723_vm4, %v16267_v15 }
 0x1b6   : > { %10242 = vmatprep.mubr.msk.f32.mxu0 %vm1723_vm4, %v16267_v15 }
 0x1b8   : > { %9801 = vmatmul.mubr.msk.f32.gmra.mrb[50].mxu1 %vm1723_vm4, %v16268_v21 }
 0x1b9   : > { %10243 = vmatmul.mubr.msk.f32.gmra.mrb[14].mxu0 %vm1723_vm4, %v16268_v21  ;;  %9803 = vmatprep.mubr.msk.f32.mxu1 %vm1723_vm4, %v16269_v59 }
 0x1ba   : > { %10245 = vmatprep.mubr.msk.f32.mxu0 %vm1723_vm4, %v16269_v59 }
 0x1bc   : > { %9804 = vmatmul.mubr.msk.f32.gmra.mrb[52].mxu1 %vm1723_vm4, %v16270_v12 }
 0x1bd   : > { %10246 = vmatmul.mubr.msk.f32.gmra.mrb[16].mxu0 %vm1723_vm4, %v16270_v12  ;;  %9806 = vmatprep.mubr.msk.f32.mxu1 %vm1723_vm4, %v16271_v17 }
 0x1be   : > { %10248 = vmatprep.mubr.msk.f32.mxu0 %vm1723_vm4, %v16271_v17 }
 0x1c0   : > { %9807 = vmatmul.mubr.msk.f32.gmra.mrb[54].mxu1 %vm1723_vm4, %v12376_v52 }
 0x1c1   : > { %10249 = vmatmul.mubr.msk.f32.gmra.mrb[18].mxu0 %vm1723_vm4, %v12376_v52  ;;  %9809 = vmatprep.mubr.msk.f32.mxu1 %vm1723_vm4, %v12386_v28 }
 0x1c2   : > { %10251 = vmatprep.mubr.msk.f32.mxu0 %vm1723_vm4, %v12386_v28 }
 0x1c4   : > { %9810 = vmatmul.mubr.msk.f32.gmra.mrb[56].mxu1 %vm1723_vm4, %v12394_v27 }
 0x1c5   : > { %10252 = vmatmul.mubr.msk.f32.gmra.mrb[20].mxu0 %vm1723_vm4, %v12394_v27  ;;  %9812 = vmatprep.mubr.msk.f32.mxu1 %vm1723_vm4, %v12414_v11 }
 0x1c6   : > { %10254 = vmatprep.mubr.msk.f32.mxu0 %vm1723_vm4, %v12414_v11 }
 0x1c8   : > { %9813 = vmatmul.mubr.msk.f32.gmra.mrb[58].mxu1 %vm1723_vm4, %v12422_v43 }
 0x1c9   : > { %10255 = vmatmul.mubr.msk.f32.gmra.mrb[22].mxu0 %vm1723_vm4, %v12422_v43  ;;  %9815 = vmatprep.mubr.msk.f32.mxu1 %vm1723_vm4, %v12445_v14 }
 0x1ca   : > { %10257 = vmatprep.mubr.msk.f32.mxu0 %vm1723_vm4, %v12445_v14 }
 0x1cc   : > { %9816 = vmatmul.mubr.msk.f32.gmra.mrb[60].mxu1 %vm1723_vm4, %v12449_v16 }
 0x1cd   : > { %10258 = vmatmul.mubr.msk.f32.gmra.mrb[24].mxu0 %vm1723_vm4, %v12449_v16  ;;  %9818 = vmatprep.mubr.msk.f32.mxu1 %vm1723_vm4, %v16309_v8 }
 0x1ce   : > { %10260 = vmatprep.mubr.msk.f32.mxu0 %vm1723_vm4, %v16309_v8 }
 0x1d0   : > { %9819 = vmatmul.mubr.msk.f32.gmra.mrb[62].mxu1 %vm1723_vm4, %v12628_v57 }
 0x1d1   : > { %10261 = vmatmul.mubr.msk.f32.gmra.mrb[26].mxu0 %vm1723_vm4, %v12628_v57  ;;  %9821 = vmatprep.mubr.msk.f32.mxu1 %vm1723_vm4, %v12633_v26 }
 0x1d2   : > { %10263 = vmatprep.mubr.msk.f32.mxu0 %vm1723_vm4, %v12633_v26 }
 0x1d4   : > { %9822 = vmatmul.mubr.msk.f32.gmra.mrb[64].mxu1 %vm1723_vm4, %v12653_v35 }
 0x1d5   : > { %10264 = vmatmul.mubr.msk.f32.gmra.mrb[28].mxu0 %vm1723_vm4, %v12653_v35  ;;  %9824 = vmatprep.mubr.msk.f32.mxu1 %vm1723_vm4, %v12660_v18 }
 0x1d6   : > { %10266 = vmatprep.mubr.msk.f32.mxu0 %vm1723_vm4, %v12660_v18 }
 0x1d8   : > { %9825 = vmatmul.mubr.msk.f32.gmra.mrb[66].mxu1 %vm1723_vm4, %v12667_v33 }
 0x1d9   : > { %10267 = vmatmul.mubr.msk.f32.gmra.mrb[30].mxu0 %vm1723_vm4, %v12667_v33  ;;  %9827 = vmatprep.mubr.msk.f32.mxu1 %vm1723_vm4, %v12683_v6 }
 0x1da   : > { %10269 = vmatprep.mubr.msk.f32.mxu0 %vm1723_vm4, %v12683_v6 }
 0x1dc   : > { %9828 = vmatmul.mubr.msk.f32.gmra.mrb[68].mxu1 %vm1723_vm4, %v12690_v54 }
 0x1dd   : > { %10270 = vmatmul.mubr.msk.f32.gmra.mrb[32].mxu0 %vm1723_vm4, %v12690_v54  ;;  %9830 = vmatprep.mubr.msk.f32.mxu1 %vm1723_vm4, %v12715_v23 }
 0x1de   : > { %10272 = vmatprep.mubr.msk.f32.mxu0 %vm1723_vm4, %v12715_v23 }
 0x1e0   : > { %9831 = vmatmul.mubr.msk.f32.gmra.mrb[70].mxu1 %vm1723_vm4, %v12730_v51 }
 0x1e1   : > { %10273 = vmatmul.mubr.msk.f32.gmra.mrb[34].mxu0 %vm1723_vm4, %v12730_v51  ;;  %9903 = vmatprep.mubr.msk.f32.mxu1 %vm1723_vm4, %v16262_v56  ;;  %v345_v56 = vld [vmem:[%s11384_s30 + $0x3b8] sm:$0xff] }
 0x1e2   : > { %10275 = vmatprep.mubr.msk.f32.mxu0 %vm1723_vm4, %v12736_v5 }
 0x1e4   : > { %9904 = vmatmul.mubr.msk.f32.vlgmr.msra.gmra.mrb[36].mxu1 %vm1723_vm4, %v16263_v46  ;;  %v16310_v46 = vld [vmem:[#allocation8_spill] sm:$0xff] }
 0x1e5   : > { %10276 = vmatmul.mubr.msk.f32.gmra.mrb[36].mxu0 %vm1723_vm4, %v12750_v40  ;;  %9906 = vmatprep.mubr.msk.f32.mxu1 %vm1723_vm4, %v16264_v10 }
 0x1e6   : > { %10278 = vmatprep.mubr.msk.f32.mxu0 %vm1723_vm4, %v12754_v32 }
 0x1e8   : > { %9907 = vmatmul.mubr.msk.f32.gmra.mrb[38].mxu1 %vm1723_vm4, %v16265_v53  ;;  %v478_v53 = vmul.f32 %v16277_v38, %v346_v62 }
 0x1e9   : > { %10279 = vmatmul.mubr.msk.f32.gmra.mrb[38].mxu0 %vm1723_vm4, %v12772_v25  ;;  %9909 = vmatprep.mubr.msk.f32.mxu1 %vm1723_vm4, %v16266_v60  ;;  %v16316_v60 = vld [vmem:[#allocation14_spill] sm:$0xff] }
 0x1ea   : > { %10281 = vmatprep.mubr.msk.f32.mxu0 %vm1723_vm4, %v12776_v19 }
 0x1ec   : > { %9910 = vmatmul.mubr.msk.f32.gmra.mrb[40].mxu1 %vm1723_vm4, %v16267_v15  ;;  %v347_v15 = vld [vmem:[%s11384_s30 + $0x3c8] sm:$0xff] }
 0x1ed   : > { %10282 = vmatmul.mubr.msk.f32.gmra.mrb[40].mxu0 %vm1723_vm4, %v12795_v55  ;;  %9912 = vmatprep.mubr.msk.f32.mxu1 %vm1723_vm4, %v16268_v21 }
 0x1ee   : > { %10284 = vmatprep.mubr.msk.f32.mxu0 %vm1723_vm4, %v12802_v42 }
 0x1f0   : > { %9913 = vmatmul.mubr.msk.f32.gmra.mrb[42].mxu1 %vm1723_vm4, %v16269_v59 }
 0x1f1   : > { %10285 = vmatmul.mubr.msk.f32.gmra.mrb[42].mxu0 %vm1723_vm4, %v12829_v20  ;;  %9915 = vmatprep.mubr.msk.f32.mxu1 %vm1723_vm4, %v16270_v12  ;;  %v16311_v12 = vld [vmem:[#allocation9_spill] sm:$0xff] }
 0x1f2   : > { %10287 = vmatprep.mubr.msk.f32.mxu0 %vm1723_vm4, %v16275_v44 }
 0x1f4   : > { %9916 = vmatmul.mubr.msk.f32.gmra.mrb[44].mxu1 %vm1723_vm4, %v16271_v17  ;;  %v16312_v17 = vld [vmem:[#allocation10_spill] sm:$0xff] }
 0x1f5   : > { %10288 = vmatmul.mubr.msk.f32.gmra.mrb[44].mxu0 %vm1723_vm4, %v16276_v4  ;;  %9918 = vmatprep.mubr.msk.f32.mxu1 %vm1723_vm4, %v12376_v52  ;;  %v16313_v52 = vld [vmem:[#allocation11_spill] sm:$0xff] }
 0x1f6   : > { %10290 = vmatprep.mubr.msk.f32.mxu0 %vm1723_vm4, %v16278_v1  ;;  %v479_v1 = vmul.f32 %v16277_v38, %v347_v15 }
 0x1f8   : > { %9919 = vmatmul.mubr.msk.f32.gmra.mrb[46].mxu1 %vm1723_vm4, %v12386_v28  ;;  %v16314_v28 = vld [vmem:[#allocation12_spill] sm:$0xff] }
 0x1f9   : > { %10291 = vmatmul.mubr.msk.f32.gmra.mrb[46].mxu0 %vm1723_vm4, %v16310_v46  ;;  %9921 = vmatprep.mubr.msk.f32.mxu1 %vm1723_vm4, %v12394_v27  ;;  %v16315_v27 = vld [vmem:[#allocation13_spill] sm:$0xff]  ;;  %v613_v46 = vadd.f32 %v12871_v45, %v483_v49 }
 0x1fa   : > { %10293 = vmatprep.mubr.msk.f32.mxu0 %vm1723_vm4, %v16311_v12 }
 0x1fb   : > { %vm739_vm0 = vcmp.ge.f32.partialorder %v613_v46, 0.0 }
 0x1fc   : > { %9922 = vmatmul.mubr.msk.f32.gmra.mrb[48].mxu1 %vm1723_vm4, %v12414_v11  ;;  %v343_v11 = vld [vmem:[%s11384_s30 + $0x3a8] sm:$0xff] }
 0x1fd   : > { %10294 = vmatmul.mubr.msk.f32.gmra.mrb[48].mxu0 %vm1723_vm4, %v16312_v17  ;;  %9924 = vmatprep.mubr.msk.f32.mxu1 %vm1723_vm4, %v12422_v43  ;;  %v344_v43 = vld [vmem:[%s11384_s30 + $0x3b0] sm:$0xff] }
 0x1fe   : > { %10296 = vmatprep.mubr.msk.f32.mxu0 %vm1723_vm4, %v16313_v52 }
 0x200   : > { %9925 = vmatmul.mubr.msk.f32.gmra.mrb[50].mxu1 %vm1723_vm4, %v12445_v14  ;;  %v475_v14 = vmul.f32 %v16277_v38, %v343_v11 }
 0x201   : > { %10297 = vmatmul.mubr.msk.f32.gmra.mrb[50].mxu0 %vm1723_vm4, %v16314_v28  ;;  %9927 = vmatprep.mubr.msk.f32.mxu1 %vm1723_vm4, %v12449_v16  ;;  %v476_v16 = vmul.f32 %v16277_v38, %v344_v43  ;;  %v865_v28 = vmul.f32 0.01, %v613_v46 }
 0x202   : > { %10299 = vmatprep.mubr.msk.f32.mxu0 %vm1723_vm4, %v16315_v27  ;;  %v605_v10 = vadd.f32 %v12871_v45, %v475_v14 }
 0x203   : > { %v606_v21 = vadd.f32 %v12871_v45, %v476_v16  ;;  %v991_v11 = vsel %vm739_vm0, %v613_v46, %v865_v28 }
 0x204   : > { %9928 = vmatmul.mubr.msk.f32.gmra.mrb[52].mxu1 %vm1723_vm4, %v16309_v8  ;;  %v857_v59 = vmul.f32 0.01, %v605_v10  ;;  %vm731_vm15 = vcmp.ge.f32.partialorder %v605_v10, 0.0 }
 0x205   : > { %10300 = vmatmul.mubr.msk.f32.gmra.mrb[52].mxu0 %vm1723_vm4, %v16316_v60  ;;  %9930 = vmatprep.mubr.msk.f32.mxu1 %vm1723_vm4, %v12628_v57  ;;  %v16317_v57 = vld [vmem:[#allocation2_spill] sm:$0xff]  ;;  %vm732_vm14 = vcmp.ge.f32.partialorder %v606_v21, 0.0 }
 0x206   : > { %10302 = vmatprep.mubr.msk.f32.mxu0 %vm1723_vm4, %v13253_v37  ;;  %v1005_v63 = vadd.s32 13, %v16317_v57 }
 0x208   : > { %9931 = vmatmul.mubr.msk.f32.gmra.mrb[54].mxu1 %vm1723_vm4, %v12633_v26  ;;  %v477_v26 = vmul.f32 %v16277_v38, %v345_v56  ;;  %vm1029_vm1 = vcmp.ge.s32.totalorder %v1005_v63, 3  ;;  %vm1043_vm5 = vcmp.lt.s32.totalorder %v1005_v63, 67 }
 0x209   : > { %10303 = vmatmul.mubr.msk.f32.gmra.mrb[54].mxu0 %vm1723_vm4, %v13257_v31  ;;  %9933 = vmatprep.mubr.msk.f32.mxu1 %vm1723_vm4, %v12653_v35  ;;  %v348_v35 = vld [vmem:[%s11384_s30 + $0x3d0] sm:$0xff]  ;;  %vm13582_vm9 = vmand %vm1029_vm1, %vm1043_vm5  ;;  %vm6340_vm1 = vcmask 1044480   ;;  %vm6733_vm5 = vcmask 1043456  }
 0x20a   : > { %10305 = vmatprep.mubr.msk.f32.mxu0 %vm1723_vm4, %v13272_v34  ;;  %v607_v4 = vadd.f32 %v12871_v45, %v477_v26  ;;  %v480_v31 = vmul.f32 %v16277_v38, %v348_v35  ;;  %v349_v34 = vld [vmem:[%s11384_s30 + $0x3d8] sm:$0xff]  ;;  %vm13600_vm12 = vmand %vm13582_vm9, %vm1058_vm6 }
 0x20b   : > { %v481_v24 = vmul.f32 %v16277_v38, %v349_v34  ;;  %vm1327_vm3 = vmand %vm13582_vm9, %vm1201_vm2  ;;  %vm5947_vm2 = vcmask 1045504  }
 0x20c   : > { %9934 = vmatmul.mubr.msk.f32.gmra.mrb[56].mxu1 %vm1723_vm4, %v12660_v18  ;;  %v858_v18 = vmul.f32 0.01, %v606_v21  ;;  %v859_v39 = vmul.f32 0.01, %v607_v4  ;;  %vm733_vm10 = vcmp.ge.f32.partialorder %v607_v4, 0.0 }
 0x20d   : > { %10306 = vmatmul.mubr.msk.f32.gmra.mrb[56].mxu0 %vm1723_vm4, %v13276_v48  ;;  %9936 = vmatprep.mubr.msk.f32.mxu1 %vm1723_vm4, %v12667_v33  ;;  %v608_v33 = vadd.f32 %v12871_v45, %v478_v53  ;;  %v350_v48 = vld [vmem:[%s11384_s30 + $0x3e0] sm:$0xff]  ;;  %v611_v30 = vadd.f32 %v12871_v45, %v481_v24  ;;  %s11232_s30 = smov 125  }
 0x20e   : > { %10308 = vmatprep.mubr.msk.f32.mxu0 %vm1723_vm4, %v13289_v36  ;;  %v984_v22 = vsel %vm732_vm14, %v606_v21, %v858_v18  ;;  %v482_v13 = vmul.f32 %v16277_v38, %v350_v48  ;;  %v985_v29 = vsel %vm733_vm10, %v607_v4, %v859_v39  ;;  %vm8175_vm14 = vcmask 23552  }
 0x20f   : > { %vm734_vm6 = vcmp.ge.f32.partialorder %v608_v33, 0.0  ;;  %v1698_v58 = vsel %vm13582_vm9, %v984_v22, 0.0  ;;  %v1699_v61 = vsel %vm13582_vm9, %v985_v29, 0.0  ;;  %v863_v8 = vmul.f32 0.01, %v611_v30 }
 0x210   : > { %9937 = vmatmul.mubr.msk.f32.gmra.mrb[58].mxu1 %vm1723_vm4, %v12683_v6  ;;  %v983_v6 = vsel %vm731_vm15, %v605_v10, %v857_v59  ;;  %vm737_vm13 = vcmp.ge.f32.partialorder %v611_v30, 0.0  ;;  %vm7126_vm15 = vcmask 1042432  }
 0x211   : > { %10309 = vmatmul.mubr.msk.f32.gmra.mrb[58].mxu0 %vm1723_vm4, %v13293_v3  ;;  %9939 = vmatprep.mubr.msk.f32.mxu1 %vm1723_vm4, %v12690_v54  ;;  %v609_v3 = vadd.f32 %v12871_v45, %v479_v1  ;;  %v860_v54 = vmul.f32 0.01, %v608_v33  ;;  %v989_v52 = vsel %vm737_vm13, %v611_v30, %v863_v8 }
 0x212   : > { %10311 = vmatprep.mubr.msk.f32.mxu0 %vm1723_vm4, %v13305_v47  ;;  %v610_v47 = vadd.f32 %v12871_v45, %v480_v31 }
 0x213   : > { %v861_v9 = vmul.f32 0.01, %v609_v3  ;;  %vm735_vm7 = vcmp.ge.f32.partialorder %v609_v3, 0.0 }
 0x214   : > { %9940 = vmatmul.mubr.msk.f32.gmra.mrb[60].mxu1 %vm1723_vm4, %v12715_v23  ;;  %v1697_v23 = vsel %vm13600_vm12, %v983_v6, 0.0  ;;  %vm736_vm11 = vcmp.ge.f32.partialorder %v610_v47, 0.0 }
 0x215   : > { %10312 = vmatmul.mubr.msk.f32.gmra.mrb[60].mxu0 %vm1723_vm4, %v13309_v41  ;;  %9942 = vmatprep.mubr.msk.f32.mxu1 %vm1723_vm4, %v12730_v51  ;;  %v986_v51 = vsel %vm734_vm6, %v608_v33, %v860_v54  ;;  %v862_v41 = vmul.f32 0.01, %v610_v47 }
 0x216   : > { %10314 = vmatprep.mubr.msk.f32.mxu0 %vm1723_vm4, %v13323_v0  ;;  %v612_v0 = vadd.f32 %v12871_v45, %v482_v13  ;;  %v1700_v38 = vsel %vm13582_vm9, %v986_v51, 0.0 }
 0x217   : > { %v988_v12 = vsel %vm736_vm11, %v610_v47, %v862_v41 }
 0x218   : > { %9943 = vmatmul.mubr.msk.f32.gmra.mrb[62].mxu1 %vm1723_vm4, %v12736_v5  ;;  %v987_v5 = vsel %vm735_vm7, %v609_v3, %v861_v9  ;;  %v864_v17 = vmul.f32 0.01, %v612_v0  ;;  %vm738_vm8 = vcmp.ge.f32.partialorder %v612_v0, 0.0  ;;  %v1702_v45 = vsel %vm13582_vm9, %v988_v12, 0.0 }
 0x219   : > { %10315 = vmatmul.mubr.msk.f32.gmra.mrb[62].mxu0 %vm1723_vm4, %v1697_v23  ;;  %9945 = vmatprep.mubr.msk.f32.mxu1 %vm1723_vm4, %v12750_v40  ;;  %v1701_v40 = vsel %vm13582_vm9, %v987_v5, 0.0 }
 0x21a   : > { %10317 = vmatprep.mubr.msk.f32.mxu0 %vm1723_vm4, %v1698_v58 }
 0x21c   : > { %9946 = vmatmul.mubr.msk.f32.gmra.mrb[64].mxu1 %vm1723_vm4, %v12754_v32  ;;  %v990_v32 = vsel %vm738_vm8, %v612_v0, %v864_v17 }
 0x21d   : > { %10318 = vmatmul.mubr.msk.f32.gmra.mrb[64].mxu0 %vm1723_vm4, %v1699_v61  ;;  %9948 = vmatprep.mubr.msk.f32.mxu1 %vm1723_vm4, %v12772_v25  ;;  %v1703_v25 = vsel %vm13582_vm9, %v989_v52, 0.0  ;;  %v1704_v27 = vsel %vm13582_vm9, %v990_v32, 0.0  ;;  %vm7519_vm9 = vcmask 1041408  }
 0x21e   : > { %10320 = vmatprep.mubr.msk.f32.mxu0 %vm1723_vm4, %v1700_v38 }
 0x220   : > { %9949 = vmatmul.mubr.msk.f32.gmra.mrb[66].mxu1 %vm1723_vm4, %v12776_v19  ;;  %v1705_v19 = vsel %vm1327_vm3, %v991_v11, 0.0 }
 0x221   : > { %10321 = vmatmul.mubr.msk.f32.gmra.mrb[66].mxu0 %vm1723_vm4, %v1701_v40  ;;  %9951 = vmatprep.mubr.msk.f32.mxu1 %vm1723_vm4, %v12795_v55 }
 0x222   : > { %10323 = vmatprep.mubr.msk.f32.mxu0 %vm1723_vm4, %v1702_v45 }
 0x224   : > { %9952 = vmatmul.mubr.msk.f32.gmra.mrb[68].mxu1 %vm1723_vm4, %v12802_v42 }
 0x225   : > { %10324 = vmatmul.mubr.msk.f32.gmra.mrb[68].mxu0 %vm1723_vm4, %v1703_v25  ;;  %9954 = vmatprep.mubr.msk.f32.mxu1 %vm1723_vm4, %v12829_v20 }
 0x226   : > { %10326 = vmatprep.mubr.msk.f32.mxu0 %vm1723_vm4, %v1704_v27 }
 0x227   : > { %v9727_v55 = vpop.f32.mrb[0].mxu1 }
 0x228   : > { %v2919_v43 = vpop.f32.mrb[1].mxu1  ;;  %9955 = vmatmul.mubr.msk.f32.gmra.mrb[70].mxu1 %vm1723_vm4, %v16275_v44 }
 0x229   : > { %10327 = vmatmul.mubr.msk.f32.gmra.mrb[70].mxu0 %vm1723_vm4, %v1705_v19  ;;  %vm5554_vm4 = vcmask 1046528  }
 0x22b   : > { %v9730_v7 = vpop.f32.mrb[2].mxu1 }
 0x22c   : > { %v2929_v60 = vpop.f32.mrb[3].mxu1 }
 0x22f   : > { %v9733_v14 = vpop.f32.mrb[4].mxu1 }
 0x230   : > { %v2939_v16 = vpop.f32.mrb[5].mxu1 }
 0x233   : > { %v13668_v42 = vpop.f32.mrb[6].mxu1 }
 0x234   : > { %v13670_v56 = vpop.f32.mrb[7].mxu1 }
 0x237   : > { %v13672_v57 = vpop.f32.mrb[8].mxu1 }
 0x238   : > { %v13674_v20 = vpop.f32.mrb[9].mxu1 }
 0x23b   : > { %v13676_v63 = vpop.f32.mrb[10].mxu1 }
 0x23c   : > { %v13678_v62 = vpop.f32.mrb[11].mxu1 }
 0x23f   : > { %v13680_v10 = vpop.f32.mrb[12].mxu1 }
 0x240   : > { %v13682_v44 = vpop.f32.mrb[13].mxu1 }
 0x243   : > { %v13684_v21 = vpop.f32.mrb[14].mxu1 }
 0x244   : > { %v13686_v26 = vpop.f32.mrb[15].mxu1 }
 0x247   : > { %v13688_v53 = vpop.f32.mrb[16].mxu1 }
 0x248   : > { %v13690_v15 = vpop.f32.mrb[17].mxu1 }
 0x24b   : > { %v13692_v35 = vpop.f32.mrb[18].mxu1 }
 0x24c   : > { %v13694_v59 = vpop.f32.mrb[19].mxu1 }
 0x24f   : > { %v13696_v18 = vpop.f32.mrb[20].mxu1 }
 0x250   : > { %v13698_v4 = vpop.f32.mrb[21].mxu1 }
 0x253   : > { %v13700_v1 = vpop.f32.mrb[22].mxu1 }
 0x254   : > { %v13702_v37 = vpop.f32.mrb[23].mxu1 }
 0x257   : > { %v13704_v33 = vpop.f32.mrb[24].mxu1 }
 0x258   : > { %v13706_v31 = vpop.f32.mrb[25].mxu1 }
 0x25b   : > { %v13708_v34 = vpop.f32.mrb[26].mxu1 }
 0x25c   : > { %v13710_v48 = vpop.f32.mrb[27].mxu1 }
 0x25f   : > { %v13712_v6 = vpop.f32.mrb[28].mxu1 }
 0x260   : > { %v13714_v36 = vpop.f32.mrb[29].mxu1 }
 0x263   : > { %v13716_v2 = vpop.f32.mrb[30].mxu1 }
 0x264   : > { %v13718_v22 = vpop.f32.mrb[31].mxu1 }
 0x267   : > { %v13720_v39 = vpop.f32.mrb[32].mxu1 }
 0x268   : > { %v13722_v3 = vpop.f32.mrb[33].mxu1 }
 0x26b   : > { %v13724_v24 = vpop.f32.mrb[34].mxu1 }
 0x26c   : > { %v13726_v54 = vpop.f32.mrb[35].mxu1 }
 0x270   : > { %v10223_v47 = vpop.f32.mrb[0].mxu0 }
 0x271   : > { %v13728_v13 = vadd.f32 %v10223_v47, %v9727_v55  ;;  %v5051_v50 = vpop.f32.mrb[1].mxu0 }
 0x272   : > { %v13730_v23 = vadd.f32 %v5051_v50, %v2919_v43 }
 0x273   : > { %v5556_v58 = vrot.slane %v13728_v13, 1  ;;  %v5949_v61 = vrot.slane %v13728_v13, 2  ;;  %v6342_v40 = vrot.slane %v13728_v13, 3  ;;  %v6735_v55 = vrot.slane %v13728_v13, 4 }
 0x274   : > { %v10226_v29 = vpop.f32.mrb[2].mxu0  ;;  %v5555_v9 = vrot.slane %v13730_v23, 1  ;;  %v5948_v0 = vrot.slane %v13730_v23, 2  ;;  %v6341_v17 = vrot.slane %v13730_v23, 3  ;;  %v6734_v19 = vrot.slane %v13730_v23, 4 }
 0x275   : > { %v13734_v30 = vadd.f32 %v10226_v29, %v9730_v7  ;;  %v5061_v49 = vpop.f32.mrb[3].mxu0  ;;  %v7127_v47 = vrot.slane %v13730_v23, 5  ;;  %v7128_v50 = vrot.slane %v13728_v13, 5 }
 0x276   : > { %v13736_v51 = vadd.f32 %v5061_v49, %v2929_v60  ;;  %v5557_v41 = vsel %vm5554_vm4, %v5555_v9, %v5556_v58  ;;  %v5950_v52 = vsel %vm5947_vm2, %v5948_v0, %v5949_v61  ;;  %v6343_v7 = vsel %vm6340_vm1, %v6341_v17, %v6342_v40 }
 0x277   : > { %5691 = vrot.lane.b32.xlu0 %v5557_v41, %s11232_s30  ;;  %v5560_v38 = vrot.slane %v13734_v30, 1  ;;  %v6736_v9 = vsel %vm6733_vm5, %v6734_v19, %v6735_v55 }
 0x278   : > { %v10229_v5 = vpop.f32.mrb[4].mxu0  ;;  %v5558_v8 = vrot.slane %v13736_v51, 1  ;;  %v5951_v32 = vrot.slane %v13736_v51, 2  ;;  %v6737_v41 = vrot.slane %v13736_v51, 4 }
 0x279   : > { %v13746_v46 = vadd.f32 %v10229_v5, %v9733_v14  ;;  %v5071_v12 = vpop.f32.mrb[5].mxu0  ;;  %v6344_v14 = vrot.slane %v13736_v51, 3  ;;  %v7520_v5 = vrot.slane %v13730_v23, 6 }
 0x27a   : > { %v13750_v45 = vadd.f32 %v5071_v12, %v2939_v16  ;;  %v5561_v28 = vsel %vm5554_vm4, %v5558_v8, %v5560_v38  ;;  %v5952_v60 = vsel %vm5947_vm2, %v5949_v61, %v5951_v32  ;;  %v6738_v17 = vsel %vm6733_vm5, %v6735_v55, %v6737_v41 }
 0x27b   : > { %6084 = vrot.lane.b32.xlu0 %v5950_v52, %s11233_s24  ;;  %5695 = vrot.lane.b32.xlu1 %v5561_v28, %s11232_s30  ;;  %v6345_v49 = vsel %vm6340_vm1, %v6342_v40, %v6344_v14  ;;  %v7521_v40 = vrot.slane %v13728_v13, 6  ;;  %v7130_v52 = vrot.slane %v13736_v51, 5 }
 0x27c   : > { %v10232_v25 = vpop.f32.mrb[6].mxu0 }
 0x27d   : > { %v13762_v27 = vadd.f32 %v10232_v25, %v13668_v42  ;;  %v5081_v11 = vpop.f32.mrb[7].mxu0  ;;  %v7522_v19 = vsel %vm7519_vm9, %v7520_v5, %v7521_v40  ;;  %v7131_v55 = vsel %vm7126_vm15, %v7128_v50, %v7130_v52  ;;  %v6739_v5 = vrot.slane %v13734_v30, 4 }
 0x27e   : > { %v13767_v43 = vadd.f32 %v5081_v11, %v13670_v56 }
 0x27f   : > { %6477 = vrot.lane.b32.xlu0 %v6343_v7, %s11234_s25  ;;  %6086 = vrot.lane.b32.xlu1 %v5952_v60, %s11233_s24 }
 0x280   : > { %v10235_v16 = vpop.f32.mrb[8].mxu0 }
 0x281   : > { %v13777_v42 = vadd.f32 %v10235_v16, %v13672_v57  ;;  %v5091_v56 = vpop.f32.mrb[9].mxu0 }
 0x282   : > { %v13782_v29 = vadd.f32 %v5091_v56, %v13674_v20  ;;  %v7129_v20 = vsel %vm7126_vm15, %v7127_v47, %v7128_v50  ;;  %v5559_v56 = vsel %vm5554_vm4, %v5556_v58, %v5558_v8  ;;  %v5953_v47 = vrot.slane %v13734_v30, 2 }
 0x283   : > { %6870 = vrot.lane.b32.xlu0 %v6736_v9, %s11235_s26  ;;  %6479 = vrot.lane.b32.xlu1 %v6345_v49, %s11234_s25  ;;  %v5562_v50 = vrot.slane %v13750_v45, 1  ;;  %v6346_v49 = vrot.slane %v13734_v30, 3 }
 0x284   : > { %v10238_v57 = vpop.f32.mrb[10].mxu0  ;;  %v5954_v58 = vsel %vm5947_vm2, %v5951_v32, %v5953_v47 }
 0x285   : > { %v13792_v0 = vadd.f32 %v10238_v57, %v13676_v63  ;;  %v5101_v61 = vpop.f32.mrb[11].mxu0  ;;  %v5563_v8 = vsel %vm5554_vm4, %v5560_v38, %v5562_v50  ;;  %v6347_v38 = vsel %vm6340_vm1, %v6344_v14, %v6346_v49 }
 0x286   : > { %v13797_v12 = vadd.f32 %v5101_v61, %v13678_v62  ;;  %v7523_v62 = vrot.slane %v13736_v51, 6  ;;  %v5955_v61 = vrot.slane %v13750_v45, 2 }
 0x287   : > { %7263 = vrot.lane.b32.xlu0 %v7129_v20, %s11236_s27  ;;  %6872 = vrot.lane.b32.xlu1 %v6738_v17, %s11235_s26 }
 0x288   : > { %v10241_v63 = vpop.f32.mrb[12].mxu0  ;;  %v7524_v16 = vsel %vm7519_vm9, %v7521_v40, %v7523_v62  ;;  %v5956_v32 = vsel %vm5947_vm2, %v5953_v47, %v5955_v61  ;;  %v6348_v40 = vrot.slane %v13750_v45, 3 }
 0x289   : > { %v13805_v28 = vadd.f32 %v10241_v63, %v13680_v10  ;;  %v5111_v25 = vpop.f32.mrb[13].mxu0 }
 0x28a   : > { %v13809_v11 = vadd.f32 %v5111_v25, %v13682_v44  ;;  %v6349_v14 = vsel %vm6340_vm1, %v6346_v49, %v6348_v40 }
 0x28b   : > { %7656 = vrot.lane.b32.xlu0 %v7522_v19, %s11237_s5  ;;  %7265 = vrot.lane.b32.xlu1 %v7131_v55, %s11236_s27  ;;  %v7132_v55 = vrot.slane %v13734_v30, 5 }
 0x28c   : > { %v10244_v7 = vpop.f32.mrb[14].mxu0 }
 0x28d   : > { %v13816_v60 = vadd.f32 %v10244_v7, %v13684_v21  ;;  %v5121_v10 = vpop.f32.mrb[15].mxu0  ;;  %v6741_v7 = vrot.slane %v13750_v45, 4 }
 0x28e   : > { %v13822_v44 = vadd.f32 %v5121_v10, %v13686_v26 }
 0x28f   : > { %7658 = vrot.lane.b32.xlu1 %v7524_v16, %s11237_s5  ;;  %5693 = vrot.lane.b32.xlu0 %v5559_v56, %s11232_s30  ;;  %v7133_v56 = vsel %vm7126_vm15, %v7130_v52, %v7132_v55  ;;  %v6742_v47 = vsel %vm6733_vm5, %v6739_v5, %v6741_v7 }
 0x290   : > { %v10247_v21 = vpop.f32.mrb[16].mxu0 }
 0x291   : > { %v13834_v9 = vadd.f32 %v10247_v21, %v13688_v53  ;;  %v5131_v26 = vpop.f32.mrb[17].mxu0  ;;  %v7134_v21 = vrot.slane %v13750_v45, 5 }
 0x292   : > { %v13838_v57 = vadd.f32 %v5131_v26, %v13690_v15 }
 0x293   : > { %6088 = vrot.lane.b32.xlu0 %v5954_v58, %s11233_s24  ;;  %5697 = vrot.lane.b32.xlu1 %v5563_v8, %s11232_s30  ;;  %v5564_v58 = vrot.slane %v13746_v46, 1  ;;  %v7135_v8 = vsel %vm7126_vm15, %v7132_v55, %v7134_v21  ;;  %v6350_v55 = vrot.slane %v13746_v46, 3 }
 0x294   : > { %v10250_v53 = vpop.f32.mrb[18].mxu0 }
 0x295   : > { %v13850_v20 = vadd.f32 %v10250_v53, %v13692_v35  ;;  %v5141_v15 = vpop.f32.mrb[19].mxu0  ;;  %v7527_v53 = vrot.slane %v13750_v45, 6 }
 0x296   : > { %v13854_v17 = vadd.f32 %v5141_v15, %v13694_v59  ;;  %v6740_v59 = vsel %vm6733_vm5, %v6737_v41, %v6739_v5  ;;  %v7525_v41 = vrot.slane %v13734_v30, 6 }
 0x297   : > { %6481 = vrot.lane.b32.xlu0 %v6347_v38, %s11234_s25  ;;  %6090 = vrot.lane.b32.xlu1 %v5956_v32, %s11233_s24 }
 0x298   : > { %v10253_v35 = vpop.f32.mrb[20].mxu0  ;;  %v7526_v52 = vsel %vm7519_vm9, %v7523_v62, %v7525_v41  ;;  %v5565_v62 = vsel %vm5554_vm4, %v5562_v50, %v5564_v58  ;;  %v7528_v32 = vsel %vm7519_vm9, %v7525_v41, %v7527_v53 }
 0x299   : > { %v13864_v63 = vadd.f32 %v10253_v35, %v13696_v18  ;;  %v5151_v25 = vpop.f32.mrb[21].mxu0  ;;  %v5566_v35 = vrot.slane %v13767_v43, 1 }
 0x29a   : > { %v13868_v19 = vadd.f32 %v5151_v25, %v13698_v4 }
 0x29b   : > { %6874 = vrot.lane.b32.xlu0 %v6740_v59, %s11235_s26  ;;  %6483 = vrot.lane.b32.xlu1 %v6349_v14, %s11234_s25  ;;  %v5567_v50 = vsel %vm5554_vm4, %v5564_v58, %v5566_v35 }
 0x29c   : > { %v10256_v10 = vpop.f32.mrb[22].mxu0 }
 0x29d   : > { %v13876_v18 = vadd.f32 %v10256_v10, %v13700_v1  ;;  %v5161_v16 = vpop.f32.mrb[23].mxu0  ;;  %v5959_v10 = vrot.slane %v13767_v43, 2 }
 0x29e   : > { %v13880_v4 = vadd.f32 %v5161_v16, %v13702_v37 }
 0x29f   : > { %7267 = vrot.lane.b32.xlu0 %v7133_v56, %s11236_s27  ;;  %6876 = vrot.lane.b32.xlu1 %v6742_v47, %s11235_s26  ;;  %v6351_v56 = vsel %vm6340_vm1, %v6348_v40, %v6350_v55 }
 0x2a0   : > { %v10259_v26 = vpop.f32.mrb[24].mxu0 }
 0x2a1   : > { %v13888_v1 = vadd.f32 %v10259_v26, %v13704_v33  ;;  %v5171_v49 = vpop.f32.mrb[25].mxu0  ;;  %v6352_v26 = vrot.slane %v13767_v43, 3 }
 0x2a2   : > { %v13892_v37 = vadd.f32 %v5171_v49, %v13706_v31  ;;  %v5957_v31 = vrot.slane %v13746_v46, 2 }
 0x2a3   : > { %7660 = vrot.lane.b32.xlu0 %v7526_v52, %s11237_s5  ;;  %7269 = vrot.lane.b32.xlu1 %v7135_v8, %s11236_s27  ;;  %v6353_v8 = vsel %vm6340_vm1, %v6350_v55, %v6352_v26 }
 0x2a4   : > { %v10262_v33 = vpop.f32.mrb[26].mxu0  ;;  %v5958_v14 = vsel %vm5947_vm2, %v5955_v61, %v5957_v31  ;;  %v5960_v47 = vsel %vm5947_vm2, %v5957_v31, %v5959_v10 }
 0x2a5   : > { %v13902_v15 = vadd.f32 %v10262_v33, %v13708_v34  ;;  %v5181_v5 = vpop.f32.mrb[27].mxu0  ;;  %v6745_v33 = vrot.slane %v13767_v43, 4 }
 0x2a6   : > { %v13906_v38 = vadd.f32 %v5181_v5, %v13710_v48 }
 0x2a7   : > { %5699 = vrot.lane.b32.xlu0 %v5565_v62, %s11232_s30  ;;  %7662 = vrot.lane.b32.xlu1 %v7528_v32, %s11237_s5  ;;  %v7529_v32 = vrot.slane %v13746_v46, 6 }
 0x2a8   : > { %v10265_v25 = vpop.f32.mrb[28].mxu0 }
 0x2a9   : > { %v13914_v34 = vadd.f32 %v10265_v25, %v13712_v6  ;;  %v5191_v59 = vpop.f32.mrb[29].mxu0  ;;  %v7138_v25 = vrot.slane %v13767_v43, 5 }
 0x2aa   : > { %v13918_v48 = vadd.f32 %v5191_v59, %v13714_v36  ;;  %v6743_v36 = vrot.slane %v13746_v46, 4 }
 0x2ab   : > { %6092 = vrot.lane.b32.xlu0 %v5958_v14, %s11233_s24  ;;  %5701 = vrot.lane.b32.xlu1 %v5567_v50, %s11232_s30 }
 0x2ac   : > { %v10268_v6 = vpop.f32.mrb[30].mxu0  ;;  %v6744_v40 = vsel %vm6733_vm5, %v6741_v7, %v6743_v36  ;;  %v6746_v7 = vsel %vm6733_vm5, %v6743_v36, %v6745_v33  ;;  %v7531_v36 = vrot.slane %v13767_v43, 6 }
 0x2ad   : > { %v13928_v16 = vadd.f32 %v10268_v6, %v13716_v2  ;;  %v5201_v61 = vpop.f32.mrb[31].mxu0  ;;  %v7530_v6 = vsel %vm7519_vm9, %v7527_v53, %v7529_v32 }
 0x2ae   : > { %v13932_v41 = vadd.f32 %v5201_v61, %v13718_v22  ;;  %v7136_v22 = vrot.slane %v13746_v46, 5 }
 0x2af   : > { %6485 = vrot.lane.b32.xlu0 %v6351_v56, %s11234_s25  ;;  %6094 = vrot.lane.b32.xlu1 %v5960_v47, %s11233_s24 }
 0x2b0   : > { %v10271_v2 = vpop.f32.mrb[32].mxu0  ;;  %v7139_v61 = vsel %vm7126_vm15, %v7136_v22, %v7138_v25 }
 0x2b1   : > { %v13942_v49 = vadd.f32 %v10271_v2, %v13720_v39  ;;  %v5211_v58 = vpop.f32.mrb[33].mxu0 }
 0x2b2   : > { %v13946_v52 = vadd.f32 %v5211_v58, %v13722_v3  ;;  %v7137_v3 = vsel %vm7126_vm15, %v7134_v21, %v7136_v22  ;;  %v7532_v22 = vsel %vm7519_vm9, %v7529_v32, %v7531_v36 }
 0x2b3   : > { %6878 = vrot.lane.b32.xlu0 %v6744_v40, %s11235_s26  ;;  %6487 = vrot.lane.b32.xlu1 %v6353_v8, %s11234_s25  ;;  %v5961_v8 = vrot.slane %v13762_v27, 2 }
 0x2b4   : > { %v10274_v39 = vpop.f32.mrb[34].mxu0 }
 0x2b5   : > { %v13956_v5 = vadd.f32 %v10274_v39, %v13724_v24  ;;  %v5221_v31 = vpop.f32.mrb[35].mxu0 }
 0x2b6   : > { %v13960_v62 = vadd.f32 %v5221_v31, %v13726_v54  ;;  %v5568_v54 = vrot.slane %v13762_v27, 1  ;;  %v5570_v31 = vrot.slane %v13782_v29, 1 }
 0x2b7   : > { %7271 = vrot.lane.b32.xlu0 %v7137_v3, %s11236_s27  ;;  %6880 = vrot.lane.b32.xlu1 %v6746_v7, %s11235_s26  ;;  %v9905_v24 = vpop.f32.mrb[36].mxu1 }
 0x2b8   : > { %v10277_v59 = vpop.f32.mrb[36].mxu0  ;;  %v3632_v14 = vpop.f32.mrb[37].mxu1  ;;  %v5569_v53 = vsel %vm5554_vm4, %v5566_v35, %v5568_v54  ;;  %v5962_v35 = vsel %vm5947_vm2, %v5959_v10, %v5961_v8  ;;  %v5571_v32 = vsel %vm5554_vm4, %v5568_v54, %v5570_v31  ;;  %v6747_v54 = vrot.slane %v13762_v27, 4 }
 0x2b9   : > { %v13969_v50 = vadd.f32 %v10277_v59, %v9905_v24  ;;  %v5231_v21 = vpop.f32.mrb[37].mxu0  ;;  %v6356_v31 = vrot.slane %v13782_v29, 3 }
 0x2ba   : > { %v13972_v55 = vadd.f32 %v5231_v21, %v3632_v14  ;;  %v6354_v21 = vrot.slane %v13762_v27, 3 }
 0x2bb   : > { %7664 = vrot.lane.b32.xlu0 %v7530_v6, %s11237_s5  ;;  %7273 = vrot.lane.b32.xlu1 %v7139_v61, %s11236_s27  ;;  %v9908_v56 = vpop.f32.mrb[38].mxu1  ;;  %v5963_v61 = vrot.slane %v13782_v29, 2 }
 0x2bc   : > { %v10280_v47 = vpop.f32.mrb[38].mxu0  ;;  %v3642_v2 = vpop.f32.mrb[39].mxu1 }
 0x2bd   : > { %v13981_v58 = vadd.f32 %v10280_v47, %v9908_v56  ;;  %v5241_v40 = vpop.f32.mrb[39].mxu0  ;;  %v5964_v10 = vsel %vm5947_vm2, %v5961_v8, %v5963_v61  ;;  %v6748_v8 = vsel %vm6733_vm5, %v6745_v33, %v6747_v54  ;;  %v6357_v61 = vsel %vm6340_vm1, %v6354_v21, %v6356_v31 }
 0x2be   : > { %v13984_v39 = vadd.f32 %v5241_v40, %v3642_v2  ;;  %v7142_v31 = vrot.slane %v13782_v29, 5 }
 0x2bf   : > { %5703 = vrot.lane.b32.xlu0 %v5569_v53, %s11232_s30  ;;  %7666 = vrot.lane.b32.xlu1 %v7532_v22, %s11237_s5  ;;  %v9911_v3 = vpop.f32.mrb[40].mxu1  ;;  %v6355_v22 = vsel %vm6340_vm1, %v6352_v26, %v6354_v21  ;;  %v7140_v26 = vrot.slane %v13762_v27, 5 }
 0x2c0   : > { %v10283_v7 = vpop.f32.mrb[40].mxu0  ;;  %v3652_v24 = vpop.f32.mrb[41].mxu1 }
 0x2c1   : > { %v13995_v59 = vadd.f32 %v10283_v7, %v9911_v3  ;;  %v5251_v14 = vpop.f32.mrb[41].mxu0  ;;  %v7141_v33 = vsel %vm7126_vm15, %v7138_v25, %v7140_v26  ;;  %v7143_v25 = vsel %vm7126_vm15, %v7140_v26, %v7142_v31  ;;  %v5966_v31 = vrot.slane %v13797_v12, 2 }
 0x2c2   : > { %v13998_v6 = vadd.f32 %v5251_v14, %v3652_v24 }
 0x2c3   : > { %6096 = vrot.lane.b32.xlu0 %v5962_v35, %s11233_s24  ;;  %5705 = vrot.lane.b32.xlu1 %v5571_v32, %s11232_s30  ;;  %v9914_v56 = vpop.f32.mrb[42].mxu1 }
 0x2c4   : > { %v10286_v47 = vpop.f32.mrb[42].mxu0  ;;  %v3662_v2 = vpop.f32.mrb[43].mxu1 }
 0x2c5   : > { %v14007_v40 = vadd.f32 %v10286_v47, %v9914_v56  ;;  %v5261_v53 = vpop.f32.mrb[43].mxu0  ;;  %v6749_v47 = vrot.slane %v13782_v29, 4 }
 0x2c6   : > { %v14012_v3 = vadd.f32 %v5261_v53, %v3662_v2 }
 0x2c7   : > { %16323 = vst [vmem:[#allocation15_spill] sm:$0xff] %v14007_v40  ;;  %6489 = vrot.lane.b32.xlu0 %v6355_v22, %s11234_s25  ;;  %6098 = vrot.lane.b32.xlu1 %v5964_v10, %s11233_s24  ;;  %v9917_v7 = vpop.f32.mrb[44].mxu1  ;;  %v6750_v21 = vsel %vm6733_vm5, %v6747_v54, %v6749_v47  ;;  %v7535_v54 = vrot.slane %v13782_v29, 6  ;;  %v5573_v47 = vrot.slane %v13797_v12, 1 }
 0x2c8   : > { %v10289_v24 = vpop.f32.mrb[44].mxu0  ;;  %v3672_v14 = vpop.f32.mrb[45].mxu1 }
 0x2c9   : > { %v14019_v35 = vadd.f32 %v10289_v24, %v9917_v7  ;;  %v5271_v32 = vpop.f32.mrb[45].mxu0  ;;  %v7533_v24 = vrot.slane %v13762_v27, 6 }
 0x2ca   : > { %v14022_v56 = vadd.f32 %v5271_v32, %v3672_v14 }
 0x2cb   : > { %16324 = vst [vmem:[#allocation16_spill] sm:$0xff] %v14019_v35  ;;  %6882 = vrot.lane.b32.xlu0 %v6748_v8, %s11235_s26  ;;  %6491 = vrot.lane.b32.xlu1 %v6357_v61, %s11234_s25  ;;  %v9920_v2 = vpop.f32.mrb[46].mxu1  ;;  %v7536_v29 = vsel %vm7519_vm9, %v7533_v24, %v7535_v54 }
 0x2cc   : > { %16325 = vst [vmem:[#allocation19_spill] sm:$0xff] %v14022_v56  ;;  %v10292_v53 = vpop.f32.mrb[46].mxu0  ;;  %v3682_v22 = vpop.f32.mrb[47].mxu1 }
 0x2cd   : > { %v14031_v10 = vadd.f32 %v10292_v53, %v9920_v2  ;;  %v5281_v7 = vpop.f32.mrb[47].mxu0 }
 0x2ce   : > { %v14034_v14 = vadd.f32 %v5281_v7, %v3682_v22  ;;  %v7534_v22 = vsel %vm7519_vm9, %v7531_v36, %v7533_v24  ;;  %v16334_v24 = vrot.slane %v13792_v0, 1 }
 0x2cf   : > { %16326 = vst [vmem:[#allocation21_spill] sm:$0xff] %v14031_v10  ;;  %7275 = vrot.lane.b32.xlu0 %v7141_v33, %s11236_s27  ;;  %6884 = vrot.lane.b32.xlu1 %v6750_v21, %s11235_s26  ;;  %v9923_v32 = vpop.f32.mrb[48].mxu1 }
 0x2d0   : > { %16327 = vst [vmem:[#allocation39_spill] sm:$0xff] %v14034_v14  ;;  %v10295_v8 = vpop.f32.mrb[48].mxu0  ;;  %v3692_v61 = vpop.f32.mrb[49].mxu1  ;;  %v5576_v54 = vsel %vm5554_vm4, %v5573_v47, %v16334_v24 }
 0x2d1   : > { %v14043_v2 = vadd.f32 %v10295_v8, %v9923_v32  ;;  %v5291_v53 = vpop.f32.mrb[49].mxu0  ;;  %v5572_v8 = vrot.slane %v13777_v42, 1 }
 0x2d2   : > { %v14048_v7 = vadd.f32 %v5291_v53, %v3692_v61 }
 0x2d3   : > { %16328 = vst [vmem:[#allocation40_spill] sm:$0xff] %v14043_v2  ;;  %7668 = vrot.lane.b32.xlu0 %v7534_v22, %s11237_s5  ;;  %7277 = vrot.lane.b32.xlu1 %v7143_v25, %s11236_s27  ;;  %v9926_v33 = vpop.f32.mrb[50].mxu1  ;;  %v5574_v26 = vsel %vm5554_vm4, %v5572_v8, %v5573_v47 }
 0x2d4   : > { %16329 = vst [vmem:[#allocation41_spill] sm:$0xff] %v14048_v7  ;;  %v10298_v21 = vpop.f32.mrb[50].mxu0  ;;  %v3702_v32 = vpop.f32.mrb[51].mxu1 }
 0x2d5   : > { %v14056_v2 = vadd.f32 %v10298_v21, %v9926_v33  ;;  %v5301_v36 = vpop.f32.mrb[51].mxu0  ;;  %v5965_v33 = vrot.slane %v13777_v42, 2 }
 0x2d6   : > { %v14059_v53 = vadd.f32 %v5301_v36, %v3702_v32 }
 0x2d7   : > { %16330 = vst [vmem:[#allocation42_spill] sm:$0xff] %v14056_v2  ;;  %7670 = vrot.lane.b32.xlu1 %v7536_v29, %s11237_s5  ;;  %5707 = vrot.lane.b32.xlu0 %v5574_v26, %s11232_s30  ;;  %v9929_v22 = vpop.f32.mrb[52].mxu1  ;;  %v5967_v8 = vsel %vm5947_vm2, %v5965_v33, %v5966_v31  ;;  %v6359_v29 = vrot.slane %v13797_v12, 3 }
 0x2d8   : > { %16331 = vst [vmem:[#allocation43_spill] sm:$0xff] %v14059_v53  ;;  %v10301_v25 = vpop.f32.mrb[52].mxu0  ;;  %v3712_v7 = vpop.f32.mrb[53].mxu1 }
 0x2d9   : > { %v14067_v21 = vadd.f32 %v10301_v25, %v9929_v22  ;;  %v5311_v61 = vpop.f32.mrb[53].mxu0 }
 0x2da   : > { %v14070_v36 = vadd.f32 %v5311_v61, %v3712_v7  ;;  %v16336_v61 = vrot.slane %v13792_v0, 2 }
 0x2db   : > { %16332 = vst [vmem:[#allocation44_spill] sm:$0xff] %v14067_v21  ;;  %5709 = vrot.lane.b32.xlu1 %v5576_v54, %s11232_s30  ;;  %6100 = vrot.lane.b32.xlu0 %v5967_v8, %s11233_s24  ;;  %v9932_v26 = vpop.f32.mrb[54].mxu1  ;;  %v6358_v21 = vrot.slane %v13777_v42, 3  ;;  %v16096_v54 = vrot.slane %v13792_v0, 3  ;;  %v6752_v8 = vrot.slane %v13797_v12, 4 }
 0x2dc   : > { %16333 = vst [vmem:[#allocation45_spill] sm:$0xff] %v14070_v36  ;;  %v10304_v22 = vpop.f32.mrb[54].mxu0  ;;  %v3722_v25 = vpop.f32.mrb[55].mxu1  ;;  %v5969_v47 = vsel %vm5947_vm2, %v5966_v31, %v16336_v61 }
 0x2dd   : > { %v14080_v32 = vadd.f32 %v10304_v22, %v9932_v26  ;;  %v5321_v7 = vpop.f32.mrb[55].mxu0  ;;  %v6360_v33 = vsel %vm6340_vm1, %v6358_v21, %v6359_v29  ;;  %v6362_v21 = vsel %vm6340_vm1, %v6359_v29, %v16096_v54 }
 0x2de   : > { %v14085_v24 = vadd.f32 %v5321_v7, %v3722_v25 }
 0x2df   : > { %16335 = vst [vmem:[#allocation46_spill] sm:$0xff] %v14080_v32  ;;  %6102 = vrot.lane.b32.xlu1 %v5969_v47, %s11233_s24  ;;  %6493 = vrot.lane.b32.xlu0 %v6360_v33, %s11234_s25  ;;  %v9935_v36 = vpop.f32.mrb[56].mxu1  ;;  %v6751_v32 = vrot.slane %v13777_v42, 4  ;;  %v7145_v47 = vrot.slane %v13797_v12, 5 }
 0x2e0   : > { %16337 = vst [vmem:[#allocation47_spill] sm:$0xff] %v14085_v24  ;;  %v10307_v26 = vpop.f32.mrb[56].mxu0  ;;  %v3732_v22 = vpop.f32.mrb[57].mxu1 }
 0x2e1   : > { %v14093_v2 = vadd.f32 %v10307_v26, %v9935_v36  ;;  %v5331_v31 = vpop.f32.mrb[57].mxu0  ;;  %v6753_v61 = vsel %vm6733_vm5, %v6751_v32, %v6752_v8  ;;  %v16342_v32 = vrot.slane %v13792_v0, 4 }
 0x2e2   : > { %v14096_v7 = vadd.f32 %v5331_v31, %v3732_v22 }
 0x2e3   : > { %16338 = vst [vmem:[#allocation48_spill] sm:$0xff] %v14093_v2  ;;  %6495 = vrot.lane.b32.xlu1 %v6362_v21, %s11234_s25  ;;  %6886 = vrot.lane.b32.xlu0 %v6753_v61, %s11235_s26  ;;  %v9938_v33 = vpop.f32.mrb[58].mxu1  ;;  %v7144_v2 = vrot.slane %v13777_v42, 5  ;;  %v6755_v29 = vsel %vm6733_vm5, %v6752_v8, %v16342_v32  ;;  %v7538_v61 = vrot.slane %v13797_v12, 6 }
 0x2e4   : > { %16339 = vst [vmem:[#allocation49_spill] sm:$0xff] %v14096_v7  ;;  %v10310_v36 = vpop.f32.mrb[58].mxu0  ;;  %v3742_v26 = vpop.f32.mrb[59].mxu1 }
 0x2e5   : > { %v14106_v25 = vadd.f32 %v10310_v36, %v9938_v33  ;;  %v5341_v22 = vpop.f32.mrb[59].mxu0  ;;  %v7146_v21 = vsel %vm7126_vm15, %v7144_v2, %v7145_v47 }
 0x2e6   : > { %v14109_v7 = vadd.f32 %v5341_v22, %v3742_v26 }
 0x2e7   : > { %16340 = vst [vmem:[#allocation50_spill] sm:$0xff] %v14106_v25  ;;  %6888 = vrot.lane.b32.xlu1 %v6755_v29, %s11235_s26  ;;  %7279 = vrot.lane.b32.xlu0 %v7146_v21, %s11236_s27  ;;  %v9941_v54 = vpop.f32.mrb[60].mxu1  ;;  %v7537_v25 = vrot.slane %v13777_v42, 6  ;;  %v16105_v29 = vrot.slane %v13792_v0, 6  ;;  %v5577_v21 = vrot.slane %v13809_v11, 1 }
 0x2e8   : > { %16341 = vst [vmem:[#allocation51_spill] sm:$0xff] %v14109_v7  ;;  %v10313_v33 = vpop.f32.mrb[60].mxu0  ;;  %v3752_v36 = vpop.f32.mrb[61].mxu1  ;;  %v16344_v7 = vrot.slane %v13792_v0, 5 }
 0x2e9   : > { %v14119_v31 = vadd.f32 %v10313_v33, %v9941_v54  ;;  %v5351_v26 = vpop.f32.mrb[61].mxu0  ;;  %v5692_v22 = vpop.permute.xlu0 %5691  ;;  %v7539_v32 = vsel %vm7519_vm9, %v7537_v25, %v7538_v61 }
 0x2ea   : > { %v7148_v8 = vsel %vm7126_vm15, %v7145_v47, %v16344_v7  ;;  %v14124_v2 = vadd.f32 %v5351_v26, %v3752_v36  ;;  %v7541_v36 = vsel %vm7519_vm9, %v7538_v61, %v16105_v29  ;;  %v16348_v26 = vrot.slane %v13792_v0, 1 }
 0x2eb   : > { %16343 = vst [vmem:[#allocation3_spill] sm:$0xff] %v14119_v31  ;;  %7281 = vrot.lane.b32.xlu1 %v7148_v8, %s11236_s27  ;;  %7672 = vrot.lane.b32.xlu0 %v7539_v32, %s11237_s5  ;;  %v9944_v54 = vpop.f32.mrb[62].mxu1  ;;  %v5970_v32 = vrot.slane %v13809_v11, 2  ;;  %v6363_v61 = vrot.slane %v13809_v11, 3 }
 0x2ec   : > { %16345 = vst [vmem:[#allocation5_spill] sm:$0xff] %v14124_v2  ;;  %v10316_v33 = vpop.f32.mrb[62].mxu0  ;;  %v3762_v31 = vpop.f32.mrb[63].mxu1  ;;  %v5578_v8 = vsel %vm5554_vm4, %v16348_v26, %v5577_v21  ;;  %v16351_v2 = vrot.slane %v13805_v28, 1 }
 0x2ed   : > { %v14131_v24 = vadd.f32 %v10316_v33, %v9944_v54  ;;  %v5361_v53 = vpop.f32.mrb[63].mxu0  ;;  %v6085_v10 = vpop.permute.xlu0 %6084 }
 0x2ee   : > { %v14134_v47 = vpop.permute.xlu1 %5695  ;;  %v14136_v25 = vadd.f32 %v5361_v53, %v3762_v31 }
 0x2ef   : > { %16346 = vst [vmem:[#allocation6_spill] sm:$0xff] %v14131_v24  ;;  %7674 = vrot.lane.b32.xlu1 %v7541_v36, %s11237_s5  ;;  %5711 = vrot.lane.b32.xlu0 %v5578_v8, %s11232_s30  ;;  %v9947_v54 = vpop.f32.mrb[64].mxu1  ;;  %v5580_v36 = vsel %vm5554_vm4, %v5577_v21, %v16351_v2  ;;  %v16352_v8 = vrot.slane %v13792_v0, 2  ;;  %v16355_v21 = vrot.slane %v13792_v0, 3 }
 0x2f0   : > { %16347 = vst [vmem:[#allocation53_spill] sm:$0xff] %v14136_v25  ;;  %v10319_v33 = vpop.f32.mrb[64].mxu0  ;;  %v3772_v7 = vpop.f32.mrb[65].mxu1 }
 0x2f1   : > { %v14147_v24 = vadd.f32 %v10319_v33, %v9947_v54  ;;  %v5371_v53 = vpop.f32.mrb[65].mxu0  ;;  %v6478_v31 = vpop.permute.xlu0 %6477  ;;  %v5971_v35 = vsel %vm5947_vm2, %v16352_v8, %v5970_v32  ;;  %v5883_v33 = vadd.f32 %v13730_v23, %v5692_v22  ;;  %v6364_v8 = vsel %vm6340_vm1, %v16355_v21, %v6363_v61 }
 0x2f2   : > { %v14151_v29 = vpop.permute.xlu1 %6086  ;;  %v14153_v26 = vadd.f32 %v5371_v53, %v3772_v7  ;;  %v6756_v22 = vrot.slane %v13809_v11, 4 }
 0x2f3   : > { %16349 = vst [vmem:[#allocation22_spill] sm:$0xff] %v14147_v24  ;;  %5713 = vrot.lane.b32.xlu1 %v5580_v36, %s11232_s30  ;;  %6104 = vrot.lane.b32.xlu0 %v5971_v35, %s11233_s24  ;;  %v9950_v54 = vpop.f32.mrb[66].mxu1  ;;  %v6276_v36 = vadd.f32 %v6085_v10, %v5883_v33 }
 0x2f4   : > { %16350 = vst [vmem:[#allocation54_spill] sm:$0xff] %v14153_v26  ;;  %v10322_v25 = vpop.f32.mrb[66].mxu0  ;;  %v3782_v24 = vpop.f32.mrb[67].mxu1  ;;  %v16354_v26 = vrot.slane %v13805_v28, 2 }
 0x2f5   : > { %v14164_v14 = vadd.f32 %v10322_v25, %v9950_v54  ;;  %v5381_v7 = vpop.f32.mrb[67].mxu0  ;;  %v6871_v53 = vpop.permute.xlu0 %6870  ;;  %v6669_v54 = vadd.f32 %v6478_v31, %v6276_v36  ;;  %v16358_v31 = vrot.slane %v13792_v0, 4 }
 0x2f6   : > { %v5973_v2 = vsel %vm5947_vm2, %v5970_v32, %v16354_v26  ;;  %v6480_v56 = vpop.permute.xlu1 %6479  ;;  %v14172_v35 = vadd.f32 %v5381_v7, %v3782_v24  ;;  %v7149_v24 = vrot.slane %v13809_v11, 5 }
 0x2f7   : > { %16353 = vst [vmem:[#allocation55_spill] sm:$0xff] %v14164_v14  ;;  %6106 = vrot.lane.b32.xlu1 %v5973_v2, %s11233_s24  ;;  %6497 = vrot.lane.b32.xlu0 %v6364_v8, %s11234_s25  ;;  %v9953_v25 = vpop.f32.mrb[68].mxu1  ;;  %v7062_v33 = vadd.f32 %v6871_v53, %v6669_v54  ;;  %v16357_v2 = vrot.slane %v13805_v28, 3  ;;  %v6757_v36 = vsel %vm6733_vm5, %v16358_v31, %v6756_v22  ;;  %v14197_v54 = vld [vmem:[%s15951_s2] ss:$0 sm:$0xff] }
 0x2f8   : > { %v10325_v14 = vpop.f32.mrb[68].mxu0  ;;  %v3792_v32 = vpop.f32.mrb[69].mxu1 }
 0x2f9   : > { %v14178_v26 = vadd.f32 %v10325_v14, %v9953_v25  ;;  %v5391_v40 = vpop.f32.mrb[69].mxu0  ;;  %v7264_v21 = vpop.permute.xlu0 %7263  ;;  %v6366_v8 = vsel %vm6340_vm1, %v6363_v61, %v16357_v2  ;;  %v7542_v2 = vrot.slane %v13809_v11, 6 }
 0x2fa   : > { %v6873_v7 = vpop.permute.xlu1 %6872  ;;  %v14182_v23 = vadd.f32 %v5391_v40, %v3792_v32  ;;  %v7455_v25 = vadd.f32 %v7264_v21, %v7062_v33  ;;  %v16361_v21 = vrot.slane %v13805_v28, 4  ;;  %v16362_v33 = vrot.slane %v13792_v0, 5 }
 0x2fb   : > { %16356 = vst [vmem:[#allocation17_spill] sm:$0xff] %v14178_v26  ;;  %6499 = vrot.lane.b32.xlu1 %v6366_v8, %s11234_s25  ;;  %6890 = vrot.lane.b32.xlu0 %v6757_v36, %s11235_s26  ;;  %v9956_v14 = vpop.f32.mrb[70].mxu1 }
 0x2fc   : > { %v10328_v10 = vpop.f32.mrb[70].mxu0  ;;  %v3802_v26 = vpop.f32.mrb[71].mxu1 }
 0x2fd   : > { %v14192_v53 = vadd.f32 %v10328_v10, %v9956_v14  ;;  %v5401_v40 = vpop.f32.mrb[71].mxu0  ;;  %v7657_v61 = vpop.permute.xlu0 %7656  ;;  %v6759_v10 = vsel %vm6733_vm5, %v6756_v22, %v16361_v21  ;;  %v7150_v14 = vsel %vm7126_vm15, %v16362_v33, %v7149_v24  ;;  %v5581_v33 = vrot.slane %v13822_v44, 1 }
 0x2fe   : > { %v7848_v8 = vadd.f32 %v7657_v61, %v7455_v25  ;;  %v7266_v31 = vpop.permute.xlu1 %7265  ;;  %v14201_v36 = vadd.f32 %v5401_v40, %v3802_v26  ;;  %v16363_v25 = vrot.slane %v13805_v28, 5  ;;  %v16364_v40 = vrot.slane %v13792_v0, 6 }
 0x2ff   : > { %16359 = vst [vmem:[#allocation18_spill] sm:$0xff] %v14192_v53  ;;  %6892 = vrot.lane.b32.xlu1 %v6759_v10, %s11235_s26  ;;  %7283 = vrot.lane.b32.xlu0 %v7150_v14, %s11236_s27  ;;  %v16116_v10 = vrot.slane %v13805_v28, 6  ;;  %v16117_v14 = vrot.slane %v13816_v60, 1 }
 0x300   : > { %16360 = vst [vmem:[#allocation20_spill] sm:$0xff] %v14201_v36  ;;  %v7919_v32 = vadd.f32 %v14197_v54, %v7848_v8  ;;  %v7152_v26 = vsel %vm7126_vm15, %v7149_v24, %v16363_v25  ;;  %v7543_v22 = vsel %vm7519_vm9, %v16364_v40, %v7542_v2 }
 0x301   : > { %v5694_v53 = vpop.permute.xlu0 %5693 }
 0x302   : > { %10928 = vtanh.f32 %v7919_v32  ;;  %v7659_v61 = vpop.permute.xlu1 %7658  ;;  %v5884_v21 = vadd.f32 %v13728_v13, %v5694_v53  ;;  %v7545_v13 = vsel %vm7519_vm9, %v7542_v2, %v16116_v10  ;;  %v16365_v53 = vrot.slane %v13805_v28, 1 }
 0x303   : > { %7285 = vrot.lane.b32.xlu1 %v7152_v26, %s11236_s27  ;;  %7676 = vrot.lane.b32.xlu0 %v7543_v22, %s11237_s5  ;;  %v5974_v26 = vrot.slane %v13822_v44, 2  ;;  %v5584_v2 = vsel %vm5554_vm4, %v5581_v33, %v16117_v14 }
 0x304   : > { %v6277_v8 = vadd.f32 %v14151_v29, %v5884_v21  ;;  %v5582_v40 = vsel %vm5554_vm4, %v16365_v53, %v5581_v33  ;;  %v5976_v21 = vrot.slane %v13816_v60, 2  ;;  %v16366_v53 = vrot.slane %v13805_v28, 2 }
 0x305   : > { %v6089_v24 = vpop.permute.xlu0 %6088 }
 0x306   : > { %v6670_v25 = vadd.f32 %v6480_v56, %v6277_v8  ;;  %v5698_v32 = vpop.permute.xlu1 %5697  ;;  %v5975_v10 = vsel %vm5947_vm2, %v16366_v53, %v5974_v26  ;;  %v5977_v33 = vsel %vm5947_vm2, %v5974_v26, %v5976_v21 }
 0x307   : > { %7678 = vrot.lane.b32.xlu1 %v7545_v13, %s11237_s5  ;;  %5715 = vrot.lane.b32.xlu0 %v5582_v40, %s11232_s30  ;;  %v6367_v13 = vrot.slane %v13822_v44, 3 }
 0x308   : > { %v7063_v29 = vadd.f32 %v6873_v7, %v6670_v25  ;;  %v5885_v25 = vadd.f32 %v13736_v51, %v14134_v47  ;;  %v6760_v51 = vrot.slane %v13822_v44, 4 }
 0x309   : > { %v6482_v22 = vpop.permute.xlu0 %6481 }
 0x30a   : > { %v7456_v56 = vadd.f32 %v7266_v31, %v7063_v29  ;;  %v6091_v8 = vpop.permute.xlu1 %6090  ;;  %v6369_v29 = vrot.slane %v13816_v60, 3 }
 0x30b   : > { %5717 = vrot.lane.b32.xlu1 %v5584_v2, %s11232_s30  ;;  %6108 = vrot.lane.b32.xlu0 %v5975_v10, %s11233_s24  ;;  %v6278_v2 = vadd.f32 %v6089_v24, %v5885_v25  ;;  %v16367_v10 = vrot.slane %v13805_v28, 3  ;;  %v16368_v25 = vrot.slane %v13805_v28, 4 }
 0x30c   : > { %v10929_v7 = vpop.eup %10928  ;;  %v7849_v31 = vadd.f32 %v7659_v61, %v7456_v56  ;;  %v5886_v61 = vadd.f32 %v13734_v30, %v5698_v32  ;;  %v6370_v24 = vsel %vm6340_vm1, %v6367_v13, %v6369_v29 }
 0x30d   : > { %10930 = vtanh.f32 %v10929_v7  ;;  %v6875_v40 = vpop.permute.xlu0 %6874  ;;  %v6368_v36 = vsel %vm6340_vm1, %v16367_v10, %v6367_v13  ;;  %v6671_v47 = vadd.f32 %v6482_v22, %v6278_v2  ;;  %v7155_v13 = vrot.slane %v13816_v60, 5 }
 0x30e   : > { %v7920_v53 = vadd.f32 %v14197_v54, %v7849_v31  ;;  %v6484_v14 = vpop.permute.xlu1 %6483  ;;  %v6761_v31 = vsel %vm6733_vm5, %v16368_v25, %v6760_v51 }
 0x30f   : > { %6110 = vrot.lane.b32.xlu1 %v5977_v33, %s11233_s24  ;;  %6501 = vrot.lane.b32.xlu0 %v6368_v36, %s11234_s25  ;;  %v7064_v56 = vadd.f32 %v6875_v40, %v6671_v47  ;;  %v6762_v33 = vrot.slane %v13816_v60, 4  ;;  %v7153_v36 = vrot.slane %v13822_v44, 5  ;;  %v16369_v47 = vrot.slane %v13805_v28, 5 }
 0x310   : > { %10932 = vtanh.f32 %v7920_v53  ;;  %v6279_v53 = vadd.f32 %v6091_v8, %v5886_v61  ;;  %v7546_v61 = vrot.slane %v13822_v44, 6 }
 0x311   : > { %v7268_v26 = vpop.permute.xlu0 %7267  ;;  %v6763_v10 = vsel %vm6733_vm5, %v6760_v51, %v6762_v33  ;;  %v7154_v8 = vsel %vm7126_vm15, %v16369_v47, %v7153_v36 }
 0x312   : > { %v6877_v7 = vpop.permute.xlu1 %6876  ;;  %v7457_v30 = vadd.f32 %v7268_v26, %v7064_v56  ;;  %v6672_v32 = vadd.f32 %v6484_v14, %v6279_v53 }
 0x313   : > { %6503 = vrot.lane.b32.xlu1 %v6370_v24, %s11234_s25  ;;  %6894 = vrot.lane.b32.xlu0 %v6761_v31, %s11235_s26  ;;  %v16119_v31 = vrot.slane %v13816_v60, 6 }
 0x314   : > { %v7065_v14 = vadd.f32 %v6877_v7, %v6672_v32  ;;  %v7156_v7 = vsel %vm7126_vm15, %v7153_v36, %v7155_v13  ;;  %v16370_v32 = vrot.slane %v13805_v28, 6 }
 0x315   : > { %v7661_v22 = vpop.permute.xlu0 %7660  ;;  %v7549_v36 = vsel %vm7519_vm9, %v7546_v61, %v16119_v31 }
 0x316   : > { %v7850_v40 = vadd.f32 %v7661_v22, %v7457_v30  ;;  %v7270_v2 = vpop.permute.xlu1 %7269  ;;  %v7547_v22 = vsel %vm7519_vm9, %v16370_v32, %v7546_v61  ;;  %v6371_v32 = vrot.slane %v13838_v57, 3 }
 0x317   : > { %v10931_v24 = vpop.eup %10930  ;;  %6896 = vrot.lane.b32.xlu1 %v6763_v10, %s11235_s26  ;;  %7287 = vrot.lane.b32.xlu0 %v7154_v8, %s11236_s27  ;;  %v7458_v56 = vadd.f32 %v7270_v2, %v7065_v14  ;;  %v5585_v10 = vrot.slane %v13838_v57, 1 }
 0x318   : > { %v8111_v51 = vmul.f32 2.0, %v10931_v24  ;;  %v7921_v26 = vadd.f32 %v14197_v54, %v7850_v40  ;;  %v16371_v24 = vrot.slane %v13816_v60, 1 }
 0x319   : > { %v5700_v25 = vpop.permute.xlu0 %5699 }
 0x31a   : > { %v10933_v53 = vpop.eup %10932  ;;  %8176 = vst.msk [vmem:[%s14282_s10] sm:$0xff] %vm8175_vm14, %v8111_v51  ;;  %10934 = vtanh.f32 %v7921_v26  ;;  %v7663_v30 = vpop.permute.xlu1 %7662  ;;  %v5586_v14 = vsel %vm5554_vm4, %v16371_v24, %v5585_v10  ;;  %v5587_v51 = vrot.slane %v13834_v9, 1  ;;  %v5978_v26 = vrot.slane %v13838_v57, 2 }
 0x31b   : > { %10936 = vtanh.f32 %v10933_v53  ;;  %v7851_v40 = vadd.f32 %v7663_v30, %v7458_v56  ;;  %7289 = vrot.lane.b32.xlu1 %v7156_v7, %s11236_s27  ;;  %7680 = vrot.lane.b32.xlu0 %v7547_v22, %s11237_s5  ;;  %v5980_v7 = vrot.slane %v13834_v9, 2  ;;  %v6764_v24 = vrot.slane %v13838_v57, 4 }
 0x31c   : > { %v5588_v30 = vsel %vm5554_vm4, %v5585_v10, %v5587_v51  ;;  %v5979_v61 = vsel %vm5947_vm2, %v5976_v21, %v5978_v26  ;;  %v6373_v10 = vrot.slane %v13834_v9, 3 }
 0x31d   : > { %v7922_v2 = vadd.f32 %v14197_v54, %v7851_v40  ;;  %v6093_v47 = vpop.permute.xlu0 %6092  ;;  %v5887_v40 = vadd.f32 %v13750_v45, %v5700_v25  ;;  %v5981_v31 = vsel %vm5947_vm2, %v5978_v26, %v5980_v7 }
 0x31e   : > { %v5702_v8 = vpop.permute.xlu1 %5701 }
 0x31f   : > { %10938 = vtanh.f32 %v7922_v2  ;;  %7682 = vrot.lane.b32.xlu1 %v7549_v36, %s11237_s5  ;;  %5719 = vrot.lane.b32.xlu0 %v5586_v14, %s11232_s30  ;;  %v6280_v14 = vadd.f32 %v6093_v47, %v5887_v40  ;;  %v6374_v47 = vsel %vm6340_vm1, %v6371_v32, %v6373_v10  ;;  %v6766_v40 = vrot.slane %v13834_v9, 4 }
 0x321   : > { %v6486_v56 = vpop.permute.xlu0 %6485 }
 0x322   : > { %v6095_v53 = vpop.permute.xlu1 %6094  ;;  %v6673_v45 = vadd.f32 %v6486_v56, %v6280_v14 }
 0x323   : > { %5721 = vrot.lane.b32.xlu1 %v5588_v30, %s11232_s30  ;;  %6112 = vrot.lane.b32.xlu0 %v5979_v61, %s11233_s24  ;;  %v6372_v30 = vsel %vm6340_vm1, %v6369_v29, %v6371_v32  ;;  %v5888_v61 = vadd.f32 %v13746_v46, %v5702_v8  ;;  %v6765_v29 = vsel %vm6733_vm5, %v6762_v33, %v6764_v24  ;;  %v7159_v33 = vrot.slane %v13834_v9, 5 }
 0x324   : > { %v10935_v22 = vpop.eup %10934  ;;  %v6767_v32 = vsel %vm6733_vm5, %v6764_v24, %v6766_v40  ;;  %v16372_v40 = vrot.slane %v13816_v60, 6 }
 0x325   : > { %v10937_v2 = vpop.eup %10936  ;;  %10940 = vtanh.f32 %v10935_v22  ;;  %v6879_v36 = vpop.permute.xlu0 %6878 }
 0x326   : > { %v8112_v21 = vmul.f32 2.0, %v10937_v2  ;;  %v6488_v51 = vpop.permute.xlu1 %6487  ;;  %v7066_v26 = vadd.f32 %v6879_v36, %v6673_v45  ;;  %v6281_v2 = vadd.f32 %v6095_v53, %v5888_v61  ;;  %v7550_v53 = vrot.slane %v13838_v57, 6 }
 0x327   : > { %6114 = vrot.lane.b32.xlu1 %v5981_v31, %s11233_s24  ;;  %6505 = vrot.lane.b32.xlu0 %v6372_v30, %s11234_s25  ;;  %v7157_v31 = vrot.slane %v13838_v57, 5  ;;  %v7552_v61 = vrot.slane %v13834_v9, 6 }
 0x328   : > { %8177 = vst.msk [vmem:[%s14282_s10 + $0x8] sm:$0xff] %vm8175_vm14, %v8112_v21  ;;  %v6674_v8 = vadd.f32 %v6488_v51, %v6281_v2 }
 0x329   : > { %v10939_v25 = vpop.eup %10938  ;;  %v7272_v22 = vpop.permute.xlu0 %7271  ;;  %v7158_v21 = vsel %vm7126_vm15, %v7155_v13, %v7157_v31 }
 0x32a   : > { %10942 = vtanh.f32 %v10939_v25  ;;  %v6881_v7 = vpop.permute.xlu1 %6880  ;;  %v7459_v46 = vadd.f32 %v7272_v22, %v7066_v26  ;;  %v5589_v22 = vrot.slane %v13854_v17, 1  ;;  %v7551_v26 = vsel %vm7519_vm9, %v16372_v40, %v7550_v53 }
 0x32b   : > { %6507 = vrot.lane.b32.xlu1 %v6374_v47, %s11234_s25  ;;  %6898 = vrot.lane.b32.xlu0 %v6765_v29, %s11235_s26  ;;  %v7067_v30 = vadd.f32 %v6881_v7, %v6674_v8  ;;  %v7160_v47 = vsel %vm7126_vm15, %v7157_v31, %v7159_v33  ;;  %v5590_v7 = vrot.slane %v13850_v20, 1  ;;  %v6769_v40 = vrot.slane %v13850_v20, 4 }
 0x32d   : > { %v7665_v56 = vpop.permute.xlu0 %7664 }
 0x32e   : > { %v7852_v10 = vadd.f32 %v7665_v56, %v7459_v46  ;;  %v7274_v36 = vpop.permute.xlu1 %7273  ;;  %v5982_v56 = vrot.slane %v13854_v17, 2 }
 0x32f   : > { %v10941_v14 = vpop.eup %10940  ;;  %6900 = vrot.lane.b32.xlu1 %v6767_v32, %s11235_s26  ;;  %7291 = vrot.lane.b32.xlu0 %v7158_v21, %s11236_s27  ;;  %v7460_v45 = vadd.f32 %v7274_v36, %v7067_v30  ;;  %v7553_v32 = vsel %vm7519_vm9, %v7550_v53, %v7552_v61  ;;  %v5983_v36 = vrot.slane %v13850_v20, 2  ;;  %v5592_v21 = vrot.slane %v13868_v19, 1 }
 0x330   : > { %v8113_v51 = vmul.f32 2.0, %v10941_v14  ;;  %v7923_v24 = vadd.f32 %v14197_v54, %v7852_v10  ;;  %v5591_v10 = vsel %vm5554_vm4, %v5589_v22, %v5590_v7  ;;  %v6375_v14 = vrot.slane %v13854_v17, 3 }
 0x331   : > { %v5704_v25 = vpop.permute.xlu0 %5703  ;;  %v5593_v53 = vsel %vm5554_vm4, %v5590_v7, %v5592_v21 }
 0x332   : > { %8178 = vst.msk [vmem:[%s14282_s10 + $0x10] sm:$0xff] %vm8175_vm14, %v8113_v51  ;;  %10944 = vtanh.f32 %v7923_v24  ;;  %v7667_v13 = vpop.permute.xlu1 %7666  ;;  %v5984_v51 = vsel %vm5947_vm2, %v5982_v56, %v5983_v36  ;;  %v6376_v24 = vrot.slane %v13850_v20, 3  ;;  %v5889_v22 = vadd.f32 %v13767_v43, %v5704_v25 }
 0x333   : > { %v7853_v29 = vadd.f32 %v7667_v13, %v7460_v45  ;;  %7293 = vrot.lane.b32.xlu1 %v7160_v47, %s11236_s27  ;;  %7684 = vrot.lane.b32.xlu0 %v7551_v26, %s11237_s5  ;;  %v5985_v45 = vrot.slane %v13868_v19, 2  ;;  %v6768_v47 = vrot.slane %v13854_v17, 4  ;;  %v6378_v26 = vrot.slane %v13868_v19, 3 }
 0x334   : > { %v10943_v9 = vpop.eup %10942 }
 0x335   : > { %v8114_v2 = vmul.f32 2.0, %v10943_v9  ;;  %v7924_v46 = vadd.f32 %v14197_v54, %v7853_v29  ;;  %v6097_v8 = vpop.permute.xlu0 %6096  ;;  %v6377_v9 = vsel %vm6340_vm1, %v6375_v14, %v6376_v24 }
 0x336   : > { %v5706_v31 = vpop.permute.xlu1 %5705  ;;  %v6282_v7 = vadd.f32 %v6097_v8, %v5889_v22  ;;  %v6379_v8 = vsel %vm6340_vm1, %v6376_v24, %v6378_v26  ;;  %v7554_v22 = vrot.slane %v13854_v17, 6  ;;  %v7555_v24 = vrot.slane %v13850_v20, 6 }
 0x337   : > { %8179 = vst.msk [vmem:[%s14282_s10 + $0x18] sm:$0xff] %vm8175_vm14, %v8114_v2  ;;  %10946 = vtanh.f32 %v7924_v46  ;;  %7686 = vrot.lane.b32.xlu1 %v7553_v32, %s11237_s5  ;;  %5723 = vrot.lane.b32.xlu0 %v5591_v10, %s11232_s30  ;;  %v5986_v2 = vsel %vm5947_vm2, %v5983_v36, %v5985_v45  ;;  %v5890_v46 = vadd.f32 %v13762_v27, %v5706_v31  ;;  %v7161_v10 = vrot.slane %v13854_v17, 5 }
 0x338   : > { %v6770_v32 = vsel %vm6733_vm5, %v6768_v47, %v6769_v40 }
 0x339   : > { %v6490_v33 = vpop.permute.xlu0 %6489 }
 0x33a   : > { %v6099_v30 = vpop.permute.xlu1 %6098  ;;  %v6675_v43 = vadd.f32 %v6490_v33, %v6282_v7 }
 0x33b   : > { %6116 = vrot.lane.b32.xlu0 %v5984_v51, %s11233_s24  ;;  %5725 = vrot.lane.b32.xlu1 %v5593_v53, %s11232_s30  ;;  %v7162_v51 = vrot.slane %v13850_v20, 5  ;;  %v6771_v53 = vrot.slane %v13868_v19, 4  ;;  %v6283_v33 = vadd.f32 %v6099_v30, %v5890_v46 }
 0x33c   : > { %v10945_v61 = vpop.eup %10944 }
 0x33d   : > { %10948 = vtanh.f32 %v10945_v61  ;;  %v6883_v13 = vpop.permute.xlu0 %6882  ;;  %v7163_v7 = vsel %vm7126_vm15, %v7161_v10, %v7162_v51  ;;  %v6772_v30 = vsel %vm6733_vm5, %v6769_v40, %v6771_v53  ;;  %v7556_v40 = vsel %vm7519_vm9, %v7554_v22, %v7555_v24 }
 0x33e   : > { %v6492_v29 = vpop.permute.xlu1 %6491  ;;  %v7068_v14 = vadd.f32 %v6883_v13, %v6675_v43 }
 0x33f   : > { %6509 = vrot.lane.b32.xlu0 %v6377_v9, %s11234_s25  ;;  %6118 = vrot.lane.b32.xlu1 %v5986_v2, %s11233_s24  ;;  %v6676_v31 = vadd.f32 %v6492_v29, %v6283_v33  ;;  %v7164_v9 = vrot.slane %v13868_v19, 5 }
 0x341   : > { %v10947_v25 = vpop.eup %10946  ;;  %v7276_v56 = vpop.permute.xlu0 %7275  ;;  %v7165_v10 = vsel %vm7126_vm15, %v7162_v51, %v7164_v9 }
 0x342   : > { %10950 = vtanh.f32 %v10947_v25  ;;  %v6885_v36 = vpop.permute.xlu1 %6884  ;;  %v7461_v27 = vadd.f32 %v7276_v56, %v7068_v14  ;;  %v7557_v14 = vrot.slane %v13868_v19, 6 }
 0x343   : > { %6902 = vrot.lane.b32.xlu0 %v6770_v32, %s11235_s26  ;;  %6511 = vrot.lane.b32.xlu1 %v6379_v8, %s11234_s25  ;;  %v7069_v43 = vadd.f32 %v6885_v36, %v6676_v31  ;;  %v5594_v32 = vrot.slane %v13864_v63, 1 }
 0x344   : > { %v7558_v51 = vsel %vm7519_vm9, %v7555_v24, %v7557_v14 }
 0x345   : > { %v7669_v61 = vpop.permute.xlu0 %7668  ;;  %v5595_v22 = vsel %vm5554_vm4, %v5592_v21, %v5594_v32 }
 0x346   : > { %v7854_v47 = vadd.f32 %v7669_v61, %v7461_v27  ;;  %v7278_v13 = vpop.permute.xlu1 %7277 }
 0x347   : > { %v10949_v2 = vpop.eup %10948  ;;  %7295 = vrot.lane.b32.xlu0 %v7163_v7, %s11236_s27  ;;  %6904 = vrot.lane.b32.xlu1 %v6772_v30, %s11235_s26  ;;  %v7462_v46 = vadd.f32 %v7278_v13, %v7069_v43  ;;  %v5987_v13 = vrot.slane %v13864_v63, 2  ;;  %v5596_v7 = vrot.slane %v13880_v4, 1  ;;  %v6380_v43 = vrot.slane %v13864_v63, 3 }
 0x348   : > { %v8115_v29 = vmul.f32 2.0, %v10949_v2  ;;  %v7925_v25 = vadd.f32 %v14197_v54, %v7854_v47 }
 0x349   : > { %v5708_v56 = vpop.permute.xlu0 %5707  ;;  %v5988_v21 = vsel %vm5947_vm2, %v5985_v45, %v5987_v13  ;;  %v5597_v24 = vsel %vm5554_vm4, %v5594_v32, %v5596_v7  ;;  %v6381_v32 = vsel %vm6340_vm1, %v6378_v26, %v6380_v43 }
 0x34a   : > { %8180 = vst.msk [vmem:[%s14282_s10 + $0x20] sm:$0xff] %vm8175_vm14, %v8115_v29  ;;  %10952 = vtanh.f32 %v7925_v25  ;;  %v7671_v8 = vpop.permute.xlu1 %7670  ;;  %v5989_v29 = vrot.slane %v13880_v4, 2 }
 0x34b   : > { %v7855_v36 = vadd.f32 %v7671_v8, %v7462_v46  ;;  %7688 = vrot.lane.b32.xlu0 %v7556_v40, %s11237_s5  ;;  %7297 = vrot.lane.b32.xlu1 %v7165_v10, %s11236_s27  ;;  %v5891_v46 = vadd.f32 %v13777_v42, %v5708_v56  ;;  %v6773_v40 = vrot.slane %v13864_v63, 4 }
 0x34c   : > { %v10951_v33 = vpop.eup %10950 }
 0x34d   : > { %v8116_v27 = vmul.f32 2.0, %v10951_v33  ;;  %v7926_v31 = vadd.f32 %v14197_v54, %v7855_v36  ;;  %v6101_v61 = vpop.permute.xlu0 %6100  ;;  %v5990_v36 = vsel %vm5947_vm2, %v5987_v13, %v5989_v29  ;;  %v6382_v33 = vrot.slane %v13880_v4, 3 }
 0x34e   : > { %v5710_v47 = vpop.permute.xlu1 %5709  ;;  %v6284_v45 = vadd.f32 %v6101_v61, %v5891_v46  ;;  %v7166_v61 = vrot.slane %v13864_v63, 5  ;;  %v6774_v13 = vsel %vm6733_vm5, %v6771_v53, %v6773_v40 }
 0x34f   : > { %8181 = vst.msk [vmem:[%s14282_s10 + $0x28] sm:$0xff] %vm8175_vm14, %v8116_v27  ;;  %10954 = vtanh.f32 %v7926_v31  ;;  %5727 = vrot.lane.b32.xlu0 %v5595_v22, %s11232_s30  ;;  %7690 = vrot.lane.b32.xlu1 %v7558_v51, %s11237_s5  ;;  %v5892_v27 = vadd.f32 %v13797_v12, %v5710_v47  ;;  %v6775_v22 = vrot.slane %v13880_v4, 4 }
 0x351   : > { %v6494_v30 = vpop.permute.xlu0 %6493  ;;  %v6776_v53 = vsel %vm6733_vm5, %v6773_v40, %v6775_v22 }
 0x352   : > { %v6103_v2 = vpop.permute.xlu1 %6102  ;;  %v6677_v42 = vadd.f32 %v6494_v30, %v6284_v45 }
 0x353   : > { %6120 = vrot.lane.b32.xlu0 %v5988_v21, %s11233_s24  ;;  %5729 = vrot.lane.b32.xlu1 %v5597_v24, %s11232_s30  ;;  %v6383_v21 = vsel %vm6340_vm1, %v6380_v43, %v6382_v33  ;;  %v6285_v30 = vadd.f32 %v6103_v2, %v5892_v27  ;;  %v7559_v2 = vrot.slane %v13864_v63, 6  ;;  %v7168_v43 = vrot.slane %v13880_v4, 5 }
 0x354   : > { %v10953_v25 = vpop.eup %10952 }
 0x355   : > { %10956 = vtanh.f32 %v10953_v25  ;;  %v6887_v8 = vpop.permute.xlu0 %6886  ;;  %v7167_v25 = vsel %vm7126_vm15, %v7164_v9, %v7166_v61  ;;  %v7560_v27 = vsel %vm7519_vm9, %v7557_v14, %v7559_v2 }
 0x356   : > { %v6496_v10 = vpop.permute.xlu1 %6495  ;;  %v7070_v26 = vadd.f32 %v6887_v8, %v6677_v42 }
 0x357   : > { %6513 = vrot.lane.b32.xlu0 %v6381_v32, %s11234_s25  ;;  %6122 = vrot.lane.b32.xlu1 %v5990_v36, %s11233_s24  ;;  %v6678_v47 = vadd.f32 %v6496_v10, %v6285_v30 }
 0x359   : > { %v10955_v56 = vpop.eup %10954  ;;  %v7280_v31 = vpop.permute.xlu0 %7279 }
 0x35a   : > { %10958 = vtanh.f32 %v10955_v56  ;;  %v6889_v51 = vpop.permute.xlu1 %6888  ;;  %v7463_v12 = vadd.f32 %v7280_v31, %v7070_v26  ;;  %v5598_v56 = vrot.slane %v13876_v18, 1  ;;  %v7169_v31 = vsel %vm7126_vm15, %v7166_v61, %v7168_v43 }
 0x35b   : > { %6906 = vrot.lane.b32.xlu0 %v6774_v13, %s11235_s26  ;;  %6515 = vrot.lane.b32.xlu1 %v6383_v21, %s11234_s25  ;;  %v7071_v32 = vadd.f32 %v6889_v51, %v6678_v47  ;;  %v7561_v26 = vrot.slane %v13880_v4, 6 }
 0x35c   : > { %v5599_v14 = vsel %vm5554_vm4, %v5596_v7, %v5598_v56 }
 0x35d   : > { %v7673_v24 = vpop.permute.xlu0 %7672  ;;  %v7562_v61 = vsel %vm7519_vm9, %v7559_v2, %v7561_v26 }
 0x35e   : > { %v7282_v46 = vpop.permute.xlu1 %7281  ;;  %v7856_v8 = vadd.f32 %v7673_v24, %v7463_v12  ;;  %v5991_v24 = vrot.slane %v13876_v18, 2 }
 0x35f   : > { %v10957_v45 = vpop.eup %10956  ;;  %7299 = vrot.lane.b32.xlu0 %v7167_v25, %s11236_s27  ;;  %6908 = vrot.lane.b32.xlu1 %v6776_v53, %s11235_s26  ;;  %v7464_v9 = vadd.f32 %v7282_v46, %v7071_v32  ;;  %v5600_v25 = vrot.slane %v13892_v37, 1 }
 0x360   : > { %v8117_v10 = vmul.f32 2.0, %v10957_v45  ;;  %v7927_v36 = vadd.f32 %v14197_v54, %v7856_v8  ;;  %v6384_v8 = vrot.slane %v13876_v18, 3  ;;  %v5992_v7 = vsel %vm5947_vm2, %v5989_v29, %v5991_v24 }
 0x361   : > { %v5712_v42 = vpop.permute.xlu0 %5711  ;;  %v5601_v2 = vsel %vm5554_vm4, %v5598_v56, %v5600_v25  ;;  %v5993_v45 = vrot.slane %v13892_v37, 2 }
 0x362   : > { %8182 = vst.msk [vmem:[%s14282_s10 + $0x30] sm:$0xff] %vm8175_vm14, %v8117_v10  ;;  %10960 = vtanh.f32 %v7927_v36  ;;  %v7675_v40 = vpop.permute.xlu1 %7674  ;;  %v5893_v10 = vadd.f32 %v13792_v0, %v5712_v42 }
 0x363   : > { %v7857_v51 = vadd.f32 %v7675_v40, %v7464_v9  ;;  %7692 = vrot.lane.b32.xlu0 %v7560_v27, %s11237_s5  ;;  %7301 = vrot.lane.b32.xlu1 %v7169_v31, %s11236_s27  ;;  %v6385_v9 = vsel %vm6340_vm1, %v6382_v33, %v6384_v8  ;;  %v5994_v56 = vsel %vm5947_vm2, %v5991_v24, %v5993_v45  ;;  %v6777_v27 = vrot.slane %v13876_v18, 4 }
 0x364   : > { %v10959_v13 = vpop.eup %10958  ;;  %v6386_v31 = vrot.slane %v13892_v37, 3  ;;  %v7170_v33 = vrot.slane %v13876_v18, 5 }
 0x365   : > { %v8118_v21 = vmul.f32 2.0, %v10959_v13  ;;  %v7928_v30 = vadd.f32 %v14197_v54, %v7857_v51  ;;  %v6105_v12 = vpop.permute.xlu0 %6104 }
 0x366   : > { %v5714_v47 = vpop.permute.xlu1 %5713  ;;  %v6286_v29 = vadd.f32 %v6105_v12, %v5893_v10 }
 0x367   : > { %8183 = vst.msk [vmem:[%s14282_s10 + $0x38] sm:$0xff] %vm8175_vm14, %v8118_v21  ;;  %10962 = vtanh.f32 %v7928_v30  ;;  %5731 = vrot.lane.b32.xlu0 %v5599_v14, %s11232_s30  ;;  %7694 = vrot.lane.b32.xlu1 %v7562_v61, %s11237_s5  ;;  %v5894_v51 = vadd.f32 %v13809_v11, %v5714_v47  ;;  %v6779_v21 = vrot.slane %v13892_v37, 4  ;;  %v6778_v14 = vsel %vm6733_vm5, %v6775_v22, %v6777_v27 }
 0x368   : > { %v6387_v61 = vsel %vm6340_vm1, %v6384_v8, %v6386_v31  ;;  %v7171_v22 = vsel %vm7126_vm15, %v7168_v43, %v7170_v33 }
 0x369   : > { %v6498_v46 = vpop.permute.xlu0 %6497  ;;  %v6780_v8 = vsel %vm6733_vm5, %v6777_v27, %v6779_v21 }
 0x36a   : > { %v6107_v53 = vpop.permute.xlu1 %6106  ;;  %v6679_v0 = vadd.f32 %v6498_v46, %v6286_v29 }
 0x36b   : > { %6124 = vrot.lane.b32.xlu0 %v5992_v7, %s11233_s24  ;;  %5733 = vrot.lane.b32.xlu1 %v5601_v2, %s11232_s30  ;;  %v6287_v24 = vadd.f32 %v6107_v53, %v5894_v51  ;;  %v7563_v7 = vrot.slane %v13876_v18, 6  ;;  %v7172_v53 = vrot.slane %v13892_v37, 5  ;;  %v7565_v51 = vrot.slane %v13892_v37, 6 }
 0x36c   : > { %v10961_v32 = vpop.eup %10960 }
 0x36d   : > { %10964 = vtanh.f32 %v10961_v32  ;;  %v6891_v36 = vpop.permute.xlu0 %6890  ;;  %v7564_v43 = vsel %vm7519_vm9, %v7561_v26, %v7563_v7 }
 0x36e   : > { %v6500_v40 = vpop.permute.xlu1 %6499  ;;  %v7072_v30 = vadd.f32 %v6891_v36, %v6679_v0  ;;  %v7173_v0 = vsel %vm7126_vm15, %v7170_v33, %v7172_v53  ;;  %v7566_v33 = vsel %vm7519_vm9, %v7563_v7, %v7565_v51  ;;  %v6388_v7 = vrot.slane %v13888_v1, 3 }
 0x36f   : > { %6517 = vrot.lane.b32.xlu0 %v6385_v9, %s11234_s25  ;;  %6126 = vrot.lane.b32.xlu1 %v5994_v56, %s11233_s24  ;;  %v6680_v47 = vadd.f32 %v6500_v40, %v6287_v24 }
 0x371   : > { %v10963_v42 = vpop.eup %10962  ;;  %v7284_v13 = vpop.permute.xlu0 %7283 }
 0x372   : > { %10966 = vtanh.f32 %v10963_v42  ;;  %v6893_v12 = vpop.permute.xlu1 %6892  ;;  %v7465_v11 = vadd.f32 %v7284_v13, %v7072_v30  ;;  %v5602_v42 = vrot.slane %v13888_v1, 1 }
 0x373   : > { %6910 = vrot.lane.b32.xlu0 %v6778_v14, %s11235_s26  ;;  %6519 = vrot.lane.b32.xlu1 %v6387_v61, %s11234_s25  ;;  %v7073_v36 = vadd.f32 %v6893_v12, %v6680_v47  ;;  %v5604_v47 = vrot.slane %v13906_v38, 1 }
 0x374   : > { %v5603_v24 = vsel %vm5554_vm4, %v5600_v25, %v5602_v42 }
 0x375   : > { %v7677_v46 = vpop.permute.xlu0 %7676 }
 0x376   : > { %v7286_v2 = vpop.permute.xlu1 %7285  ;;  %v7858_v32 = vadd.f32 %v7677_v46, %v7465_v11  ;;  %v5995_v11 = vrot.slane %v13888_v1, 2 }
 0x377   : > { %v10965_v10 = vpop.eup %10964  ;;  %7303 = vrot.lane.b32.xlu0 %v7171_v22, %s11236_s27  ;;  %6912 = vrot.lane.b32.xlu1 %v6780_v8, %s11235_s26  ;;  %v7466_v40 = vadd.f32 %v7286_v2, %v7073_v36  ;;  %v5997_v22 = vrot.slane %v13906_v38, 2 }
 0x378   : > { %v8119_v9 = vmul.f32 2.0, %v10965_v10  ;;  %v7929_v29 = vadd.f32 %v14197_v54, %v7858_v32  ;;  %v5996_v25 = vsel %vm5947_vm2, %v5993_v45, %v5995_v11  ;;  %v5605_v32 = vsel %vm5554_vm4, %v5602_v42, %v5604_v47 }
 0x379   : > { %v5716_v56 = vpop.permute.xlu0 %5715  ;;  %v6389_v45 = vsel %vm6340_vm1, %v6386_v31, %v6388_v7 }
 0x37a   : > { %8184 = vst.msk [vmem:[%s14282_s10 + $0x40] sm:$0xff] %vm8175_vm14, %v8119_v9  ;;  %10968 = vtanh.f32 %v7929_v29  ;;  %v7679_v27 = vpop.permute.xlu1 %7678  ;;  %v5895_v10 = vadd.f32 %v13805_v28, %v5716_v56  ;;  %v6781_v9 = vrot.slane %v13888_v1, 4 }
 0x37b   : > { %v7859_v13 = vadd.f32 %v7679_v27, %v7466_v40  ;;  %7696 = vrot.lane.b32.xlu0 %v7564_v43, %s11237_s5  ;;  %7305 = vrot.lane.b32.xlu1 %v7173_v0, %s11236_s27  ;;  %v5998_v43 = vsel %vm5947_vm2, %v5995_v11, %v5997_v22  ;;  %v6390_v27 = vrot.slane %v13906_v38, 3 }
 0x37c   : > { %v10967_v30 = vpop.eup %10966 }
 0x37d   : > { %v8120_v26 = vmul.f32 2.0, %v10967_v30  ;;  %v7930_v12 = vadd.f32 %v14197_v54, %v7859_v13  ;;  %v6109_v14 = vpop.permute.xlu0 %6108  ;;  %v6782_v13 = vsel %vm6733_vm5, %v6779_v21, %v6781_v9  ;;  %v7174_v30 = vrot.slane %v13888_v1, 5 }
 0x37e   : > { %v5718_v61 = vpop.permute.xlu1 %5717  ;;  %v6288_v29 = vadd.f32 %v6109_v14, %v5895_v10  ;;  %v6783_v14 = vrot.slane %v13906_v38, 4  ;;  %v7567_v21 = vrot.slane %v13888_v1, 6 }
 0x37f   : > { %8185 = vst.msk [vmem:[%s14282_s10 + $0x48] sm:$0xff] %vm8175_vm14, %v8120_v26  ;;  %10970 = vtanh.f32 %v7930_v12  ;;  %5735 = vrot.lane.b32.xlu0 %v5603_v24, %s11232_s30  ;;  %7698 = vrot.lane.b32.xlu1 %v7566_v33, %s11237_s5  ;;  %v5896_v56 = vadd.f32 %v13822_v44, %v5718_v61  ;;  %v6391_v12 = vsel %vm6340_vm1, %v6388_v7, %v6390_v27 }
 0x381   : > { %v6502_v46 = vpop.permute.xlu0 %6501 }
 0x382   : > { %v6111_v2 = vpop.permute.xlu1 %6110  ;;  %v6681_v0 = vadd.f32 %v6502_v46, %v6288_v29  ;;  %v7175_v46 = vsel %vm7126_vm15, %v7172_v53, %v7174_v30  ;;  %v7569_v29 = vrot.slane %v13906_v38, 6 }
 0x383   : > { %6128 = vrot.lane.b32.xlu0 %v5996_v25, %s11233_s24  ;;  %5737 = vrot.lane.b32.xlu1 %v5605_v32, %s11232_s30  ;;  %v6289_v24 = vadd.f32 %v6111_v2, %v5896_v56  ;;  %v6784_v25 = vsel %vm6733_vm5, %v6781_v9, %v6783_v14  ;;  %v7176_v2 = vrot.slane %v13906_v38, 5  ;;  %v7568_v9 = vsel %vm7519_vm9, %v7565_v51, %v7567_v21 }
 0x384   : > { %v10969_v8 = vpop.eup %10968  ;;  %v5606_v38 = vrot.slane %v13902_v15, 1  ;;  %v7570_v51 = vsel %vm7519_vm9, %v7567_v21, %v7569_v29 }
 0x385   : > { %10972 = vtanh.f32 %v10969_v8  ;;  %v6895_v36 = vpop.permute.xlu0 %6894 }
 0x386   : > { %v6504_v40 = vpop.permute.xlu1 %6503  ;;  %v7074_v31 = vadd.f32 %v6895_v36, %v6681_v0 }
 0x387   : > { %6521 = vrot.lane.b32.xlu0 %v6389_v45, %s11234_s25  ;;  %6130 = vrot.lane.b32.xlu1 %v5998_v43, %s11233_s24  ;;  %v6682_v61 = vadd.f32 %v6504_v40, %v6289_v24  ;;  %v7177_v40 = vsel %vm7126_vm15, %v7174_v30, %v7176_v2  ;;  %v5607_v45 = vrot.slane %v13918_v48, 1  ;;  %v5609_v30 = vrot.slane %v13914_v34, 1 }
 0x389   : > { %v10971_v28 = vpop.eup %10970  ;;  %v7288_v42 = vpop.permute.xlu0 %7287  ;;  %v5610_v14 = vsel %vm5554_vm4, %v5607_v45, %v5609_v30 }
 0x38a   : > { %10974 = vtanh.f32 %v10971_v28  ;;  %v6897_v26 = vpop.permute.xlu1 %6896  ;;  %v7467_v44 = vadd.f32 %v7288_v42, %v7074_v31  ;;  %v6000_v31 = vrot.slane %v13918_v48, 2 }
 0x38b   : > { %6914 = vrot.lane.b32.xlu0 %v6782_v13, %s11235_s26  ;;  %6523 = vrot.lane.b32.xlu1 %v6391_v12, %s11234_s25  ;;  %v7075_v7 = vadd.f32 %v6897_v26, %v6682_v61  ;;  %v5608_v13 = vsel %vm5554_vm4, %v5606_v38, %v5607_v45  ;;  %v5999_v26 = vrot.slane %v13902_v15, 2  ;;  %v6393_v61 = vrot.slane %v13918_v48, 3 }
 0x38d   : > { %v7681_v33 = vpop.permute.xlu0 %7680  ;;  %v6001_v24 = vsel %vm5947_vm2, %v5999_v26, %v6000_v31 }
 0x38e   : > { %v7290_v11 = vpop.permute.xlu1 %7289  ;;  %v7860_v47 = vadd.f32 %v7681_v33, %v7467_v44  ;;  %v6002_v44 = vrot.slane %v13914_v34, 2 }
 0x38f   : > { %v10973_v32 = vpop.eup %10972  ;;  %7307 = vrot.lane.b32.xlu0 %v7175_v46, %s11236_s27  ;;  %6916 = vrot.lane.b32.xlu1 %v6784_v25, %s11235_s26  ;;  %v7468_v10 = vadd.f32 %v7290_v11, %v7075_v7  ;;  %v6392_v11 = vrot.slane %v13902_v15, 3  ;;  %v6395_v46 = vrot.slane %v13914_v34, 3 }
 0x390   : > { %v8121_v22 = vmul.f32 2.0, %v10973_v32  ;;  %v7931_v8 = vadd.f32 %v14197_v54, %v7860_v47  ;;  %v6003_v32 = vsel %vm5947_vm2, %v6000_v31, %v6002_v44 }
 0x391   : > { %v5720_v36 = vpop.permute.xlu0 %5719  ;;  %v6394_v7 = vsel %vm6340_vm1, %v6392_v11, %v6393_v61 }
 0x392   : > { %8186 = vst.msk [vmem:[%s14282_s10 + $0x50] sm:$0xff] %vm8175_vm14, %v8121_v22  ;;  %10976 = vtanh.f32 %v7931_v8  ;;  %v7683_v53 = vpop.permute.xlu1 %7682  ;;  %v5897_v21 = vadd.f32 %v13816_v60, %v5720_v36  ;;  %v6786_v22 = vrot.slane %v13918_v48, 4  ;;  %v6785_v8 = vrot.slane %v13902_v15, 4 }
 0x393   : > { %v7861_v43 = vadd.f32 %v7683_v53, %v7468_v10  ;;  %7700 = vrot.lane.b32.xlu0 %v7568_v9, %s11237_s5  ;;  %7309 = vrot.lane.b32.xlu1 %v7177_v40, %s11236_s27  ;;  %v6396_v53 = vsel %vm6340_vm1, %v6393_v61, %v6395_v46  ;;  %v6788_v9 = vrot.slane %v13914_v34, 4  ;;  %v14662_v61 = vld [vmem:[%s15951_s2] ss:$0 sm:$0xff] }
 0x394   : > { %v10975_v27 = vpop.eup %10974 }
 0x395   : > { %v8122_v0 = vmul.f32 2.0, %v10975_v27  ;;  %v7932_v28 = vadd.f32 %v14197_v54, %v7861_v43  ;;  %v6113_v56 = vpop.permute.xlu0 %6112  ;;  %v6787_v43 = vsel %vm6733_vm5, %v6785_v8, %v6786_v22  ;;  %v7179_v27 = vrot.slane %v13918_v48, 5 }
 0x396   : > { %v5722_v42 = vpop.permute.xlu1 %5721  ;;  %v6290_v25 = vadd.f32 %v6113_v56, %v5897_v21  ;;  %v6789_v31 = vsel %vm6733_vm5, %v6786_v22, %v6788_v9  ;;  %v7571_v21 = vrot.slane %v13902_v15, 6  ;;  %v5611_v22 = vrot.slane %v13932_v41, 1 }
 0x397   : > { %8187 = vst.msk [vmem:[%s14282_s10 + $0x58] sm:$0xff] %vm8175_vm14, %v8122_v0  ;;  %10978 = vtanh.f32 %v7932_v28  ;;  %7702 = vrot.lane.b32.xlu1 %v7570_v51, %s11237_s5  ;;  %5739 = vrot.lane.b32.xlu0 %v5608_v13, %s11232_s30  ;;  %v5898_v36 = vadd.f32 %v13838_v57, %v5722_v42  ;;  %v7178_v0 = vrot.slane %v13902_v15, 5  ;;  %v7181_v42 = vrot.slane %v13914_v34, 5 }
 0x399   : > { %v6506_v54 = vpop.permute.xlu0 %6505  ;;  %v7180_v26 = vsel %vm7126_vm15, %v7178_v0, %v7179_v27 }
 0x39a   : > { %v6115_v12 = vpop.permute.xlu1 %6114  ;;  %v6683_v60 = vadd.f32 %v6506_v54, %v6290_v25  ;;  %v7572_v54 = vrot.slane %v13918_v48, 6  ;;  %v7574_v25 = vrot.slane %v13914_v34, 6 }
 0x39b   : > { %5741 = vrot.lane.b32.xlu1 %v5610_v14, %s11232_s30  ;;  %6132 = vrot.lane.b32.xlu0 %v6001_v24, %s11233_s24  ;;  %v6291_v38 = vadd.f32 %v6115_v12, %v5898_v36 }
 0x39c   : > { %v10977_v33 = vpop.eup %10976 }
 0x39d   : > { %10980 = vtanh.f32 %v10977_v33  ;;  %v6899_v47 = vpop.permute.xlu0 %6898 }
 0x39e   : > { %v6508_v2 = vpop.permute.xlu1 %6507  ;;  %v7076_v40 = vadd.f32 %v6899_v47, %v6683_v60 }
 0x39f   : > { %6134 = vrot.lane.b32.xlu1 %v6003_v32, %s11233_s24  ;;  %6525 = vrot.lane.b32.xlu0 %v6394_v7, %s11234_s25  ;;  %v6684_v28 = vadd.f32 %v6508_v2, %v6291_v38  ;;  %v7182_v32 = vsel %vm7126_vm15, %v7179_v27, %v7181_v42  ;;  %v7573_v7 = vsel %vm7519_vm9, %v7571_v21, %v7572_v54  ;;  %v6004_v27 = vrot.slane %v13932_v41, 2 }
 0x3a1   : > { %v10979_v10 = vpop.eup %10978  ;;  %v7292_v29 = vpop.permute.xlu0 %7291 }
 0x3a2   : > { %10982 = vtanh.f32 %v10979_v10  ;;  %v6901_v45 = vpop.permute.xlu1 %6900  ;;  %v7469_v57 = vadd.f32 %v7292_v29, %v7076_v40  ;;  %v7575_v40 = vsel %vm7519_vm9, %v7572_v54, %v7574_v25  ;;  %v6790_v54 = vrot.slane %v13932_v41, 4 }
 0x3a3   : > { %6527 = vrot.lane.b32.xlu1 %v6396_v53, %s11234_s25  ;;  %6918 = vrot.lane.b32.xlu0 %v6787_v43, %s11235_s26  ;;  %v7077_v14 = vadd.f32 %v6901_v45, %v6684_v28  ;;  %v5612_v45 = vsel %vm5554_vm4, %v5609_v30, %v5611_v22  ;;  %v5613_v43 = vrot.slane %v13928_v16, 1  ;;  %v6005_v30 = vsel %vm5947_vm2, %v6002_v44, %v6004_v27 }
 0x3a4   : > { %v6006_v28 = vrot.slane %v13928_v16, 2 }
 0x3a5   : > { %v7685_v56 = vpop.permute.xlu0 %7684  ;;  %v5614_v0 = vsel %vm5554_vm4, %v5611_v22, %v5613_v43  ;;  %v7183_v22 = vrot.slane %v13932_v41, 5 }
 0x3a6   : > { %v7294_v51 = vpop.permute.xlu1 %7293  ;;  %v7862_v13 = vadd.f32 %v7685_v56, %v7469_v57  ;;  %v6397_v56 = vrot.slane %v13932_v41, 3  ;;  %v6007_v44 = vsel %vm5947_vm2, %v6004_v27, %v6006_v28 }
 0x3a7   : > { %v10981_v12 = vpop.eup %10980  ;;  %6920 = vrot.lane.b32.xlu1 %v6789_v31, %s11235_s26  ;;  %7311 = vrot.lane.b32.xlu0 %v7180_v26, %s11236_s27  ;;  %v7470_v11 = vadd.f32 %v7294_v51, %v7077_v14  ;;  %v6399_v26 = vrot.slane %v13928_v16, 3 }
 0x3a8   : > { %v8123_v24 = vmul.f32 2.0, %v10981_v12  ;;  %v7933_v33 = vadd.f32 %v14662_v61, %v7862_v13 }
 0x3a9   : > { %v5724_v47 = vpop.permute.xlu0 %5723 }
 0x3aa   : > { %8188 = vst.msk [vmem:[%s14282_s10 + $0x60] sm:$0xff] %vm8175_vm14, %v8123_v24  ;;  %10984 = vtanh.f32 %v7933_v33  ;;  %v7687_v2 = vpop.permute.xlu1 %7686  ;;  %v5899_v13 = vadd.f32 %v13854_v17, %v5724_v47  ;;  %v6398_v24 = vsel %vm6340_vm1, %v6395_v46, %v6397_v56  ;;  %v6400_v47 = vsel %vm6340_vm1, %v6397_v56, %v6399_v26 }
 0x3ab   : > { %v7863_v60 = vadd.f32 %v7687_v2, %v7470_v11  ;;  %7313 = vrot.lane.b32.xlu1 %v7182_v32, %s11236_s27  ;;  %7704 = vrot.lane.b32.xlu0 %v7573_v7, %s11237_s5  ;;  %v6791_v2 = vsel %vm6733_vm5, %v6788_v9, %v6790_v54  ;;  %v6792_v7 = vrot.slane %v13928_v16, 4 }
 0x3ac   : > { %v10983_v8 = vpop.eup %10982 }
 0x3ad   : > { %v8124_v10 = vmul.f32 2.0, %v10983_v8  ;;  %v7934_v36 = vadd.f32 %v14662_v61, %v7863_v60  ;;  %v6117_v29 = vpop.permute.xlu0 %6116 }
 0x3ae   : > { %v5726_v53 = vpop.permute.xlu1 %5725  ;;  %v6292_v12 = vadd.f32 %v6117_v29, %v5899_v13 }
 0x3af   : > { %8189 = vst.msk [vmem:[%s14282_s10 + $0x68] sm:$0xff] %vm8175_vm14, %v8124_v10  ;;  %10986 = vtanh.f32 %v7934_v36  ;;  %7706 = vrot.lane.b32.xlu1 %v7575_v40, %s11237_s5  ;;  %5743 = vrot.lane.b32.xlu0 %v5612_v45, %s11232_s30  ;;  %v5900_v21 = vadd.f32 %v13850_v20, %v5726_v53  ;;  %v7185_v36 = vrot.slane %v13928_v16, 5  ;;  %v6793_v53 = vsel %vm6733_vm5, %v6790_v54, %v6792_v7 }
 0x3b0   : > { %v7184_v40 = vsel %vm7126_vm15, %v7181_v42, %v7183_v22  ;;  %v7576_v45 = vrot.slane %v13932_v41, 6  ;;  %v5615_v54 = vrot.slane %v13946_v52, 1 }
 0x3b1   : > { %v6510_v38 = vpop.permute.xlu0 %6509  ;;  %v7186_v42 = vsel %vm7126_vm15, %v7183_v22, %v7185_v36  ;;  %v6010_v22 = vrot.slane %v13942_v49, 2 }
 0x3b2   : > { %v6119_v57 = vpop.permute.xlu1 %6118  ;;  %v6685_v17 = vadd.f32 %v6510_v38, %v6292_v12 }
 0x3b3   : > { %5745 = vrot.lane.b32.xlu1 %v5614_v0, %s11232_s30  ;;  %6136 = vrot.lane.b32.xlu0 %v6005_v30, %s11233_s24  ;;  %v6293_v60 = vadd.f32 %v6119_v57, %v5900_v21 }
 0x3b4   : > { %v10985_v51 = vpop.eup %10984 }
 0x3b5   : > { %10988 = vtanh.f32 %v10985_v51  ;;  %v6903_v31 = vpop.permute.xlu0 %6902  ;;  %v7578_v51 = vrot.slane %v13928_v16, 6 }
 0x3b6   : > { %v6512_v14 = vpop.permute.xlu1 %6511  ;;  %v7078_v32 = vadd.f32 %v6903_v31, %v6685_v17  ;;  %v7577_v31 = vsel %vm7519_vm9, %v7574_v25, %v7576_v45  ;;  %v5616_v25 = vsel %vm5554_vm4, %v5613_v43, %v5615_v54 }
 0x3b7   : > { %6138 = vrot.lane.b32.xlu1 %v6007_v44, %s11233_s24  ;;  %6529 = vrot.lane.b32.xlu0 %v6398_v24, %s11234_s25  ;;  %v6686_v8 = vadd.f32 %v6512_v14, %v6293_v60  ;;  %v7579_v21 = vsel %vm7519_vm9, %v7576_v45, %v7578_v51  ;;  %v6401_v60 = vrot.slane %v13946_v52, 3  ;;  %v6794_v45 = vrot.slane %v13946_v52, 4 }
 0x3b9   : > { %v10987_v33 = vpop.eup %10986  ;;  %v7296_v11 = vpop.permute.xlu0 %7295 }
 0x3ba   : > { %10990 = vtanh.f32 %v10987_v33  ;;  %v6905_v46 = vpop.permute.xlu1 %6904  ;;  %v7471_v20 = vadd.f32 %v7296_v11, %v7078_v32  ;;  %v5617_v11 = vrot.slane %v13942_v49, 1 }
 0x3bb   : > { %6531 = vrot.lane.b32.xlu1 %v6400_v47, %s11234_s25  ;;  %6922 = vrot.lane.b32.xlu0 %v6791_v2, %s11235_s26  ;;  %v7079_v38 = vadd.f32 %v6905_v46, %v6686_v8  ;;  %v6008_v47 = vrot.slane %v13946_v52, 2 }
 0x3bc   : > { %v5618_v46 = vsel %vm5554_vm4, %v5615_v54, %v5617_v11 }
 0x3bd   : > { %v7689_v10 = vpop.permute.xlu0 %7688  ;;  %v6009_v43 = vsel %vm5947_vm2, %v6006_v28, %v6008_v47  ;;  %v6011_v28 = vsel %vm5947_vm2, %v6008_v47, %v6010_v22 }
 0x3be   : > { %v7864_v29 = vadd.f32 %v7689_v10, %v7471_v20  ;;  %v7298_v9 = vpop.permute.xlu1 %7297 }
 0x3bf   : > { %v10989_v27 = vpop.eup %10988  ;;  %6924 = vrot.lane.b32.xlu1 %v6793_v53, %s11235_s26  ;;  %7315 = vrot.lane.b32.xlu0 %v7184_v40, %s11236_s27  ;;  %v7472_v30 = vadd.f32 %v7298_v9, %v7079_v38  ;;  %v6402_v40 = vsel %vm6340_vm1, %v6399_v26, %v6401_v60 }
 0x3c0   : > { %v8125_v57 = vmul.f32 2.0, %v10989_v27  ;;  %v7935_v0 = vadd.f32 %v14662_v61, %v7864_v29  ;;  %v6403_v29 = vrot.slane %v13942_v49, 3 }
 0x3c1   : > { %v5728_v56 = vpop.permute.xlu0 %5727 }
 0x3c2   : > { %8190 = vst.msk [vmem:[%s14282_s10 + $0x70] sm:$0xff] %vm8175_vm14, %v8125_v57  ;;  %10992 = vtanh.f32 %v7935_v0  ;;  %v7691_v13 = vpop.permute.xlu1 %7690  ;;  %v5901_v8 = vadd.f32 %v13868_v19, %v5728_v56  ;;  %v6796_v0 = vrot.slane %v13942_v49, 4  ;;  %v6404_v26 = vsel %vm6340_vm1, %v6401_v60, %v6403_v29 }
 0x3c3   : > { %v7865_v12 = vadd.f32 %v7691_v13, %v7472_v30  ;;  %7317 = vrot.lane.b32.xlu1 %v7186_v42, %s11236_s27  ;;  %7708 = vrot.lane.b32.xlu0 %v7577_v31, %s11237_s5  ;;  %v7187_v30 = vrot.slane %v13946_v52, 5  ;;  %v6795_v42 = vsel %vm6733_vm5, %v6792_v7, %v6794_v45  ;;  %v7189_v7 = vrot.slane %v13942_v49, 5 }
 0x3c4   : > { %v10991_v14 = vpop.eup %10990 }
 0x3c5   : > { %v8126_v44 = vmul.f32 2.0, %v10991_v14  ;;  %v7936_v24 = vadd.f32 %v14662_v61, %v7865_v12  ;;  %v6121_v17 = vpop.permute.xlu0 %6120  ;;  %v6797_v14 = vsel %vm6733_vm5, %v6794_v45, %v6796_v0  ;;  %v7190_v60 = vsel %vm7126_vm15, %v7187_v30, %v7189_v7 }
 0x3c6   : > { %v5730_v33 = vpop.permute.xlu1 %5729  ;;  %v6294_v9 = vadd.f32 %v6121_v17, %v5901_v8  ;;  %v7188_v17 = vsel %vm7126_vm15, %v7185_v36, %v7187_v30  ;;  %v5619_v8 = vrot.slane %v13960_v62, 1  ;;  %v6014_v30 = vrot.slane %v13956_v5, 2 }
 0x3c7   : > { %8191 = vst.msk [vmem:[%s14282_s10 + $0x78] sm:$0xff] %vm8175_vm14, %v8126_v44  ;;  %10994 = vtanh.f32 %v7936_v24  ;;  %7710 = vrot.lane.b32.xlu1 %v7579_v21, %s11237_s5  ;;  %5747 = vrot.lane.b32.xlu0 %v5616_v25, %s11232_s30  ;;  %v5902_v38 = vadd.f32 %v13864_v63, %v5730_v33  ;;  %v7580_v33 = vrot.slane %v13946_v52, 6 }
 0x3c9   : > { %v6514_v2 = vpop.permute.xlu0 %6513 }
 0x3ca   : > { %v6123_v32 = vpop.permute.xlu1 %6122  ;;  %v6687_v19 = vadd.f32 %v6514_v2, %v6294_v9 }
 0x3cb   : > { %5749 = vrot.lane.b32.xlu1 %v5618_v46, %s11232_s30  ;;  %6140 = vrot.lane.b32.xlu0 %v6009_v43, %s11233_s24  ;;  %v6295_v31 = vadd.f32 %v6123_v32, %v5902_v38  ;;  %v7582_v43 = vrot.slane %v13942_v49, 6  ;;  %v6012_v38 = vrot.slane %v13960_v62, 2 }
 0x3cc   : > { %v10993_v20 = vpop.eup %10992 }
 0x3cd   : > { %10996 = vtanh.f32 %v10993_v20  ;;  %v6907_v10 = vpop.permute.xlu0 %6906  ;;  %v7581_v20 = vsel %vm7519_vm9, %v7578_v51, %v7580_v33  ;;  %v5620_v51 = vsel %vm5554_vm4, %v5617_v11, %v5619_v8  ;;  %v6013_v11 = vsel %vm5947_vm2, %v6010_v22, %v6012_v38 }
 0x3ce   : > { %v6516_v53 = vpop.permute.xlu1 %6515  ;;  %v7080_v56 = vadd.f32 %v6907_v10, %v6687_v19  ;;  %v7583_v19 = vsel %vm7519_vm9, %v7580_v33, %v7582_v43  ;;  %v6407_v22 = vrot.slane %v13956_v5, 3 }
 0x3cf   : > { %6142 = vrot.lane.b32.xlu1 %v6011_v28, %s11233_s24  ;;  %6533 = vrot.lane.b32.xlu0 %v6402_v40, %s11234_s25  ;;  %v6688_v54 = vadd.f32 %v6516_v53, %v6295_v31 }
 0x3d1   : > { %v10995_v27 = vpop.eup %10994  ;;  %v7300_v57 = vpop.permute.xlu0 %7299 }
 0x3d2   : > { %10998 = vtanh.f32 %v10995_v27  ;;  %v6909_v13 = vpop.permute.xlu1 %6908  ;;  %v7473_v63 = vadd.f32 %v7300_v57, %v7080_v56  ;;  %v5621_v27 = vrot.slane %v13956_v5, 1 }
 0x3d3   : > { %6535 = vrot.lane.b32.xlu1 %v6404_v26, %s11234_s25  ;;  %6926 = vrot.lane.b32.xlu0 %v6795_v42, %s11235_s26  ;;  %v7081_v25 = vadd.f32 %v6909_v13, %v6688_v54  ;;  %v6405_v26 = vrot.slane %v13960_v62, 3  ;;  %v6015_v54 = vsel %vm5947_vm2, %v6012_v38, %v6014_v30 }
 0x3d4   : > { %v5622_v13 = vsel %vm5554_vm4, %v5619_v8, %v5621_v27  ;;  %v7193_v8 = vrot.slane %v13956_v5, 5 }
 0x3d5   : > { %v7693_v12 = vpop.permute.xlu0 %7692 }
 0x3d6   : > { %v7866_v44 = vadd.f32 %v7693_v12, %v7473_v63  ;;  %v7302_v24 = vpop.permute.xlu1 %7301 }
 0x3d7   : > { %v10997_v21 = vpop.eup %10996  ;;  %6928 = vrot.lane.b32.xlu1 %v6797_v14, %s11235_s26  ;;  %7319 = vrot.lane.b32.xlu0 %v7188_v17, %s11236_s27  ;;  %v7474_v32 = vadd.f32 %v7302_v24, %v7081_v25  ;;  %v6798_v24 = vrot.slane %v13960_v62, 4  ;;  %v6800_v25 = vrot.slane %v13956_v5, 4 }
 0x3d8   : > { %v8127_v47 = vmul.f32 2.0, %v10997_v21  ;;  %v7937_v2 = vadd.f32 %v14662_v61, %v7866_v44  ;;  %v6406_v44 = vsel %vm6340_vm1, %v6403_v29, %v6405_v26 }
 0x3d9   : > { %v5732_v46 = vpop.permute.xlu0 %5731 }
 0x3da   : > { %8192 = vst.msk [vmem:[%s14282_s10 + $0x80] sm:$0xff] %vm8175_vm14, %v8127_v47  ;;  %11000 = vtanh.f32 %v7937_v2  ;;  %v7695_v36 = vpop.permute.xlu1 %7694  ;;  %v5903_v31 = vadd.f32 %v13880_v4, %v5732_v46  ;;  %v7191_v47 = vrot.slane %v13960_v62, 5  ;;  %v6799_v46 = vsel %vm6733_vm5, %v6796_v0, %v6798_v24 }
 0x3db   : > { %v7867_v10 = vadd.f32 %v7695_v36, %v7474_v32  ;;  %7321 = vrot.lane.b32.xlu1 %v7190_v60, %s11236_s27  ;;  %7712 = vrot.lane.b32.xlu0 %v7581_v20, %s11237_s5  ;;  %v6408_v32 = vsel %vm6340_vm1, %v6405_v26, %v6407_v22  ;;  %v5626_v22 = vrot.slane %v13984_v39, 1 }
 0x3dc   : > { %v10999_v9 = vpop.eup %10998  ;;  %v7192_v0 = vsel %vm7126_vm15, %v7189_v7, %v7191_v47 }
 0x3dd   : > { %v8128_v53 = vmul.f32 2.0, %v10999_v9  ;;  %v7938_v28 = vadd.f32 %v14662_v61, %v7867_v10  ;;  %v6125_v40 = vpop.permute.xlu0 %6124  ;;  %v7584_v10 = vrot.slane %v13960_v62, 6 }
 0x3de   : > { %v5734_v45 = vpop.permute.xlu1 %5733  ;;  %v6296_v12 = vadd.f32 %v6125_v40, %v5903_v31 }
 0x3df   : > { %8193 = vst.msk [vmem:[%s14282_s10 + $0x88] sm:$0xff] %vm8175_vm14, %v8128_v53  ;;  %11002 = vtanh.f32 %v7938_v28  ;;  %7714 = vrot.lane.b32.xlu1 %v7583_v19, %s11237_s5  ;;  %5751 = vrot.lane.b32.xlu0 %v5620_v51, %s11232_s30  ;;  %v5904_v33 = vadd.f32 %v13876_v18, %v5734_v45  ;;  %v6801_v28 = vsel %vm6733_vm5, %v6798_v24, %v6800_v25 }
 0x3e0   : > { %v7585_v30 = vsel %vm7519_vm9, %v7582_v43, %v7584_v10 }
 0x3e1   : > { %v6518_v57 = vpop.permute.xlu0 %6517 }
 0x3e2   : > { %v6127_v56 = vpop.permute.xlu1 %6126  ;;  %v6689_v17 = vadd.f32 %v6518_v57, %v6296_v12  ;;  %v7194_v57 = vsel %vm7126_vm15, %v7191_v47, %v7193_v8  ;;  %v6019_v47 = vrot.slane %v13984_v39, 2  ;;  %v6803_v8 = vrot.slane %v13969_v50, 4 }
 0x3e3   : > { %5753 = vrot.lane.b32.xlu1 %v5622_v13, %s11232_s30  ;;  %6144 = vrot.lane.b32.xlu0 %v6013_v11, %s11233_s24  ;;  %v6297_v36 = vadd.f32 %v6127_v56, %v5904_v33  ;;  %v7586_v56 = vrot.slane %v13956_v5, 6  ;;  %v5623_v13 = vrot.slane %v13972_v55, 1  ;;  %v5624_v11 = vrot.slane %v13969_v50, 1 }
 0x3e4   : > { %v11001_v42 = vpop.eup %11000 }
 0x3e5   : > { %11004 = vtanh.f32 %v11001_v42  ;;  %v6911_v63 = vpop.permute.xlu0 %6910  ;;  %v7587_v5 = vsel %vm7519_vm9, %v7584_v10, %v7586_v56  ;;  %v5627_v25 = vsel %vm5554_vm4, %v5624_v11, %v5626_v22  ;;  %v6412_v10 = vrot.slane %v13984_v39, 3 }
 0x3e6   : > { %v6520_v14 = vpop.permute.xlu1 %6519  ;;  %v7082_v2 = vadd.f32 %v6911_v63, %v6689_v17  ;;  %v6409_v17 = vrot.slane %v13972_v55, 3 }
 0x3e7   : > { %6146 = vrot.lane.b32.xlu1 %v6015_v54, %s11233_s24  ;;  %6537 = vrot.lane.b32.xlu0 %v6406_v44, %s11234_s25  ;;  %v6690_v60 = vadd.f32 %v6520_v14, %v6297_v36  ;;  %v6016_v54 = vrot.slane %v13972_v55, 2  ;;  %v5625_v14 = vsel %vm5554_vm4, %v5623_v13, %v5624_v11  ;;  %v6017_v44 = vrot.slane %v13969_v50, 2 }
 0x3e8   : > { %v6802_v36 = vrot.slane %v13972_v55, 4  ;;  %v7588_v13 = vrot.slane %v13972_v55, 6 }
 0x3e9   : > { %v11003_v4 = vpop.eup %11002  ;;  %v7304_v21 = vpop.permute.xlu0 %7303 }
 0x3ea   : > { %11006 = vtanh.f32 %v11003_v4  ;;  %v6913_v29 = vpop.permute.xlu1 %6912  ;;  %v7475_v18 = vadd.f32 %v7304_v21, %v7082_v2  ;;  %v6410_v4 = vrot.slane %v13969_v50, 3  ;;  %v6018_v21 = vsel %vm5947_vm2, %v6016_v54, %v6017_v44 }
 0x3eb   : > { %6539 = vrot.lane.b32.xlu1 %v6408_v32, %s11234_s25  ;;  %6930 = vrot.lane.b32.xlu0 %v6799_v46, %s11235_s26  ;;  %v7083_v45 = vadd.f32 %v6913_v29, %v6690_v60 }
 0x3ec   : > { %v6411_v46 = vsel %vm6340_vm1, %v6409_v17, %v6410_v4 }
 0x3ed   : > { %v7697_v20 = vpop.permute.xlu0 %7696 }
 0x3ee   : > { %v7868_v9 = vadd.f32 %v7697_v20, %v7475_v18  ;;  %v7306_v53 = vpop.permute.xlu1 %7305  ;;  %v6020_v20 = vsel %vm5947_vm2, %v6017_v44, %v6019_v47 }
 0x3ef   : > { %v11005_v40 = vpop.eup %11004  ;;  %6932 = vrot.lane.b32.xlu1 %v6801_v28, %s11235_s26  ;;  %7323 = vrot.lane.b32.xlu0 %v7192_v0, %s11236_s27  ;;  %v7476_v27 = vadd.f32 %v7306_v53, %v7083_v45  ;;  %v7195_v0 = vrot.slane %v13972_v55, 5  ;;  %v6805_v45 = vrot.slane %v13984_v39, 4 }
 0x3f0   : > { %v8129_v19 = vmul.f32 2.0, %v11005_v40  ;;  %v7939_v51 = vadd.f32 %v14662_v61, %v7868_v9  ;;  %v7196_v40 = vrot.slane %v13969_v50, 5 }
 0x3f1   : > { %v5736_v38 = vpop.permute.xlu0 %5735 }
 0x3f2   : > { %8194 = vst.msk [vmem:[%s14282_s10 + $0x90] sm:$0xff] %vm8175_vm14, %v8129_v19  ;;  %11008 = vtanh.f32 %v7939_v51  ;;  %v7699_v7 = vpop.permute.xlu1 %7698  ;;  %v5905_v29 = vadd.f32 %v13892_v37, %v5736_v38  ;;  %v6413_v38 = vsel %vm6340_vm1, %v6410_v4, %v6412_v10  ;;  %v7197_v56 = vsel %vm7126_vm15, %v7195_v0, %v7196_v40 }
 0x3f3   : > { %v7869_v26 = vadd.f32 %v7699_v7, %v7476_v27  ;;  %7325 = vrot.lane.b32.xlu1 %v7194_v57, %s11236_s27  ;;  %7716 = vrot.lane.b32.xlu0 %v7585_v30, %s11237_s5  ;;  %v6804_v27 = vsel %vm6733_vm5, %v6802_v36, %v6803_v8  ;;  %v6023_v0 = vrot.slane %v13998_v6, 2 }
 0x3f4   : > { %v11007_v42 = vpop.eup %11006 }
 0x3f5   : > { %v8130_v31 = vmul.f32 2.0, %v11007_v42  ;;  %v7940_v43 = vadd.f32 %v14662_v61, %v7869_v26  ;;  %v6129_v63 = vpop.permute.xlu0 %6128  ;;  %v6806_v42 = vsel %vm6733_vm5, %v6803_v8, %v6805_v45  ;;  %v5630_v8 = vrot.slane %v13998_v6, 1 }
 0x3f6   : > { %v5738_v12 = vpop.permute.xlu1 %5737  ;;  %v6298_v18 = vadd.f32 %v6129_v63, %v5905_v29 }
 0x3f7   : > { %8195 = vst.msk [vmem:[%s14282_s10 + $0x98] sm:$0xff] %vm8175_vm14, %v8130_v31  ;;  %11010 = vtanh.f32 %v7940_v43  ;;  %7718 = vrot.lane.b32.xlu1 %v7587_v5, %s11237_s5  ;;  %5755 = vrot.lane.b32.xlu0 %v5625_v14, %s11232_s30  ;;  %v5906_v53 = vadd.f32 %v13888_v1, %v5738_v12  ;;  %v7589_v31 = vrot.slane %v13969_v50, 6  ;;  %v7198_v43 = vrot.slane %v13984_v39, 5 }
 0x3f9   : > { %v6522_v24 = vpop.permute.xlu0 %6521  ;;  %v7590_v4 = vsel %vm7519_vm9, %v7588_v13, %v7589_v31 }
 0x3fa   : > { %v6131_v33 = vpop.permute.xlu1 %6130  ;;  %v6691_v37 = vadd.f32 %v6522_v24, %v6298_v18  ;;  %v5628_v24 = vrot.slane %v13981_v58, 1 }
 0x3fb   : > { %6148 = vrot.lane.b32.xlu0 %v6018_v21, %s11233_s24  ;;  %5757 = vrot.lane.b32.xlu1 %v5627_v25, %s11232_s30  ;;  %v6299_v57 = vadd.f32 %v6131_v33, %v5906_v53  ;;  %v7199_v33 = vsel %vm7126_vm15, %v7196_v40, %v7198_v43  ;;  %v7591_v21 = vrot.slane %v13984_v39, 6 }
 0x3fc   : > { %v11009_v2 = vpop.eup %11008  ;;  %v5629_v18 = vsel %vm5554_vm4, %v5626_v22, %v5628_v24 }
 0x3fd   : > { %11012 = vtanh.f32 %v11009_v2  ;;  %v6915_v32 = vpop.permute.xlu0 %6914 }
 0x3fe   : > { %v6524_v60 = vpop.permute.xlu1 %6523  ;;  %v7084_v19 = vadd.f32 %v6915_v32, %v6691_v37 }
 0x3ff   : > { %6541 = vrot.lane.b32.xlu0 %v6411_v46, %s11234_s25  ;;  %6150 = vrot.lane.b32.xlu1 %v6020_v20, %s11233_s24  ;;  %v6692_v30 = vadd.f32 %v6524_v60, %v6299_v57  ;;  %v7592_v60 = vsel %vm7519_vm9, %v7589_v31, %v7591_v21  ;;  %v6021_v20 = vrot.slane %v13981_v58, 2 }
 0x401   : > { %v11011_v9 = vpop.eup %11010  ;;  %v7308_v28 = vpop.permute.xlu0 %7307  ;;  %v6022_v22 = vsel %vm5947_vm2, %v6019_v47, %v6021_v20  ;;  %v6024_v57 = vsel %vm5947_vm2, %v6021_v20, %v6023_v0  ;;  %v7595_v20 = vrot.slane %v13998_v6, 6 }
 0x402   : > { %11014 = vtanh.f32 %v11011_v9  ;;  %v6917_v51 = vpop.permute.xlu1 %6916  ;;  %v7477_v1 = vadd.f32 %v7308_v28, %v7084_v19  ;;  %v6414_v9 = vrot.slane %v13981_v58, 3  ;;  %v5631_v28 = vsel %vm5554_vm4, %v5628_v24, %v5630_v8 }
 0x403   : > { %6934 = vrot.lane.b32.xlu0 %v6804_v27, %s11235_s26  ;;  %6543 = vrot.lane.b32.xlu1 %v6413_v38, %s11234_s25  ;;  %v7085_v54 = vadd.f32 %v6917_v51, %v6692_v30  ;;  %v6416_v30 = vrot.slane %v13998_v6, 3 }
 0x404   : > { %v6415_v27 = vsel %vm6340_vm1, %v6412_v10, %v6414_v9  ;;  %v7200_v10 = vrot.slane %v13981_v58, 5 }
 0x405   : > { %v7701_v7 = vpop.permute.xlu0 %7700 }
 0x406   : > { %v7870_v11 = vadd.f32 %v7701_v7, %v7477_v1  ;;  %v7310_v26 = vpop.permute.xlu1 %7309  ;;  %v6807_v1 = vrot.slane %v13981_v58, 4 }
 0x407   : > { %v11013_v63 = vpop.eup %11012  ;;  %7327 = vrot.lane.b32.xlu0 %v7197_v56, %s11236_s27  ;;  %6936 = vrot.lane.b32.xlu1 %v6806_v42, %s11235_s26  ;;  %v7478_v14 = vadd.f32 %v7310_v26, %v7085_v54 }
 0x408   : > { %v8131_v12 = vmul.f32 2.0, %v11013_v63  ;;  %v7941_v5 = vadd.f32 %v14662_v61, %v7870_v11  ;;  %v6809_v11 = vrot.slane %v13998_v6, 4  ;;  %v6808_v31 = vsel %vm6733_vm5, %v6805_v45, %v6807_v1 }
 0x409   : > { %v5740_v44 = vpop.permute.xlu0 %5739  ;;  %v6417_v63 = vsel %vm6340_vm1, %v6414_v9, %v6416_v30  ;;  %v7201_v45 = vsel %vm7126_vm15, %v7198_v43, %v7200_v10 }
 0x40a   : > { %8196 = vst.msk [vmem:[%s14282_s10 + $0xa0] sm:$0xff] %vm8175_vm14, %v8131_v12  ;;  %11016 = vtanh.f32 %v7941_v5  ;;  %v7703_v17 = vpop.permute.xlu1 %7702  ;;  %v5907_v19 = vadd.f32 %v13902_v15, %v5740_v44 }
 0x40b   : > { %v7871_v25 = vadd.f32 %v7703_v17, %v7478_v14  ;;  %7720 = vrot.lane.b32.xlu0 %v7590_v4, %s11237_s5  ;;  %7329 = vrot.lane.b32.xlu1 %v7199_v33, %s11236_s27  ;;  %v7593_v14 = vrot.slane %v13981_v58, 6  ;;  %v6810_v17 = vsel %vm6733_vm5, %v6807_v1, %v6809_v11  ;;  %v7202_v4 = vrot.slane %v13998_v6, 5 }
 0x40c   : > { %v11015_v2 = vpop.eup %11014 }
 0x40d   : > { %v8132_v29 = vmul.f32 2.0, %v11015_v2  ;;  %v7942_v32 = vadd.f32 %v14662_v61, %v7871_v25  ;;  %v6133_v46 = vpop.permute.xlu0 %6132  ;;  %v7594_v43 = vsel %vm7519_vm9, %v7591_v21, %v7593_v14 }
 0x40e   : > { %v5742_v36 = vpop.permute.xlu1 %5741  ;;  %v6300_v47 = vadd.f32 %v6133_v46, %v5907_v19  ;;  %v7596_v19 = vsel %vm7519_vm9, %v7593_v14, %v7595_v20 }
 0x40f   : > { %8197 = vst.msk [vmem:[%s14282_s10 + $0xa8] sm:$0xff] %vm8175_vm14, %v8132_v29  ;;  %11018 = vtanh.f32 %v7942_v32  ;;  %5759 = vrot.lane.b32.xlu0 %v5629_v18, %s11232_s30  ;;  %7722 = vrot.lane.b32.xlu1 %v7592_v60, %s11237_s5  ;;  %v5908_v56 = vadd.f32 %v13918_v48, %v5742_v36  ;;  %v7203_v18 = vsel %vm7126_vm15, %v7200_v10, %v7202_v4  ;;  %v5632_v60 = vrot.slane %v13995_v59, 1 }
 0x411   : > { %v6526_v37 = vpop.permute.xlu0 %6525 }
 0x412   : > { %v6135_v53 = vpop.permute.xlu1 %6134  ;;  %v6693_v15 = vadd.f32 %v6526_v37, %v6300_v47 }
 0x413   : > { %6152 = vrot.lane.b32.xlu0 %v6022_v22, %s11233_s24  ;;  %5761 = vrot.lane.b32.xlu1 %v5631_v28, %s11232_s30  ;;  %v6301_v54 = vadd.f32 %v6135_v53, %v5908_v56 }
 0x414   : > { %v11017_v40 = vpop.eup %11016 }
 0x415   : > { %11020 = vtanh.f32 %v11017_v40  ;;  %v6919_v51 = vpop.permute.xlu0 %6918  ;;  %v5633_v40 = vsel %vm5554_vm4, %v5630_v8, %v5632_v60 }
 0x416   : > { %v6528_v38 = vpop.permute.xlu1 %6527  ;;  %v7086_v26 = vadd.f32 %v6919_v51, %v6693_v15  ;;  %v6025_v51 = vrot.slane %v13995_v59, 2  ;;  %v6027_v15 = vrot.slane %v14012_v3, 2 }
 0x417   : > { %6545 = vrot.lane.b32.xlu0 %v6415_v27, %s11234_s25  ;;  %6154 = vrot.lane.b32.xlu1 %v6024_v57, %s11233_s24  ;;  %v6694_v12 = vadd.f32 %v6528_v38, %v6301_v54  ;;  %v5634_v27 = vrot.slane %v14012_v3, 1  ;;  %v6418_v38 = vrot.slane %v13995_v59, 3 }
 0x418   : > { %v6026_v8 = vsel %vm5947_vm2, %v6023_v0, %v6025_v51 }
 0x419   : > { %v11019_v7 = vpop.eup %11018  ;;  %v7312_v13 = vpop.permute.xlu0 %7311  ;;  %v5635_v1 = vsel %vm5554_vm4, %v5632_v60, %v5634_v27  ;;  %v6419_v10 = vsel %vm6340_vm1, %v6416_v30, %v6418_v38  ;;  %v7204_v30 = vrot.slane %v13995_v59, 5 }
 0x41a   : > { %11022 = vtanh.f32 %v11019_v7  ;;  %v6921_v42 = vpop.permute.xlu1 %6920  ;;  %v7479_v48 = vadd.f32 %v7312_v13, %v7086_v26 }
 0x41b   : > { %6938 = vrot.lane.b32.xlu0 %v6808_v31, %s11235_s26  ;;  %6547 = vrot.lane.b32.xlu1 %v6417_v63, %s11234_s25  ;;  %v7087_v25 = vadd.f32 %v6921_v42, %v6694_v12  ;;  %v6028_v42 = vsel %vm5947_vm2, %v6025_v51, %v6027_v15  ;;  %v6811_v31 = vrot.slane %v13995_v59, 4  ;;  %v6420_v63 = vrot.slane %v14012_v3, 3 }
 0x41d   : > { %v7705_v5 = vpop.permute.xlu0 %7704 }
 0x41e   : > { %v7314_v44 = vpop.permute.xlu1 %7313  ;;  %v7872_v24 = vadd.f32 %v7705_v5, %v7479_v48  ;;  %v6813_v5 = vrot.slane %v14012_v3, 4 }
 0x41f   : > { %v11021_v33 = vpop.eup %11020  ;;  %7331 = vrot.lane.b32.xlu0 %v7201_v45, %s11236_s27  ;;  %6940 = vrot.lane.b32.xlu1 %v6810_v17, %s11235_s26  ;;  %v7480_v32 = vadd.f32 %v7314_v44, %v7087_v25  ;;  %v6421_v45 = vsel %vm6340_vm1, %v6418_v38, %v6420_v63 }
 0x420   : > { %v8133_v2 = vmul.f32 2.0, %v11021_v33  ;;  %v7943_v29 = vadd.f32 %v14662_v61, %v7872_v24  ;;  %v6812_v24 = vsel %vm6733_vm5, %v6809_v11, %v6811_v31  ;;  %v7205_v11 = vsel %vm7126_vm15, %v7202_v4, %v7204_v30 }
 0x421   : > { %v5744_v46 = vpop.permute.xlu0 %5743 }
 0x422   : > { %8198 = vst.msk [vmem:[%s14282_s10 + $0xb0] sm:$0xff] %vm8175_vm14, %v8133_v2  ;;  %11024 = vtanh.f32 %v7943_v29  ;;  %v7707_v36 = vpop.permute.xlu1 %7706  ;;  %v5909_v56 = vadd.f32 %v13914_v34, %v5744_v46  ;;  %v7597_v2 = vrot.slane %v13995_v59, 6  ;;  %v6814_v46 = vsel %vm6733_vm5, %v6811_v31, %v6813_v5 }
 0x423   : > { %v7873_v37 = vadd.f32 %v7707_v36, %v7480_v32  ;;  %7724 = vrot.lane.b32.xlu0 %v7594_v43, %s11237_s5  ;;  %7333 = vrot.lane.b32.xlu1 %v7203_v18, %s11236_s27  ;;  %v7206_v43 = vrot.slane %v14012_v3, 5 }
 0x424   : > { %v11023_v9 = vpop.eup %11022 }
 0x425   : > { %v8134_v21 = vmul.f32 2.0, %v11023_v9  ;;  %v7944_v53 = vadd.f32 %v14662_v61, %v7873_v37  ;;  %v6137_v22 = vpop.permute.xlu0 %6136 }
 0x426   : > { %v5746_v28 = vpop.permute.xlu1 %5745  ;;  %v6302_v0 = vadd.f32 %v6137_v22, %v5909_v56 }
 0x427   : > { %8199 = vst.msk [vmem:[%s14282_s10 + $0xb8] sm:$0xff] %vm8175_vm14, %v8134_v21  ;;  %11026 = vtanh.f32 %v7944_v53  ;;  %5763 = vrot.lane.b32.xlu0 %v5633_v40, %s11232_s30  ;;  %7726 = vrot.lane.b32.xlu1 %v7596_v19, %s11237_s5  ;;  %v5910_v48 = vadd.f32 %v13932_v41, %v5746_v28  ;;  %v16373_v53 = vld [vmem:[#allocation15_spill] sm:$0xff]  ;;  %v7598_v28 = vsel %vm7519_vm9, %v7595_v20, %v7597_v2  ;;  %v7599_v19 = vrot.slane %v14012_v3, 6 }
 0x428   : > { %v5636_v22 = vrot.slane %v16373_v53, 1  ;;  %v7207_v40 = vsel %vm7126_vm15, %v7204_v30, %v7206_v43  ;;  %v6029_v56 = vrot.slane %v16373_v53, 2 }
 0x429   : > { %v6530_v47 = vpop.permute.xlu0 %6529 }
 0x42a   : > { %v6139_v57 = vpop.permute.xlu1 %6138  ;;  %v6695_v34 = vadd.f32 %v6530_v47, %v6302_v0  ;;  %v5637_v20 = vsel %vm5554_vm4, %v5634_v27, %v5636_v22  ;;  %v6030_v27 = vsel %vm5947_vm2, %v6027_v15, %v6029_v56 }
 0x42b   : > { %6156 = vrot.lane.b32.xlu0 %v6026_v8, %s11233_s24  ;;  %5765 = vrot.lane.b32.xlu1 %v5635_v1, %s11232_s30  ;;  %v6303_v17 = vadd.f32 %v6139_v57, %v5910_v48 }
 0x42c   : > { %v11025_v7 = vpop.eup %11024 }
 0x42d   : > { %11028 = vtanh.f32 %v11025_v7  ;;  %v6923_v13 = vpop.permute.xlu0 %6922  ;;  %v7600_v7 = vsel %vm7519_vm9, %v7597_v2, %v7599_v19 }
 0x42e   : > { %v6532_v26 = vpop.permute.xlu1 %6531  ;;  %v7088_v14 = vadd.f32 %v6923_v13, %v6695_v34  ;;  %v16374_v13 = vld [vmem:[#allocation19_spill] sm:$0xff] }
 0x42f   : > { %6549 = vrot.lane.b32.xlu0 %v6419_v10, %s11234_s25  ;;  %6158 = vrot.lane.b32.xlu1 %v6028_v42, %s11233_s24  ;;  %v6696_v33 = vadd.f32 %v6532_v26, %v6303_v17  ;;  %v5638_v10 = vrot.slane %v16374_v13, 1  ;;  %v6422_v42 = vrot.slane %v16373_v53, 3  ;;  %v6031_v31 = vrot.slane %v16374_v13, 2 }
 0x431   : > { %v11027_v54 = vpop.eup %11026  ;;  %v7316_v12 = vpop.permute.xlu0 %7315  ;;  %v5639_v26 = vsel %vm5554_vm4, %v5636_v22, %v5638_v10  ;;  %v6423_v15 = vsel %vm6340_vm1, %v6420_v63, %v6422_v42 }
 0x432   : > { %11030 = vtanh.f32 %v11027_v54  ;;  %v6925_v44 = vpop.permute.xlu1 %6924  ;;  %v7481_v41 = vadd.f32 %v7316_v12, %v7088_v14  ;;  %v6815_v12 = vrot.slane %v16373_v53, 4 }
 0x433   : > { %6942 = vrot.lane.b32.xlu0 %v6812_v24, %s11235_s26  ;;  %6551 = vrot.lane.b32.xlu1 %v6421_v45, %s11234_s25  ;;  %v7089_v18 = vadd.f32 %v6925_v44, %v6696_v33  ;;  %v6032_v44 = vsel %vm5947_vm2, %v6029_v56, %v6031_v31  ;;  %v6424_v24 = vrot.slane %v16374_v13, 3 }
 0x434   : > { %v6816_v33 = vsel %vm6733_vm5, %v6813_v5, %v6815_v12 }
 0x435   : > { %v7709_v25 = vpop.permute.xlu0 %7708 }
 0x436   : > { %v7318_v29 = vpop.permute.xlu1 %7317  ;;  %v7874_v32 = vadd.f32 %v7709_v25, %v7481_v41  ;;  %v7208_v25 = vrot.slane %v16373_v53, 5 }
 0x437   : > { %v11029_v36 = vpop.eup %11028  ;;  %7335 = vrot.lane.b32.xlu0 %v7205_v11, %s11236_s27  ;;  %6944 = vrot.lane.b32.xlu1 %v6814_v46, %s11235_s26  ;;  %v7482_v9 = vadd.f32 %v7318_v29, %v7089_v18  ;;  %v6425_v29 = vsel %vm6340_vm1, %v6422_v42, %v6424_v24  ;;  %v7601_v18 = vrot.slane %v16373_v53, 6 }
 0x438   : > { %v8135_v60 = vmul.f32 2.0, %v11029_v36  ;;  %v7945_v37 = vadd.f32 %v14662_v61, %v7874_v32  ;;  %v6817_v32 = vrot.slane %v16374_v13, 4 }
 0x439   : > { %v5748_v21 = vpop.permute.xlu0 %5747 }
 0x43a   : > { %8200 = vst.msk [vmem:[%s14282_s10 + $0xc0] sm:$0xff] %vm8175_vm14, %v8135_v60  ;;  %11032 = vtanh.f32 %v7945_v37  ;;  %v7711_v4 = vpop.permute.xlu1 %7710  ;;  %v5911_v54 = vadd.f32 %v13928_v16, %v5748_v21  ;;  %v7209_v37 = vsel %vm7126_vm15, %v7206_v43, %v7208_v25  ;;  %v7210_v21 = vrot.slane %v16374_v13, 5 }
 0x43b   : > { %v7875_v51 = vadd.f32 %v7711_v4, %v7482_v9  ;;  %7728 = vrot.lane.b32.xlu0 %v7598_v28, %s11237_s5  ;;  %7337 = vrot.lane.b32.xlu1 %v7207_v40, %s11236_s27  ;;  %v6818_v9 = vsel %vm6733_vm5, %v6815_v12, %v6817_v32  ;;  %v15116_v40 = vld [vmem:[%s15951_s2] ss:$0 sm:$0xff] }
 0x43c   : > { %v11031_v47 = vpop.eup %11030 }
 0x43d   : > { %v8136_v38 = vmul.f32 2.0, %v11031_v47  ;;  %v7946_v57 = vadd.f32 %v14662_v61, %v7875_v51  ;;  %v6141_v8 = vpop.permute.xlu0 %6140 }
 0x43e   : > { %v5750_v1 = vpop.permute.xlu1 %5749  ;;  %v6304_v30 = vadd.f32 %v6141_v8, %v5911_v54  ;;  %v7602_v8 = vsel %vm7519_vm9, %v7599_v19, %v7601_v18 }
 0x43f   : > { %8201 = vst.msk [vmem:[%s14282_s10 + $0xc8] sm:$0xff] %vm8175_vm14, %v8136_v38  ;;  %11034 = vtanh.f32 %v7946_v57  ;;  %5767 = vrot.lane.b32.xlu0 %v5637_v20, %s11232_s30  ;;  %7730 = vrot.lane.b32.xlu1 %v7600_v7, %s11237_s5  ;;  %v5912_v17 = vadd.f32 %v13946_v52, %v5750_v1  ;;  %v7603_v38 = vrot.slane %v16374_v13, 6  ;;  %v7211_v1 = vsel %vm7126_vm15, %v7208_v25, %v7210_v21  ;;  %v16375_v20 = vld [vmem:[#allocation39_spill] sm:$0xff]  ;;  %v16376_v13 = vld [vmem:[#allocation16_spill] sm:$0xff] }
 0x440   : > { %v5641_v7 = vrot.slane %v16375_v20, 1  ;;  %v6033_v12 = vrot.slane %v16376_v13, 2 }
 0x441   : > { %v6534_v61 = vpop.permute.xlu0 %6533  ;;  %v7604_v19 = vsel %vm7519_vm9, %v7601_v18, %v7603_v38 }
 0x442   : > { %v6143_v0 = vpop.permute.xlu1 %6142  ;;  %v6697_v45 = vadd.f32 %v6534_v61, %v6304_v30  ;;  %v5640_v61 = vrot.slane %v16376_v13, 1 }
 0x443   : > { %6160 = vrot.lane.b32.xlu0 %v6030_v27, %s11233_s24  ;;  %5769 = vrot.lane.b32.xlu1 %v5639_v26, %s11232_s30  ;;  %v6305_v11 = vadd.f32 %v6143_v0, %v5912_v17 }
 0x444   : > { %v11033_v34 = vpop.eup %11032  ;;  %v5642_v31 = vsel %vm5554_vm4, %v5640_v61, %v5641_v7 }
 0x445   : > { %11036 = vtanh.f32 %v11033_v34  ;;  %v6927_v48 = vpop.permute.xlu0 %6926  ;;  %v16377_v34 = vld [vmem:[#allocation21_spill] sm:$0xff] }
 0x446   : > { %v6536_v14 = vpop.permute.xlu1 %6535  ;;  %v7090_v63 = vadd.f32 %v6927_v48, %v6697_v45  ;;  %v5643_v54 = vrot.slane %v16377_v34, 1  ;;  %v6034_v48 = vrot.slane %v16375_v20, 2  ;;  %v6036_v24 = vrot.slane %v16377_v34, 2 }
 0x447   : > { %6553 = vrot.lane.b32.xlu0 %v6423_v15, %s11234_s25  ;;  %6162 = vrot.lane.b32.xlu1 %v6032_v44, %s11233_s24  ;;  %v6698_v46 = vadd.f32 %v6536_v14, %v6305_v11  ;;  %v6427_v45 = vrot.slane %v16375_v20, 3  ;;  %v6429_v25 = vrot.slane %v16377_v34, 3  ;;  %v6820_v11 = vrot.slane %v16375_v20, 4 }
 0x448   : > { %v5644_v15 = vsel %vm5554_vm4, %v5641_v7, %v5643_v54  ;;  %v6035_v44 = vsel %vm5947_vm2, %v6033_v12, %v6034_v48  ;;  %v7606_v7 = vrot.slane %v16375_v20, 6 }
 0x449   : > { %v11035_v16 = vpop.eup %11034  ;;  %v7320_v41 = vpop.permute.xlu0 %7319 }
 0x44a   : > { %11038 = vtanh.f32 %v11035_v16  ;;  %v6929_v2 = vpop.permute.xlu1 %6928  ;;  %v7483_v52 = vadd.f32 %v7320_v41, %v7090_v63  ;;  %v6426_v41 = vrot.slane %v16376_v13, 3 }
 0x44b   : > { %6946 = vrot.lane.b32.xlu0 %v6816_v33, %s11235_s26  ;;  %6555 = vrot.lane.b32.xlu1 %v6425_v29, %s11234_s25  ;;  %v7091_v4 = vadd.f32 %v6929_v2, %v6698_v46  ;;  %v6037_v29 = vsel %vm5947_vm2, %v6034_v48, %v6036_v24 }
 0x44c   : > { %v6428_v32 = vsel %vm6340_vm1, %v6426_v41, %v6427_v45 }
 0x44d   : > { %v7713_v36 = vpop.permute.xlu0 %7712 }
 0x44e   : > { %v7322_v5 = vpop.permute.xlu1 %7321  ;;  %v7876_v60 = vadd.f32 %v7713_v36, %v7483_v52  ;;  %v6819_v52 = vrot.slane %v16376_v13, 4 }
 0x44f   : > { %v11037_v22 = vpop.eup %11036  ;;  %7339 = vrot.lane.b32.xlu0 %v7209_v37, %s11236_s27  ;;  %6948 = vrot.lane.b32.xlu1 %v6818_v9, %s11235_s26  ;;  %v7484_v47 = vadd.f32 %v7322_v5, %v7091_v4  ;;  %v6430_v5 = vsel %vm6340_vm1, %v6427_v45, %v6429_v25 }
 0x450   : > { %v8137_v28 = vmul.f32 2.0, %v11037_v22  ;;  %v7947_v51 = vadd.f32 %v15116_v40, %v7876_v60  ;;  %v6822_v60 = vrot.slane %v16377_v34, 4  ;;  %v6821_v21 = vsel %vm6733_vm5, %v6819_v52, %v6820_v11 }
 0x451   : > { %v5752_v43 = vpop.permute.xlu0 %5751  ;;  %v7213_v22 = vrot.slane %v16375_v20, 5 }
 0x452   : > { %8202 = vst.msk [vmem:[%s14282_s10 + $0xd0] sm:$0xff] %vm8175_vm14, %v8137_v28  ;;  %11040 = vtanh.f32 %v7947_v51  ;;  %v7715_v57 = vpop.permute.xlu1 %7714  ;;  %v5913_v17 = vadd.f32 %v13942_v49, %v5752_v43  ;;  %v7212_v28 = vrot.slane %v16376_v13, 5  ;;  %v6823_v43 = vsel %vm6733_vm5, %v6820_v11, %v6822_v60 }
 0x453   : > { %v7877_v56 = vadd.f32 %v7715_v57, %v7484_v47  ;;  %7732 = vrot.lane.b32.xlu0 %v7602_v8, %s11237_s5  ;;  %7341 = vrot.lane.b32.xlu1 %v7211_v1, %s11236_s27  ;;  %v7215_v1 = vrot.slane %v16377_v34, 5 }
 0x454   : > { %v11039_v10 = vpop.eup %11038  ;;  %v7214_v8 = vsel %vm7126_vm15, %v7212_v28, %v7213_v22 }
 0x455   : > { %v8138_v0 = vmul.f32 2.0, %v11039_v10  ;;  %v7948_v27 = vadd.f32 %v15116_v40, %v7877_v56  ;;  %v6145_v26 = vpop.permute.xlu0 %6144  ;;  %v7216_v48 = vsel %vm7126_vm15, %v7213_v22, %v7215_v1 }
 0x456   : > { %v5754_v42 = vpop.permute.xlu1 %5753  ;;  %v6306_v63 = vadd.f32 %v6145_v26, %v5913_v17 }
 0x457   : > { %8203 = vst.msk [vmem:[%s14282_s10 + $0xd8] sm:$0xff] %vm8175_vm14, %v8138_v0  ;;  %11042 = vtanh.f32 %v7948_v27  ;;  %7734 = vrot.lane.b32.xlu1 %v7604_v19, %s11237_s5  ;;  %5771 = vrot.lane.b32.xlu0 %v5642_v31, %s11232_s30  ;;  %v5914_v36 = vadd.f32 %v13960_v62, %v5754_v42  ;;  %v7605_v27 = vrot.slane %v16376_v13, 6  ;;  %v7608_v19 = vrot.slane %v16377_v34, 6 }
 0x459   : > { %v6538_v30 = vpop.permute.xlu0 %6537  ;;  %v7607_v12 = vsel %vm7519_vm9, %v7605_v27, %v7606_v7 }
 0x45a   : > { %v6147_v14 = vpop.permute.xlu1 %6146  ;;  %v6699_v49 = vadd.f32 %v6538_v30, %v6306_v63  ;;  %v16378_v30 = vld [vmem:[#allocation41_spill] sm:$0xff] }
 0x45b   : > { %5773 = vrot.lane.b32.xlu1 %v5644_v15, %s11232_s30  ;;  %6164 = vrot.lane.b32.xlu0 %v6035_v44, %s11233_s24  ;;  %v6307_v4 = vadd.f32 %v6147_v14, %v5914_v36  ;;  %v5645_v14 = vrot.slane %v16378_v30, 1  ;;  %v6431_v36 = vrot.slane %v16378_v30, 3 }
 0x45c   : > { %v11041_v16 = vpop.eup %11040 }
 0x45d   : > { %11044 = vtanh.f32 %v11041_v16  ;;  %v6931_v33 = vpop.permute.xlu0 %6930  ;;  %v5646_v63 = vsel %vm5554_vm4, %v5643_v54, %v5645_v14 }
 0x45e   : > { %v6540_v2 = vpop.permute.xlu1 %6539  ;;  %v7092_v37 = vadd.f32 %v6931_v33, %v6699_v49  ;;  %v7609_v33 = vsel %vm7519_vm9, %v7606_v7, %v7608_v19 }
 0x45f   : > { %6166 = vrot.lane.b32.xlu1 %v6037_v29, %s11233_s24  ;;  %6557 = vrot.lane.b32.xlu0 %v6428_v32, %s11234_s25  ;;  %v6700_v51 = vadd.f32 %v6540_v2, %v6307_v4  ;;  %v16379_v2 = vld [vmem:[#allocation40_spill] sm:$0xff]  ;;  %v6038_v32 = vrot.slane %v16378_v30, 2 }
 0x460   : > { %v5647_v29 = vrot.slane %v16379_v2, 1  ;;  %v6040_v49 = vrot.slane %v16379_v2, 2  ;;  %v6433_v4 = vrot.slane %v16379_v2, 3 }
 0x461   : > { %v11043_v46 = vpop.eup %11042  ;;  %v7324_v18 = vpop.permute.xlu0 %7323  ;;  %v6039_v54 = vsel %vm5947_vm2, %v6036_v24, %v6038_v32  ;;  %v6432_v24 = vsel %vm6340_vm1, %v6429_v25, %v6431_v36 }
 0x462   : > { %11046 = vtanh.f32 %v11043_v46  ;;  %v6933_v9 = vpop.permute.xlu1 %6932  ;;  %v7485_v62 = vadd.f32 %v7324_v18, %v7092_v37  ;;  %v5648_v46 = vsel %vm5554_vm4, %v5645_v14, %v5647_v29 }
 0x463   : > { %6559 = vrot.lane.b32.xlu1 %v6430_v5, %s11234_s25  ;;  %6950 = vrot.lane.b32.xlu0 %v6821_v21, %s11235_s26  ;;  %v7093_v10 = vadd.f32 %v6933_v9, %v6700_v51  ;;  %v6041_v9 = vsel %vm5947_vm2, %v6038_v32, %v6040_v49 }
 0x465   : > { %v7717_v47 = vpop.permute.xlu0 %7716 }
 0x466   : > { %v7326_v38 = vpop.permute.xlu1 %7325  ;;  %v7878_v57 = vadd.f32 %v7717_v47, %v7485_v62  ;;  %v6824_v62 = vrot.slane %v16378_v30, 4 }
 0x467   : > { %v11045_v56 = vpop.eup %11044  ;;  %6952 = vrot.lane.b32.xlu1 %v6823_v43, %s11235_s26  ;;  %7343 = vrot.lane.b32.xlu0 %v7214_v8, %s11236_s27  ;;  %v7486_v26 = vadd.f32 %v7326_v38, %v7093_v10  ;;  %v6826_v43 = vrot.slane %v16379_v2, 4  ;;  %v7217_v38 = vrot.slane %v16378_v30, 5  ;;  %v6434_v8 = vsel %vm6340_vm1, %v6431_v36, %v6433_v4 }
 0x468   : > { %v8139_v61 = vmul.f32 2.0, %v11045_v56  ;;  %v7949_v0 = vadd.f32 %v15116_v40, %v7878_v57  ;;  %v6825_v7 = vsel %vm6733_vm5, %v6822_v60, %v6824_v62 }
 0x469   : > { %v5756_v42 = vpop.permute.xlu0 %5755  ;;  %v7218_v60 = vsel %vm7126_vm15, %v7215_v1, %v7217_v38 }
 0x46a   : > { %8204 = vst.msk [vmem:[%s14282_s10 + $0xe0] sm:$0xff] %vm8175_vm14, %v8139_v61  ;;  %11048 = vtanh.f32 %v7949_v0  ;;  %v7719_v31 = vpop.permute.xlu1 %7718  ;;  %v5915_v5 = vadd.f32 %v13972_v55, %v5756_v42  ;;  %v7219_v0 = vrot.slane %v16379_v2, 5  ;;  %v6827_v42 = vsel %vm6733_vm5, %v6824_v62, %v6826_v43 }
 0x46b   : > { %v7879_v15 = vadd.f32 %v7719_v31, %v7486_v26  ;;  %7345 = vrot.lane.b32.xlu1 %v7216_v48, %s11236_s27  ;;  %7736 = vrot.lane.b32.xlu0 %v7607_v12, %s11237_s5  ;;  %v7610_v31 = vrot.slane %v16378_v30, 6 }
 0x46c   : > { %v11047_v44 = vpop.eup %11046  ;;  %v7220_v1 = vsel %vm7126_vm15, %v7217_v38, %v7219_v0 }
 0x46d   : > { %v8140_v45 = vmul.f32 2.0, %v11047_v44  ;;  %v7950_v16 = vadd.f32 %v15116_v40, %v7879_v15  ;;  %v6149_v17 = vpop.permute.xlu0 %6148 }
 0x46e   : > { %v5758_v41 = vpop.permute.xlu1 %5757  ;;  %v6308_v21 = vadd.f32 %v6149_v17, %v5915_v5  ;;  %v16381_v5 = vld [vmem:[#allocation42_spill] sm:$0xff] }
 0x46f   : > { %8205 = vst.msk [vmem:[%s14282_s10 + $0xe8] sm:$0xff] %vm8175_vm14, %v8140_v45  ;;  %11050 = vtanh.f32 %v7950_v16  ;;  %7738 = vrot.lane.b32.xlu1 %v7609_v33, %s11237_s5  ;;  %5775 = vrot.lane.b32.xlu0 %v5646_v63, %s11232_s30  ;;  %v5916_v51 = vadd.f32 %v13969_v50, %v5758_v41  ;;  %v7612_v16 = vrot.slane %v16379_v2, 6  ;;  %v7611_v41 = vsel %vm7519_vm9, %v7608_v19, %v7610_v31  ;;  %v16380_v33 = vld [vmem:[#allocation43_spill] sm:$0xff] }
 0x470   : > { %v5649_v63 = vrot.slane %v16380_v33, 1 }
 0x471   : > { %v6542_v11 = vpop.permute.xlu0 %6541 }
 0x472   : > { %v6151_v52 = vpop.permute.xlu1 %6150  ;;  %v6701_v55 = vadd.f32 %v6542_v11, %v6308_v21  ;;  %v5650_v19 = vsel %vm5554_vm4, %v5647_v29, %v5649_v63 }
 0x473   : > { %5777 = vrot.lane.b32.xlu1 %v5648_v46, %s11232_s30  ;;  %6168 = vrot.lane.b32.xlu0 %v6039_v54, %s11233_s24  ;;  %v6309_v56 = vadd.f32 %v6151_v52, %v5916_v51 }
 0x474   : > { %v11049_v18 = vpop.eup %11048 }
 0x475   : > { %11052 = vtanh.f32 %v11049_v18  ;;  %v6935_v37 = vpop.permute.xlu0 %6934  ;;  %v7613_v18 = vsel %vm7519_vm9, %v7610_v31, %v7612_v16 }
 0x476   : > { %v6544_v22 = vpop.permute.xlu1 %6543  ;;  %v7094_v57 = vadd.f32 %v6935_v37, %v6701_v55  ;;  %v5651_v37 = vrot.slane %v16381_v5, 1  ;;  %v6435_v55 = vrot.slane %v16380_v33, 3 }
 0x477   : > { %6170 = vrot.lane.b32.xlu1 %v6041_v9, %s11233_s24  ;;  %6561 = vrot.lane.b32.xlu0 %v6432_v24, %s11234_s25  ;;  %v6702_v10 = vadd.f32 %v6544_v22, %v6309_v56  ;;  %v6042_v9 = vrot.slane %v16380_v33, 2  ;;  %v6044_v22 = vrot.slane %v16381_v5, 2 }
 0x478   : > { %v5652_v62 = vsel %vm5554_vm4, %v5649_v63, %v5651_v37 }
 0x479   : > { %v11051_v28 = vpop.eup %11050  ;;  %v7328_v47 = vpop.permute.xlu0 %7327  ;;  %v6043_v29 = vsel %vm5947_vm2, %v6040_v49, %v6042_v9  ;;  %v6045_v38 = vsel %vm5947_vm2, %v6042_v9, %v6044_v22  ;;  %v6436_v49 = vsel %vm6340_vm1, %v6433_v4, %v6435_v55 }
 0x47a   : > { %11054 = vtanh.f32 %v11051_v28  ;;  %v6937_v25 = vpop.permute.xlu1 %6936  ;;  %v7487_v50 = vadd.f32 %v7328_v47, %v7094_v57 }
 0x47b   : > { %6563 = vrot.lane.b32.xlu1 %v6434_v8, %s11234_s25  ;;  %6954 = vrot.lane.b32.xlu0 %v6825_v7, %s11235_s26  ;;  %v7095_v12 = vadd.f32 %v6937_v25, %v6702_v10  ;;  %v6437_v8 = vrot.slane %v16381_v5, 3  ;;  %v6828_v7 = vrot.slane %v16380_v33, 4 }
 0x47d   : > { %v7721_v61 = vpop.permute.xlu0 %7720 }
 0x47e   : > { %v7880_v27 = vadd.f32 %v7721_v61, %v7487_v50  ;;  %v7330_v26 = vpop.permute.xlu1 %7329  ;;  %v6830_v61 = vrot.slane %v16381_v5, 4 }
 0x47f   : > { %v11053_v48 = vpop.eup %11052  ;;  %6956 = vrot.lane.b32.xlu1 %v6827_v42, %s11235_s26  ;;  %7347 = vrot.lane.b32.xlu0 %v7218_v60, %s11236_s27  ;;  %v7488_v44 = vadd.f32 %v7330_v26, %v7095_v12  ;;  %v6438_v42 = vsel %vm6340_vm1, %v6435_v55, %v6437_v8  ;;  %v6829_v60 = vsel %vm6733_vm5, %v6826_v43, %v6828_v7 }
 0x480   : > { %v8141_v14 = vmul.f32 2.0, %v11053_v48  ;;  %v7951_v15 = vadd.f32 %v15116_v40, %v7880_v27  ;;  %v7221_v27 = vrot.slane %v16380_v33, 5 }
 0x481   : > { %v5760_v45 = vpop.permute.xlu0 %5759 }
 0x482   : > { %8206 = vst.msk [vmem:[%s14282_s10 + $0xf0] sm:$0xff] %vm8175_vm14, %v8141_v14  ;;  %11056 = vtanh.f32 %v7951_v15  ;;  %v7723_v17 = vpop.permute.xlu1 %7722  ;;  %v5917_v51 = vadd.f32 %v13984_v39, %v5760_v45  ;;  %v7223_v14 = vrot.slane %v16381_v5, 5  ;;  %v6831_v45 = vsel %vm6733_vm5, %v6828_v7, %v6830_v61 }
 0x483   : > { %v7881_v32 = vadd.f32 %v7723_v17, %v7488_v44  ;;  %7349 = vrot.lane.b32.xlu1 %v7220_v1, %s11236_s27  ;;  %7740 = vrot.lane.b32.xlu0 %v7611_v41, %s11237_s5  ;;  %v7222_v43 = vsel %vm7126_vm15, %v7219_v0, %v7221_v27  ;;  %v7614_v17 = vrot.slane %v16380_v33, 6 }
 0x484   : > { %v11055_v11 = vpop.eup %11054 }
 0x485   : > { %v8142_v52 = vmul.f32 2.0, %v11055_v11  ;;  %v7952_v46 = vadd.f32 %v15116_v40, %v7881_v32  ;;  %v6153_v54 = vpop.permute.xlu0 %6152 }
 0x486   : > { %v5762_v36 = vpop.permute.xlu1 %5761  ;;  %v6310_v57 = vadd.f32 %v6153_v54, %v5917_v51  ;;  %v7615_v54 = vsel %vm7519_vm9, %v7612_v16, %v7614_v17  ;;  %v16383_v51 = vld [vmem:[#allocation44_spill] sm:$0xff] }
 0x487   : > { %8207 = vst.msk [vmem:[%s14282_s10 + $0xf8] sm:$0xff] %vm8175_vm14, %v8142_v52  ;;  %11058 = vtanh.f32 %v7952_v46  ;;  %7742 = vrot.lane.b32.xlu1 %v7613_v18, %s11237_s5  ;;  %5779 = vrot.lane.b32.xlu0 %v5650_v19, %s11232_s30  ;;  %v5918_v50 = vadd.f32 %v13981_v58, %v5762_v36  ;;  %v7224_v46 = vsel %vm7126_vm15, %v7221_v27, %v7223_v14  ;;  %v7616_v36 = vrot.slane %v16381_v5, 6  ;;  %v16382_v18 = vld [vmem:[#allocation45_spill] sm:$0xff] }
 0x488   : > { %v5653_v19 = vrot.slane %v16382_v18, 1  ;;  %v6441_v27 = vrot.slane %v16383_v51, 3 }
 0x489   : > { %v6546_v21 = vpop.permute.xlu0 %6545 }
 0x48a   : > { %v6155_v24 = vpop.permute.xlu1 %6154  ;;  %v6703_v39 = vadd.f32 %v6546_v21, %v6310_v57  ;;  %v5654_v16 = vsel %vm5554_vm4, %v5651_v37, %v5653_v19  ;;  %v6048_v37 = vrot.slane %v16383_v51, 2 }
 0x48b   : > { %5781 = vrot.lane.b32.xlu1 %v5652_v62, %s11232_s30  ;;  %6172 = vrot.lane.b32.xlu0 %v6043_v29, %s11233_s24  ;;  %v6311_v31 = vadd.f32 %v6155_v24, %v5918_v50 }
 0x48c   : > { %v11057_v28 = vpop.eup %11056 }
 0x48d   : > { %11060 = vtanh.f32 %v11057_v28  ;;  %v6939_v47 = vpop.permute.xlu0 %6938  ;;  %v7617_v28 = vsel %vm7519_vm9, %v7614_v17, %v7616_v36 }
 0x48e   : > { %v6548_v25 = vpop.permute.xlu1 %6547  ;;  %v7096_v26 = vadd.f32 %v6939_v47, %v6703_v39  ;;  %v5655_v47 = vrot.slane %v16383_v51, 1  ;;  %v6439_v39 = vrot.slane %v16382_v18, 3 }
 0x48f   : > { %6174 = vrot.lane.b32.xlu1 %v6045_v38, %s11233_s24  ;;  %6565 = vrot.lane.b32.xlu0 %v6436_v49, %s11234_s25  ;;  %v6704_v48 = vadd.f32 %v6548_v25, %v6311_v31  ;;  %v6046_v38 = vrot.slane %v16382_v18, 2 }
 0x490   : > { %v5656_v49 = vsel %vm5554_vm4, %v5653_v19, %v5655_v47  ;;  %v16385_v47 = vld [vmem:[#allocation46_spill] sm:$0xff] }
 0x491   : > { %v11059_v56 = vpop.eup %11058  ;;  %v7332_v10 = vpop.permute.xlu0 %7331  ;;  %v6047_v7 = vsel %vm5947_vm2, %v6044_v22, %v6046_v38  ;;  %v6049_v22 = vsel %vm5947_vm2, %v6046_v38, %v6048_v37  ;;  %v5658_v38 = vrot.slane %v16385_v47, 1 }
 0x492   : > { %11062 = vtanh.f32 %v11059_v56  ;;  %v6941_v4 = vpop.permute.xlu1 %6940  ;;  %v7489_v58 = vadd.f32 %v7332_v10, %v7096_v26  ;;  %v6832_v26 = vrot.slane %v16382_v18, 4 }
 0x493   : > { %6567 = vrot.lane.b32.xlu1 %v6438_v42, %s11234_s25  ;;  %6958 = vrot.lane.b32.xlu0 %v6829_v60, %s11235_s26  ;;  %v7097_v41 = vadd.f32 %v6941_v4, %v6704_v48  ;;  %v6440_v60 = vsel %vm6340_vm1, %v6437_v8, %v6439_v39  ;;  %v6834_v8 = vrot.slane %v16383_v51, 4 }
 0x495   : > { %v7725_v12 = vpop.permute.xlu0 %7724 }
 0x496   : > { %v7882_v15 = vadd.f32 %v7725_v12, %v7489_v58  ;;  %v7334_v44 = vpop.permute.xlu1 %7333  ;;  %v6442_v12 = vsel %vm6340_vm1, %v6439_v39, %v6441_v27 }
 0x497   : > { %v11061_v1 = vpop.eup %11060  ;;  %6960 = vrot.lane.b32.xlu1 %v6831_v45, %s11235_s26  ;;  %7351 = vrot.lane.b32.xlu0 %v7222_v43, %s11236_s27  ;;  %v7490_v11 = vadd.f32 %v7334_v44, %v7097_v41  ;;  %v7225_v43 = vrot.slane %v16382_v18, 5 }
 0x498   : > { %v8143_v63 = vmul.f32 2.0, %v11061_v1  ;;  %v7953_v32 = vadd.f32 %v15116_v40, %v7882_v15  ;;  %v6833_v15 = vsel %vm6733_vm5, %v6830_v61, %v6832_v26 }
 0x499   : > { %v5764_v52 = vpop.permute.xlu0 %5763 }
 0x49a   : > { %8208 = vst.msk [vmem:[%s14282_s10 + $0x100] sm:$0xff] %vm8175_vm14, %v8143_v63  ;;  %11064 = vtanh.f32 %v7953_v32  ;;  %v7727_v0 = vpop.permute.xlu1 %7726  ;;  %v5919_v50 = vadd.f32 %v13998_v6, %v5764_v52  ;;  %v7227_v63 = vrot.slane %v16383_v51, 5  ;;  %v7226_v52 = vsel %vm7126_vm15, %v7223_v14, %v7225_v43 }
 0x49b   : > { %v7883_v9 = vadd.f32 %v7727_v0, %v7490_v11  ;;  %7353 = vrot.lane.b32.xlu1 %v7224_v46, %s11236_s27  ;;  %7744 = vrot.lane.b32.xlu0 %v7615_v54, %s11237_s5  ;;  %v6835_v11 = vsel %vm6733_vm5, %v6832_v26, %v6834_v8  ;;  %v7618_v46 = vrot.slane %v16382_v18, 6 }
 0x49c   : > { %v11063_v21 = vpop.eup %11062 }
 0x49d   : > { %v8144_v24 = vmul.f32 2.0, %v11063_v21  ;;  %v7954_v62 = vadd.f32 %v15116_v40, %v7883_v9  ;;  %v6157_v29 = vpop.permute.xlu0 %6156 }
 0x49e   : > { %v5766_v55 = vpop.permute.xlu1 %5765  ;;  %v6312_v4 = vadd.f32 %v6157_v29, %v5919_v50  ;;  %v7620_v29 = vrot.slane %v16383_v51, 6  ;;  %v6051_v50 = vrot.slane %v16385_v47, 2 }
 0x49f   : > { %8209 = vst.msk [vmem:[%s14282_s10 + $0x108] sm:$0xff] %vm8175_vm14, %v8144_v24  ;;  %11066 = vtanh.f32 %v7954_v62  ;;  %7746 = vrot.lane.b32.xlu1 %v7617_v28, %s11237_s5  ;;  %5783 = vrot.lane.b32.xlu0 %v5654_v16, %s11232_s30  ;;  %v5920_v58 = vadd.f32 %v13995_v59, %v5766_v55  ;;  %v7228_v62 = vsel %vm7126_vm15, %v7225_v43, %v7227_v63  ;;  %v16384_v28 = vld [vmem:[#allocation47_spill] sm:$0xff] }
 0x4a0   : > { %v7619_v55 = vsel %vm7519_vm9, %v7616_v36, %v7618_v46  ;;  %v5657_v16 = vrot.slane %v16384_v28, 1  ;;  %v7621_v37 = vsel %vm7519_vm9, %v7618_v46, %v7620_v29 }
 0x4a1   : > { %v6550_v57 = vpop.permute.xlu0 %6549 }
 0x4a2   : > { %v6159_v25 = vpop.permute.xlu1 %6158  ;;  %v6705_v31 = vadd.f32 %v6550_v57, %v6312_v4  ;;  %v5659_v36 = vsel %vm5554_vm4, %v5657_v16, %v5658_v38  ;;  %v6443_v4 = vrot.slane %v16384_v28, 3  ;;  %v7623_v16 = vrot.slane %v16385_v47, 6 }
 0x4a3   : > { %5785 = vrot.lane.b32.xlu1 %v5656_v49, %s11232_s30  ;;  %6176 = vrot.lane.b32.xlu0 %v6047_v7, %s11233_s24  ;;  %v6313_v17 = vadd.f32 %v6159_v25, %v5920_v58 }
 0x4a4   : > { %v11065_v56 = vpop.eup %11064 }
 0x4a5   : > { %11068 = vtanh.f32 %v11065_v56  ;;  %v6943_v10 = vpop.permute.xlu0 %6942  ;;  %v6050_v56 = vrot.slane %v16384_v28, 2 }
 0x4a6   : > { %v6552_v42 = vpop.permute.xlu1 %6551  ;;  %v7098_v44 = vadd.f32 %v6943_v10, %v6705_v31  ;;  %v16386_v10 = vld [vmem:[#allocation49_spill] sm:$0xff]  ;;  %v6444_v31 = vrot.slane %v16385_v47, 3 }
 0x4a7   : > { %6178 = vrot.lane.b32.xlu1 %v6049_v22, %s11233_s24  ;;  %6569 = vrot.lane.b32.xlu0 %v6440_v60, %s11234_s25  ;;  %v6706_v1 = vadd.f32 %v6552_v42, %v6313_v17  ;;  %v5660_v27 = vrot.slane %v16386_v10, 1  ;;  %v6052_v22 = vsel %vm5947_vm2, %v6050_v56, %v6051_v50 }
 0x4a8   : > { %v6445_v43 = vsel %vm6340_vm1, %v6443_v4, %v6444_v31  ;;  %v7625_v4 = vrot.slane %v16386_v10, 6 }
 0x4a9   : > { %v11067_v6 = vpop.eup %11066  ;;  %v7336_v48 = vpop.permute.xlu0 %7335  ;;  %v5661_v60 = vsel %vm5554_vm4, %v5658_v38, %v5660_v27  ;;  %v7232_v38 = vrot.slane %v16386_v10, 5 }
 0x4aa   : > { %11070 = vtanh.f32 %v11067_v6  ;;  %v6945_v45 = vpop.permute.xlu1 %6944  ;;  %v7491_v59 = vadd.f32 %v7336_v48, %v7098_v44  ;;  %v6053_v6 = vrot.slane %v16386_v10, 2  ;;  %v6837_v44 = vrot.slane %v16385_v47, 4 }
 0x4ab   : > { %6571 = vrot.lane.b32.xlu1 %v6442_v12, %s11234_s25  ;;  %6962 = vrot.lane.b32.xlu0 %v6833_v15, %s11235_s26  ;;  %v7099_v54 = vadd.f32 %v6945_v45, %v6706_v1  ;;  %v6836_v15 = vrot.slane %v16384_v28, 4 }
 0x4ac   : > { %v6054_v17 = vsel %vm5947_vm2, %v6051_v50, %v6053_v6 }
 0x4ad   : > { %v7729_v41 = vpop.permute.xlu0 %7728 }
 0x4ae   : > { %v7884_v32 = vadd.f32 %v7729_v41, %v7491_v59  ;;  %v7338_v61 = vpop.permute.xlu1 %7337  ;;  %v6446_v59 = vrot.slane %v16386_v10, 3 }
 0x4af   : > { %v11069_v0 = vpop.eup %11068  ;;  %6964 = vrot.lane.b32.xlu1 %v6835_v11, %s11235_s26  ;;  %7355 = vrot.lane.b32.xlu0 %v7226_v52, %s11236_s27  ;;  %v7492_v21 = vadd.f32 %v7338_v61, %v7099_v54  ;;  %v7230_v61 = vrot.slane %v16385_v47, 5  ;;  %v6839_v11 = vrot.slane %v16386_v10, 4 }
 0x4b0   : > { %v8145_v19 = vmul.f32 2.0, %v11069_v0  ;;  %v7955_v9 = vadd.f32 %v15116_v40, %v7884_v32  ;;  %v7229_v32 = vrot.slane %v16384_v28, 5  ;;  %v6838_v0 = vsel %vm6733_vm5, %v6836_v15, %v6837_v44 }
 0x4b1   : > { %v5768_v24 = vpop.permute.xlu0 %5767  ;;  %v6447_v54 = vsel %vm6340_vm1, %v6444_v31, %v6446_v59  ;;  %v7626_v15 = vsel %vm7519_vm9, %v7623_v16, %v7625_v4 }
 0x4b2   : > { %8210 = vst.msk [vmem:[%s14282_s10 + $0x110] sm:$0xff] %vm8175_vm14, %v8145_v19  ;;  %11072 = vtanh.f32 %v7955_v9  ;;  %v7731_v14 = vpop.permute.xlu1 %7730  ;;  %v5921_v48 = vadd.f32 %v14012_v3, %v5768_v24  ;;  %v7231_v24 = vsel %vm7126_vm15, %v7229_v32, %v7230_v61 }
 0x4b3   : > { %v7885_v57 = vadd.f32 %v7731_v14, %v7492_v21  ;;  %7357 = vrot.lane.b32.xlu1 %v7228_v62, %s11236_s27  ;;  %7748 = vrot.lane.b32.xlu0 %v7619_v55, %s11237_s5  ;;  %v6840_v62 = vsel %vm6733_vm5, %v6837_v44, %v6839_v11  ;;  %v7622_v55 = vrot.slane %v16384_v28, 6 }
 0x4b4   : > { %v11071_v25 = vpop.eup %11070 }
 0x4b5   : > { %v8146_v51 = vmul.f32 2.0, %v11071_v25  ;;  %v7956_v49 = vadd.f32 %v15116_v40, %v7885_v57  ;;  %v6161_v7 = vpop.permute.xlu0 %6160  ;;  %v7624_v50 = vsel %vm7519_vm9, %v7622_v55, %v7623_v16 }
 0x4b6   : > { %v5770_v39 = vpop.permute.xlu1 %5769  ;;  %v6314_v45 = vadd.f32 %v6161_v7, %v5921_v48 }
 0x4b7   : > { %8211 = vst.msk [vmem:[%s14282_s10 + $0x118] sm:$0xff] %vm8175_vm14, %v8146_v51  ;;  %11074 = vtanh.f32 %v7956_v49  ;;  %7750 = vrot.lane.b32.xlu1 %v7621_v37, %s11237_s5  ;;  %5787 = vrot.lane.b32.xlu0 %v5659_v36, %s11232_s30  ;;  %v5922_v41 = vadd.f32 %v16373_v53, %v5770_v39  ;;  %v16387_v39 = vld [vmem:[#allocation48_spill] sm:$0xff] }
 0x4b8   : > { %v5662_v36 = vrot.slane %v16387_v39, 1  ;;  %v6055_v44 = vrot.slane %v16387_v39, 2 }
 0x4b9   : > { %v6554_v26 = vpop.permute.xlu0 %6553 }
 0x4ba   : > { %v6163_v42 = vpop.permute.xlu1 %6162  ;;  %v6707_v3 = vadd.f32 %v6554_v26, %v6314_v45  ;;  %v7233_v26 = vsel %vm7126_vm15, %v7230_v61, %v7232_v38  ;;  %v16388_v45 = vld [vmem:[#allocation51_spill] sm:$0xff] }
 0x4bb   : > { %6180 = vrot.lane.b32.xlu0 %v6052_v22, %s11233_s24  ;;  %5789 = vrot.lane.b32.xlu1 %v5661_v60, %s11232_s30  ;;  %v6315_v19 = vadd.f32 %v6163_v42, %v5922_v41  ;;  %v6057_v41 = vrot.slane %v16388_v45, 2  ;;  %v6843_v55 = vrot.slane %v16388_v45, 4 }
 0x4bc   : > { %v11073_v58 = vpop.eup %11072 }
 0x4bd   : > { %11076 = vtanh.f32 %v11073_v58  ;;  %v6947_v12 = vpop.permute.xlu0 %6946 }
 0x4be   : > { %v6556_v8 = vpop.permute.xlu1 %6555  ;;  %v7100_v52 = vadd.f32 %v6947_v12, %v6707_v3  ;;  %v5663_v12 = vsel %vm5554_vm4, %v5660_v27, %v5662_v36  ;;  %v6056_v27 = vsel %vm5947_vm2, %v6053_v6, %v6055_v44 }
 0x4bf   : > { %6573 = vrot.lane.b32.xlu0 %v6445_v43, %s11234_s25  ;;  %6182 = vrot.lane.b32.xlu1 %v6054_v17, %s11233_s24  ;;  %v6708_v9 = vadd.f32 %v6556_v8, %v6315_v19  ;;  %v5664_v8 = vrot.slane %v16388_v45, 1  ;;  %v6450_v19 = vrot.slane %v16388_v45, 3 }
 0x4c1   : > { %v11075_v1 = vpop.eup %11074  ;;  %v7340_v63 = vpop.permute.xlu0 %7339  ;;  %v5665_v3 = vsel %vm5554_vm4, %v5662_v36, %v5664_v8 }
 0x4c2   : > { %11078 = vtanh.f32 %v11075_v1  ;;  %v6949_v46 = vpop.permute.xlu1 %6948  ;;  %v7493_v53 = vadd.f32 %v7340_v63, %v7100_v52  ;;  %v6448_v1 = vrot.slane %v16387_v39, 3  ;;  %v6841_v52 = vrot.slane %v16387_v39, 4 }
 0x4c3   : > { %6966 = vrot.lane.b32.xlu0 %v6838_v0, %s11235_s26  ;;  %6575 = vrot.lane.b32.xlu1 %v6447_v54, %s11234_s25  ;;  %v7101_v25 = vadd.f32 %v6949_v46, %v6708_v9  ;;  %v6058_v54 = vsel %vm5947_vm2, %v6055_v44, %v6057_v41 }
 0x4c4   : > { %v6449_v6 = vsel %vm6340_vm1, %v6446_v59, %v6448_v1 }
 0x4c5   : > { %v7733_v21 = vpop.permute.xlu0 %7732 }
 0x4c6   : > { %v7886_v29 = vadd.f32 %v7733_v21, %v7493_v53  ;;  %v7342_v14 = vpop.permute.xlu1 %7341 }
 0x4c7   : > { %v11077_v57 = vpop.eup %11076  ;;  %7359 = vrot.lane.b32.xlu0 %v7231_v24, %s11236_s27  ;;  %6968 = vrot.lane.b32.xlu1 %v6840_v62, %s11235_s26  ;;  %v7494_v7 = vadd.f32 %v7342_v14, %v7101_v25  ;;  %v6842_v24 = vsel %vm6733_vm5, %v6839_v11, %v6841_v52  ;;  %v7234_v62 = vrot.slane %v16387_v39, 5  ;;  %v6451_v14 = vsel %vm6340_vm1, %v6448_v1, %v6450_v19 }
 0x4c8   : > { %v8147_v51 = vmul.f32 2.0, %v11077_v57  ;;  %v7957_v49 = vadd.f32 %v15116_v40, %v7886_v29 }
 0x4c9   : > { %v5772_v37 = vpop.permute.xlu0 %5771  ;;  %v7235_v11 = vsel %vm7126_vm15, %v7232_v38, %v7234_v62 }
 0x4ca   : > { %8212 = vst.msk [vmem:[%s14282_s10 + $0x120] sm:$0xff] %vm8175_vm14, %v8147_v51  ;;  %11080 = vtanh.f32 %v7957_v49  ;;  %v7735_v56 = vpop.permute.xlu1 %7734  ;;  %v5923_v32 = vadd.f32 %v16376_v13, %v5772_v37  ;;  %v16389_v37 = vld [vmem:[#allocation50_spill] sm:$0xff] }
 0x4cb   : > { %v7887_v42 = vadd.f32 %v7735_v56, %v7494_v7  ;;  %7752 = vrot.lane.b32.xlu0 %v7624_v50, %s11237_s5  ;;  %7361 = vrot.lane.b32.xlu1 %v7233_v26, %s11236_s27  ;;  %v6844_v7 = vsel %vm6733_vm5, %v6841_v52, %v6843_v55  ;;  %v5666_v36 = vrot.slane %v16389_v37, 1  ;;  %v7236_v56 = vrot.slane %v16388_v45, 5 }
 0x4cc   : > { %v11079_v22 = vpop.eup %11078  ;;  %v6059_v38 = vrot.slane %v16389_v37, 2 }
 0x4cd   : > { %v8148_v60 = vmul.f32 2.0, %v11079_v22  ;;  %v7958_v31 = vadd.f32 %v15116_v40, %v7887_v42  ;;  %v6165_v58 = vpop.permute.xlu0 %6164 }
 0x4ce   : > { %v5774_v48 = vpop.permute.xlu1 %5773  ;;  %v6316_v46 = vadd.f32 %v6165_v58, %v5923_v32  ;;  %v6060_v32 = vsel %vm5947_vm2, %v6057_v41, %v6059_v38  ;;  %v6845_v41 = vrot.slane %v16389_v37, 4 }
 0x4cf   : > { %8213 = vst.msk [vmem:[%s14282_s10 + $0x128] sm:$0xff] %vm8175_vm14, %v8148_v60  ;;  %11082 = vtanh.f32 %v7958_v31  ;;  %5791 = vrot.lane.b32.xlu0 %v5663_v12, %s11232_s30  ;;  %7754 = vrot.lane.b32.xlu1 %v7626_v15, %s11237_s5  ;;  %v5924_v9 = vadd.f32 %v16375_v20, %v5774_v48  ;;  %v5667_v48 = vsel %vm5554_vm4, %v5664_v8, %v5666_v36  ;;  %v16390_v15 = vld [vmem:[#allocation5_spill] sm:$0xff]  ;;  %v6452_v8 = vrot.slane %v16389_v37, 3 }
 0x4d0   : > { %v7237_v12 = vsel %vm7126_vm15, %v7234_v62, %v7236_v56  ;;  %v5668_v44 = vrot.slane %v16390_v15, 1  ;;  %v6061_v52 = vrot.slane %v16390_v15, 2 }
 0x4d1   : > { %v6558_v43 = vpop.permute.xlu0 %6557 }
 0x4d2   : > { %v6167_v17 = vpop.permute.xlu1 %6166  ;;  %v6709_v53 = vadd.f32 %v6558_v43, %v6316_v46 }
 0x4d3   : > { %6184 = vrot.lane.b32.xlu0 %v6056_v27, %s11233_s24  ;;  %5793 = vrot.lane.b32.xlu1 %v5665_v3, %s11232_s30  ;;  %v6317_v16 = vadd.f32 %v6167_v17, %v5924_v9 }
 0x4d4   : > { %v11081_v63 = vpop.eup %11080 }
 0x4d5   : > { %11084 = vtanh.f32 %v11081_v63  ;;  %v6951_v61 = vpop.permute.xlu0 %6950 }
 0x4d6   : > { %v6560_v0 = vpop.permute.xlu1 %6559  ;;  %v7102_v59 = vadd.f32 %v6951_v61, %v6709_v53  ;;  %v5669_v61 = vsel %vm5554_vm4, %v5666_v36, %v5668_v44 }
 0x4d7   : > { %6577 = vrot.lane.b32.xlu0 %v6449_v6, %s11234_s25  ;;  %6186 = vrot.lane.b32.xlu1 %v6058_v54, %s11233_s24  ;;  %v6710_v57 = vadd.f32 %v6560_v0, %v6317_v16  ;;  %v6062_v6 = vsel %vm5947_vm2, %v6059_v38, %v6061_v52  ;;  %v6454_v54 = vrot.slane %v16390_v15, 3  ;;  %v16392_v38 = vld [vmem:[#allocation53_spill] sm:$0xff] }
 0x4d9   : > { %v11083_v13 = vpop.eup %11082  ;;  %v7344_v21 = vpop.permute.xlu0 %7343 }
 0x4da   : > { %11086 = vtanh.f32 %v11083_v13  ;;  %v6953_v29 = vpop.permute.xlu1 %6952  ;;  %v7495_v20 = vadd.f32 %v7344_v21, %v7102_v59  ;;  %v7238_v21 = vrot.slane %v16389_v37, 5  ;;  %v6455_v59 = vsel %vm6340_vm1, %v6452_v8, %v6454_v54 }
 0x4db   : > { %6970 = vrot.lane.b32.xlu0 %v6842_v24, %s11235_s26  ;;  %6579 = vrot.lane.b32.xlu1 %v6451_v14, %s11234_s25  ;;  %v7103_v26 = vadd.f32 %v6953_v29, %v6710_v57  ;;  %v6847_v29 = vrot.slane %v16390_v15, 4  ;;  %v16391_v57 = vld [vmem:[#allocation3_spill] sm:$0xff] }
 0x4dd   : > { %v7737_v25 = vpop.permute.xlu0 %7736 }
 0x4de   : > { %v7346_v51 = vpop.permute.xlu1 %7345  ;;  %v7888_v49 = vadd.f32 %v7737_v25, %v7495_v20  ;;  %v5670_v25 = vrot.slane %v16391_v57, 1 }
 0x4df   : > { %v11085_v50 = vpop.eup %11084  ;;  %7363 = vrot.lane.b32.xlu0 %v7235_v11, %s11236_s27  ;;  %6972 = vrot.lane.b32.xlu1 %v6844_v7, %s11235_s26  ;;  %v7496_v60 = vadd.f32 %v7346_v51, %v7103_v26  ;;  %v7240_v11 = vrot.slane %v16390_v15, 5  ;;  %v6848_v7 = vsel %vm6733_vm5, %v6845_v41, %v6847_v29 }
 0x4e0   : > { %v8149_v42 = vmul.f32 2.0, %v11085_v50  ;;  %v7959_v22 = vadd.f32 %v15116_v40, %v7888_v49  ;;  %v7239_v49 = vsel %vm7126_vm15, %v7236_v56, %v7238_v21  ;;  %v6063_v56 = vrot.slane %v16391_v57, 2 }
 0x4e1   : > { %v5776_v31 = vpop.permute.xlu0 %5775 }
 0x4e2   : > { %8214 = vst.msk [vmem:[%s14282_s10 + $0x130] sm:$0xff] %vm8175_vm14, %v8149_v42  ;;  %11088 = vtanh.f32 %v7959_v22  ;;  %v7739_v58 = vpop.permute.xlu1 %7738  ;;  %v5925_v13 = vadd.f32 %v16377_v34, %v5776_v31  ;;  %v5671_v42 = vsel %vm5554_vm4, %v5668_v44, %v5670_v25  ;;  %v7241_v31 = vsel %vm7126_vm15, %v7238_v21, %v7240_v11  ;;  %v15541_v44 = vld [vmem:[%s15951_s2] ss:$0 sm:$0xff] }
 0x4e3   : > { %v7889_v43 = vadd.f32 %v7739_v58, %v7496_v60  ;;  %5795 = vrot.lane.b32.xlu0 %v5667_v48, %s11232_s30  ;;  %7365 = vrot.lane.b32.xlu1 %v7237_v12, %s11236_s27  ;;  %v5672_v58 = vrot.slane %v16392_v38, 1  ;;  %v6458_v21 = vrot.slane %v16392_v38, 3 }
 0x4e4   : > { %v11087_v17 = vpop.eup %11086 }
 0x4e5   : > { %v8150_v27 = vmul.f32 2.0, %v11087_v17  ;;  %v7960_v3 = vadd.f32 %v15116_v40, %v7889_v43  ;;  %v6169_v1 = vpop.permute.xlu0 %6168  ;;  %v6453_v40 = vsel %vm6340_vm1, %v6450_v19, %v6452_v8  ;;  %v6846_v19 = vsel %vm6733_vm5, %v6843_v55, %v6845_v41 }
 0x4e6   : > { %v5778_v63 = vpop.permute.xlu1 %5777  ;;  %v6318_v24 = vadd.f32 %v6169_v1, %v5925_v13  ;;  %v6456_v1 = vrot.slane %v16391_v57, 3  ;;  %v6065_v8 = vrot.slane %v16392_v38, 2 }
 0x4e7   : > { %8215 = vst.msk [vmem:[%s14282_s10 + $0x138] sm:$0xff] %vm8175_vm14, %v8150_v27  ;;  %11090 = vtanh.f32 %v7960_v3  ;;  %6188 = vrot.lane.b32.xlu0 %v6060_v32, %s11233_s24  ;;  %5797 = vrot.lane.b32.xlu1 %v5669_v61, %s11232_s30  ;;  %v5926_v16 = vadd.f32 %v16378_v30, %v5778_v63  ;;  %v6064_v32 = vsel %vm5947_vm2, %v6061_v52, %v6063_v56 }
 0x4e8   : > { %v5673_v61 = vsel %vm5554_vm4, %v5670_v25, %v5672_v58  ;;  %v6457_v13 = vsel %vm6340_vm1, %v6454_v54, %v6456_v1  ;;  %v6066_v52 = vsel %vm5947_vm2, %v6063_v56, %v6065_v8  ;;  %v7242_v54 = vrot.slane %v16391_v57, 5 }
 0x4e9   : > { %v6562_v46 = vpop.permute.xlu0 %6561  ;;  %v7244_v25 = vrot.slane %v16392_v38, 5 }
 0x4ea   : > { %v6171_v0 = vpop.permute.xlu1 %6170  ;;  %v6711_v14 = vadd.f32 %v6562_v46, %v6318_v24 }
 0x4eb   : > { %6581 = vrot.lane.b32.xlu0 %v6453_v40, %s11234_s25  ;;  %6190 = vrot.lane.b32.xlu1 %v6062_v6, %s11233_s24  ;;  %v6319_v36 = vadd.f32 %v6171_v0, %v5926_v16 }
 0x4ec   : > { %v11089_v53 = vpop.eup %11088 }
 0x4ed   : > { %11092 = vtanh.f32 %v11089_v53  ;;  %v6955_v9 = vpop.permute.xlu0 %6954 }
 0x4ee   : > { %v6564_v62 = vpop.permute.xlu1 %6563  ;;  %v7104_v55 = vadd.f32 %v6955_v9, %v6711_v14  ;;  %v6849_v9 = vrot.slane %v16391_v57, 4  ;;  %v6851_v14 = vrot.slane %v16392_v38, 4 }
 0x4ef   : > { %6974 = vrot.lane.b32.xlu0 %v6846_v19, %s11235_s26  ;;  %6583 = vrot.lane.b32.xlu1 %v6455_v59, %s11234_s25  ;;  %v6712_v26 = vadd.f32 %v6564_v62, %v6319_v36  ;;  %v6459_v59 = vsel %vm6340_vm1, %v6456_v1, %v6458_v21 }
 0x4f0   : > { %v6850_v19 = vsel %vm6733_vm5, %v6847_v29, %v6849_v9  ;;  %v7243_v29 = vsel %vm7126_vm15, %v7240_v11, %v7242_v54 }
 0x4f1   : > { %v11091_v34 = vpop.eup %11090  ;;  %v7348_v20 = vpop.permute.xlu0 %7347 }
 0x4f2   : > { %11094 = vtanh.f32 %v11091_v34  ;;  %v6957_v51 = vpop.permute.xlu1 %6956  ;;  %v7497_v50 = vadd.f32 %v7348_v20, %v7104_v55 }
 0x4f3   : > { %7367 = vrot.lane.b32.xlu0 %v7239_v49, %s11236_s27  ;;  %6976 = vrot.lane.b32.xlu1 %v6848_v7, %s11235_s26  ;;  %v7105_v12 = vadd.f32 %v6957_v51, %v6712_v26  ;;  %v6852_v49 = vsel %vm6733_vm5, %v6849_v9, %v6851_v14  ;;  %v16393_v7 = vld [vmem:[#allocation54_spill] sm:$0xff] }
 0x4f4   : > { %v5675_v36 = vrot.slane %v16393_v7, 1 }
 0x4f5   : > { %v7741_v30 = vpop.permute.xlu0 %7740 }
 0x4f6   : > { %v7350_v22 = vpop.permute.xlu1 %7349  ;;  %v7890_v60 = vadd.f32 %v7741_v30, %v7497_v50 }
 0x4f7   : > { %v11093_v48 = vpop.eup %11092  ;;  %5799 = vrot.lane.b32.xlu0 %v5671_v42, %s11232_s30  ;;  %7369 = vrot.lane.b32.xlu1 %v7241_v31, %s11236_s27  ;;  %v7498_v27 = vadd.f32 %v7350_v22, %v7105_v12  ;;  %v16395_v31 = vld [vmem:[#allocation22_spill] sm:$0xff]  ;;  %v6068_v12 = vrot.slane %v16393_v7, 2 }
 0x4f8   : > { %v8151_v43 = vmul.f32 2.0, %v11093_v48  ;;  %v7961_v17 = vadd.f32 %v15541_v44, %v7890_v60  ;;  %v7245_v60 = vsel %vm7126_vm15, %v7242_v54, %v7244_v25  ;;  %v5677_v56 = vrot.slane %v16395_v31, 1 }
 0x4f9   : > { %v5780_v3 = vpop.permute.xlu0 %5779  ;;  %v6070_v1 = vrot.slane %v16395_v31, 2 }
 0x4fa   : > { %8216 = vst.msk [vmem:[%s14282_s10 + $0x140] sm:$0xff] %vm8175_vm14, %v8151_v43  ;;  %11096 = vtanh.f32 %v7961_v17  ;;  %v7743_v63 = vpop.permute.xlu1 %7742  ;;  %v5927_v16 = vadd.f32 %v16379_v2, %v5780_v3  ;;  %v16394_v2 = vld [vmem:[#allocation6_spill] sm:$0xff] }
 0x4fb   : > { %v7891_v46 = vadd.f32 %v7743_v63, %v7498_v27  ;;  %6192 = vrot.lane.b32.xlu0 %v6064_v32, %s11233_s24  ;;  %5801 = vrot.lane.b32.xlu1 %v5673_v61, %s11232_s30  ;;  %v5674_v26 = vrot.slane %v16394_v2, 1  ;;  %v5678_v61 = vsel %vm5554_vm4, %v5675_v36, %v5677_v56  ;;  %v6071_v9 = vsel %vm5947_vm2, %v6068_v12, %v6070_v1 }
 0x4fc   : > { %v11095_v0 = vpop.eup %11094  ;;  %v6853_v14 = vrot.slane %v16394_v2, 4 }
 0x4fd   : > { %v8152_v40 = vmul.f32 2.0, %v11095_v0  ;;  %v7962_v6 = vadd.f32 %v15541_v44, %v7891_v46  ;;  %v6173_v41 = vpop.permute.xlu0 %6172  ;;  %v5676_v48 = vsel %vm5554_vm4, %v5674_v26, %v5675_v36  ;;  %v6461_v46 = vrot.slane %v16393_v7, 3 }
 0x4fe   : > { %v5782_v53 = vpop.permute.xlu1 %5781  ;;  %v6320_v55 = vadd.f32 %v6173_v41, %v5927_v16  ;;  %v7246_v36 = vrot.slane %v16394_v2, 5 }
 0x4ff   : > { %8217 = vst.msk [vmem:[%s14282_s10 + $0x148] sm:$0xff] %vm8175_vm14, %v8152_v40  ;;  %11098 = vtanh.f32 %v7962_v6  ;;  %6585 = vrot.lane.b32.xlu0 %v6457_v13, %s11234_s25  ;;  %6194 = vrot.lane.b32.xlu1 %v6066_v52, %s11233_s24  ;;  %v5928_v42 = vadd.f32 %v16380_v33, %v5782_v53  ;;  %v6067_v33 = vrot.slane %v16394_v2, 2  ;;  %v6460_v53 = vrot.slane %v16394_v2, 3 }
 0x501   : > { %v6566_v24 = vpop.permute.xlu0 %6565  ;;  %v6069_v8 = vsel %vm5947_vm2, %v6067_v33, %v6068_v12  ;;  %v16396_v12 = vld [vmem:[#allocation55_spill] sm:$0xff] }
 0x502   : > { %v6175_v62 = vpop.permute.xlu1 %6174  ;;  %v6713_v50 = vadd.f32 %v6566_v24, %v6320_v55  ;;  %v6462_v24 = vsel %vm6340_vm1, %v6460_v53, %v6461_v46 }
 0x503   : > { %6978 = vrot.lane.b32.xlu0 %v6850_v19, %s11235_s26  ;;  %6587 = vrot.lane.b32.xlu1 %v6459_v59, %s11234_s25  ;;  %v6321_v43 = vadd.f32 %v6175_v62, %v5928_v42  ;;  %v6463_v62 = vrot.slane %v16395_v31, 3  ;;  %v6854_v19 = vrot.slane %v16393_v7, 4 }
 0x504   : > { %v11097_v34 = vpop.eup %11096 }
 0x505   : > { %11100 = vtanh.f32 %v11097_v34  ;;  %v6959_v20 = vpop.permute.xlu0 %6958  ;;  %v6464_v55 = vsel %vm6340_vm1, %v6461_v46, %v6463_v62 }
 0x506   : > { %v6568_v51 = vpop.permute.xlu1 %6567  ;;  %v7106_v11 = vadd.f32 %v6959_v20, %v6713_v50 }
 0x507   : > { %7371 = vrot.lane.b32.xlu0 %v7243_v29, %s11236_s27  ;;  %6980 = vrot.lane.b32.xlu1 %v6852_v49, %s11235_s26  ;;  %v6714_v27 = vadd.f32 %v6568_v51, %v6321_v43  ;;  %v6855_v51 = vsel %vm6733_vm5, %v6853_v14, %v6854_v19  ;;  %v6856_v29 = vrot.slane %v16395_v31, 4  ;;  %v7247_v49 = vrot.slane %v16393_v7, 5 }
 0x508   : > { %v5681_v43 = vrot.slane %v16396_v12, 1 }
 0x509   : > { %v11099_v30 = vpop.eup %11098  ;;  %v7352_v22 = vpop.permute.xlu0 %7351  ;;  %v7248_v42 = vsel %vm7126_vm15, %v7246_v36, %v7247_v49  ;;  %v7251_v36 = vrot.slane %v14172_v35, 5 }
 0x50a   : > { %11102 = vtanh.f32 %v11099_v30  ;;  %v6961_v58 = vpop.permute.xlu1 %6960  ;;  %v7499_v17 = vadd.f32 %v7352_v22, %v7106_v11  ;;  %v6857_v30 = vsel %vm6733_vm5, %v6854_v19, %v6856_v29  ;;  %v7249_v22 = vrot.slane %v16395_v31, 5 }
 0x50b   : > { %7373 = vrot.lane.b32.xlu1 %v7245_v60, %s11236_s27  ;;  %5803 = vrot.lane.b32.xlu0 %v5676_v48, %s11232_s30  ;;  %v7107_v40 = vadd.f32 %v6961_v58, %v6714_v27  ;;  %v5679_v60 = vrot.slane %v14172_v35, 1 }
 0x50d   : > { %v7745_v3 = vpop.permute.xlu0 %7744  ;;  %v5682_v46 = vsel %vm5554_vm4, %v5679_v60, %v5681_v43 }
 0x50e   : > { %v7354_v63 = vpop.permute.xlu1 %7353  ;;  %v7892_v32 = vadd.f32 %v7745_v3, %v7499_v17  ;;  %v6072_v17 = vrot.slane %v14172_v35, 2  ;;  %v7250_v3 = vsel %vm7126_vm15, %v7247_v49, %v7249_v22 }
 0x50f   : > { %v11101_v0 = vpop.eup %11100  ;;  %5805 = vrot.lane.b32.xlu1 %v5678_v61, %s11232_s30  ;;  %6196 = vrot.lane.b32.xlu0 %v6069_v8, %s11233_s24  ;;  %v7500_v13 = vadd.f32 %v7354_v63, %v7107_v40  ;;  %v5680_v63 = vsel %vm5554_vm4, %v5677_v56, %v5679_v60 }
 0x510   : > { %v8153_v6 = vmul.f32 2.0, %v11101_v0  ;;  %v7963_v41 = vadd.f32 %v15541_v44, %v7892_v32  ;;  %v6073_v0 = vsel %vm5947_vm2, %v6070_v1, %v6072_v17 }
 0x511   : > { %v5784_v52 = vpop.permute.xlu0 %5783 }
 0x512   : > { %8218 = vst.msk [vmem:[%s14282_s10 + $0x150] sm:$0xff] %vm8175_vm14, %v8153_v6  ;;  %11104 = vtanh.f32 %v7963_v41  ;;  %v7747_v21 = vpop.permute.xlu1 %7746  ;;  %v5929_v58 = vadd.f32 %v16381_v5, %v5784_v52  ;;  %v6074_v6 = vrot.slane %v16396_v12, 2  ;;  %v6465_v41 = vrot.slane %v14172_v35, 3 }
 0x513   : > { %v7893_v59 = vadd.f32 %v7747_v21, %v7500_v13  ;;  %6198 = vrot.lane.b32.xlu1 %v6071_v9, %s11233_s24  ;;  %6589 = vrot.lane.b32.xlu0 %v6462_v24, %s11234_s25  ;;  %v6467_v9 = vrot.slane %v16396_v12, 3 }
 0x514   : > { %v11103_v54 = vpop.eup %11102  ;;  %v6075_v24 = vsel %vm5947_vm2, %v6072_v17, %v6074_v6  ;;  %v6466_v19 = vsel %vm6340_vm1, %v6463_v62, %v6465_v41  ;;  %v5683_v17 = vrot.slane %v14182_v23, 1 }
 0x515   : > { %v8154_v34 = vmul.f32 2.0, %v11103_v54  ;;  %v7964_v16 = vadd.f32 %v15541_v44, %v7893_v59  ;;  %v6177_v20 = vpop.permute.xlu0 %6176  ;;  %v6858_v59 = vrot.slane %v14172_v35, 4  ;;  %v6468_v62 = vsel %vm6340_vm1, %v6465_v41, %v6467_v9 }
 0x516   : > { %v5786_v25 = vpop.permute.xlu1 %5785  ;;  %v6322_v33 = vadd.f32 %v6177_v20, %v5929_v58 }
 0x517   : > { %8219 = vst.msk [vmem:[%s14282_s10 + $0x158] sm:$0xff] %vm8175_vm14, %v8154_v34  ;;  %11106 = vtanh.f32 %v7964_v16  ;;  %6591 = vrot.lane.b32.xlu1 %v6464_v55, %s11234_s25  ;;  %6982 = vrot.lane.b32.xlu0 %v6855_v51, %s11235_s26  ;;  %v5930_v61 = vadd.f32 %v16382_v18, %v5786_v25  ;;  %v6860_v55 = vrot.slane %v16396_v12, 4  ;;  %v6859_v49 = vsel %vm6733_vm5, %v6856_v29, %v6858_v59 }
 0x518   : > { %v7252_v29 = vsel %vm7126_vm15, %v7249_v22, %v7251_v36  ;;  %v5684_v22 = vsel %vm5554_vm4, %v5681_v43, %v5683_v17 }
 0x519   : > { %v6570_v50 = vpop.permute.xlu0 %6569  ;;  %v6861_v58 = vsel %vm6733_vm5, %v6858_v59, %v6860_v55  ;;  %v6862_v59 = vrot.slane %v14182_v23, 4 }
 0x51a   : > { %v6179_v26 = vpop.permute.xlu1 %6178  ;;  %v6715_v5 = vadd.f32 %v6570_v50, %v6322_v33 }
 0x51b   : > { %6984 = vrot.lane.b32.xlu1 %v6857_v30, %s11235_s26  ;;  %7375 = vrot.lane.b32.xlu0 %v7248_v42, %s11236_s27  ;;  %v6323_v53 = vadd.f32 %v6179_v26, %v5930_v61 }
 0x51c   : > { %v11105_v11 = vpop.eup %11104 }
 0x51d   : > { %11108 = vtanh.f32 %v11105_v11  ;;  %v6963_v48 = vpop.permute.xlu0 %6962 }
 0x51e   : > { %v6572_v27 = vpop.permute.xlu1 %6571  ;;  %v7108_v40 = vadd.f32 %v6963_v48, %v6715_v5  ;;  %v7253_v48 = vrot.slane %v16396_v12, 5 }
 0x51f   : > { %7377 = vrot.lane.b32.xlu1 %v7250_v3, %s11236_s27  ;;  %5807 = vrot.lane.b32.xlu0 %v5680_v63, %s11232_s30  ;;  %v6716_v13 = vadd.f32 %v6572_v27, %v6323_v53  ;;  %v16397_v63 = vld [vmem:[#allocation17_spill] sm:$0xff]  ;;  %v6469_v53 = vrot.slane %v14182_v23, 3 }
 0x520   : > { %v7254_v3 = vsel %vm7126_vm15, %v7251_v36, %v7253_v48  ;;  %v5685_v5 = vrot.slane %v16397_v63, 1 }
 0x521   : > { %v11107_v32 = vpop.eup %11106  ;;  %v7356_v8 = vpop.permute.xlu0 %7355 }
 0x522   : > { %11110 = vtanh.f32 %v11107_v32  ;;  %v6965_v56 = vpop.permute.xlu1 %6964  ;;  %v7501_v18 = vadd.f32 %v7356_v8, %v7108_v40  ;;  %v6076_v32 = vrot.slane %v14182_v23, 2  ;;  %v5686_v43 = vsel %vm5554_vm4, %v5683_v17, %v5685_v5 }
 0x523   : > { %5809 = vrot.lane.b32.xlu1 %v5682_v46, %s11232_s30  ;;  %6200 = vrot.lane.b32.xlu0 %v6073_v0, %s11233_s24  ;;  %v7109_v14 = vadd.f32 %v6965_v56, %v6716_v13  ;;  %v6078_v0 = vrot.slane %v16397_v63, 2 }
 0x524   : > { %v6077_v41 = vsel %vm5947_vm2, %v6074_v6, %v6076_v32 }
 0x525   : > { %v7749_v52 = vpop.permute.xlu0 %7748 }
 0x526   : > { %v7358_v21 = vpop.permute.xlu1 %7357  ;;  %v7894_v1 = vadd.f32 %v7749_v52, %v7501_v18 }
 0x527   : > { %v11109_v54 = vpop.eup %11108  ;;  %6202 = vrot.lane.b32.xlu1 %v6075_v24, %s11233_s24  ;;  %6593 = vrot.lane.b32.xlu0 %v6466_v19, %s11234_s25  ;;  %v7502_v20 = vadd.f32 %v7358_v21, %v7109_v14  ;;  %v6079_v21 = vsel %vm5947_vm2, %v6076_v32, %v6078_v0  ;;  %v6470_v19 = vsel %vm6340_vm1, %v6467_v9, %v6469_v53 }
 0x528   : > { %v8155_v34 = vmul.f32 2.0, %v11109_v54  ;;  %v7965_v16 = vadd.f32 %v15541_v44, %v7894_v1  ;;  %v6471_v1 = vrot.slane %v16397_v63, 3  ;;  %v6863_v9 = vsel %vm6733_vm5, %v6860_v55, %v6862_v59 }
 0x529   : > { %v5788_v25 = vpop.permute.xlu0 %5787 }
 0x52a   : > { %8220 = vst.msk [vmem:[%s14282_s10 + $0x160] sm:$0xff] %vm8175_vm14, %v8155_v34  ;;  %11112 = vtanh.f32 %v7965_v16  ;;  %v7751_v51 = vpop.permute.xlu1 %7750  ;;  %v5931_v8 = vadd.f32 %v16384_v28, %v5788_v25  ;;  %v6472_v16 = vsel %vm6340_vm1, %v6469_v53, %v6471_v1 }
 0x52b   : > { %v7895_v50 = vadd.f32 %v7751_v51, %v7502_v20  ;;  %6595 = vrot.lane.b32.xlu1 %v6468_v62, %s11234_s25  ;;  %6986 = vrot.lane.b32.xlu0 %v6859_v49, %s11235_s26  ;;  %v6864_v51 = vrot.slane %v16397_v63, 4  ;;  %v7255_v62 = vrot.slane %v14182_v23, 5 }
 0x52c   : > { %v11111_v26 = vpop.eup %11110 }
 0x52d   : > { %v8156_v30 = vmul.f32 2.0, %v11111_v26  ;;  %v7966_v42 = vadd.f32 %v15541_v44, %v7895_v50  ;;  %v6181_v60 = vpop.permute.xlu0 %6180 }
 0x52e   : > { %v5790_v11 = vpop.permute.xlu1 %5789  ;;  %v6324_v40 = vadd.f32 %v6181_v60, %v5931_v8  ;;  %v7257_v60 = vrot.slane %v16397_v63, 5  ;;  %v16399_v8 = vld [vmem:[#allocation18_spill] sm:$0xff] }
 0x52f   : > { %8221 = vst.msk [vmem:[%s14282_s10 + $0x168] sm:$0xff] %vm8175_vm14, %v8156_v30  ;;  %11114 = vtanh.f32 %v7966_v42  ;;  %6988 = vrot.lane.b32.xlu1 %v6861_v58, %s11235_s26  ;;  %7379 = vrot.lane.b32.xlu0 %v7252_v29, %s11236_s27  ;;  %v5932_v13 = vadd.f32 %v16385_v47, %v5790_v11  ;;  %v6865_v11 = vsel %vm6733_vm5, %v6862_v59, %v6864_v51  ;;  %v16398_v29 = vld [vmem:[#allocation20_spill] sm:$0xff] }
 0x530   : > { %v7256_v58 = vsel %vm7126_vm15, %v7253_v48, %v7255_v62  ;;  %v5687_v17 = vrot.slane %v16398_v29, 1  ;;  %v7258_v48 = vsel %vm7126_vm15, %v7255_v62, %v7257_v60  ;;  %v6868_v62 = vrot.slane %v16399_v8, 4 }
 0x531   : > { %v6574_v33 = vpop.permute.xlu0 %6573 }
 0x532   : > { %v6183_v27 = vpop.permute.xlu1 %6182  ;;  %v6717_v18 = vadd.f32 %v6574_v33, %v6324_v40 }
 0x533   : > { %7381 = vrot.lane.b32.xlu1 %v7254_v3, %s11236_s27  ;;  %5811 = vrot.lane.b32.xlu0 %v5684_v22, %s11232_s30  ;;  %v6325_v54 = vadd.f32 %v6183_v27, %v5932_v13 }
 0x534   : > { %v11113_v61 = vpop.eup %11112 }
 0x535   : > { %11116 = vtanh.f32 %v11113_v61  ;;  %v6967_v46 = vpop.permute.xlu0 %6966 }
 0x536   : > { %v6576_v56 = vpop.permute.xlu1 %6575  ;;  %v7110_v24 = vadd.f32 %v6967_v46, %v6717_v18  ;;  %v5689_v46 = vrot.slane %v16399_v8, 1 }
 0x537   : > { %5813 = vrot.lane.b32.xlu1 %v5686_v43, %s11232_s30  ;;  %6204 = vrot.lane.b32.xlu0 %v6077_v41, %s11233_s24  ;;  %v6718_v14 = vadd.f32 %v6576_v56, %v6325_v54  ;;  %v5688_v43 = vsel %vm5554_vm4, %v5685_v5, %v5687_v17  ;;  %v6080_v41 = vrot.slane %v16398_v29, 2 }
 0x539   : > { %v11115_v28 = vpop.eup %11114  ;;  %v7360_v52 = vpop.permute.xlu0 %7359  ;;  %v6081_v5 = vsel %vm5947_vm2, %v6078_v0, %v6080_v41  ;;  %v6475_v0 = vrot.slane %v16399_v8, 3 }
 0x53a   : > { %11118 = vtanh.f32 %v11115_v28  ;;  %v6969_v6 = vpop.permute.xlu1 %6968  ;;  %v7503_v47 = vadd.f32 %v7360_v52, %v7110_v24  ;;  %v6082_v28 = vrot.slane %v16399_v8, 2  ;;  %v6473_v24 = vrot.slane %v16398_v29, 3 }
 0x53b   : > { %6206 = vrot.lane.b32.xlu1 %v6079_v21, %s11233_s24  ;;  %6597 = vrot.lane.b32.xlu0 %v6470_v19, %s11234_s25  ;;  %v7111_v36 = vadd.f32 %v6969_v6, %v6718_v14  ;;  %v5690_v21 = vsel %vm5554_vm4, %v5687_v17, %v5689_v46  ;;  %v7261_v17 = vrot.slane %v16399_v8, 5 }
 0x53c   : > { %v6083_v54 = vsel %vm5947_vm2, %v6080_v41, %v6082_v28 }
 0x53d   : > { %v7753_v34 = vpop.permute.xlu0 %7752 }
 0x53e   : > { %v7896_v20 = vadd.f32 %v7753_v34, %v7503_v47  ;;  %v7362_v25 = vpop.permute.xlu1 %7361  ;;  %v6474_v34 = vsel %vm6340_vm1, %v6471_v1, %v6473_v24  ;;  %v6476_v1 = vsel %vm6340_vm1, %v6473_v24, %v6475_v0 }
 0x53f   : > { %v11117_v49 = vpop.eup %11116  ;;  %6599 = vrot.lane.b32.xlu1 %v6472_v16, %s11234_s25  ;;  %6990 = vrot.lane.b32.xlu0 %v6863_v9, %s11235_s26  ;;  %v7504_v30 = vadd.f32 %v7362_v25, %v7111_v36  ;;  %v6866_v16 = vrot.slane %v16398_v29, 4 }
 0x540   : > { %v8157_v50 = vmul.f32 2.0, %v11117_v49  ;;  %v7967_v26 = vadd.f32 %v15541_v44, %v7896_v20  ;;  %v7259_v49 = vrot.slane %v16398_v29, 5 }
 0x541   : > { %v5792_v42 = vpop.permute.xlu0 %5791 }
 0x542   : > { %8222 = vst.msk [vmem:[%s14282_s10 + $0x170] sm:$0xff] %vm8175_vm14, %v8157_v50  ;;  %11120 = vtanh.f32 %v7967_v26  ;;  %v7755_v55 = vpop.permute.xlu1 %7754  ;;  %v5933_v3 = vadd.f32 %v16386_v10, %v5792_v42  ;;  %v6867_v26 = vsel %vm6733_vm5, %v6864_v51, %v6866_v16  ;;  %v7633_v10 = vrot.slane %v16390_v15, 6 }
 0x543   : > { %v7897_v33 = vadd.f32 %v7755_v55, %v7504_v30  ;;  %6992 = vrot.lane.b32.xlu1 %v6865_v11, %s11235_s26  ;;  %7383 = vrot.lane.b32.xlu0 %v7256_v58, %s11236_s27  ;;  %v6869_v11 = vsel %vm6733_vm5, %v6866_v16, %v6868_v62  ;;  %v7260_v58 = vsel %vm7126_vm15, %v7257_v60, %v7259_v49 }
 0x544   : > { %v11119_v27 = vpop.eup %11118 }
 0x545   : > { %v8158_v22 = vmul.f32 2.0, %v11119_v27  ;;  %v7968_v32 = vadd.f32 %v15541_v44, %v7897_v33  ;;  %v6185_v61 = vpop.permute.xlu0 %6184  ;;  %v7627_v33 = vrot.slane %v16387_v39, 6 }
 0x546   : > { %v6326_v40 = vadd.f32 %v6185_v61, %v5933_v3  ;;  %v5794_v56 = vpop.permute.xlu1 %5793  ;;  %v7629_v61 = vrot.slane %v16388_v45, 6 }
 0x547   : > { %8223 = vst.msk [vmem:[%s14282_s10 + $0x178] sm:$0xff] %vm8175_vm14, %v8158_v22  ;;  %11122 = vtanh.f32 %v7968_v32  ;;  %7385 = vrot.lane.b32.xlu1 %v7258_v48, %s11236_s27  ;;  %5815 = vrot.lane.b32.xlu0 %v5688_v43, %s11232_s30  ;;  %v5934_v53 = vadd.f32 %v16387_v39, %v5794_v56  ;;  %v7262_v39 = vsel %vm7126_vm15, %v7259_v49, %v7261_v17  ;;  %v7631_v56 = vrot.slane %v16389_v37, 6 }
 0x548   : > { %v7646_v49 = vrot.slane %v16396_v12, 6 }
 0x549   : > { %v6578_v18 = vpop.permute.xlu0 %6577 }
 0x54a   : > { %v6719_v13 = vadd.f32 %v6578_v18, %v6326_v40  ;;  %v6187_v52 = vpop.permute.xlu1 %6186  ;;  %v7628_v40 = vsel %vm7519_vm9, %v7625_v4, %v7627_v33  ;;  %v7635_v4 = vrot.slane %v16391_v57, 6 }
 0x54b   : > { %v6327_v6 = vadd.f32 %v6187_v52, %v5934_v53  ;;  %5817 = vrot.lane.b32.xlu1 %v5690_v21, %s11232_s30  ;;  %6208 = vrot.lane.b32.xlu0 %v6081_v5, %s11233_s24  ;;  %v7630_v53 = vsel %vm7519_vm9, %v7627_v33, %v7629_v61 }
 0x54c   : > { %v11121_v19 = vpop.eup %11120 }
 0x54d   : > { %11124 = vtanh.f32 %v11121_v19  ;;  %v6971_v59 = vpop.permute.xlu0 %6970  ;;  %v7636_v19 = vsel %vm7519_vm9, %v7633_v10, %v7635_v4 }
 0x54e   : > { %v7112_v47 = vadd.f32 %v6971_v59, %v6719_v13  ;;  %v6580_v14 = vpop.permute.xlu1 %6579  ;;  %v7632_v13 = vsel %vm7519_vm9, %v7629_v61, %v7631_v56  ;;  %v7640_v59 = vrot.slane %v16393_v7, 6 }
 0x54f   : > { %v6720_v20 = vadd.f32 %v6580_v14, %v6327_v6  ;;  %6210 = vrot.lane.b32.xlu1 %v6083_v54, %s11233_s24  ;;  %6601 = vrot.lane.b32.xlu0 %v6474_v34, %s11234_s25  ;;  %v7634_v6 = vsel %vm7519_vm9, %v7631_v56, %v7633_v10 }
 0x551   : > { %v11123_v25 = vpop.eup %11122  ;;  %v7364_v9 = vpop.permute.xlu0 %7363 }
 0x552   : > { %11126 = vtanh.f32 %v11123_v25  ;;  %v15766_v36 = vadd.f32 %v7364_v9, %v7112_v47  ;;  %v6973_v50 = vpop.permute.xlu1 %6972  ;;  %v7639_v47 = vrot.slane %v16394_v2, 6  ;;  %v7644_v25 = vrot.slane %v14172_v35, 6 }
 0x553   : > { %v7113_v30 = vadd.f32 %v6973_v50, %v6720_v20  ;;  %6603 = vrot.lane.b32.xlu1 %v6476_v1, %s11234_s25  ;;  %6994 = vrot.lane.b32.xlu0 %v6867_v26, %s11235_s26  ;;  %v7642_v20 = vrot.slane %v16395_v31, 6 }
 0x554   : > { %v7641_v16 = vsel %vm7519_vm9, %v7639_v47, %v7640_v59 }
 0x555   : > { %v5796_v42 = vpop.permute.xlu0 %5795  ;;  %v7643_v1 = vsel %vm7519_vm9, %v7640_v59, %v7642_v20  ;;  %v7645_v26 = vsel %vm7519_vm9, %v7642_v20, %v7644_v25 }
 0x556   : > { %v7366_v55 = vpop.permute.xlu1 %7365  ;;  %v5935_v22 = vadd.f32 %v16388_v45, %v5796_v42 }
 0x557   : > { %v11125_v27 = vpop.eup %11124  ;;  %v15780_v51 = vadd.f32 %v7366_v55, %v7113_v30  ;;  %6996 = vrot.lane.b32.xlu1 %v6869_v11, %s11235_s26  ;;  %7387 = vrot.lane.b32.xlu0 %v7260_v58, %s11236_s27  ;;  %v7648_v30 = vrot.slane %v14182_v23, 6  ;;  %v7647_v58 = vsel %vm7519_vm9, %v7644_v25, %v7646_v49 }
 0x558   : > { %v8159_v3 = vmul.f32 2.0, %v11125_v27 }
 0x559   : > { %v6189_v32 = vpop.permute.xlu0 %6188  ;;  %v7649_v27 = vsel %vm7519_vm9, %v7646_v49, %v7648_v30 }
 0x55a   : > { %8224 = vst.msk [vmem:[%s14282_s10 + $0x180] sm:$0xff] %vm8175_vm14, %v8159_v3  ;;  %v6328_v60 = vadd.f32 %v6189_v32, %v5935_v22  ;;  %v5798_v46 = vpop.permute.xlu1 %5797  ;;  %v7650_v3 = vrot.slane %v16397_v63, 6  ;;  %v7652_v22 = vrot.slane %v16398_v29, 6 }
 0x55b   : > { %7389 = vrot.lane.b32.xlu1 %v7262_v39, %s11236_s27  ;;  %7756 = vrot.lane.b32.xlu0 %v7628_v40, %s11237_s5  ;;  %v5936_v45 = vadd.f32 %v16389_v37, %v5798_v46  ;;  %v7637_v37 = vrot.slane %v16392_v38, 6  ;;  %v7654_v40 = vrot.slane %v16399_v8, 6 }
 0x55c   : > { %v11127_v48 = vpop.eup %11126  ;;  %v7651_v46 = vsel %vm7519_vm9, %v7648_v30, %v7650_v3  ;;  %v7653_v39 = vsel %vm7519_vm9, %v7650_v3, %v7652_v22 }
 0x55d   : > { %v8160_v43 = vmul.f32 2.0, %v11127_v48  ;;  %v6582_v41 = vpop.permute.xlu0 %6581  ;;  %v7638_v34 = vsel %vm7519_vm9, %v7635_v4, %v7637_v37 }
 0x55e   : > { %v6721_v18 = vadd.f32 %v6582_v41, %v6328_v60  ;;  %v6191_v28 = vpop.permute.xlu1 %6190  ;;  %v7655_v41 = vsel %vm7519_vm9, %v7652_v22, %v7654_v40 }
 0x55f   : > { %8225 = vst.msk [vmem:[%s14282_s10 + $0x188] sm:$0xff] %vm8175_vm14, %v8160_v43  ;;  %v6329_v52 = vadd.f32 %v6191_v28, %v5936_v45  ;;  %7758 = vrot.lane.b32.xlu1 %v7630_v53, %s11237_s5  ;;  %7760 = vrot.lane.b32.xlu0 %v7632_v13, %s11237_s5 }
 0x561   : > { %v6975_v21 = vpop.permute.xlu0 %6974 }
 0x562   : > { %v7114_v5 = vadd.f32 %v6975_v21, %v6721_v18  ;;  %v6584_v24 = vpop.permute.xlu1 %6583 }
 0x563   : > { %v6722_v54 = vadd.f32 %v6584_v24, %v6329_v52  ;;  %7762 = vrot.lane.b32.xlu1 %v7634_v6, %s11237_s5  ;;  %7764 = vrot.lane.b32.xlu0 %v7636_v19, %s11237_s5 }
 0x565   : > { %v7368_v14 = vpop.permute.xlu0 %7367 }
 0x566   : > { %v15812_v0 = vadd.f32 %v7368_v14, %v7114_v5  ;;  %v6977_v38 = vpop.permute.xlu1 %6976 }
 0x567   : > { %v7115_v9 = vadd.f32 %v6977_v38, %v6722_v54  ;;  %7766 = vrot.lane.b32.xlu1 %v7638_v34, %s11237_s5  ;;  %7768 = vrot.lane.b32.xlu0 %v7641_v16, %s11237_s5 }
 0x569   : > { %v5800_v62 = vpop.permute.xlu0 %5799 }
 0x56a   : > { %v7370_v50 = vpop.permute.xlu1 %7369  ;;  %v5937_v55 = vadd.f32 %v16390_v15, %v5800_v62 }
 0x56b   : > { %v15823_v42 = vadd.f32 %v7370_v50, %v7115_v9  ;;  %7770 = vrot.lane.b32.xlu1 %v7643_v1, %s11237_s5  ;;  %7772 = vrot.lane.b32.xlu0 %v7645_v26, %s11237_s5 }
 0x56d   : > { %v6193_v11 = vpop.permute.xlu0 %6192 }
 0x56e   : > { %v6330_v17 = vadd.f32 %v6193_v11, %v5937_v55  ;;  %v5802_v33 = vpop.permute.xlu1 %5801 }
 0x56f   : > { %7774 = vrot.lane.b32.xlu1 %v7647_v58, %s11237_s5  ;;  %7776 = vrot.lane.b32.xlu0 %v7649_v27, %s11237_s5  ;;  %v5938_v32 = vadd.f32 %v16391_v57, %v5802_v33 }
 0x571   : > { %v6586_v61 = vpop.permute.xlu0 %6585 }
 0x572   : > { %v6723_v60 = vadd.f32 %v6586_v61, %v6330_v17  ;;  %v6195_v15 = vpop.permute.xlu1 %6194 }
 0x573   : > { %v6331_v56 = vadd.f32 %v6195_v15, %v5938_v32  ;;  %7778 = vrot.lane.b32.xlu1 %v7651_v46, %s11237_s5  ;;  %7780 = vrot.lane.b32.xlu0 %v7653_v39, %s11237_s5 }
 0x575   : > { %v6979_v48 = vpop.permute.xlu0 %6978 }
 0x576   : > { %v7116_v43 = vadd.f32 %v6979_v48, %v6723_v60  ;;  %v6588_v45 = vpop.permute.xlu1 %6587 }
 0x577   : > { %v6724_v57 = vadd.f32 %v6588_v45, %v6331_v56  ;;  %7782 = vrot.lane.b32.xlu1 %v7655_v41, %s11237_s5 }
 0x579   : > { %v7372_v53 = vpop.permute.xlu0 %7371 }
 0x57a   : > { %v15842_v18 = vadd.f32 %v7372_v53, %v7116_v43  ;;  %v6981_v28 = vpop.permute.xlu1 %6980 }
 0x57b   : > { %v7117_v13 = vadd.f32 %v6981_v28, %v6724_v57 }
 0x57d   : > { %v5804_v10 = vpop.permute.xlu0 %5803 }
 0x57e   : > { %v7374_v8 = vpop.permute.xlu1 %7373  ;;  %v5939_v52 = vadd.f32 %v16394_v2, %v5804_v10 }
 0x57f   : > { %v15844_v4 = vadd.f32 %v7374_v8, %v7117_v13 }
 0x581   : > { %v6197_v21 = vpop.permute.xlu0 %6196 }
 0x582   : > { %v5806_v37 = vpop.permute.xlu1 %5805  ;;  %v6332_v5 = vadd.f32 %v6197_v21, %v5939_v52 }
 0x583   : > { %v5940_v24 = vadd.f32 %v16393_v7, %v5806_v37 }
 0x585   : > { %v6590_v6 = vpop.permute.xlu0 %6589 }
 0x586   : > { %v6199_v19 = vpop.permute.xlu1 %6198  ;;  %v6725_v59 = vadd.f32 %v6590_v6, %v6332_v5 }
 0x587   : > { %v6333_v54 = vadd.f32 %v6199_v19, %v5940_v24 }
 0x589   : > { %v6983_v47 = vpop.permute.xlu0 %6982 }
 0x58a   : > { %v6592_v14 = vpop.permute.xlu1 %6591  ;;  %v7118_v34 = vadd.f32 %v6983_v47, %v6725_v59 }
 0x58b   : > { %v6726_v38 = vadd.f32 %v6592_v14, %v6333_v54 }
 0x58d   : > { %v7376_v16 = vpop.permute.xlu0 %7375 }
 0x58e   : > { %v6985_v20 = vpop.permute.xlu1 %6984  ;;  %v15848_v25 = vadd.f32 %v7376_v16, %v7118_v34 }
 0x58f   : > { %v7119_v9 = vadd.f32 %v6985_v20, %v6726_v38 }
 0x591   : > { %v5808_v62 = vpop.permute.xlu0 %5807 }
 0x592   : > { %v7378_v2 = vpop.permute.xlu1 %7377  ;;  %v5941_v50 = vadd.f32 %v16395_v31, %v5808_v62 }
 0x593   : > { %v15850_v49 = vadd.f32 %v7378_v2, %v7119_v9 }
 0x595   : > { %v6201_v7 = vpop.permute.xlu0 %6200 }
 0x596   : > { %v5810_v1 = vpop.permute.xlu1 %5809  ;;  %v6334_v26 = vadd.f32 %v6201_v7, %v5941_v50 }
 0x597   : > { %v5942_v30 = vadd.f32 %v14172_v35, %v5810_v1 }
 0x599   : > { %v6594_v55 = vpop.permute.xlu0 %6593 }
 0x59a   : > { %v6203_v11 = vpop.permute.xlu1 %6202  ;;  %v6727_v58 = vadd.f32 %v6594_v55, %v6334_v26 }
 0x59b   : > { %v6335_v17 = vadd.f32 %v6203_v11, %v5942_v30 }
 0x59d   : > { %v6987_v33 = vpop.permute.xlu0 %6986 }
 0x59e   : > { %v6596_v27 = vpop.permute.xlu1 %6595 }
 0x59f   : > { %v6728_v7 = vadd.f32 %v6596_v27, %v6335_v17 }
 0x5a1   : > { %v7380_v3 = vpop.permute.xlu0 %7379 }
 0x5a2   : > { %v6989_v22 = vpop.permute.xlu1 %6988 }
 0x5a3   : > { %v7121_v55 = vadd.f32 %v6989_v22, %v6728_v7 }
 0x5a5   : > { %v5812_v32 = vpop.permute.xlu0 %5811 }
 0x5a6   : > { %v15854_v61 = vpop.permute.xlu1 %7381  ;;  %v5943_v16 = vadd.f32 %v16396_v12, %v5812_v32 }
 0x5a9   : > { %v6205_v60 = vpop.permute.xlu0 %6204 }
 0x5aa   : > { %v5814_v15 = vpop.permute.xlu1 %5813  ;;  %v6336_v62 = vadd.f32 %v6205_v60, %v5943_v16 }
 0x5ab   : > { %v5944_v11 = vadd.f32 %v14182_v23, %v5814_v15 }
 0x5ad   : > { %v6598_v46 = vpop.permute.xlu0 %6597 }
 0x5ae   : > { %v6207_v31 = vpop.permute.xlu1 %6206 }
 0x5b1   : > { %v6991_v39 = vpop.permute.xlu0 %6990 }
 0x5b2   : > { %v15856_v40 = vpop.permute.xlu1 %6599 }
 0x5b5   : > { %v7384_v56 = vpop.permute.xlu0 %7383 }
 0x5b6   : > { %v15858_v35 = vpop.permute.xlu1 %6992 }
 0x5b9   : > { %v5816_v48 = vpop.permute.xlu0 %5815 }
 0x5ba   : > { %v15860_v43 = vpop.permute.xlu1 %7385  ;;  %v5945_v12 = vadd.f32 %v16397_v63, %v5816_v48  ;;  %v7514_v63 = vadd.f32 %v15854_v61, %v7121_v55 }
 0x5bd   : > { %v6209_v45 = vpop.permute.xlu0 %6208 }
 0x5be   : > { %v5818_v41 = vpop.permute.xlu1 %5817 }
 0x5c1   : > { %v6602_v57 = vpop.permute.xlu0 %6601 }
 0x5c2   : > { %v15862_v53 = vpop.permute.xlu1 %6210 }
 0x5c5   : > { %v6995_v28 = vpop.permute.xlu0 %6994 }
 0x5c6   : > { %v15864_v13 = vpop.permute.xlu1 %6603 }
 0x5c9   : > { %v15866_v10 = vpop.permute.xlu0 %7387 }
 0x5ca   : > { %v15868_v8 = vpop.permute.xlu1 %6996 }
 0x5cd   : > { %v7757_v52 = vpop.permute.xlu0 %7756 }
 0x5ce   : > { %v15870_v21 = vpop.permute.xlu1 %7389  ;;  %v7898_v37 = vadd.f32 %v7757_v52, %v15766_v36 }
 0x5d0   : > { %v7969_v5 = vadd.f32 %v15541_v44, %v7898_v37 }
 0x5d1   : > { %v7761_v24 = vpop.permute.xlu0 %7760 }
 0x5d2   : > { %11128 = vtanh.f32 %v7969_v5  ;;  %v7759_v6 = vpop.permute.xlu1 %7758  ;;  %v7900_v19 = vadd.f32 %v7761_v24, %v15812_v0 }
 0x5d3   : > { %v7899_v59 = vadd.f32 %v7759_v6, %v15780_v51  ;;  %v7120_v51 = vadd.f32 %v6987_v33, %v6727_v58 }
 0x5d4   : > { %v7971_v54 = vadd.f32 %v15541_v44, %v7900_v19 }
 0x5d5   : > { %v7970_v47 = vadd.f32 %v15541_v44, %v7899_v59  ;;  %v7765_v14 = vpop.permute.xlu0 %7764  ;;  %v7513_v26 = vadd.f32 %v7380_v3, %v7120_v51 }
 0x5d6   : > { %11130 = vtanh.f32 %v7971_v54  ;;  %v7763_v34 = vpop.permute.xlu1 %7762  ;;  %v7902_v38 = vadd.f32 %v7765_v14, %v15842_v18 }
 0x5d7   : > { %11132 = vtanh.f32 %v7970_v47  ;;  %v7901_v36 = vadd.f32 %v7763_v34, %v15823_v42  ;;  %v6729_v42 = vadd.f32 %v6598_v46, %v6336_v62 }
 0x5d8   : > { %v7973_v20 = vadd.f32 %v15541_v44, %v7902_v38 }
 0x5d9   : > { %v7972_v0 = vadd.f32 %v15541_v44, %v7901_v36  ;;  %v7769_v9 = vpop.permute.xlu0 %7768  ;;  %v7122_v32 = vadd.f32 %v6991_v39, %v6729_v42  ;;  %v5946_v39 = vadd.f32 %v16398_v29, %v5818_v41 }
 0x5da   : > { %11134 = vtanh.f32 %v7973_v20  ;;  %v7767_v2 = vpop.permute.xlu1 %7766  ;;  %v7904_v50 = vadd.f32 %v7769_v9, %v15848_v25  ;;  %v6338_v25 = vadd.f32 %v6209_v45, %v5945_v12 }
 0x5db   : > { %11136 = vtanh.f32 %v7972_v0  ;;  %v7903_v18 = vadd.f32 %v7767_v2, %v15844_v4  ;;  %v6337_v4 = vadd.f32 %v6207_v31, %v5944_v11  ;;  %v7515_v46 = vadd.f32 %v7384_v56, %v7122_v32 }
 0x5dc   : > { %v11129_v1 = vpop.eup %11128  ;;  %v7975_v30 = vadd.f32 %v15541_v44, %v7904_v50  ;;  %v6731_v22 = vadd.f32 %v6602_v57, %v6338_v25  ;;  %v6339_v61 = vadd.f32 %v15862_v53, %v5946_v39 }
 0x5dd   : > { %11138 = vtanh.f32 %v11129_v1  ;;  %v7974_v58 = vadd.f32 %v15541_v44, %v7903_v18  ;;  %v7773_v33 = vpop.permute.xlu0 %7772  ;;  %v6730_v48 = vadd.f32 %v15856_v40, %v6337_v4 }
 0x5de   : > { %11140 = vtanh.f32 %v7975_v30  ;;  %v7771_v17 = vpop.permute.xlu1 %7770  ;;  %v7906_v27 = vadd.f32 %v7773_v33, %v7513_v26  ;;  %v7124_v31 = vadd.f32 %v6995_v28, %v6731_v22  ;;  %v6732_v28 = vadd.f32 %v15864_v13, %v6339_v61 }
 0x5df   : > { %11142 = vtanh.f32 %v7974_v58  ;;  %v7905_v3 = vadd.f32 %v7771_v17, %v15850_v49  ;;  %v7123_v5 = vadd.f32 %v15858_v35, %v6730_v48  ;;  %v11191_v35 = vld [vmem:[%s15951_s2] ss:$0 sm:$0xff] }
 0x5e0   : > { %v11131_v60 = vpop.eup %11130  ;;  %v7977_v23 = vadd.f32 %v15541_v44, %v7906_v27  ;;  %v7517_v24 = vadd.f32 %v15866_v10, %v7124_v31  ;;  %v7125_v54 = vadd.f32 %v15868_v8, %v6732_v28 }
 0x5e1   : > { %v11133_v15 = vpop.eup %11132  ;;  %11144 = vtanh.f32 %v11131_v60  ;;  %v7976_v45 = vadd.f32 %v15541_v44, %v7905_v3  ;;  %v7777_v52 = vpop.permute.xlu0 %7776  ;;  %v7516_v41 = vadd.f32 %v15860_v43, %v7123_v5 }
 0x5e2   : > { %11146 = vtanh.f32 %v11133_v15  ;;  %v7775_v37 = vpop.permute.xlu1 %7774  ;;  %v7908_v49 = vadd.f32 %v7777_v52, %v7515_v46  ;;  %v7518_v34 = vadd.f32 %v15870_v21, %v7125_v54 }
 0x5e3   : > { %11148 = vtanh.f32 %v7976_v45  ;;  %v7907_v56 = vadd.f32 %v7775_v37, %v7514_v63 }
 0x5e4   : > { %v11135_v57 = vpop.eup %11134  ;;  %11150 = vtanh.f32 %v7977_v23  ;;  %v7979_v29 = vadd.f32 %v15541_v44, %v7908_v49 }
 0x5e5   : > { %v11137_v40 = vpop.eup %11136  ;;  %11152 = vtanh.f32 %v11135_v57  ;;  %v7978_v6 = vadd.f32 %v11191_v35, %v7907_v56  ;;  %v7781_v53 = vpop.permute.xlu0 %7780 }
 0x5e6   : > { %11154 = vtanh.f32 %v11137_v40  ;;  %v7779_v19 = vpop.permute.xlu1 %7778  ;;  %v7910_v59 = vadd.f32 %v7781_v53, %v7517_v24 }
 0x5e7   : > { %v11139_v10 = vpop.eup %11138  ;;  %11156 = vtanh.f32 %v7978_v6  ;;  %v7909_v44 = vadd.f32 %v7779_v19, %v7516_v41 }
 0x5e8   : > { %v11141_v47 = vpop.eup %11140  ;;  %v8161_v43 = vmul.f32 2.0, %v11139_v10  ;;  %11158 = vtanh.f32 %v7979_v29  ;;  %v7981_v13 = vadd.f32 %v11191_v35, %v7910_v59 }
 0x5e9   : > { %v11143_v14 = vpop.eup %11142  ;;  %11160 = vtanh.f32 %v11141_v47  ;;  %v7980_v38 = vadd.f32 %v11191_v35, %v7909_v44 }
 0x5ea   : > { %8226 = vst.msk [vmem:[%s14282_s10 + $0x190] sm:$0xff] %vm8175_vm14, %v8161_v43  ;;  %11162 = vtanh.f32 %v11143_v14  ;;  %v7783_v36 = vpop.permute.xlu1 %7782 }
 0x5eb   : > { %v11145_v16 = vpop.eup %11144  ;;  %11164 = vtanh.f32 %v7980_v38  ;;  %v7911_v8 = vadd.f32 %v7783_v36, %v7518_v34 }
 0x5ec   : > { %v11147_v20 = vpop.eup %11146  ;;  %v8163_v0 = vmul.f32 2.0, %v11145_v16  ;;  %11166 = vtanh.f32 %v7981_v13 }
 0x5ed   : > { %v11149_v9 = vpop.eup %11148  ;;  %v8162_v51 = vmul.f32 2.0, %v11147_v20  ;;  %v7982_v62 = vadd.f32 %v11191_v35, %v7911_v8 }
 0x5ee   : > { %v11151_v21 = vpop.eup %11150  ;;  %8228 = vst.msk [vmem:[%s14282_s10 + $0x1a0] sm:$0xff] %vm8175_vm14, %v8163_v0  ;;  %11168 = vtanh.f32 %v11149_v9 }
 0x5ef   : > { %v11153_v2 = vpop.eup %11152  ;;  %8227 = vst.msk [vmem:[%s14282_s10 + $0x198] sm:$0xff] %vm8175_vm14, %v8162_v51  ;;  %11170 = vtanh.f32 %v11151_v21 }
 0x5f0   : > { %v11155_v50 = vpop.eup %11154  ;;  %v8165_v7 = vmul.f32 2.0, %v11153_v2  ;;  %11172 = vtanh.f32 %v7982_v62 }
 0x5f1   : > { %v11157_v18 = vpop.eup %11156  ;;  %v8164_v1 = vmul.f32 2.0, %v11155_v50 }
 0x5f2   : > { %v11159_v26 = vpop.eup %11158  ;;  %8230 = vst.msk [vmem:[%s14282_s10 + $0x1b0] sm:$0xff] %vm8175_vm14, %v8165_v7  ;;  %11174 = vtanh.f32 %v11157_v18 }
 0x5f3   : > { %v11161_v42 = vpop.eup %11160  ;;  %8229 = vst.msk [vmem:[%s14282_s10 + $0x1a8] sm:$0xff] %vm8175_vm14, %v8164_v1  ;;  %11176 = vtanh.f32 %v11159_v26 }
 0x5f4   : > { %v11163_v12 = vpop.eup %11162  ;;  %v8167_v30 = vmul.f32 2.0, %v11161_v42 }
 0x5f5   : > { %v11165_v55 = vpop.eup %11164  ;;  %v8166_v11 = vmul.f32 2.0, %v11163_v12 }
 0x5f6   : > { %v11167_v58 = vpop.eup %11166  ;;  %8232 = vst.msk [vmem:[%s14282_s10 + $0x1c0] sm:$0xff] %vm8175_vm14, %v8167_v30  ;;  %11178 = vtanh.f32 %v11165_v55 }
 0x5f7   : > { %8231 = vst.msk [vmem:[%s14282_s10 + $0x1b8] sm:$0xff] %vm8175_vm14, %v8166_v11  ;;  %11180 = vtanh.f32 %v11167_v58 }
 0x5f8   : > { %v11169_v33 = vpop.eup %11168 }
 0x5f9   : > { %v11171_v32 = vpop.eup %11170  ;;  %v8168_v25 = vmul.f32 2.0, %v11169_v33 }
 0x5fa   : > { %v11173_v17 = vpop.eup %11172  ;;  %v8169_v27 = vmul.f32 2.0, %v11171_v32 }
 0x5fb   : > { %8233 = vst.msk [vmem:[%s14282_s10 + $0x1c8] sm:$0xff] %vm8175_vm14, %v8168_v25  ;;  %11182 = vtanh.f32 %v11173_v17 }
 0x5fc   : > { %v11175_v4 = vpop.eup %11174  ;;  %8234 = vst.msk [vmem:[%s14282_s10 + $0x1d0] sm:$0xff] %vm8175_vm14, %v8169_v27 }
 0x5fd   : > { %v11177_v3 = vpop.eup %11176  ;;  %v8170_v60 = vmul.f32 2.0, %v11175_v4 }
 0x5fe   : > { %v8171_v63 = vmul.f32 2.0, %v11177_v3 }
 0x5ff   : > { %8235 = vst.msk [vmem:[%s14282_s10 + $0x1d8] sm:$0xff] %vm8175_vm14, %v8170_v60 }
 0x600   : > { %v11179_v46 = vpop.eup %11178  ;;  %8236 = vst.msk [vmem:[%s14282_s10 + $0x1e0] sm:$0xff] %vm8175_vm14, %v8171_v63 }
 0x601   : > { %v11181_v22 = vpop.eup %11180  ;;  %v8172_v23 = vmul.f32 2.0, %v11179_v46 }
 0x602   : > { %v8173_v15 = vmul.f32 2.0, %v11181_v22 }
 0x603   : > { %8237 = vst.msk [vmem:[%s14282_s10 + $0x1e8] sm:$0xff] %vm8175_vm14, %v8172_v23 }
 0x604   : > { %8238 = vst.msk [vmem:[%s14282_s10 + $0x1f0] sm:$0xff] %vm8175_vm14, %v8173_v15 }
 0x605   : > { %v11183_v48 = vpop.eup %11182 }
 0x606   : > { %v8174_v39 = vmul.f32 2.0, %v11183_v48 }
 0x608   : > { %8239 = vst.msk [vmem:[%s14282_s10 + $0x1f8] sm:$0xff] %vm8175_vm14, %v8174_v39 }
 0x609 PF: > { %s14_s19 = sadd.s32 1, %s11230_s19   ;;  %s16400_s15 = smov %s11222_s17 }
 0x60a   : > { %p11_p7 = scmp.ge.s32.totalorder %s14_s19, 18   ;;  %s16401_s16 = smov %s11226_s18 }
 0x60b   : > { %s16402_s17 = smov %s16405_s20  ;;  %s16403_s18 = smov %s16409_s21 }
 0x60c   :  { %13 = sbr.rel (!%p11_p7) target bundleno = 3 (0x3), region = 73 }

</bundles_post_ra>
